<compile_context>
chip_gen: v7x
topology: tpu7x:2x2x1
jax: 0.10.0
libtpu: 0.0.40
codegen_flags: <defaults>
</compile_context>

<pallas_src>
import functools

import jax
import jax.numpy as jnp
from jax import lax
from jax.experimental import pallas as pl
from jax.experimental.pallas import tpu as pltpu

_NEG_BIG = -1.0e30  # padded-class bias -> exp underflows to exactly 0 in f32


def _maml_inner_kernel(steps, lr,
                       x_ref, onehot_ref, w1_ref, w2_ref,
                       w1_out, w2_out, logits_out):
    """TB-task inner-loop SGD (momentum=0) on CE loss + adapted-model logits.

    x_ref      : (TB, N, D+1)   support inputs, last column == 1 (bias fold)
    onehot_ref : (TB, N, Cpad)  one-hot labels, zeros at padded classes
    w1_ref     : (D+1, H+1)     [W1; b1] with an extra constant-ones channel
    w2_ref     : (H+1, Cpad)    [W2; b2], padded-class bias == -1e30
    w1_out     : (TB, D+1, H+1) per-task adapted augmented layer-1 weights
    w2_out     : (TB, H+1, Cpad) per-task adapted augmented layer-2 weights
    logits_out : (TB, N, Cpad)  adapted-model logits on the support batch
    """
    TB, N, _ = x_ref.shape
    Haug = w1_ref.shape[1]          # H + 1 (col H is the constant ones channel)
    H = Haug - 1
    inv_n = 1.0 / N

    # Loop-invariant loads (hoisted once per grid step).
    x = x_ref[...]                  # (TB, N, D+1)
    onehot = onehot_ref[...]        # (TB, N, Cpad)

    # Mask that keeps the constant ones channel of the hidden layer frozen.
    hid_mask = (lax.broadcasted_iota(jnp.int32, (1, 1, Haug), 2) < H
                ).astype(jnp.float32)

    # Fast weights live directly in the VMEM-resident output blocks.
    w1_out[...] = jnp.broadcast_to(w1_ref[...][None], (TB,) + w1_ref.shape)
    w2_out[...] = jnp.broadcast_to(w2_ref[...][None], (TB,) + w2_ref.shape)

    # (t,n,k) x (t,k,m) -> (t,n,m)
    fwd_dims = (((2,), (1,)), ((0,), (0,)))

    def forward(w1, w2):
        hpre = lax.dot_general(x, w1, fwd_dims,
                               preferred_element_type=jnp.float32)  # (TB,N,H+1)
        relu_mask = hpre > 0.0
        h = jnp.where(relu_mask, hpre, 0.0)         # column H stays exactly 1
        logits = lax.dot_general(h, w2, fwd_dims,
                                 preferred_element_type=jnp.float32)  # (TB,N,Cpad)
        return relu_mask, h, logits

    # `steps` SGD steps, statically unrolled (steps is a Python int).
    # TODO(synk): verify via pl.lower_as_mlir that these contracting-dim
    # dot_generals lower without explicit XLU transposes.
    for _ in range(steps):
        w1 = w1_out[...]
        w2 = w2_out[...]
        relu_mask, h, logits = forward(w1, w2)

        # softmax-CE gradient; padded classes are exactly 0 (bias == -1e30).
        m = jnp.max(logits, axis=-1, keepdims=True)
        e = jnp.exp(logits - m)
        p = e * pl.reciprocal(jnp.sum(e, axis=-1, keepdims=True), approx=True)
        g = (p - onehot) * inv_n                     # (TB, N, Cpad)

        # Batched contracting-dim matmuls; db2/db1 ride along as the extra
        # augmented row of each dW slab (no separate XLU reductions).
        dw2 = lax.dot_general(h, g, (((1,), (1,)), ((0,), (0,))),
                              preferred_element_type=jnp.float32)   # (TB,H+1,Cpad)
        dh = lax.dot_general(g, w2, (((2,), (2,)), ((0,), (0,))),
                             preferred_element_type=jnp.float32)    # (TB,N,H+1)
        dhpre = jnp.where(relu_mask, dh, 0.0) * hid_mask
        dw1 = lax.dot_general(x, dhpre, (((1,), (1,)), ((0,), (0,))),
                              preferred_element_type=jnp.float32)   # (TB,D+1,H+1)

        # SGD update (GDLearner => momentum = 0).
        w1_out[...] = w1 - lr * dw1
        w2_out[...] = w2 - lr * dw2

    # Final forward with the adapted fast weights.
    _, _, logits = forward(w1_out[...], w2_out[...])
    logits_out[...] = logits


def mamlpp_forward(x, y, w1, b1, w2, b2, *, steps, lr, task_block=2):
    """Inner adaptation for a meta-batch of T tasks.

    x: (T, N, D), y: (T, N) int; shared meta-weights w1 (D,H), b1 (1,H),
    w2 (H,C), b2 (1,C).  Returns per-task adapted (w1, b1, w2, b2) and the
    adapted model's logits on each task's support batch.
    """
    T, N, D = x.shape
    H = w1.shape[1]
    C = w2.shape[1]
    assert T % task_block == 0, "pad the meta-batch so task_block divides T"
    TB = task_block
    Cpad = max(128, ((C + 127) // 128) * 128)   # lane-dense class dim
    Daug, Haug = D + 1, H + 1

    # --- host-side packing (outside the kernel) -----------------------------
    x_aug = jnp.concatenate(
        [x.astype(jnp.float32), jnp.ones((T, N, 1), jnp.float32)], axis=-1)
    onehot = jax.nn.one_hot(y, Cpad, dtype=jnp.float32)          # (T, N, Cpad)

    w1_aug = jnp.zeros((Daug, Haug), jnp.float32)
    w1_aug = w1_aug.at[:D, :H].set(w1)
    w1_aug = w1_aug.at[D, :H].set(b1[0])
    w1_aug = w1_aug.at[D, H].set(1.0)            # constant ones hidden channel

    w2_aug = jnp.zeros((Haug, Cpad), jnp.float32)
    w2_aug = w2_aug.at[:H, :C].set(w2)
    w2_aug = w2_aug.at[H, :C].set(b2[0])
    w2_aug = w2_aug.at[H, C:].set(_NEG_BIG)      # kill padded classes in softmax

    # --- pallas_call ---------------------------------------------------------
    def per_task(r, c):
        return pl.BlockSpec((TB, r, c), lambda t: (t, 0, 0))

    def shared(r, c):
        return pl.BlockSpec((r, c), lambda t: (0, 0))

    out_shapes = (
        jax.ShapeDtypeStruct((T, Daug, Haug), jnp.float32),
        jax.ShapeDtypeStruct((T, Haug, Cpad), jnp.float32),
        jax.ShapeDtypeStruct((T, N, Cpad), jnp.float32),
    )
    kernel = functools.partial(_maml_inner_kernel, steps, lr)
    # NOTE: at TB<=64 double-buffered blocks stay far below the scoped-VMEM
    # default on all generations (incl. v7x's 64 MiB/TC); no vmem_limit needed.
    w1o, w2o, logits_o = pl.pallas_call(
        kernel,
        out_shape=out_shapes,
        grid=(T // TB,),
        in_specs=[
            per_task(N, Daug),      # x (augmented)
            per_task(N, Cpad),      # one-hot labels (lane-dense)
            shared(Daug, Haug),     # [W1; b1 | ones-channel]
            shared(Haug, Cpad),     # [W2; b2] (class-padded)
        ],
        out_specs=(
            per_task(Daug, Haug),
            per_task(Haug, Cpad),
            per_task(N, Cpad),
        ),
        compiler_params=pltpu.CompilerParams(
            dimension_semantics=("parallel",)),   # v7x: shard task blocks on 2 TCs
    )(x_aug, onehot, w1_aug, w2_aug)

    # --- host-side unpacking --------------------------------------------------
    w1_fast = w1o[:, :D, :H]
    b1_fast = w1o[:, D:D + 1, :H]
    w2_fast = w2o[:, :H, :C]
    b2_fast = w2o[:, H:H + 1, :C]
    logits = logits_o[:, :, :C]
    return w1_fast, b1_fast, w2_fast, b2_fast, logits


def _reference(x, y, w1, b1, w2, b2, steps, lr):
    """Pure-JAX reference of the same inner loop (single task)."""
    N, C = x.shape[0], w2.shape[1]
    onehot = jax.nn.one_hot(y, C, dtype=jnp.float32)

    def fwd(params):
        w1, b1, w2, b2 = params
        hpre = x @ w1 + b1
        h = jnp.maximum(hpre, 0.0)
        return hpre, h, h @ w2 + b2

    params = (w1, b1, w2, b2)
    for _ in range(steps):
        w1c, b1c, w2c, b2c = params
        hpre, h, logits = fwd(params)
        p = jax.nn.softmax(logits, axis=-1)
        g = (p - onehot) / N
        dw2 = h.T @ g
        db2 = jnp.sum(g, axis=0, keepdims=True)
        dh = g @ w2c.T
        dhpre = dh * (hpre > 0.0)
        dw1 = x.T @ dhpre
        db1 = jnp.sum(dhpre, axis=0, keepdims=True)
        params = (w1c - lr * dw1, b1c - lr * db1, w2c - lr * dw2, b2c - lr * db2)
    _, _, logits = fwd(params)
    return params + (logits,)


if __name__ == "__main__":
    # Meta-batch of 8 tasks (2 per grid step -> 4 grid blocks, >=2 per TC on v7x);
    # per-task batch=8, features=64, hidden=128, classes=16 (padded to 128).
    T, N, D, H, C = 8, 8, 64, 128, 16
    STEPS_TRAIN = 5     # MAMLpp(steps_train=5, ...), training mode
    LR = 0.05

    key = jax.random.PRNGKey(0)
    kx, ky, k1, k2 = jax.random.split(key, 4)
    x = jax.random.normal(kx, (T, N, D), dtype=jnp.float32)
    y = jax.random.randint(ky, (T, N), 0, C, dtype=jnp.int32)
    w1 = jax.random.normal(k1, (D, H), dtype=jnp.float32) * (1.0 / jnp.sqrt(D))
    b1 = jnp.zeros((1, H), jnp.float32)
    w2 = jax.random.normal(k2, (H, C), dtype=jnp.float32) * (1.0 / jnp.sqrt(H))
    b2 = jnp.zeros((1, C), jnp.float32)

    outs = mamlpp_forward(x, y, w1, b1, w2, b2,
                          steps=STEPS_TRAIN, lr=LR, task_block=2)
    outs = jax.block_until_ready(outs)

    # Tolerance relaxed vs the exact f32 reference because the kernel uses the
    # EUP approximate reciprocal (rel err ~2^-12) in the softmax denominator,
    # compounded over 5 inner steps.
    for t in range(T):
        refs = _reference(x[t], y[t], w1, b1, w2, b2, STEPS_TRAIN, LR)
        names = ("w1", "b1", "w2", "b2", "logits")
        for name, o, r in zip(names, outs, refs):
            assert jnp.allclose(o[t], r, atol=5e-3, rtol=5e-3), \
                f"mismatch vs reference: task {t}, {name}"

    # TODO(synk): training-mode mimo=True also collects every intermediate
    # fast-weight set (MimoModel); only the final adapted weights are emitted.
    # TODO(synk): MAML++ per-step/per-layer learnable inner LRs are collapsed to
    # the single scalar lr of GDLearner (momentum=0), as in the spec's forward.
    print("KERNEL_OK")
</pallas_src>

<mosaic_0001>
module attributes {stable_mosaic.version = 11 : i64} {
  func.func @_maml_inner_kernel(%arg0: i32, %arg1: memref<2x8x65xf32, #tpu.memory_space<vmem>>, %arg2: memref<2x8x128xf32, #tpu.memory_space<vmem>>, %arg3: memref<65x129xf32, #tpu.memory_space<vmem>>, %arg4: memref<129x128xf32, #tpu.memory_space<vmem>>, %arg5: memref<2x65x129xf32, #tpu.memory_space<vmem>>, %arg6: memref<2x129x128xf32, #tpu.memory_space<vmem>>, %arg7: memref<2x8x128xf32, #tpu.memory_space<vmem>>) attributes {dimension_semantics = [#tpu.dimension_semantics<parallel>], iteration_bounds = array<i64: 4>, scalar_prefetch = 0 : i64, scratch_operands = 0 : i64, tpu.core_type = #tpu.core_type<tc>, window_params = [{transform_indices = @transform_0, window_bounds = array<i64: 2, 8, 65>}, {transform_indices = @transform_1, window_bounds = array<i64: 2, 8, 128>}, {pipeline_mode = #tpu.pipeline_mode<synchronous>, transform_indices = @transform_2, window_bounds = array<i64: 65, 129>}, {pipeline_mode = #tpu.pipeline_mode<synchronous>, transform_indices = @transform_3, window_bounds = array<i64: 129, 128>}, {transform_indices = @transform_4, window_bounds = array<i64: 2, 65, 129>}, {transform_indices = @transform_5, window_bounds = array<i64: 2, 129, 128>}, {transform_indices = @transform_6, window_bounds = array<i64: 2, 8, 128>}]} {
    %c0 = arith.constant 0 : index
    %c0_0 = arith.constant 0 : index
    %c0_1 = arith.constant 0 : index
    %0 = vector.load %arg1[%c0, %c0_0, %c0_1] : memref<2x8x65xf32, #tpu.memory_space<vmem>>, vector<2x8x65xf32>
    %c0_2 = arith.constant 0 : index
    %c0_3 = arith.constant 0 : index
    %c0_4 = arith.constant 0 : index
    %1 = vector.load %arg2[%c0_2, %c0_3, %c0_4] : memref<2x8x128xf32, #tpu.memory_space<vmem>>, vector<2x8x128xf32>
    %2 = tpu.iota {dimensions = array<i32: 2>} : vector<1x1x129xi32>
    %c128_i32 = arith.constant 128 : i32
    %3 = vector.broadcast %c128_i32 : i32 to vector<1x1x129xi32>
    %4 = arith.cmpi slt, %2, %3 : vector<1x1x129xi32>
    %5 = arith.extui %4 : vector<1x1x129xi1> to vector<1x1x129xi32>
    %6 = arith.sitofp %5 : vector<1x1x129xi32> to vector<1x1x129xf32>
    %c0_5 = arith.constant 0 : index
    %c0_6 = arith.constant 0 : index
    %7 = vector.load %arg3[%c0_5, %c0_6] : memref<65x129xf32, #tpu.memory_space<vmem>>, vector<65x129xf32>
    %8 = vector.shape_cast %7 : vector<65x129xf32> to vector<1x65x129xf32>
    %9 = vector.shape_cast %8 : vector<1x65x129xf32> to vector<1x65x129xf32>
    %10 = vector.broadcast %9 : vector<1x65x129xf32> to vector<2x65x129xf32>
    %c0_7 = arith.constant 0 : index
    %c0_8 = arith.constant 0 : index
    %c0_9 = arith.constant 0 : index
    %11 = vector.load %arg5[%c0_7, %c0_8, %c0_9] : memref<2x65x129xf32, #tpu.memory_space<vmem>>, vector<2x65x129xf32>
    tpu.vector_store %arg5[%c0_7, %c0_8, %c0_9], %10 {strides = array<i32>} : memref<2x65x129xf32, #tpu.memory_space<vmem>>, vector<2x65x129xf32>,
    %c0_10 = arith.constant 0 : index
    %c0_11 = arith.constant 0 : index
    %12 = vector.load %arg4[%c0_10, %c0_11] : memref<129x128xf32, #tpu.memory_space<vmem>>, vector<129x128xf32>
    %13 = vector.shape_cast %12 : vector<129x128xf32> to vector<1x129x128xf32>
    %14 = vector.shape_cast %13 : vector<1x129x128xf32> to vector<1x129x128xf32>
    %15 = vector.broadcast %14 : vector<1x129x128xf32> to vector<2x129x128xf32>
    %c0_12 = arith.constant 0 : index
    %c0_13 = arith.constant 0 : index
    %c0_14 = arith.constant 0 : index
    %16 = vector.load %arg6[%c0_12, %c0_13, %c0_14] : memref<2x129x128xf32, #tpu.memory_space<vmem>>, vector<2x129x128xf32>
    tpu.vector_store %arg6[%c0_12, %c0_13, %c0_14], %15 {strides = array<i32>} : memref<2x129x128xf32, #tpu.memory_space<vmem>>, vector<2x129x128xf32>,
    %c0_15 = arith.constant 0 : index
    %c0_16 = arith.constant 0 : index
    %c0_17 = arith.constant 0 : index
    %17 = vector.load %arg5[%c0_15, %c0_16, %c0_17] : memref<2x65x129xf32, #tpu.memory_space<vmem>>, vector<2x65x129xf32>
    %c0_18 = arith.constant 0 : index
    %c0_19 = arith.constant 0 : index
    %c0_20 = arith.constant 0 : index
    %18 = vector.load %arg6[%c0_18, %c0_19, %c0_20] : memref<2x129x128xf32, #tpu.memory_space<vmem>>, vector<2x129x128xf32>
    %cst = arith.constant dense<0.000000e+00> : vector<2x8x129xf32>
    %19 = tpu.matmul %0, %17, %cst {dimension_numbers = #tpu.dot_dimension_numbers<[2], [1], [1], [2], [0, 0, 0, 1, 1, 2], [0], [0]>} : vector<2x8x65xf32>, vector<2x65x129xf32>, vector<2x8x129xf32> -> vector<2x8x129xf32>
    %cst_21 = arith.constant 0.000000e+00 : f32
    %20 = vector.broadcast %cst_21 : f32 to vector<2x8x129xf32>
    %21 = arith.cmpf ogt, %19, %20 : vector<2x8x129xf32>
    %cst_22 = arith.constant 0.000000e+00 : f32
    %22 = vector.broadcast %cst_22 : f32 to vector<2x8x129xf32>
    %23 = arith.select %21, %19, %22 : vector<2x8x129xi1>, vector<2x8x129xf32>
    %cst_23 = arith.constant dense<0.000000e+00> : vector<2x8x128xf32>
    %24 = tpu.matmul %23, %18, %cst_23 {dimension_numbers = #tpu.dot_dimension_numbers<[2], [1], [1], [2], [0, 0, 0, 1, 1, 2], [0], [0]>} : vector<2x8x129xf32>, vector<2x129x128xf32>, vector<2x8x128xf32> -> vector<2x8x128xf32>
    %cst_24 = arith.constant dense<0xFF800000> : vector<2x8xf32>
    %25 = vector.multi_reduction <maximumf>, %24, %cst_24 [2] : vector<2x8x128xf32> to vector<2x8xf32>
    %26 = vector.shape_cast %25 : vector<2x8xf32> to vector<2x8x1xf32>
    %27 = vector.broadcast %26 : vector<2x8x1xf32> to vector<2x8x128xf32>
    %28 = arith.subf %24, %27 : vector<2x8x128xf32>
    %29 = math.exp %28 : vector<2x8x128xf32>
    %cst_25 = arith.constant dense<0.000000e+00> : vector<2x8xf32>
    %30 = vector.multi_reduction <add>, %29, %cst_25 [2] : vector<2x8x128xf32> to vector<2x8xf32>
    %31 = vector.shape_cast %30 : vector<2x8xf32> to vector<2x8x1xf32>
    %32 = tpu.reciprocal %31 {approx = true} : vector<2x8x1xf32> -> vector<2x8x1xf32>
    %33 = vector.broadcast %32 : vector<2x8x1xf32> to vector<2x8x128xf32>
    %34 = arith.mulf %29, %33 : vector<2x8x128xf32>
    %35 = arith.subf %34, %1 : vector<2x8x128xf32>
    %cst_26 = arith.constant 1.250000e-01 : f32
    %36 = vector.broadcast %cst_26 : f32 to vector<2x8x128xf32>
    %37 = arith.mulf %35, %36 : vector<2x8x128xf32>
    %cst_27 = arith.constant dense<0.000000e+00> : vector<2x129x128xf32>
    %38 = tpu.matmul %23, %37, %cst_27 {dimension_numbers = #tpu.dot_dimension_numbers<[1], [1], [2], [2], [0, 0, 0, 2, 1, 2], [0], [0]>} : vector<2x8x129xf32>, vector<2x8x128xf32>, vector<2x129x128xf32> -> vector<2x129x128xf32>
    %cst_28 = arith.constant dense<0.000000e+00> : vector<2x8x129xf32>
    %39 = tpu.matmul %37, %18, %cst_28 {dimension_numbers = #tpu.dot_dimension_numbers<[2], [2], [1], [1], [0, 0, 0, 1, 1, 1], [0], [0]>} : vector<2x8x128xf32>, vector<2x129x128xf32>, vector<2x8x129xf32> -> vector<2x8x129xf32>
    %cst_29 = arith.constant 0.000000e+00 : f32
    %40 = vector.broadcast %cst_29 : f32 to vector<2x8x129xf32>
    %41 = arith.select %21, %39, %40 : vector<2x8x129xi1>, vector<2x8x129xf32>
    %42 = vector.broadcast %6 : vector<1x1x129xf32> to vector<2x8x129xf32>
    %43 = arith.mulf %41, %42 : vector<2x8x129xf32>
    %cst_30 = arith.constant dense<0.000000e+00> : vector<2x65x129xf32>
    %44 = tpu.matmul %0, %43, %cst_30 {dimension_numbers = #tpu.dot_dimension_numbers<[1], [1], [2], [2], [0, 0, 0, 2, 1, 2], [0], [0]>} : vector<2x8x65xf32>, vector<2x8x129xf32>, vector<2x65x129xf32> -> vector<2x65x129xf32>
    %cst_31 = arith.constant 5.000000e-02 : f32
    %45 = vector.broadcast %cst_31 : f32 to vector<2x65x129xf32>
    %46 = arith.mulf %45, %44 : vector<2x65x129xf32>
    %47 = arith.subf %17, %46 : vector<2x65x129xf32>
    %c0_32 = arith.constant 0 : index
    %c0_33 = arith.constant 0 : index
    %c0_34 = arith.constant 0 : index
    %48 = vector.load %arg5[%c0_32, %c0_33, %c0_34] : memref<2x65x129xf32, #tpu.memory_space<vmem>>, vector<2x65x129xf32>
    tpu.vector_store %arg5[%c0_32, %c0_33, %c0_34], %47 {strides = array<i32>} : memref<2x65x129xf32, #tpu.memory_space<vmem>>, vector<2x65x129xf32>,
    %cst_35 = arith.constant 5.000000e-02 : f32
    %49 = vector.broadcast %cst_35 : f32 to vector<2x129x128xf32>
    %50 = arith.mulf %49, %38 : vector<2x129x128xf32>
    %51 = arith.subf %18, %50 : vector<2x129x128xf32>
    %c0_36 = arith.constant 0 : index
    %c0_37 = arith.constant 0 : index
    %c0_38 = arith.constant 0 : index
    %52 = vector.load %arg6[%c0_36, %c0_37, %c0_38] : memref<2x129x128xf32, #tpu.memory_space<vmem>>, vector<2x129x128xf32>
    tpu.vector_store %arg6[%c0_36, %c0_37, %c0_38], %51 {strides = array<i32>} : memref<2x129x128xf32, #tpu.memory_space<vmem>>, vector<2x129x128xf32>,
    %c0_39 = arith.constant 0 : index
    %c0_40 = arith.constant 0 : index
    %c0_41 = arith.constant 0 : index
    %53 = vector.load %arg5[%c0_39, %c0_40, %c0_41] : memref<2x65x129xf32, #tpu.memory_space<vmem>>, vector<2x65x129xf32>
    %c0_42 = arith.constant 0 : index
    %c0_43 = arith.constant 0 : index
    %c0_44 = arith.constant 0 : index
    %54 = vector.load %arg6[%c0_42, %c0_43, %c0_44] : memref<2x129x128xf32, #tpu.memory_space<vmem>>, vector<2x129x128xf32>
    %cst_45 = arith.constant dense<0.000000e+00> : vector<2x8x129xf32>
    %55 = tpu.matmul %0, %53, %cst_45 {dimension_numbers = #tpu.dot_dimension_numbers<[2], [1], [1], [2], [0, 0, 0, 1, 1, 2], [0], [0]>} : vector<2x8x65xf32>, vector<2x65x129xf32>, vector<2x8x129xf32> -> vector<2x8x129xf32>
    %cst_46 = arith.constant 0.000000e+00 : f32
    %56 = vector.broadcast %cst_46 : f32 to vector<2x8x129xf32>
    %57 = arith.cmpf ogt, %55, %56 : vector<2x8x129xf32>
    %cst_47 = arith.constant 0.000000e+00 : f32
    %58 = vector.broadcast %cst_47 : f32 to vector<2x8x129xf32>
    %59 = arith.select %57, %55, %58 : vector<2x8x129xi1>, vector<2x8x129xf32>
    %cst_48 = arith.constant dense<0.000000e+00> : vector<2x8x128xf32>
    %60 = tpu.matmul %59, %54, %cst_48 {dimension_numbers = #tpu.dot_dimension_numbers<[2], [1], [1], [2], [0, 0, 0, 1, 1, 2], [0], [0]>} : vector<2x8x129xf32>, vector<2x129x128xf32>, vector<2x8x128xf32> -> vector<2x8x128xf32>
    %cst_49 = arith.constant dense<0xFF800000> : vector<2x8xf32>
    %61 = vector.multi_reduction <maximumf>, %60, %cst_49 [2] : vector<2x8x128xf32> to vector<2x8xf32>
    %62 = vector.shape_cast %61 : vector<2x8xf32> to vector<2x8x1xf32>
    %63 = vector.broadcast %62 : vector<2x8x1xf32> to vector<2x8x128xf32>
    %64 = arith.subf %60, %63 : vector<2x8x128xf32>
    %65 = math.exp %64 : vector<2x8x128xf32>
    %cst_50 = arith.constant dense<0.000000e+00> : vector<2x8xf32>
    %66 = vector.multi_reduction <add>, %65, %cst_50 [2] : vector<2x8x128xf32> to vector<2x8xf32>
    %67 = vector.shape_cast %66 : vector<2x8xf32> to vector<2x8x1xf32>
    %68 = tpu.reciprocal %67 {approx = true} : vector<2x8x1xf32> -> vector<2x8x1xf32>
    %69 = vector.broadcast %68 : vector<2x8x1xf32> to vector<2x8x128xf32>
    %70 = arith.mulf %65, %69 : vector<2x8x128xf32>
    %71 = arith.subf %70, %1 : vector<2x8x128xf32>
    %cst_51 = arith.constant 1.250000e-01 : f32
    %72 = vector.broadcast %cst_51 : f32 to vector<2x8x128xf32>
    %73 = arith.mulf %71, %72 : vector<2x8x128xf32>
    %cst_52 = arith.constant dense<0.000000e+00> : vector<2x129x128xf32>
    %74 = tpu.matmul %59, %73, %cst_52 {dimension_numbers = #tpu.dot_dimension_numbers<[1], [1], [2], [2], [0, 0, 0, 2, 1, 2], [0], [0]>} : vector<2x8x129xf32>, vector<2x8x128xf32>, vector<2x129x128xf32> -> vector<2x129x128xf32>
    %cst_53 = arith.constant dense<0.000000e+00> : vector<2x8x129xf32>
    %75 = tpu.matmul %73, %54, %cst_53 {dimension_numbers = #tpu.dot_dimension_numbers<[2], [2], [1], [1], [0, 0, 0, 1, 1, 1], [0], [0]>} : vector<2x8x128xf32>, vector<2x129x128xf32>, vector<2x8x129xf32> -> vector<2x8x129xf32>
    %cst_54 = arith.constant 0.000000e+00 : f32
    %76 = vector.broadcast %cst_54 : f32 to vector<2x8x129xf32>
    %77 = arith.select %57, %75, %76 : vector<2x8x129xi1>, vector<2x8x129xf32>
    %78 = vector.broadcast %6 : vector<1x1x129xf32> to vector<2x8x129xf32>
    %79 = arith.mulf %77, %78 : vector<2x8x129xf32>
    %cst_55 = arith.constant dense<0.000000e+00> : vector<2x65x129xf32>
    %80 = tpu.matmul %0, %79, %cst_55 {dimension_numbers = #tpu.dot_dimension_numbers<[1], [1], [2], [2], [0, 0, 0, 2, 1, 2], [0], [0]>} : vector<2x8x65xf32>, vector<2x8x129xf32>, vector<2x65x129xf32> -> vector<2x65x129xf32>
    %cst_56 = arith.constant 5.000000e-02 : f32
    %81 = vector.broadcast %cst_56 : f32 to vector<2x65x129xf32>
    %82 = arith.mulf %81, %80 : vector<2x65x129xf32>
    %83 = arith.subf %53, %82 : vector<2x65x129xf32>
    %c0_57 = arith.constant 0 : index
    %c0_58 = arith.constant 0 : index
    %c0_59 = arith.constant 0 : index
    %84 = vector.load %arg5[%c0_57, %c0_58, %c0_59] : memref<2x65x129xf32, #tpu.memory_space<vmem>>, vector<2x65x129xf32>
    tpu.vector_store %arg5[%c0_57, %c0_58, %c0_59], %83 {strides = array<i32>} : memref<2x65x129xf32, #tpu.memory_space<vmem>>, vector<2x65x129xf32>,
    %cst_60 = arith.constant 5.000000e-02 : f32
    %85 = vector.broadcast %cst_60 : f32 to vector<2x129x128xf32>
    %86 = arith.mulf %85, %74 : vector<2x129x128xf32>
    %87 = arith.subf %54, %86 : vector<2x129x128xf32>
    %c0_61 = arith.constant 0 : index
    %c0_62 = arith.constant 0 : index
    %c0_63 = arith.constant 0 : index
    %88 = vector.load %arg6[%c0_61, %c0_62, %c0_63] : memref<2x129x128xf32, #tpu.memory_space<vmem>>, vector<2x129x128xf32>
    tpu.vector_store %arg6[%c0_61, %c0_62, %c0_63], %87 {strides = array<i32>} : memref<2x129x128xf32, #tpu.memory_space<vmem>>, vector<2x129x128xf32>,
    %c0_64 = arith.constant 0 : index
    %c0_65 = arith.constant 0 : index
    %c0_66 = arith.constant 0 : index
    %89 = vector.load %arg5[%c0_64, %c0_65, %c0_66] : memref<2x65x129xf32, #tpu.memory_space<vmem>>, vector<2x65x129xf32>
    %c0_67 = arith.constant 0 : index
    %c0_68 = arith.constant 0 : index
    %c0_69 = arith.constant 0 : index
    %90 = vector.load %arg6[%c0_67, %c0_68, %c0_69] : memref<2x129x128xf32, #tpu.memory_space<vmem>>, vector<2x129x128xf32>
    %cst_70 = arith.constant dense<0.000000e+00> : vector<2x8x129xf32>
    %91 = tpu.matmul %0, %89, %cst_70 {dimension_numbers = #tpu.dot_dimension_numbers<[2], [1], [1], [2], [0, 0, 0, 1, 1, 2], [0], [0]>} : vector<2x8x65xf32>, vector<2x65x129xf32>, vector<2x8x129xf32> -> vector<2x8x129xf32>
    %cst_71 = arith.constant 0.000000e+00 : f32
    %92 = vector.broadcast %cst_71 : f32 to vector<2x8x129xf32>
    %93 = arith.cmpf ogt, %91, %92 : vector<2x8x129xf32>
    %cst_72 = arith.constant 0.000000e+00 : f32
    %94 = vector.broadcast %cst_72 : f32 to vector<2x8x129xf32>
    %95 = arith.select %93, %91, %94 : vector<2x8x129xi1>, vector<2x8x129xf32>
    %cst_73 = arith.constant dense<0.000000e+00> : vector<2x8x128xf32>
    %96 = tpu.matmul %95, %90, %cst_73 {dimension_numbers = #tpu.dot_dimension_numbers<[2], [1], [1], [2], [0, 0, 0, 1, 1, 2], [0], [0]>} : vector<2x8x129xf32>, vector<2x129x128xf32>, vector<2x8x128xf32> -> vector<2x8x128xf32>
    %cst_74 = arith.constant dense<0xFF800000> : vector<2x8xf32>
    %97 = vector.multi_reduction <maximumf>, %96, %cst_74 [2] : vector<2x8x128xf32> to vector<2x8xf32>
    %98 = vector.shape_cast %97 : vector<2x8xf32> to vector<2x8x1xf32>
    %99 = vector.broadcast %98 : vector<2x8x1xf32> to vector<2x8x128xf32>
    %100 = arith.subf %96, %99 : vector<2x8x128xf32>
    %101 = math.exp %100 : vector<2x8x128xf32>
    %cst_75 = arith.constant dense<0.000000e+00> : vector<2x8xf32>
    %102 = vector.multi_reduction <add>, %101, %cst_75 [2] : vector<2x8x128xf32> to vector<2x8xf32>
    %103 = vector.shape_cast %102 : vector<2x8xf32> to vector<2x8x1xf32>
    %104 = tpu.reciprocal %103 {approx = true} : vector<2x8x1xf32> -> vector<2x8x1xf32>
    %105 = vector.broadcast %104 : vector<2x8x1xf32> to vector<2x8x128xf32>
    %106 = arith.mulf %101, %105 : vector<2x8x128xf32>
    %107 = arith.subf %106, %1 : vector<2x8x128xf32>
    %cst_76 = arith.constant 1.250000e-01 : f32
    %108 = vector.broadcast %cst_76 : f32 to vector<2x8x128xf32>
    %109 = arith.mulf %107, %108 : vector<2x8x128xf32>
    %cst_77 = arith.constant dense<0.000000e+00> : vector<2x129x128xf32>
    %110 = tpu.matmul %95, %109, %cst_77 {dimension_numbers = #tpu.dot_dimension_numbers<[1], [1], [2], [2], [0, 0, 0, 2, 1, 2], [0], [0]>} : vector<2x8x129xf32>, vector<2x8x128xf32>, vector<2x129x128xf32> -> vector<2x129x128xf32>
    %cst_78 = arith.constant dense<0.000000e+00> : vector<2x8x129xf32>
    %111 = tpu.matmul %109, %90, %cst_78 {dimension_numbers = #tpu.dot_dimension_numbers<[2], [2], [1], [1], [0, 0, 0, 1, 1, 1], [0], [0]>} : vector<2x8x128xf32>, vector<2x129x128xf32>, vector<2x8x129xf32> -> vector<2x8x129xf32>
    %cst_79 = arith.constant 0.000000e+00 : f32
    %112 = vector.broadcast %cst_79 : f32 to vector<2x8x129xf32>
    %113 = arith.select %93, %111, %112 : vector<2x8x129xi1>, vector<2x8x129xf32>
    %114 = vector.broadcast %6 : vector<1x1x129xf32> to vector<2x8x129xf32>
    %115 = arith.mulf %113, %114 : vector<2x8x129xf32>
    %cst_80 = arith.constant dense<0.000000e+00> : vector<2x65x129xf32>
    %116 = tpu.matmul %0, %115, %cst_80 {dimension_numbers = #tpu.dot_dimension_numbers<[1], [1], [2], [2], [0, 0, 0, 2, 1, 2], [0], [0]>} : vector<2x8x65xf32>, vector<2x8x129xf32>, vector<2x65x129xf32> -> vector<2x65x129xf32>
    %cst_81 = arith.constant 5.000000e-02 : f32
    %117 = vector.broadcast %cst_81 : f32 to vector<2x65x129xf32>
    %118 = arith.mulf %117, %116 : vector<2x65x129xf32>
    %119 = arith.subf %89, %118 : vector<2x65x129xf32>
    %c0_82 = arith.constant 0 : index
    %c0_83 = arith.constant 0 : index
    %c0_84 = arith.constant 0 : index
    %120 = vector.load %arg5[%c0_82, %c0_83, %c0_84] : memref<2x65x129xf32, #tpu.memory_space<vmem>>, vector<2x65x129xf32>
    tpu.vector_store %arg5[%c0_82, %c0_83, %c0_84], %119 {strides = array<i32>} : memref<2x65x129xf32, #tpu.memory_space<vmem>>, vector<2x65x129xf32>,
    %cst_85 = arith.constant 5.000000e-02 : f32
    %121 = vector.broadcast %cst_85 : f32 to vector<2x129x128xf32>
    %122 = arith.mulf %121, %110 : vector<2x129x128xf32>
    %123 = arith.subf %90, %122 : vector<2x129x128xf32>
    %c0_86 = arith.constant 0 : index
    %c0_87 = arith.constant 0 : index
    %c0_88 = arith.constant 0 : index
    %124 = vector.load %arg6[%c0_86, %c0_87, %c0_88] : memref<2x129x128xf32, #tpu.memory_space<vmem>>, vector<2x129x128xf32>
    tpu.vector_store %arg6[%c0_86, %c0_87, %c0_88], %123 {strides = array<i32>} : memref<2x129x128xf32, #tpu.memory_space<vmem>>, vector<2x129x128xf32>,
    %c0_89 = arith.constant 0 : index
    %c0_90 = arith.constant 0 : index
    %c0_91 = arith.constant 0 : index
    %125 = vector.load %arg5[%c0_89, %c0_90, %c0_91] : memref<2x65x129xf32, #tpu.memory_space<vmem>>, vector<2x65x129xf32>
    %c0_92 = arith.constant 0 : index
    %c0_93 = arith.constant 0 : index
    %c0_94 = arith.constant 0 : index
    %126 = vector.load %arg6[%c0_92, %c0_93, %c0_94] : memref<2x129x128xf32, #tpu.memory_space<vmem>>, vector<2x129x128xf32>
    %cst_95 = arith.constant dense<0.000000e+00> : vector<2x8x129xf32>
    %127 = tpu.matmul %0, %125, %cst_95 {dimension_numbers = #tpu.dot_dimension_numbers<[2], [1], [1], [2], [0, 0, 0, 1, 1, 2], [0], [0]>} : vector<2x8x65xf32>, vector<2x65x129xf32>, vector<2x8x129xf32> -> vector<2x8x129xf32>
    %cst_96 = arith.constant 0.000000e+00 : f32
    %128 = vector.broadcast %cst_96 : f32 to vector<2x8x129xf32>
    %129 = arith.cmpf ogt, %127, %128 : vector<2x8x129xf32>
    %cst_97 = arith.constant 0.000000e+00 : f32
    %130 = vector.broadcast %cst_97 : f32 to vector<2x8x129xf32>
    %131 = arith.select %129, %127, %130 : vector<2x8x129xi1>, vector<2x8x129xf32>
    %cst_98 = arith.constant dense<0.000000e+00> : vector<2x8x128xf32>
    %132 = tpu.matmul %131, %126, %cst_98 {dimension_numbers = #tpu.dot_dimension_numbers<[2], [1], [1], [2], [0, 0, 0, 1, 1, 2], [0], [0]>} : vector<2x8x129xf32>, vector<2x129x128xf32>, vector<2x8x128xf32> -> vector<2x8x128xf32>
    %cst_99 = arith.constant dense<0xFF800000> : vector<2x8xf32>
    %133 = vector.multi_reduction <maximumf>, %132, %cst_99 [2] : vector<2x8x128xf32> to vector<2x8xf32>
    %134 = vector.shape_cast %133 : vector<2x8xf32> to vector<2x8x1xf32>
    %135 = vector.broadcast %134 : vector<2x8x1xf32> to vector<2x8x128xf32>
    %136 = arith.subf %132, %135 : vector<2x8x128xf32>
    %137 = math.exp %136 : vector<2x8x128xf32>
    %cst_100 = arith.constant dense<0.000000e+00> : vector<2x8xf32>
    %138 = vector.multi_reduction <add>, %137, %cst_100 [2] : vector<2x8x128xf32> to vector<2x8xf32>
    %139 = vector.shape_cast %138 : vector<2x8xf32> to vector<2x8x1xf32>
    %140 = tpu.reciprocal %139 {approx = true} : vector<2x8x1xf32> -> vector<2x8x1xf32>
    %141 = vector.broadcast %140 : vector<2x8x1xf32> to vector<2x8x128xf32>
    %142 = arith.mulf %137, %141 : vector<2x8x128xf32>
    %143 = arith.subf %142, %1 : vector<2x8x128xf32>
    %cst_101 = arith.constant 1.250000e-01 : f32
    %144 = vector.broadcast %cst_101 : f32 to vector<2x8x128xf32>
    %145 = arith.mulf %143, %144 : vector<2x8x128xf32>
    %cst_102 = arith.constant dense<0.000000e+00> : vector<2x129x128xf32>
    %146 = tpu.matmul %131, %145, %cst_102 {dimension_numbers = #tpu.dot_dimension_numbers<[1], [1], [2], [2], [0, 0, 0, 2, 1, 2], [0], [0]>} : vector<2x8x129xf32>, vector<2x8x128xf32>, vector<2x129x128xf32> -> vector<2x129x128xf32>
    %cst_103 = arith.constant dense<0.000000e+00> : vector<2x8x129xf32>
    %147 = tpu.matmul %145, %126, %cst_103 {dimension_numbers = #tpu.dot_dimension_numbers<[2], [2], [1], [1], [0, 0, 0, 1, 1, 1], [0], [0]>} : vector<2x8x128xf32>, vector<2x129x128xf32>, vector<2x8x129xf32> -> vector<2x8x129xf32>
    %cst_104 = arith.constant 0.000000e+00 : f32
    %148 = vector.broadcast %cst_104 : f32 to vector<2x8x129xf32>
    %149 = arith.select %129, %147, %148 : vector<2x8x129xi1>, vector<2x8x129xf32>
    %150 = vector.broadcast %6 : vector<1x1x129xf32> to vector<2x8x129xf32>
    %151 = arith.mulf %149, %150 : vector<2x8x129xf32>
    %cst_105 = arith.constant dense<0.000000e+00> : vector<2x65x129xf32>
    %152 = tpu.matmul %0, %151, %cst_105 {dimension_numbers = #tpu.dot_dimension_numbers<[1], [1], [2], [2], [0, 0, 0, 2, 1, 2], [0], [0]>} : vector<2x8x65xf32>, vector<2x8x129xf32>, vector<2x65x129xf32> -> vector<2x65x129xf32>
    %cst_106 = arith.constant 5.000000e-02 : f32
    %153 = vector.broadcast %cst_106 : f32 to vector<2x65x129xf32>
    %154 = arith.mulf %153, %152 : vector<2x65x129xf32>
    %155 = arith.subf %125, %154 : vector<2x65x129xf32>
    %c0_107 = arith.constant 0 : index
    %c0_108 = arith.constant 0 : index
    %c0_109 = arith.constant 0 : index
    %156 = vector.load %arg5[%c0_107, %c0_108, %c0_109] : memref<2x65x129xf32, #tpu.memory_space<vmem>>, vector<2x65x129xf32>
    tpu.vector_store %arg5[%c0_107, %c0_108, %c0_109], %155 {strides = array<i32>} : memref<2x65x129xf32, #tpu.memory_space<vmem>>, vector<2x65x129xf32>,
    %cst_110 = arith.constant 5.000000e-02 : f32
    %157 = vector.broadcast %cst_110 : f32 to vector<2x129x128xf32>
    %158 = arith.mulf %157, %146 : vector<2x129x128xf32>
    %159 = arith.subf %126, %158 : vector<2x129x128xf32>
    %c0_111 = arith.constant 0 : index
    %c0_112 = arith.constant 0 : index
    %c0_113 = arith.constant 0 : index
    %160 = vector.load %arg6[%c0_111, %c0_112, %c0_113] : memref<2x129x128xf32, #tpu.memory_space<vmem>>, vector<2x129x128xf32>
    tpu.vector_store %arg6[%c0_111, %c0_112, %c0_113], %159 {strides = array<i32>} : memref<2x129x128xf32, #tpu.memory_space<vmem>>, vector<2x129x128xf32>,
    %c0_114 = arith.constant 0 : index
    %c0_115 = arith.constant 0 : index
    %c0_116 = arith.constant 0 : index
    %161 = vector.load %arg5[%c0_114, %c0_115, %c0_116] : memref<2x65x129xf32, #tpu.memory_space<vmem>>, vector<2x65x129xf32>
    %c0_117 = arith.constant 0 : index
    %c0_118 = arith.constant 0 : index
    %c0_119 = arith.constant 0 : index
    %162 = vector.load %arg6[%c0_117, %c0_118, %c0_119] : memref<2x129x128xf32, #tpu.memory_space<vmem>>, vector<2x129x128xf32>
    %cst_120 = arith.constant dense<0.000000e+00> : vector<2x8x129xf32>
    %163 = tpu.matmul %0, %161, %cst_120 {dimension_numbers = #tpu.dot_dimension_numbers<[2], [1], [1], [2], [0, 0, 0, 1, 1, 2], [0], [0]>} : vector<2x8x65xf32>, vector<2x65x129xf32>, vector<2x8x129xf32> -> vector<2x8x129xf32>
    %cst_121 = arith.constant 0.000000e+00 : f32
    %164 = vector.broadcast %cst_121 : f32 to vector<2x8x129xf32>
    %165 = arith.cmpf ogt, %163, %164 : vector<2x8x129xf32>
    %cst_122 = arith.constant 0.000000e+00 : f32
    %166 = vector.broadcast %cst_122 : f32 to vector<2x8x129xf32>
    %167 = arith.select %165, %163, %166 : vector<2x8x129xi1>, vector<2x8x129xf32>
    %cst_123 = arith.constant dense<0.000000e+00> : vector<2x8x128xf32>
    %168 = tpu.matmul %167, %162, %cst_123 {dimension_numbers = #tpu.dot_dimension_numbers<[2], [1], [1], [2], [0, 0, 0, 1, 1, 2], [0], [0]>} : vector<2x8x129xf32>, vector<2x129x128xf32>, vector<2x8x128xf32> -> vector<2x8x128xf32>
    %cst_124 = arith.constant dense<0xFF800000> : vector<2x8xf32>
    %169 = vector.multi_reduction <maximumf>, %168, %cst_124 [2] : vector<2x8x128xf32> to vector<2x8xf32>
    %170 = vector.shape_cast %169 : vector<2x8xf32> to vector<2x8x1xf32>
    %171 = vector.broadcast %170 : vector<2x8x1xf32> to vector<2x8x128xf32>
    %172 = arith.subf %168, %171 : vector<2x8x128xf32>
    %173 = math.exp %172 : vector<2x8x128xf32>
    %cst_125 = arith.constant dense<0.000000e+00> : vector<2x8xf32>
    %174 = vector.multi_reduction <add>, %173, %cst_125 [2] : vector<2x8x128xf32> to vector<2x8xf32>
    %175 = vector.shape_cast %174 : vector<2x8xf32> to vector<2x8x1xf32>
    %176 = tpu.reciprocal %175 {approx = true} : vector<2x8x1xf32> -> vector<2x8x1xf32>
    %177 = vector.broadcast %176 : vector<2x8x1xf32> to vector<2x8x128xf32>
    %178 = arith.mulf %173, %177 : vector<2x8x128xf32>
    %179 = arith.subf %178, %1 : vector<2x8x128xf32>
    %cst_126 = arith.constant 1.250000e-01 : f32
    %180 = vector.broadcast %cst_126 : f32 to vector<2x8x128xf32>
    %181 = arith.mulf %179, %180 : vector<2x8x128xf32>
    %cst_127 = arith.constant dense<0.000000e+00> : vector<2x129x128xf32>
    %182 = tpu.matmul %167, %181, %cst_127 {dimension_numbers = #tpu.dot_dimension_numbers<[1], [1], [2], [2], [0, 0, 0, 2, 1, 2], [0], [0]>} : vector<2x8x129xf32>, vector<2x8x128xf32>, vector<2x129x128xf32> -> vector<2x129x128xf32>
    %cst_128 = arith.constant dense<0.000000e+00> : vector<2x8x129xf32>
    %183 = tpu.matmul %181, %162, %cst_128 {dimension_numbers = #tpu.dot_dimension_numbers<[2], [2], [1], [1], [0, 0, 0, 1, 1, 1], [0], [0]>} : vector<2x8x128xf32>, vector<2x129x128xf32>, vector<2x8x129xf32> -> vector<2x8x129xf32>
    %cst_129 = arith.constant 0.000000e+00 : f32
    %184 = vector.broadcast %cst_129 : f32 to vector<2x8x129xf32>
    %185 = arith.select %165, %183, %184 : vector<2x8x129xi1>, vector<2x8x129xf32>
    %186 = vector.broadcast %6 : vector<1x1x129xf32> to vector<2x8x129xf32>
    %187 = arith.mulf %185, %186 : vector<2x8x129xf32>
    %cst_130 = arith.constant dense<0.000000e+00> : vector<2x65x129xf32>
    %188 = tpu.matmul %0, %187, %cst_130 {dimension_numbers = #tpu.dot_dimension_numbers<[1], [1], [2], [2], [0, 0, 0, 2, 1, 2], [0], [0]>} : vector<2x8x65xf32>, vector<2x8x129xf32>, vector<2x65x129xf32> -> vector<2x65x129xf32>
    %cst_131 = arith.constant 5.000000e-02 : f32
    %189 = vector.broadcast %cst_131 : f32 to vector<2x65x129xf32>
    %190 = arith.mulf %189, %188 : vector<2x65x129xf32>
    %191 = arith.subf %161, %190 : vector<2x65x129xf32>
    %c0_132 = arith.constant 0 : index
    %c0_133 = arith.constant 0 : index
    %c0_134 = arith.constant 0 : index
    %192 = vector.load %arg5[%c0_132, %c0_133, %c0_134] : memref<2x65x129xf32, #tpu.memory_space<vmem>>, vector<2x65x129xf32>
    tpu.vector_store %arg5[%c0_132, %c0_133, %c0_134], %191 {strides = array<i32>} : memref<2x65x129xf32, #tpu.memory_space<vmem>>, vector<2x65x129xf32>,
    %cst_135 = arith.constant 5.000000e-02 : f32
    %193 = vector.broadcast %cst_135 : f32 to vector<2x129x128xf32>
    %194 = arith.mulf %193, %182 : vector<2x129x128xf32>
    %195 = arith.subf %162, %194 : vector<2x129x128xf32>
    %c0_136 = arith.constant 0 : index
    %c0_137 = arith.constant 0 : index
    %c0_138 = arith.constant 0 : index
    %196 = vector.load %arg6[%c0_136, %c0_137, %c0_138] : memref<2x129x128xf32, #tpu.memory_space<vmem>>, vector<2x129x128xf32>
    tpu.vector_store %arg6[%c0_136, %c0_137, %c0_138], %195 {strides = array<i32>} : memref<2x129x128xf32, #tpu.memory_space<vmem>>, vector<2x129x128xf32>,
    %c0_139 = arith.constant 0 : index
    %c0_140 = arith.constant 0 : index
    %c0_141 = arith.constant 0 : index
    %197 = vector.load %arg5[%c0_139, %c0_140, %c0_141] : memref<2x65x129xf32, #tpu.memory_space<vmem>>, vector<2x65x129xf32>
    %c0_142 = arith.constant 0 : index
    %c0_143 = arith.constant 0 : index
    %c0_144 = arith.constant 0 : index
    %198 = vector.load %arg6[%c0_142, %c0_143, %c0_144] : memref<2x129x128xf32, #tpu.memory_space<vmem>>, vector<2x129x128xf32>
    %cst_145 = arith.constant dense<0.000000e+00> : vector<2x8x129xf32>
    %199 = tpu.matmul %0, %197, %cst_145 {dimension_numbers = #tpu.dot_dimension_numbers<[2], [1], [1], [2], [0, 0, 0, 1, 1, 2], [0], [0]>} : vector<2x8x65xf32>, vector<2x65x129xf32>, vector<2x8x129xf32> -> vector<2x8x129xf32>
    %cst_146 = arith.constant 0.000000e+00 : f32
    %200 = vector.broadcast %cst_146 : f32 to vector<2x8x129xf32>
    %201 = arith.cmpf ogt, %199, %200 : vector<2x8x129xf32>
    %cst_147 = arith.constant 0.000000e+00 : f32
    %202 = vector.broadcast %cst_147 : f32 to vector<2x8x129xf32>
    %203 = arith.select %201, %199, %202 : vector<2x8x129xi1>, vector<2x8x129xf32>
    %cst_148 = arith.constant dense<0.000000e+00> : vector<2x8x128xf32>
    %204 = tpu.matmul %203, %198, %cst_148 {dimension_numbers = #tpu.dot_dimension_numbers<[2], [1], [1], [2], [0, 0, 0, 1, 1, 2], [0], [0]>} : vector<2x8x129xf32>, vector<2x129x128xf32>, vector<2x8x128xf32> -> vector<2x8x128xf32>
    %c0_149 = arith.constant 0 : index
    %c0_150 = arith.constant 0 : index
    %c0_151 = arith.constant 0 : index
    %205 = vector.load %arg7[%c0_149, %c0_150, %c0_151] : memref<2x8x128xf32, #tpu.memory_space<vmem>>, vector<2x8x128xf32>
    tpu.vector_store %arg7[%c0_149, %c0_150, %c0_151], %204 {strides = array<i32>} : memref<2x8x128xf32, #tpu.memory_space<vmem>>, vector<2x8x128xf32>,
    return
  }
  func.func @transform_0(%arg0: i32) -> (i32, i32, i32) {
    %c0_i32 = arith.constant 0 : i32
    %c0_i32_0 = arith.constant 0 : i32
    %c0_i32_1 = arith.constant 0 : i32
    return %arg0, %c0_i32, %c0_i32_0 : i32, i32, i32
  }
  func.func @transform_1(%arg0: i32) -> (i32, i32, i32) {
    %c0_i32 = arith.constant 0 : i32
    %c0_i32_0 = arith.constant 0 : i32
    %c0_i32_1 = arith.constant 0 : i32
    return %arg0, %c0_i32, %c0_i32_0 : i32, i32, i32
  }
  func.func @transform_2(%arg0: i32) -> (i32, i32) {
    %c0_i32 = arith.constant 0 : i32
    %c0_i32_0 = arith.constant 0 : i32
    %c0_i32_1 = arith.constant 0 : i32
    return %c0_i32, %c0_i32_0 : i32, i32
  }
  func.func @transform_3(%arg0: i32) -> (i32, i32) {
    %c0_i32 = arith.constant 0 : i32
    %c0_i32_0 = arith.constant 0 : i32
    %c0_i32_1 = arith.constant 0 : i32
    return %c0_i32, %c0_i32_0 : i32, i32
  }
  func.func @transform_4(%arg0: i32) -> (i32, i32, i32) {
    %c0_i32 = arith.constant 0 : i32
    %c0_i32_0 = arith.constant 0 : i32
    %c0_i32_1 = arith.constant 0 : i32
    return %arg0, %c0_i32, %c0_i32_0 : i32, i32, i32
  }
  func.func @transform_5(%arg0: i32) -> (i32, i32, i32) {
    %c0_i32 = arith.constant 0 : i32
    %c0_i32_0 = arith.constant 0 : i32
    %c0_i32_1 = arith.constant 0 : i32
    return %arg0, %c0_i32, %c0_i32_0 : i32, i32, i32
  }
  func.func @transform_6(%arg0: i32) -> (i32, i32, i32) {
    %c0_i32 = arith.constant 0 : i32
    %c0_i32_0 = arith.constant 0 : i32
    %c0_i32_1 = arith.constant 0 : i32
    return %arg0, %c0_i32, %c0_i32_0 : i32, i32, i32
  }
}

</mosaic_0001>

<bundles_post_ra>
// kernel: tpu_custom_call.1
= control target key start
LH: loop header
LB: loop body
LE: loop exit
PB: predicated region body
PF: predicated region fallthrough
CT: control target
= control target key end

     0   :  { %12 = vsyncpa [#allocation3], 0  ;;  %s14962_s0 = inlined_call_operand.vmem [shape: f32[8,8,65], index: 0, kind: input, shape index: {}]   ;;  %s14963_s1 = inlined_call_operand.vmem [shape: f32[8,8,128], index: 1, kind: input, shape index: {}]   ;;  %s14964_s2 = inlined_call_operand.vmem [shape: f32[65,129], index: 2, kind: input, shape index: {}]   ;;  %s14965_s3 = inlined_call_operand.vmem [shape: f32[129,128], index: 3, kind: input, shape index: {}]   ;;  %s14966_s4 = inlined_call_operand.vmem [shape: f32[8,65,129], index: 4, kind: output, shape index: {0}]   ;;  %s14967_s5 = inlined_call_operand.vmem [shape: f32[8,129,128], index: 5, kind: output, shape index: {1}]   ;;  %s14968_s6 = inlined_call_operand.hbm [shape: f32[8,8,128], index: 6, kind: output, shape index: {2}]  }
   0x1   :  { %14 = vsyncpa [#allocation3 + $0x1], 0  ;;  %s10859_s21 = smov 0   ;;  %s10861_s22 = smov 0  }
   0x2   :  { %s10863_s23 = smov 0   ;;  %s10865_s24 = smov 0  }
   0x3 LB: > { %s10880_s25 = sadd.s32 4294967295, %s10816_s24   ;;  %s8769_s26 = sadd.s32 4294967294, %s10816_s24   ;;  %s10816_s24 = sphi %s10865_s24, %s15510_s24   ;;  %s10812_s23 = sphi %s10863_s23, %s15509_s23   ;;  %s10808_s22 = sphi %s10861_s22, %s15508_s22   ;;  %s10804_s21 = sphi %s10859_s21, %s15507_s21  }
   0x4   : > { %s10884_s27 = sadd.s32 1, %s10816_s24   ;;  %s173_s28 = sadd.s32 1, %s10812_s23 }
   0x5   : > { %s170_s29 = ssub.s32 %s10816_s24, %s10884_s27  ;;  %p183_p0 = scmp.ne.s32.totalorder %s10812_s23, %s10808_s22 }
   0x6   : > { %p171_p1 = scmp.eq.s32.totalorder %s170_s29, 0  ;;  %p184_p2 = scmp.eq.s32.totalorder %s10880_s25, 3 }
   0x7   : > { %p189_p3 = scmp.ne.s32.totalorder %s10808_s22, %s10804_s21  ;;  %p190_p4 = scmp.eq.s32.totalorder %s8769_s26, 3 }
   0x8   : > { %s10895_s30 = scalar_select %p171_p1, %s10812_s23, %s173_s28  }
   0x9   : > { %p10897_p5 = por %p184_p2, %p183_p0  ;;  %p10901_p6 = por %p190_p4, %p189_p3 }
   0xa   : > { %p8772_p7 = scmp.ge.s32.totalorder %s10816_s24, 1  ;;  %p232_p8 = scmp.lt.s32.totalorder %s10816_s24, 5 }
   0xc   : > { %p233_p9 = pnand %p8772_p7, %p232_p8 }
   0xe   : > { %236 = sbr.rel (%p233_p9) target bundleno = 7313 (0x1c91), region = 36 }
  0x15   : > { %s8774_s9 = sshll.u32 %s10880_s25, 1  ;;  %v14969_v0 = vmov 0.0   ;;  %v320_v1 = vld [vmem:[%s14964_s2 + $0x8] sm:$0xff]  ;;  %v322_v2 = vld [vmem:[%s14964_s2 + $0x18] sm:$0xff]  ;;  %v10921_v3 = vld [vmem:[%s14964_s2] sm:$0xff]  ;;  %vm338_vm0 = vcmask 7168  }
  0x16   : > { %p280_p10 = scmp.lt.s32.totalorder %s8774_s9, 7  ;;  %571 = vmatprep.mubr.f32.mxu0 %v14969_v0  ;;  %651 = vmatprep.mubr.f32.mxu1 %v14969_v0  ;;  %15147 = vst [vmem:[#allocation5_spill] sm:$0xff] %v10921_v3  ;;  %v10926_v4 = vld [vmem:[%s14964_s2 + $0x10] sm:$0xff]  ;;  %v324_v5 = vld [vmem:[%s14964_s2 + $0x28] sm:$0xff]  ;;  %v326_v6 = vld [vmem:[%s14964_s2 + $0x38] sm:$0xff]  ;;  %vm355_vm1 = vcmask 0  }
  0x17   : > { %15148 = vst [vmem:[#allocation6_spill] sm:$0xff] %v10926_v4  ;;  %v10937_v7 = vld [vmem:[%s14964_s2 + $0x20] sm:$0xff]  ;;  %v10942_v8 = vld [vmem:[%s14964_s2 + $0x30] sm:$0xff]  ;;  %v328_v9 = vld [vmem:[%s14964_s2 + $0x48] sm:$0xff]  ;;  %v9858_v40 = vpack.c.bf16 %v10926_v4, %v10921_v3  ;;  %vm500_vm2 = vcmask 1040384   ;;  %vm496_vm3 = vcmask 531456  }
  0x18   : > { %s15512_s9 = smov (!%p280_p10, %s8774_s9), 7  ;;  %15149 = vst [vmem:[#allocation7_spill] sm:$0xff] %v10937_v7  ;;  %15150 = vst [vmem:[#allocation8_spill] sm:$0xff] %v10942_v8  ;;  %v330_v10 = vld [vmem:[%s14964_s2 + $0x58] sm:$0xff]  ;;  %v10953_v11 = vld [vmem:[%s14964_s2 + $0x40] sm:$0xff]  ;;  %v9862_v55 = vpack.c.bf16 %v10942_v8, %v10937_v7  ;;  %vm10820_vm8 = vmmov 0  }
  0x19   : > { %15151 = vst [vmem:[#allocation9_spill] sm:$0xff] %v10953_v11  ;;  %v10958_v12 = vld [vmem:[%s14964_s2 + $0x50] sm:$0xff]  ;;  %v332_v13 = vld [vmem:[%s14964_s2 + $0x68] sm:$0xff]  ;;  %v334_v14 = vld [vmem:[%s14964_s2 + $0x78] sm:$0xff]  ;;  %s10560_s12 = smul.u32 144, %s15512_s9  ;;  %s8775_s16 = sshll.u32 %s15512_s9, 3 }
  0x1a   : > { %15152 = vst [vmem:[#allocation10_spill] sm:$0xff] %v10958_v12  ;;  %v10969_v15 = vld [vmem:[%s14964_s2 + $0x60] sm:$0xff]  ;;  %v10975_v16 = vld [vmem:[%s14964_s2 + $0x70] sm:$0xff]  ;;  %v336_v17 = vld [vmem:[%s14964_s2 + $0x88] sm:$0x1]  ;;  %s10561_s19 = smul.u32 136, %s15512_s9  ;;  %s11256_s18 = scalar_lea.vmem %s14962_s0, %s8775_s16 }
  0x1b   : > { %15153 = vst [vmem:[#allocation11_spill] sm:$0xff] %v10969_v15  ;;  %15154 = vst [vmem:[#allocation12_spill] sm:$0xff] %v10975_v16  ;;  %v335_v18 = vld [vmem:[%s14964_s2 + $0x80] sm:$0x1]  ;;  %v10992_v20 = vld [vmem:[%s14965_s3 + $0x8] sm:$0xff]  ;;  %s11002_s15 = scalar_lea.vmem %s14966_s4, %s10560_s12  ;;  %s11502_s17 = scalar_lea.vmem %s14963_s1, %s8775_s16  ;;  %vm904_vm9 = vcmask 64512  }
  0x1c   : > { %v10987_v19 = vld [vmem:[%s14965_s3] sm:$0xff]  ;;  %v10997_v21 = vld [vmem:[%s14965_s3 + $0x10] sm:$0xff]  ;;  %v11007_v22 = vld [vmem:[%s14965_s3 + $0x18] sm:$0xff]  ;;  %339 = vst.msk [vmem:[%s11002_s15 + $0x8] sm:$0xff] %vm338_vm0, %v320_v1  ;;  %s11057_s10 = scalar_lea.vmem %s14967_s5, %s10561_s19  ;;  %s276_s9 = sand.u32 1, %s10808_s22  }
  0x1d   : > { %v11012_v23 = vld [vmem:[%s14965_s3 + $0x20] sm:$0xff]  ;;  %v11017_v24 = vld [vmem:[%s14965_s3 + $0x28] sm:$0xff]  ;;  %341 = vst.msk [vmem:[%s11002_s15 + $0x18] sm:$0xff] %vm338_vm0, %v322_v2  ;;  %337 = vst [vmem:[%s11002_s15] sm:$0xff] %v10921_v3  ;;  %s9129_s12 = sshll.u32 %s10880_s25, 8  ;;  %s14921_s28 = scalar_lea.sflag [#allocation3], %s276_s9 }
  0x1e   : > { %340 = vst [vmem:[%s11002_s15 + $0x10] sm:$0xff] %v10926_v4  ;;  %343 = vst.msk [vmem:[%s11002_s15 + $0x28] sm:$0xff] %vm338_vm0, %v324_v5  ;;  %v11062_v25 = vld [vmem:[%s14965_s3 + $0x30] sm:$0xff]  ;;  %v11114_v26 = vld [vmem:[%s14965_s3 + $0x38] sm:$0xff]  ;;  %s14919_s26 = scalar_lea.hbm %s14968_s6, %s9129_s12  ;;  %s10821_s25 = smov [#allocation2]  }
  0x1f   : > { %345 = vst.msk [vmem:[%s11002_s15 + $0x38] sm:$0xff] %vm338_vm0, %v326_v6  ;;  %342 = vst [vmem:[%s11002_s15 + $0x20] sm:$0xff] %v10937_v7  ;;  %v11121_v27 = vld [vmem:[%s14965_s3 + $0x40] sm:$0xff]  ;;  %v11126_v28 = vld [vmem:[%s14965_s3 + $0x48] sm:$0xff]  ;;  %s10758_s11 = sshll.u32 %s10821_s25, 4  ;;  %s10759_s11 = int_to_ptr.vmem [resolvable:$false] %s10758_s11 }
  0x20   : > { %344 = vst [vmem:[%s11002_s15 + $0x30] sm:$0xff] %v10942_v8  ;;  %347 = vst.msk [vmem:[%s11002_s15 + $0x48] sm:$0xff] %vm338_vm0, %v328_v9  ;;  %v11151_v29 = vld [vmem:[%s14965_s3 + $0x50] sm:$0xff]  ;;  %v11156_v30 = vld [vmem:[%s14965_s3 + $0x58] sm:$0xff]  ;;  %s10760_s13 = scalar_lea.vmem %s10759_s11, 512 }
  0x21   : > { %349 = vst.msk [vmem:[%s11002_s15 + $0x58] sm:$0xff] %vm338_vm0, %v330_v10  ;;  %346 = vst [vmem:[%s11002_s15 + $0x40] sm:$0xff] %v10953_v11  ;;  %v11161_v31 = vld [vmem:[%s14965_s3 + $0x60] sm:$0xff]  ;;  %v11176_v32 = vld [vmem:[%s14965_s3 + $0x68] sm:$0xff] }
  0x22   : > { %348 = vst [vmem:[%s11002_s15 + $0x50] sm:$0xff] %v10958_v12  ;;  %351 = vst.msk [vmem:[%s11002_s15 + $0x68] sm:$0xff] %vm338_vm0, %v332_v13  ;;  %v11409_v0 = vld [vmem:[%s14965_s3 + $0x70] sm:$0xff] }
  0x23   : > { %353 = vst.msk [vmem:[%s11002_s15 + $0x78] sm:$0xff] %vm338_vm0, %v334_v14  ;;  %350 = vst [vmem:[%s11002_s15 + $0x60] sm:$0xff] %v10969_v15  ;;  %v427_v33 = vld [vmem:[%s11002_s15 + $0x8] sm:$0xff] }
  0x24   : > { %352 = vst [vmem:[%s11002_s15 + $0x70] sm:$0xff] %v10975_v16  ;;  %356 = vst.msk [vmem:[%s11002_s15 + $0x88] sm:$0x1] %vm355_vm1, %v336_v17  ;;  %v429_v34 = vld [vmem:[%s11002_s15 + $0x18] sm:$0xff]  ;;  %v426_v38 = vld [vmem:[%s11002_s15] sm:$0xff] }
  0x25   : > { %354 = vst [vmem:[%s11002_s15 + $0x80] sm:$0x1] %v335_v18  ;;  %358 = vst.msk [vmem:[%s11002_s15 + $0x98] sm:$0xff] %vm338_vm0, %v320_v1  ;;  %v9840_v36 = vpack.c.bf16 %v429_v34, %v427_v33  ;;  %v428_v39 = vld [vmem:[%s11002_s15 + $0x10] sm:$0xff]  ;;  %v431_v43 = vld [vmem:[%s11002_s15 + $0x28] sm:$0xff] }
  0x26   : > { %360 = vst.msk [vmem:[%s11002_s15 + $0xa8] sm:$0xff] %vm338_vm0, %v322_v2  ;;  %357 = vst [vmem:[%s11002_s15 + $0x90] sm:$0xff] %v10921_v3  ;;  %v9842_v42 = vpack.c.bf16 %v428_v39, %v426_v38  ;;  %v433_v44 = vld [vmem:[%s11002_s15 + $0x38] sm:$0xff]  ;;  %v430_v48 = vld [vmem:[%s11002_s15 + $0x20] sm:$0xff] }
  0x27   : > { %359 = vst [vmem:[%s11002_s15 + $0xa0] sm:$0xff] %v10926_v4  ;;  %362 = vst.msk [vmem:[%s11002_s15 + $0xb8] sm:$0xff] %vm338_vm0, %v324_v5  ;;  %9841 = vmatprep.subr.bf16.mxu0 %v9840_v36  ;;  %v9844_v46 = vpack.c.bf16 %v433_v44, %v431_v43  ;;  %v432_v49 = vld [vmem:[%s11002_s15 + $0x30] sm:$0xff]  ;;  %v435_v52 = vld [vmem:[%s11002_s15 + $0x48] sm:$0xff]  ;;  %v9866_v5 = vpack.c.bf16 %v10958_v12, %v10953_v11  ;;  %v11284_v43 = vpack.c.bf16 %v10992_v20, %v10987_v19 }
  0x28   : > { %364 = vst.msk [vmem:[%s11002_s15 + $0xc8] sm:$0xff] %vm338_vm0, %v326_v6  ;;  %361 = vst [vmem:[%s11002_s15 + $0xb0] sm:$0xff] %v10937_v7  ;;  %9843 = vmatpush1.bf16.msra.mxu0 %v9842_v42  ;;  %v9846_v51 = vpack.c.bf16 %v432_v49, %v430_v48  ;;  %v437_v53 = vld [vmem:[%s11002_s15 + $0x58] sm:$0xff]  ;;  %v434_v58 = vld [vmem:[%s11002_s15 + $0x40] sm:$0xff]  ;;  %v14972_v48 = vmov 0.0|0.0  }
  0x29   : > { %363 = vst [vmem:[%s11002_s15 + $0xc0] sm:$0xff] %v10942_v8  ;;  %366 = vst.msk [vmem:[%s11002_s15 + $0xd8] sm:$0xff] %vm338_vm0, %v328_v9  ;;  %9845 = vmatprep.subr.bf16.mxu0 %v9844_v46  ;;  %v9848_v56 = vpack.c.bf16 %v437_v53, %v435_v52  ;;  %v436_v59 = vld [vmem:[%s11002_s15 + $0x50] sm:$0xff]  ;;  %v439_v61 = vld [vmem:[%s11002_s15 + $0x68] sm:$0xff] }
  0x2a   : > { %368 = vst.msk [vmem:[%s11002_s15 + $0xe8] sm:$0xff] %vm338_vm0, %v330_v10  ;;  %365 = vst [vmem:[%s11002_s15 + $0xd0] sm:$0xff] %v10953_v11  ;;  %v441_v62 = vld [vmem:[%s11002_s15 + $0x78] sm:$0xff]  ;;  %v9850_v2 = vpack.c.bf16 %v436_v59, %v434_v58  ;;  %v438_v9 = vld [vmem:[%s11002_s15 + $0x60] sm:$0xff] }
  0x2b   : > { %367 = vst [vmem:[%s11002_s15 + $0xe0] sm:$0xff] %v10958_v12  ;;  %370 = vst.msk [vmem:[%s11002_s15 + $0xf8] sm:$0xff] %vm338_vm0, %v332_v13  ;;  %v9852_v6 = vpack.c.bf16 %v441_v62, %v439_v61  ;;  %v440_v10 = vld [vmem:[%s11002_s15 + $0x70] sm:$0xff] }
  0x2c   : > { %372 = vst.msk [vmem:[%s11002_s15 + $0x108] sm:$0xff] %vm338_vm0, %v334_v14  ;;  %369 = vst [vmem:[%s11002_s15 + $0xf0] sm:$0xff] %v10969_v15  ;;  %v11193_v35 = vld [vmem:[%s11002_s15 + $0x98] sm:$0xff]  ;;  %9847 = vmatpush1.bf16.msra.mxu0 %v9846_v51  ;;  %v9854_v14 = vpack.c.bf16 %v440_v10, %v438_v9  ;;  %v442_v38 = vld [vmem:[%s11002_s15 + $0x80] sm:$0x1] }
  0x2d   : > { %371 = vst [vmem:[%s11002_s15 + $0x100] sm:$0xff] %v10975_v16  ;;  %374 = vst.msk [vmem:[%s11002_s15 + $0x118] sm:$0x1] %vm355_vm1, %v336_v17  ;;  %v11196_v37 = vld [vmem:[%s11002_s15 + $0xa8] sm:$0xff]  ;;  %9849 = vmatprep.subr.bf16.mxu0 %v9848_v56  ;;  %v9870_v17 = vpack.c.bf16 %v10975_v16, %v10969_v15  ;;  %v15171_v15 = vmov 0.0  }
  0x2e   : > { %373 = vst [vmem:[%s11002_s15 + $0x110] sm:$0x1] %v335_v18  ;;  %392 = vst [vmem:[%s11057_s10] sm:$0xff] %v10987_v19  ;;  %v9856_v41 = vpack.c.bf16 %v11196_v37, %v11193_v35  ;;  %v11207_v45 = vld [vmem:[%s11002_s15 + $0xb8] sm:$0xff]  ;;  %v443_v18 = vld [vmem:[%s11002_s15 + $0x88] sm:$0x1] }
  0x2f   : > { %393 = vst [vmem:[%s11057_s10 + $0x8] sm:$0xff] %v10992_v20  ;;  %394 = vst [vmem:[%s11057_s10 + $0x10] sm:$0xff] %v10997_v21  ;;  %v11210_v47 = vld [vmem:[%s11002_s15 + $0xc8] sm:$0xff] }
  0x30   : > { %395 = vst [vmem:[%s11057_s10 + $0x18] sm:$0xff] %v11007_v22  ;;  %396 = vst [vmem:[%s11057_s10 + $0x20] sm:$0xff] %v11012_v23  ;;  %9857 = vmatprep.subr.bf16.mxu1 %v9856_v41  ;;  %v9860_v50 = vpack.c.bf16 %v11210_v47, %v11207_v45  ;;  %v11219_v54 = vld [vmem:[%s11002_s15 + $0xd8] sm:$0xff]  ;;  %9851 = vmatpush1.bf16.msra.mxu0 %v9850_v2  ;;  %v11275_v41 = vld [vmem:[%s11256_s18 + $0x8] sm:$0xff] }
  0x31   : > { %397 = vst [vmem:[%s11057_s10 + $0x28] sm:$0xff] %v11017_v24  ;;  %398 = vst [vmem:[%s11057_s10 + $0x30] sm:$0xff] %v11062_v25  ;;  %9859 = vmatpush1.bf16.msra.mxu1 %v9858_v40  ;;  %v11224_v57 = vld [vmem:[%s11002_s15 + $0xe8] sm:$0xff]  ;;  %9853 = vmatprep.subr.bf16.mxu0 %v9852_v6  ;;  %v11272_v40 = vld [vmem:[%s11256_s18] sm:$0xff] }
  0x32   : > { %409 = vst [vmem:[%s11057_s10 + $0x88] sm:$0xff] %v10987_v19  ;;  %410 = vst [vmem:[%s11057_s10 + $0x90] sm:$0xff] %v10992_v20  ;;  %9861 = vmatprep.subr.bf16.mxu1 %v9860_v50  ;;  %v9864_v60 = vpack.c.bf16 %v11224_v57, %v11219_v54  ;;  %v11233_v63 = vld [vmem:[%s11002_s15 + $0xf8] sm:$0xff]  ;;  %v11309_v50 = vpack.c.bf16 %v11007_v22, %v10997_v21 }
  0x33   : > { %411 = vst [vmem:[%s11057_s10 + $0x98] sm:$0xff] %v10997_v21  ;;  %412 = vst [vmem:[%s11057_s10 + $0xa0] sm:$0xff] %v11007_v22  ;;  %v11236_v1 = vld [vmem:[%s11002_s15 + $0x108] sm:$0xff] }
  0x34   : > { %413 = vst [vmem:[%s11057_s10 + $0xa8] sm:$0xff] %v11012_v23  ;;  %414 = vst [vmem:[%s11057_s10 + $0xb0] sm:$0xff] %v11017_v24  ;;  %v9868_v13 = vpack.c.bf16 %v11236_v1, %v11233_v63  ;;  %v11249_v33 = vld [vmem:[%s11002_s15 + $0x118] sm:$0x1]  ;;  %9855 = vmatpush1.bf16.msra.mxu0 %v9854_v14 }
  0x35   : > { %399 = vst [vmem:[%s11057_s10 + $0x38] sm:$0xff] %v11114_v26  ;;  %415 = vst [vmem:[%s11057_s10 + $0xb8] sm:$0xff] %v11062_v25  ;;  %9863 = vmatpush1.bf16.msra.mxu1 %v9862_v55  ;;  %v11259_v34 = vld [vmem:[%s11057_s10] sm:$0xff]  ;;  %8782 = vmatprep.subr.msk.mxu0 %vm500_vm2, %v443_v18  ;;  %v11269_v39 = vld [vmem:[%s11002_s15 + $0x110] sm:$0x1]  ;;  %v11327_v55 = vpack.c.bf16 %v11017_v24, %v11012_v23 }
  0x36   : > { %400 = vst [vmem:[%s11057_s10 + $0x40] sm:$0xff] %v11121_v27  ;;  %401 = vst [vmem:[%s11057_s10 + $0x48] sm:$0xff] %v11126_v28  ;;  %9865 = vmatprep.subr.bf16.mxu1 %v9864_v60  ;;  %v11262_v36 = vld [vmem:[%s11057_s10 + $0x8] sm:$0xff]  ;;  %v11287_v44 = vld [vmem:[%s11057_s10 + $0x10] sm:$0xff]  ;;  %v11345_v60 = vpack.c.bf16 %v11114_v26, %v11062_v25 }
  0x37   : > { %15155 = vst [vmem:[#allocation13_spill] sm:$0xff] %v11151_v29  ;;  %15156 = vst [vmem:[#allocation14_spill] sm:$0xff] %v11156_v30  ;;  %v11279_v42 = vpack.c.bf16 %v11262_v36, %v11259_v34  ;;  %v11290_v46 = vld [vmem:[%s11057_s10 + $0x18] sm:$0xff]  ;;  %v11312_v51 = vld [vmem:[%s11057_s10 + $0x20] sm:$0xff] }
  0x38   : > { %15157 = vst [vmem:[#allocation15_spill] sm:$0xff] %v11161_v31  ;;  %416 = vst [vmem:[%s11057_s10 + $0xc0] sm:$0xff] %v11114_v26  ;;  %8783 = vmatpush1.msk.msra.mxu0 %vm500_vm2, %v442_v38  ;;  %v11303_v49 = vpack.c.bf16 %v11290_v46, %v11287_v44  ;;  %v11315_v52 = vld [vmem:[%s11057_s10 + $0x28] sm:$0xff]  ;;  %v11330_v56 = vld [vmem:[%s11057_s10 + $0x30] sm:$0xff]  ;;  %v11399_v38 = vpack.c.bf16 %v11176_v32, %v11161_v31 }
  0x39   : > { %417 = vst [vmem:[%s11057_s10 + $0xc8] sm:$0xff] %v11121_v27  ;;  %418 = vst [vmem:[%s11057_s10 + $0xd0] sm:$0xff] %v11126_v28  ;;  %9867 = vmatpush1.bf16.msra.mxu1 %v9866_v5  ;;  %8784 = vmatmul.mubr.msk.f32.vlgmr.msra.gmra.mrb[0].mxu0 %vm496_vm3, %v11272_v40  ;;  %v11321_v53 = vpack.c.bf16 %v11315_v52, %v11312_v51  ;;  %v11363_v5 = vpack.c.bf16 %v11126_v28, %v11121_v27 }
  0x3a   : > { %402 = vst [vmem:[%s11057_s10 + $0x50] sm:$0xff] %v11151_v29  ;;  %403 = vst [vmem:[%s11057_s10 + $0x58] sm:$0xff] %v11156_v30  ;;  %9869 = vmatprep.subr.bf16.mxu1 %v9868_v13  ;;  %9872 = vmatprep.subr.bf16.mxu0 %v14972_v48  ;;  %v11381_v13 = vpack.c.bf16 %v11156_v30, %v11151_v29 }
  0x3b   : > { %15158 = vst [vmem:[#allocation16_spill] sm:$0xff] %v11176_v32  ;;  %404 = vst [vmem:[%s11057_s10 + $0x60] sm:$0xff] %v11161_v31  ;;  %9874 = vmatpush1.bf16.msra.mxu0 %v11279_v42 }
  0x3c   : > { %419 = vst [vmem:[%s11057_s10 + $0xd8] sm:$0xff] %v11151_v29  ;;  %420 = vst [vmem:[%s11057_s10 + $0xe0] sm:$0xff] %v11156_v30  ;;  %9875 = vmatprep.subr.bf16.mxu0 %v14972_v48  ;;  %v11333_v58 = vld [vmem:[%s11057_s10 + $0x38] sm:$0xff]  ;;  %v15176_v30 = vmov 0.0|0.0  }
  0x3d   : > { %405 = vst [vmem:[%s11057_s10 + $0x68] sm:$0xff] %v11176_v32  ;;  %421 = vst [vmem:[%s11057_s10 + $0xe8] sm:$0xff] %v11161_v31  ;;  %9871 = vmatpush1.bf16.msra.mxu1 %v9870_v17  ;;  %v11339_v59 = vpack.c.bf16 %v11333_v58, %v11330_v56  ;;  %v11348_v61 = vld [vmem:[%s11057_s10 + $0x40] sm:$0xff]  ;;  %v11351_v62 = vld [vmem:[%s11057_s10 + $0x48] sm:$0xff] }
  0x3e   : > { %422 = vst [vmem:[%s11057_s10 + $0xf0] sm:$0xff] %v11176_v32  ;;  %15159 = vst [vmem:[#allocation17_spill] sm:$0xff] %v11193_v35  ;;  %8785 = vmatprep.subr.msk.mxu1 %vm500_vm2, %v11249_v33  ;;  %v11357_v2 = vpack.c.bf16 %v11351_v62, %v11348_v61 }
  0x3f   : > { %15160 = vst [vmem:[#allocation18_spill] sm:$0xff] %v11196_v37  ;;  %15161 = vst [vmem:[#allocation19_spill] sm:$0xff] %v11207_v45  ;;  %9877 = vmatpush1.bf16.msra.mxu0 %v11303_v49 }
  0x40   : > { %15162 = vst [vmem:[#allocation20_spill] sm:$0xff] %v11210_v47  ;;  %15163 = vst [vmem:[#allocation21_spill] sm:$0xff] %v11219_v54  ;;  %9878 = vmatprep.subr.bf16.mxu0 %v14972_v48 }
  0x41   : > { %15164 = vst [vmem:[#allocation22_spill] sm:$0xff] %v11224_v57  ;;  %15165 = vst [vmem:[#allocation23_spill] sm:$0xff] %v11233_v63  ;;  %8786 = vmatpush1.msk.msra.mxu1 %vm500_vm2, %v11269_v39  ;;  %v11366_v6 = vld [vmem:[%s11057_s10 + $0x50] sm:$0xff]  ;;  %v11369_v9 = vld [vmem:[%s11057_s10 + $0x58] sm:$0xff] }
  0x42   : > { %15166 = vst [vmem:[#allocation24_spill] sm:$0xff] %v11236_v1  ;;  %15167 = vst [vmem:[#allocation25_spill] sm:$0xff] %v11249_v33  ;;  %8787 = vmatmul.mubr.msk.f32.vlgmr.msra.gmra.mrb[0].mxu1 %vm496_vm3, %v11275_v41  ;;  %9896 = vmatprep.subr.bf16.mxu1 %v14972_v48  ;;  %v11375_v10 = vpack.c.bf16 %v11369_v9, %v11366_v6  ;;  %v11384_v14 = vld [vmem:[%s11057_s10 + $0x60] sm:$0xff]  ;;  %v11414_v33 = vld [vmem:[%s14965_s3 + $0x78] sm:$0xff] }
  0x43   : > { %15168 = vst [vmem:[#allocation26_spill] sm:$0xff] %v11269_v39  ;;  %9898 = vmatpush1.bf16.msra.mxu1 %v11284_v43  ;;  %9880 = vmatpush1.bf16.msra.mxu0 %v11321_v53  ;;  %15169 = vst [vmem:[#allocation27_spill] sm:$0xff] %v11409_v0  ;;  %v11441_v63 = vpack.c.bf16 %v11414_v33, %v11409_v0 }
  0x44   : > { %9899 = vmatprep.subr.bf16.mxu1 %v14972_v48  ;;  %9881 = vmatprep.subr.bf16.mxu0 %v14972_v48  ;;  %v11387_v17 = vld [vmem:[%s11057_s10 + $0x68] sm:$0xff]  ;;  %15170 = vst [vmem:[#allocation28_spill] sm:$0xff] %v11414_v33  ;;  %406 = vst [vmem:[%s11057_s10 + $0x70] sm:$0xff] %v11409_v0 }
  0x45   : > { %v11393_v18 = vpack.c.bf16 %v11387_v17, %v11384_v14  ;;  %407 = vst [vmem:[%s11057_s10 + $0x78] sm:$0xff] %v11414_v33  ;;  %423 = vst [vmem:[%s11057_s10 + $0xf8] sm:$0xff] %v11409_v0 }
  0x46   : > { %424 = vst [vmem:[%s11057_s10 + $0x100] sm:$0xff] %v11414_v33 }
  0x47   : > { %9901 = vmatpush1.bf16.msra.mxu1 %v11309_v50  ;;  %9883 = vmatpush1.bf16.msra.mxu0 %v11339_v59 }
  0x48   : > { %9902 = vmatprep.subr.bf16.mxu1 %v14972_v48  ;;  %9884 = vmatprep.subr.bf16.mxu0 %v14972_v48 }
  0x4b   : > { %9904 = vmatpush1.bf16.msra.mxu1 %v11327_v55  ;;  %9886 = vmatpush1.bf16.msra.mxu0 %v11357_v2  ;;  %v11430_v39 = vld [vmem:[%s11057_s10 + $0x70] sm:$0xff] }
  0x4c   : > { %9905 = vmatprep.subr.bf16.mxu1 %v14972_v48  ;;  %9887 = vmatprep.subr.bf16.mxu0 %v14972_v48  ;;  %v11433_v1 = vld [vmem:[%s11057_s10 + $0x78] sm:$0xff] }
  0x4d   : > { %v11437_v16 = vpack.c.bf16 %v11433_v1, %v11430_v39 }
  0x4f   : > { %9907 = vmatpush1.bf16.msra.mxu1 %v11345_v60  ;;  %9889 = vmatpush1.bf16.msra.mxu0 %v11375_v10 }
  0x50   : > { %9908 = vmatprep.subr.bf16.mxu1 %v14972_v48  ;;  %9890 = vmatprep.subr.bf16.mxu0 %v14972_v48 }
  0x53   : > { %9910 = vmatpush1.bf16.msra.mxu1 %v11363_v5  ;;  %9892 = vmatpush1.bf16.msra.mxu0 %v11393_v18 }
  0x54   : > { %9911 = vmatprep.subr.bf16.mxu1 %v14972_v48  ;;  %9893 = vmatprep.subr.bf16.mxu0 %v14972_v48 }
  0x57   : > { %9913 = vmatpush1.bf16.msra.mxu1 %v11381_v13  ;;  %9895 = vmatpush1.bf16.msra.mxu0 %v11437_v16 }
  0x58   : > { %9914 = vmatprep.subr.bf16.mxu1 %v14972_v48  ;;  %704 = vmatprep.subr.mxu0 %v15171_v15 }
  0x5b   : > { %9916 = vmatpush1.bf16.msra.mxu1 %v11399_v38 }
  0x5c   : > { %9917 = vmatprep.subr.bf16.mxu1 %v14972_v48  ;;  %v391_v48 = vld [vmem:[%s14965_s3 + $0x80] sm:$0x1] }
  0x5d   : > { %408 = vst [vmem:[%s11057_s10 + $0x80] sm:$0x1] %v391_v48  ;;  %425 = vst [vmem:[%s11057_s10 + $0x108] sm:$0x1] %v391_v48 }
  0x5f   : > { %9919 = vmatpush1.bf16.msra.mxu1 %v11441_v63 }
  0x60   : > { %780 = vmatprep.subr.mxu1 %v15171_v15 }
  0x64   : > { %v11448_v48 = vld [vmem:[%s11057_s10 + $0x80] sm:$0x1]  ;;  %v11451_v57 = vld [vmem:[%s11057_s10 + $0x108] sm:$0x1] }
  0x65   : > { %8788 = vmatpush1.msk.msra.mxu0 %vm500_vm2, %v11448_v48  ;;  %8791 = vmatpush1.msk.msra.mxu1 %vm500_vm2, %v11451_v57 }
  0x66   : > { %9310 = vmatprep.subr.mxu0 %v15171_v15  ;;  %9363 = vmatprep.subr.mxu1 %v15171_v15 }
 0x10c   : > { %v11459_v12 = vpop.f32.mrb[0].mxu0 }
 0x10d   : > { %15172 = vst [vmem:[#allocation29_spill] sm:$0xff] %v11459_v12  ;;  %v11463_v11 = vpop.f32.mrb[1].mxu0  ;;  %vm658_vm7 = vcmp.gt.f32.partialorder %v11459_v12, 0.0 }
 0x10e   : > { %15174 = vst [vmem:[#allocation31_spill] sm:$0xff] %v11463_v11  ;;  %vm659_vm4 = vcmp.gt.f32.partialorder %v11463_v11, 0.0  ;;  %v662_v3 = vsel %vm658_vm7, %v11459_v12, 0.0 }
 0x10f   : > { %v663_v8 = vsel %vm659_vm4, %v11463_v11, 0.0 }
 0x110   : > { %8789 = vmatprep.mubr.msk.f32.mxu0 %vm338_vm0, %v663_v8 }
 0x111   : > { %8790 = vmatmul.mubr.msk.f32.vlgmr.msra.gmra.mrb[2].mxu0 %vm658_vm7, %v11459_v12 }
 0x112   : > { %9312 = vmatprep.mubr.msk.f32.mxu0 %vm10820_vm8, %v15171_v15 }
 0x115   : > { %v11461_v54 = vpop.f32.mrb[0].mxu1 }
 0x116   : > { %15173 = vst [vmem:[#allocation30_spill] sm:$0xff] %v11461_v54  ;;  %v11465_v47 = vpop.f32.mrb[1].mxu1  ;;  %vm660_vm6 = vcmp.gt.f32.partialorder %v11461_v54, 0.0 }
 0x117   : > { %15175 = vst [vmem:[#allocation32_spill] sm:$0xff] %v11465_v47  ;;  %vm661_vm5 = vcmp.gt.f32.partialorder %v11465_v47, 0.0 }
 0x118   : > { %v665_v45 = vsel %vm661_vm5, %v11465_v47, 0.0 }
 0x119   : > { %8792 = vmatprep.mubr.msk.f32.mxu1 %vm338_vm0, %v665_v45 }
 0x11a   : > { %8793 = vmatmul.mubr.msk.f32.vlgmr.msra.gmra.mrb[2].mxu1 %vm660_vm6, %v11461_v54 }
 0x11b   : > { %9365 = vmatprep.mubr.msk.f32.mxu1 %vm10820_vm8, %v15171_v15 }
 0x1e4   : > { %v738_v7 = vpop.f32.mrb[2].mxu0 }
 0x1e5   : > { %818 = vmax.xlane.f32.xlu0 %v738_v7  ;;  %v740_v4 = vpop.f32.mrb[3].mxu0 }
 0x1ed   : > { %v814_v37 = vpop.f32.mrb[2].mxu1 }
 0x1ee   : > { %v816_v35 = vpop.f32.mrb[3].mxu1  ;;  %820 = vmax.xlane.f32.xlu0 %v814_v37 }
 0x21b   : > { %840 = vxpose.xlu0.b32.start.end [1/1] (short) %v662_v3, 128 }
 0x258   : > { %872 = vxpose.xlu0.b32.start.end [1/1] (short) (narrow) %v663_v8, 8 }
 0x25c   : > { %1521 = vxpose.xlu0.b32.start.end [1/1] (short) (narrow) %v11272_v40, 72 }
 0x272   : > { %v819_v47 = vpop.xlane.xlu0 %818 }
 0x273   : > { %v822_v33 = vsub.f32 %v738_v7, %v819_v47 }
 0x275   : > { %v824_v0 = vmul.f32 1.442695, %v822_v33  ;;  %v308_v33 = vld [vmem:[%s11502_s17] sm:$0xff] }
 0x277   : > { %10606 = vpow2.f32 %v824_v0  ;;  %v664_v0 = vsel %vm660_vm6, %v11461_v54, 0.0  ;;  %v309_v54 = vld [vmem:[%s11502_s17 + $0x8] sm:$0xff] }
 0x27b   : > { %v821_v32 = vpop.xlane.xlu0 %820 }
 0x27c   : > { %v823_v11 = vsub.f32 %v814_v37, %v821_v32 }
 0x27d   : > { %1699 = vxpose.xlu0.b32.start.end [1/1] (short) (narrow) %v11275_v41, 72 }
 0x27e   : > { %v826_v31 = vmul.f32 1.442695, %v823_v11 }
 0x280   : > { %10608 = vpow2.f32 %v826_v31 }
 0x281   : > { %v10607_v4 = vpop.eup %10606 }
 0x282   : > { %828 = vadd.xlane.f32.xlu1 %v10607_v4 }
 0x28a   : > { %v10609_v35 = vpop.eup %10608 }
 0x28b   : > { %830 = vadd.xlane.f32.xlu1 %v10609_v35 }
 0x29b   : > { %v856_v3 = vpop.trf.xlu0 }
 0x29f   : > { %v857_v7 = vpop.trf.xlu0 }
 0x2a3   : > { %v858_v8 = vpop.trf.xlu0 }
 0x2a7   : > { %v859_v31 = vpop.trf.xlu0 }
 0x2ab   : > { %v860_v37 = vpop.trf.xlu0 }
 0x2af   : > { %v861_v41 = vpop.trf.xlu0 }
 0x2be   : > { %1106 = vxpose.xlu1.b32.start.end [1/1] (short) %v664_v0, 128 }
 0x2fb   : > { %1138 = vxpose.xlu1.b32.start.end [1/1] (short) (narrow) %v665_v45, 8 }
 0x30f   : > { %v829_v11 = vpop.xlane.xlu1 %828 }
 0x310   : > { %10610 = vrcp.f32 %v829_v11 }
 0x318   : > { %v831_v32 = vpop.xlane.xlu1 %830 }
 0x319   : > { %10612 = vrcp.f32 %v831_v32 }
 0x31a   : > { %v10611_v47 = vpop.eup %10610 }
 0x31b   : > { %v834_v45 = vmul.f32 %v10611_v47, %v10607_v4  ;;  %v862_v4 = vpop.trf.xlu0 }
 0x31d   : > { %v836_v40 = vsub.f32 %v834_v45, %v308_v33 }
 0x31f   : > { %v11506_v11 = vmul.f32 0.125, %v836_v40 }
 0x321   : > { %9311 = vmatpush3.msra.mxu0 %v11506_v11 }
 0x322   : > { %9313 = vmatmul.mubr.msk.f32.vlgmr.msra.gmra.mrb[4].mxu0 %vm904_vm9, %v856_v3  ;;  %9920 = vmatprep.subr.bf16.mxu0 %v15176_v30 }
 0x323   : > { %v10613_v0 = vpop.eup %10612  ;;  %9315 = vmatprep.mubr.msk.f32.mxu0 %vm10820_vm8, %v15171_v15 }
 0x324   : > { %v835_v12 = vmul.f32 %v10613_v0, %v10609_v35 }
 0x326   : > { %v837_v32 = vsub.f32 %v835_v12, %v309_v54  ;;  %9316 = vmatmul.mubr.msk.f32.gmra.mrb[6].mxu0 %vm904_vm9, %v857_v7  ;;  %v863_v12 = vpop.trf.xlu0 }
 0x327   : > { %9318 = vmatprep.mubr.msk.f32.mxu0 %vm10820_vm8, %v15171_v15 }
 0x328   : > { %v11511_v29 = vmul.f32 0.125, %v837_v32  ;;  %9922 = vmatpush1.bf16.xpose.msra.mxu0 %v11279_v42 }
 0x329   : > { %9923 = vmatprep.subr.bf16.mxu0 %v15176_v30 }
 0x32a   : > { %9364 = vmatpush3.msra.mxu1 %v11511_v29  ;;  %9319 = vmatmul.mubr.msk.f32.gmra.mrb[8].mxu0 %vm904_vm9, %v858_v8  ;;  %v864_v54 = vpop.trf.xlu0 }
 0x32b   : > { %9944 = vmatprep.subr.bf16.mxu1 %v15176_v30  ;;  %9321 = vmatprep.mubr.msk.f32.mxu0 %vm10820_vm8, %v15171_v15 }
 0x32e   : > { %9322 = vmatmul.mubr.msk.f32.gmra.mrb[10].mxu0 %vm904_vm9, %v859_v31  ;;  %v865_v42 = vpop.trf.xlu0 }
 0x32f   : > { %9324 = vmatprep.mubr.msk.f32.mxu0 %vm10820_vm8, %v15171_v15 }
 0x330   : > { %9925 = vmatpush1.bf16.xpose.msra.mxu0 %v11303_v49 }
 0x331   : > { %9926 = vmatprep.subr.bf16.mxu0 %v15176_v30 }
 0x332   : > { %9325 = vmatmul.mubr.msk.f32.gmra.mrb[12].mxu0 %vm904_vm9, %v860_v37  ;;  %v866_v49 = vpop.trf.xlu0 }
 0x333   : > { %9327 = vmatprep.mubr.msk.f32.mxu0 %vm10820_vm8, %v15171_v15 }
 0x336   : > { %9328 = vmatmul.mubr.msk.f32.gmra.mrb[14].mxu0 %vm904_vm9, %v861_v41 }
 0x337   : > { %9330 = vmatprep.mubr.msk.f32.mxu0 %vm10820_vm8, %v15171_v15 }
 0x338   : > { %9928 = vmatpush1.bf16.xpose.msra.mxu0 %v11321_v53  ;;  %v867_v53 = vpop.trf.xlu0 }
 0x339   : > { %9929 = vmatprep.subr.bf16.mxu0 %v15176_v30 }
 0x33a   : > { %9331 = vmatmul.mubr.msk.f32.gmra.mrb[16].mxu0 %vm904_vm9, %v862_v4 }
 0x33b   : > { %9333 = vmatprep.mubr.msk.f32.mxu0 %vm10820_vm8, %v15171_v15 }
 0x33e   : > { %v1122_v35 = vpop.trf.xlu1  ;;  %9334 = vmatmul.mubr.msk.f32.gmra.mrb[18].mxu0 %vm904_vm9, %v863_v12 }
 0x33f   : > { %9366 = vmatmul.mubr.msk.f32.vlgmr.msra.gmra.mrb[4].mxu1 %vm904_vm9, %v1122_v35  ;;  %9336 = vmatprep.mubr.msk.f32.mxu0 %vm10820_vm8, %v15171_v15 }
 0x340   : > { %9946 = vmatpush1.bf16.xpose.msra.mxu1 %v11284_v43  ;;  %9368 = vmatprep.mubr.msk.f32.mxu1 %vm10820_vm8, %v15171_v15 }
 0x341   : > { %9947 = vmatprep.subr.bf16.mxu1 %v15176_v30  ;;  %9931 = vmatpush1.bf16.xpose.msra.mxu0 %v11339_v59 }
 0x342   : > { %v1123_v3 = vpop.trf.xlu1  ;;  %9932 = vmatprep.subr.bf16.mxu0 %v15176_v30  ;;  %9337 = vmatmul.mubr.msk.f32.gmra.mrb[20].mxu0 %vm904_vm9, %v864_v54 }
 0x343   : > { %9369 = vmatmul.mubr.msk.f32.gmra.mrb[6].mxu1 %vm904_vm9, %v1123_v3  ;;  %9339 = vmatprep.mubr.msk.f32.mxu0 %vm10820_vm8, %v15171_v15 }
 0x344   : > { %9371 = vmatprep.mubr.msk.f32.mxu1 %vm10820_vm8, %v15171_v15 }
 0x346   : > { %v1124_v43 = vpop.trf.xlu1  ;;  %9340 = vmatmul.mubr.msk.f32.gmra.mrb[22].mxu0 %vm904_vm9, %v865_v42 }
 0x347   : > { %9372 = vmatmul.mubr.msk.f32.gmra.mrb[8].mxu1 %vm904_vm9, %v1124_v43  ;;  %9342 = vmatprep.mubr.msk.f32.mxu0 %vm10820_vm8, %v15171_v15 }
 0x348   : > { %9949 = vmatpush1.bf16.xpose.msra.mxu1 %v11309_v50  ;;  %9374 = vmatprep.mubr.msk.f32.mxu1 %vm10820_vm8, %v15171_v15  ;;  %v868_v50 = vpop.trf.xlu0 }
 0x349   : > { %9950 = vmatprep.subr.bf16.mxu1 %v15176_v30  ;;  %9934 = vmatpush1.bf16.xpose.msra.mxu0 %v11357_v2 }
 0x34a   : > { %v1125_v7 = vpop.trf.xlu1  ;;  %9935 = vmatprep.subr.bf16.mxu0 %v15176_v30  ;;  %9343 = vmatmul.mubr.msk.f32.gmra.mrb[24].mxu0 %vm904_vm9, %v866_v49 }
 0x34b   : > { %9375 = vmatmul.mubr.msk.f32.gmra.mrb[10].mxu1 %vm904_vm9, %v1125_v7  ;;  %9345 = vmatprep.mubr.msk.f32.mxu0 %vm10820_vm8, %v15171_v15 }
 0x34c   : > { %9377 = vmatprep.mubr.msk.f32.mxu1 %vm10820_vm8, %v15171_v15  ;;  %v869_v31 = vpop.trf.xlu0 }
 0x34e   : > { %v1126_v59 = vpop.trf.xlu1  ;;  %9346 = vmatmul.mubr.msk.f32.gmra.mrb[26].mxu0 %vm904_vm9, %v867_v53 }
 0x34f   : > { %9378 = vmatmul.mubr.msk.f32.gmra.mrb[12].mxu1 %vm904_vm9, %v1126_v59  ;;  %9348 = vmatprep.mubr.msk.f32.mxu0 %vm10820_vm8, %v15171_v15 }
 0x350   : > { %9952 = vmatpush1.bf16.xpose.msra.mxu1 %v11327_v55  ;;  %9380 = vmatprep.mubr.msk.f32.mxu1 %vm10820_vm8, %v15171_v15  ;;  %v870_v2 = vpop.trf.xlu0 }
 0x351   : > { %9953 = vmatprep.subr.bf16.mxu1 %v15176_v30  ;;  %9937 = vmatpush1.bf16.xpose.msra.mxu0 %v11375_v10 }
 0x352   : > { %v1127_v8 = vpop.trf.xlu1  ;;  %9938 = vmatprep.subr.bf16.mxu0 %v15176_v30  ;;  %9349 = vmatmul.mubr.msk.f32.gmra.mrb[28].mxu0 %vm904_vm9, %v868_v50 }
 0x353   : > { %9381 = vmatmul.mubr.msk.f32.gmra.mrb[14].mxu1 %vm904_vm9, %v1127_v8  ;;  %9351 = vmatprep.mubr.msk.f32.mxu0 %vm10820_vm8, %v15171_v15 }
 0x354   : > { %9383 = vmatprep.mubr.msk.f32.mxu1 %vm10820_vm8, %v15171_v15  ;;  %v871_v10 = vpop.trf.xlu0 }
 0x356   : > { %v1128_v55 = vpop.trf.xlu1  ;;  %9352 = vmatmul.mubr.msk.f32.gmra.mrb[30].mxu0 %vm904_vm9, %v869_v31 }
 0x357   : > { %9384 = vmatmul.mubr.msk.f32.gmra.mrb[16].mxu1 %vm904_vm9, %v1128_v55  ;;  %9354 = vmatprep.mubr.msk.f32.mxu0 %vm10820_vm8, %v15171_v15 }
 0x358   : > { %9955 = vmatpush1.bf16.xpose.msra.mxu1 %v11345_v60  ;;  %9386 = vmatprep.mubr.msk.f32.mxu1 %vm10820_vm8, %v15171_v15 }
 0x359   : > { %9956 = vmatprep.subr.bf16.mxu1 %v15176_v30  ;;  %9940 = vmatpush1.bf16.xpose.msra.mxu0 %v11393_v18 }
 0x35a   : > { %v1129_v37 = vpop.trf.xlu1  ;;  %9941 = vmatprep.subr.bf16.mxu0 %v15176_v30  ;;  %9355 = vmatmul.mubr.msk.f32.gmra.mrb[32].mxu0 %vm904_vm9, %v870_v2 }
 0x35b   : > { %9387 = vmatmul.mubr.msk.f32.gmra.mrb[18].mxu1 %vm904_vm9, %v1129_v37  ;;  %9357 = vmatprep.mubr.msk.f32.mxu0 %vm10820_vm8, %v15171_v15 }
 0x35c   : > { %9389 = vmatprep.mubr.msk.f32.mxu1 %vm10820_vm8, %v15171_v15 }
 0x35e   : > { %v1130_v60 = vpop.trf.xlu1  ;;  %9358 = vmatmul.mubr.msk.f32.gmra.mrb[34].mxu0 %vm904_vm9, %v871_v10 }
 0x35f   : > { %9390 = vmatmul.mubr.msk.f32.gmra.mrb[20].mxu1 %vm904_vm9, %v1130_v60  ;;  %9360 = vmatprep.mubr.msk.f32.mxu0 %vm10820_vm8, %v15171_v15 }
 0x360   : > { %9958 = vmatpush1.bf16.xpose.msra.mxu1 %v11363_v5  ;;  %9392 = vmatprep.mubr.msk.f32.mxu1 %vm10820_vm8, %v15171_v15  ;;  %v888_v5 = vpop.trf.xlu0 }
 0x361   : > { %9959 = vmatprep.subr.bf16.mxu1 %v15176_v30  ;;  %9943 = vmatpush1.bf16.xpose.msra.mxu0 %v11437_v16 }
 0x362   : > { %v1131_v47 = vpop.trf.xlu1  ;;  %1403 = vmatprep.subr.mxu0 %v15171_v15  ;;  %9361 = vmatmul.mubr.msk.f32.gmra.mrb[36].mxu0 %vm904_vm9, %v888_v5 }
 0x363   : > { %9393 = vmatmul.mubr.msk.f32.gmra.mrb[22].mxu1 %vm904_vm9, %v1131_v47  ;;  %1435 = vmatprep.mubr.f32.mxu0 %v15171_v15 }
 0x364   : > { %9395 = vmatprep.mubr.msk.f32.mxu1 %vm10820_vm8, %v15171_v15  ;;  %v11660_v8 = vpop.trf.xlu0 }
 0x366   : > { %v1132_v18 = vpop.trf.xlu1 }
 0x367   : > { %9396 = vmatmul.mubr.msk.f32.gmra.mrb[24].mxu1 %vm904_vm9, %v1132_v18 }
 0x368   : > { %9961 = vmatpush1.bf16.xpose.msra.mxu1 %v11381_v13  ;;  %9398 = vmatprep.mubr.msk.f32.mxu1 %vm10820_vm8, %v15171_v15  ;;  %v11665_v37 = vpop.trf.xlu0 }
 0x369   : > { %9962 = vmatprep.subr.bf16.mxu1 %v15176_v30  ;;  %1404 = vmatpush1.xpose.msra.mxu0 %v11448_v48 }
 0x36a   : > { %v1133_v33 = vpop.trf.xlu1 }
 0x36b   : > { %9399 = vmatmul.mubr.msk.f32.gmra.mrb[26].mxu1 %vm904_vm9, %v1133_v33 }
 0x36c   : > { %9401 = vmatprep.mubr.msk.f32.mxu1 %vm10820_vm8, %v15171_v15  ;;  %1436 = vmatmul.mubr.f32.vlgmr.msra.gmra.mrb[38].mxu0 %v11506_v11 }
 0x36d   : > { %1644 = vmatprep.mubr.f32.mxu0 %v15171_v15 }
 0x36e   : > { %v1134_v16 = vpop.trf.xlu1 }
 0x36f   : > { %9402 = vmatmul.mubr.msk.f32.gmra.mrb[28].mxu1 %vm904_vm9, %v1134_v16 }
 0x370   : > { %9964 = vmatpush1.bf16.xpose.msra.mxu1 %v11399_v38  ;;  %9404 = vmatprep.mubr.msk.f32.mxu1 %vm10820_vm8, %v15171_v15 }
 0x371   : > { %9965 = vmatprep.subr.bf16.mxu1 %v15176_v30 }
 0x372   : > { %v1135_v13 = vpop.trf.xlu1 }
 0x373   : > { %9405 = vmatmul.mubr.msk.f32.gmra.mrb[30].mxu1 %vm904_vm9, %v1135_v13 }
 0x374   : > { %9407 = vmatprep.mubr.msk.f32.mxu1 %vm10820_vm8, %v15171_v15 }
 0x376   : > { %v1136_v45 = vpop.trf.xlu1 }
 0x377   : > { %9408 = vmatmul.mubr.msk.f32.gmra.mrb[32].mxu1 %vm904_vm9, %v1136_v45 }
 0x378   : > { %9967 = vmatpush1.bf16.xpose.msra.mxu1 %v11441_v63  ;;  %9410 = vmatprep.mubr.msk.f32.mxu1 %vm10820_vm8, %v15171_v15 }
 0x379   : > { %1474 = vmatprep.subr.mxu1 %v15171_v15 }
 0x37a   : > { %v1137_v38 = vpop.trf.xlu1 }
 0x37b   : > { %9411 = vmatmul.mubr.msk.f32.gmra.mrb[34].mxu1 %vm904_vm9, %v1137_v38 }
 0x37c   : > { %9413 = vmatprep.mubr.msk.f32.mxu1 %vm10820_vm8, %v15171_v15 }
 0x37e   : > { %v1154_v40 = vpop.trf.xlu1 }
 0x37f   : > { %9414 = vmatmul.mubr.msk.f32.gmra.mrb[36].mxu1 %vm904_vm9, %v1154_v40 }
 0x380   : > { %1475 = vmatpush1.xpose.msra.mxu1 %v11451_v57  ;;  %1506 = vmatprep.mubr.f32.mxu1 %v15171_v15 }
 0x383   : > { %1507 = vmatmul.mubr.f32.vlgmr.msra.gmra.mrb[38].mxu1 %v11511_v29 }
 0x384   : > { %1822 = vmatprep.mubr.f32.mxu1 %v15171_v15 }
 0x3f5   : > { %v1022_v63 = vpop.f32.mrb[4].mxu0 }
 0x3f6   : > { %v1985_v41 = vmul.f32 0.05, %v1022_v63  ;;  %v9314_v0 = vpop.f32.mrb[5].mxu0 }
 0x3f8   : > { %v2019_v11 = vsub.f32 %v11259_v34, %v1985_v41 }
 0x3f9   : > { %v1027_v32 = vpop.f32.mrb[6].mxu0 }
 0x3fa   : > { %2053 = vst [vmem:[%s11057_s10] sm:$0xff] %v2019_v11  ;;  %v1986_v4 = vmul.f32 0.05, %v1027_v32  ;;  %v9317_v12 = vpop.f32.mrb[7].mxu0 }
 0x3fc   : > { %v2020_v54 = vsub.f32 %v11262_v36, %v1986_v4 }
 0x3fd   : > { %v1032_v42 = vpop.f32.mrb[8].mxu0 }
 0x3fe   : > { %2054 = vst [vmem:[%s11057_s10 + $0x8] sm:$0xff] %v2020_v54  ;;  %v1987_v35 = vmul.f32 0.05, %v1032_v42  ;;  %v9320_v29 = vpop.f32.mrb[9].mxu0 }
 0x400   : > { %v2021_v49 = vsub.f32 %v11287_v44, %v1987_v35 }
 0x401   : > { %v1037_v3 = vpop.f32.mrb[10].mxu0 }
 0x402   : > { %2055 = vst [vmem:[%s11057_s10 + $0x10] sm:$0xff] %v2021_v49  ;;  %v1988_v43 = vmul.f32 0.05, %v1037_v3  ;;  %v9323_v53 = vpop.f32.mrb[11].mxu0 }
 0x404   : > { %v2022_v34 = vsub.f32 %v11290_v46, %v1988_v43 }
 0x405   : > { %v1042_v7 = vpop.f32.mrb[12].mxu0 }
 0x406   : > { %2056 = vst [vmem:[%s11057_s10 + $0x18] sm:$0xff] %v2022_v34  ;;  %v1989_v50 = vmul.f32 0.05, %v1042_v7  ;;  %v9326_v59 = vpop.f32.mrb[13].mxu0 }
 0x408   : > { %v2023_v36 = vsub.f32 %v11312_v51, %v1989_v50 }
 0x409   : > { %v1047_v31 = vpop.f32.mrb[14].mxu0 }
 0x40a   : > { %2057 = vst [vmem:[%s11057_s10 + $0x20] sm:$0xff] %v2023_v36  ;;  %v1990_v55 = vmul.f32 0.05, %v1047_v31  ;;  %v9329_v44 = vpop.f32.mrb[15].mxu0 }
 0x40c   : > { %v2024_v2 = vsub.f32 %v11315_v52, %v1990_v55 }
 0x40d   : > { %v1052_v60 = vpop.f32.mrb[16].mxu0 }
 0x40e   : > { %2058 = vst [vmem:[%s11057_s10 + $0x28] sm:$0xff] %v2024_v2  ;;  %v1991_v5 = vmul.f32 0.05, %v1052_v60  ;;  %v9332_v18 = vpop.f32.mrb[17].mxu0 }
 0x410   : > { %v2025_v33 = vsub.f32 %v11330_v56, %v1991_v5 }
 0x411   : > { %v1057_v13 = vpop.f32.mrb[18].mxu0 }
 0x412   : > { %v1287_v46 = vpop.f32.mrb[4].mxu1  ;;  %2059 = vst [vmem:[%s11057_s10 + $0x30] sm:$0xff] %v2025_v33  ;;  %v1992_v38 = vmul.f32 0.05, %v1057_v13  ;;  %v9335_v40 = vpop.f32.mrb[19].mxu0 }
 0x413   : > { %v2002_v10 = vmul.f32 0.05, %v1287_v46  ;;  %v9367_v47 = vpop.f32.mrb[5].mxu1 }
 0x414   : > { %v2026_v41 = vsub.f32 %v11333_v58, %v1992_v38 }
 0x415   : > { %v11669_v51 = vsub.f32 %v10987_v19, %v2002_v10  ;;  %v11679_v19 = vpop.trf.xlu0  ;;  %v1062_v0 = vpop.f32.mrb[20].mxu0 }
 0x416   : > { %v1292_v16 = vpop.f32.mrb[6].mxu1  ;;  %2060 = vst [vmem:[%s11057_s10 + $0x38] sm:$0xff] %v2026_v41  ;;  %v1993_v4 = vmul.f32 0.05, %v1062_v0  ;;  %v9338_v12 = vpop.f32.mrb[21].mxu0 }
 0x417   : > { %2070 = vst [vmem:[%s11057_s10 + $0x88] sm:$0xff] %v11669_v51  ;;  %v2003_v52 = vmul.f32 0.05, %v1292_v16  ;;  %v9370_v45 = vpop.f32.mrb[7].mxu1 }
 0x419   : > { %v11676_v63 = vsub.f32 %v10992_v20, %v2003_v52  ;;  %v2027_v20 = vsub.f32 %v11348_v61, %v1993_v4  ;;  %v1067_v58 = vpop.f32.mrb[22].mxu0 }
 0x41a   : > { %v1297_v56 = vpop.f32.mrb[8].mxu1  ;;  %v1994_v49 = vmul.f32 0.05, %v1067_v58  ;;  %v9341_v3 = vpop.f32.mrb[23].mxu0 }
 0x41b   : > { %2071 = vst [vmem:[%s11057_s10 + $0x90] sm:$0xff] %v11676_v63  ;;  %v2004_v11 = vmul.f32 0.05, %v1297_v56  ;;  %v9373_v32 = vpop.f32.mrb[9].mxu1  ;;  %2061 = vst [vmem:[%s11057_s10 + $0x40] sm:$0xff] %v2027_v20 }
 0x41c   : > { %v2028_v53 = vsub.f32 %v11351_v62, %v1994_v49 }
 0x41d   : > { %v11685_v54 = vsub.f32 %v10997_v21, %v2004_v11  ;;  %v11695_v21 = vpop.trf.xlu0  ;;  %v1072_v34 = vpop.f32.mrb[24].mxu0 }
 0x41e   : > { %v1302_v42 = vpop.f32.mrb[10].mxu1  ;;  %2062 = vst [vmem:[%s11057_s10 + $0x48] sm:$0xff] %v2028_v53  ;;  %v1995_v59 = vmul.f32 0.05, %v1072_v34  ;;  %v9344_v36 = vpop.f32.mrb[25].mxu0 }
 0x41f   : > { %2072 = vst [vmem:[%s11057_s10 + $0x98] sm:$0xff] %v11685_v54  ;;  %v2005_v35 = vmul.f32 0.05, %v1302_v42  ;;  %v9376_v29 = vpop.f32.mrb[11].mxu1 }
 0x421   : > { %v11692_v43 = vsub.f32 %v11007_v22, %v2005_v35  ;;  %v2029_v22 = vsub.f32 %v11366_v6, %v1995_v59  ;;  %v1077_v62 = vpop.f32.mrb[26].mxu0 }
 0x422   : > { %v1307_v61 = vpop.f32.mrb[12].mxu1  ;;  %v1996_v46 = vmul.f32 0.05, %v1077_v62  ;;  %v9347_v60 = vpop.f32.mrb[27].mxu0 }
 0x423   : > { %2073 = vst [vmem:[%s11057_s10 + $0xa0] sm:$0xff] %v11692_v43  ;;  %v2006_v7 = vmul.f32 0.05, %v1307_v61  ;;  %v9379_v50 = vpop.f32.mrb[13].mxu1  ;;  %2063 = vst [vmem:[%s11057_s10 + $0x50] sm:$0xff] %v2029_v22  ;;  %v15186_v60 = vld [vmem:[#allocation14_spill] sm:$0xff] }
 0x424   : > { %v2030_v47 = vsub.f32 %v11369_v9, %v1996_v46 }
 0x425   : > { %v11701_v31 = vsub.f32 %v11012_v23, %v2006_v7  ;;  %v11711_v23 = vpop.trf.xlu0  ;;  %v1082_v5 = vpop.f32.mrb[28].mxu0 }
 0x426   : > { %v1312_v55 = vpop.f32.mrb[14].mxu1  ;;  %15177 = vst [vmem:[#allocation33_spill] sm:$0xff] %v11711_v23  ;;  %2064 = vst [vmem:[%s11057_s10 + $0x58] sm:$0xff] %v2030_v47  ;;  %v1997_v16 = vmul.f32 0.05, %v1082_v5  ;;  %v9350_v13 = vpop.f32.mrb[29].mxu0 }
 0x427   : > { %2074 = vst [vmem:[%s11057_s10 + $0xa8] sm:$0xff] %v11701_v31  ;;  %v2007_v44 = vmul.f32 0.05, %v1312_v55  ;;  %v9382_v2 = vpop.f32.mrb[15].mxu1  ;;  %v15183_v55 = vld [vmem:[#allocation13_spill] sm:$0xff]  ;;  %v15189_v13 = vld [vmem:[#allocation15_spill] sm:$0xff] }
 0x429   : > { %v11708_v10 = vsub.f32 %v11017_v24, %v2007_v44  ;;  %v2031_v24 = vsub.f32 %v11384_v14, %v1997_v16  ;;  %v1087_v9 = vpop.f32.mrb[30].mxu0 }
 0x42a   : > { %v1317_v6 = vpop.f32.mrb[16].mxu1  ;;  %v1998_v41 = vmul.f32 0.05, %v1087_v9  ;;  %v9353_v56 = vpop.f32.mrb[31].mxu0 }
 0x42b   : > { %2075 = vst [vmem:[%s11057_s10 + $0xb0] sm:$0xff] %v11708_v10  ;;  %v2008_v18 = vmul.f32 0.05, %v1317_v6  ;;  %v9385_v33 = vpop.f32.mrb[17].mxu1  ;;  %2065 = vst [vmem:[%s11057_s10 + $0x60] sm:$0xff] %v2031_v24 }
 0x42c   : > { %v2032_v11 = vsub.f32 %v11387_v17, %v1998_v41 }
 0x42d   : > { %v11717_v52 = vsub.f32 %v11062_v25, %v2008_v18  ;;  %v11727_v25 = vpop.trf.xlu0  ;;  %v1092_v32 = vpop.f32.mrb[32].mxu0 }
 0x42e   : > { %v1322_v45 = vpop.f32.mrb[18].mxu1  ;;  %15179 = vst [vmem:[#allocation35_spill] sm:$0xff] %v11727_v25  ;;  %2066 = vst [vmem:[%s11057_s10 + $0x68] sm:$0xff] %v2032_v11  ;;  %v1999_v20 = vmul.f32 0.05, %v1092_v32  ;;  %v9356_v42 = vpop.f32.mrb[33].mxu0 }
 0x42f   : > { %2076 = vst [vmem:[%s11057_s10 + $0xb8] sm:$0xff] %v11717_v52  ;;  %v2009_v38 = vmul.f32 0.05, %v1322_v45  ;;  %v9388_v40 = vpop.f32.mrb[19].mxu1  ;;  %v15192_v11 = vld [vmem:[#allocation16_spill] sm:$0xff] }
 0x431   : > { %v11724_v0 = vsub.f32 %v11114_v26, %v2009_v38  ;;  %v2033_v26 = vsub.f32 %v11430_v39, %v1999_v20  ;;  %v1097_v17 = vpop.f32.mrb[34].mxu0  ;;  %v11739_v61 = vpop.trf.xlu0 }
 0x432   : > { %v1327_v14 = vpop.f32.mrb[20].mxu1  ;;  %v2000_v3 = vmul.f32 0.05, %v1097_v17  ;;  %v9359_v53 = vpop.f32.mrb[35].mxu0  ;;  %15181 = vst [vmem:[#allocation37_spill] sm:$0xff] %v11739_v61 }
 0x433   : > { %15178 = vst [vmem:[#allocation34_spill] sm:$0xff] %v11724_v0  ;;  %2077 = vst [vmem:[%s11057_s10 + $0xc0] sm:$0xff] %v11724_v0  ;;  %v2010_v4 = vmul.f32 0.05, %v1327_v14  ;;  %v9391_v12 = vpop.f32.mrb[21].mxu1  ;;  %v15199_v53 = vld [vmem:[#allocation28_spill] sm:$0xff] }
 0x434   : > { %2067 = vst [vmem:[%s11057_s10 + $0x70] sm:$0xff] %v2033_v26  ;;  %v15196_v26 = vld [vmem:[#allocation27_spill] sm:$0xff] }
 0x435   : > { %v11733_v58 = vsub.f32 %v11121_v27, %v2010_v4  ;;  %v2034_v27 = vsub.f32 %v11433_v1, %v2000_v3  ;;  %v1102_v7 = vpop.f32.mrb[36].mxu0  ;;  %v11752_v2 = vpop.trf.xlu0 }
 0x436   : > { %v1332_v35 = vpop.f32.mrb[22].mxu1  ;;  %v2001_v36 = vmul.f32 0.05, %v1102_v7  ;;  %v9362_v22 = vpop.f32.mrb[37].mxu0  ;;  %15185 = vst [vmem:[#allocation39_spill] sm:$0xff] %v11752_v2 }
 0x437   : > { %15180 = vst [vmem:[#allocation36_spill] sm:$0xff] %v11733_v58  ;;  %2078 = vst [vmem:[%s11057_s10 + $0xc8] sm:$0xff] %v11733_v58  ;;  %v2011_v29 = vmul.f32 0.05, %v1332_v35  ;;  %v9394_v49 = vpop.f32.mrb[23].mxu1 }
 0x438   : > { %2068 = vst [vmem:[%s11057_s10 + $0x78] sm:$0xff] %v2034_v27  ;;  %v2035_v44 = vsub.f32 %v11448_v48, %v2001_v36 }
 0x439   : > { %v11742_v34 = vsub.f32 %v11126_v28, %v2011_v29  ;;  %v11762_v16 = vpop.trf.xlu0 }
 0x43a   : > { %v1337_v39 = vpop.f32.mrb[24].mxu1  ;;  %2069 = vst [vmem:[%s11057_s10 + $0x80] sm:$0x1] %v2035_v44  ;;  %15188 = vst [vmem:[#allocation40_spill] sm:$0xff] %v11762_v16 }
 0x43b   : > { %15182 = vst [vmem:[#allocation38_spill] sm:$0xff] %v11742_v34  ;;  %2079 = vst [vmem:[%s11057_s10 + $0xd0] sm:$0xff] %v11742_v34  ;;  %v2012_v50 = vmul.f32 0.05, %v1337_v39  ;;  %v9397_v59 = vpop.f32.mrb[25].mxu1 }
 0x43d   : > { %v11749_v62 = vsub.f32 %v15183_v55, %v2012_v50  ;;  %v11778_v12 = vpop.trf.xlu0 }
 0x43e   : > { %v1342_v28 = vpop.f32.mrb[26].mxu1  ;;  %15195 = vst [vmem:[#allocation16_spill] sm:$0xff] %v11778_v12 }
 0x43f   : > { %15184 = vst [vmem:[#allocation13_spill] sm:$0xff] %v11749_v62  ;;  %2080 = vst [vmem:[%s11057_s10 + $0xd8] sm:$0xff] %v11749_v62  ;;  %v2013_v1 = vmul.f32 0.05, %v1342_v28  ;;  %v9400_v46 = vpop.f32.mrb[27].mxu1  ;;  %v1437_v33 = vpop.f32.mrb[38].mxu0 }
 0x440   : > { %v1439_v48 = vpop.f32.mrb[39].mxu0 }
 0x441   : > { %v11758_v47 = vsub.f32 %v15186_v60, %v2013_v1  ;;  %v1514_v9 = vsel %vm659_vm4, %v1439_v48, 0.0  ;;  %v11791_v3 = vpop.trf.xlu0 }
 0x442   : > { %v1347_v6 = vpop.f32.mrb[28].mxu1  ;;  %v1518_v38 = vmul.f32 0.0, %v1514_v9  ;;  %15198 = vst [vmem:[#allocation27_spill] sm:$0xff] %v11791_v3 }
 0x443   : > { %15187 = vst [vmem:[#allocation14_spill] sm:$0xff] %v11758_v47  ;;  %2081 = vst [vmem:[%s11057_s10 + $0xe0] sm:$0xff] %v11758_v47  ;;  %v2014_v5 = vmul.f32 0.05, %v1347_v6  ;;  %v9403_v18 = vpop.f32.mrb[29].mxu1 }
 0x444   : > { %1580 = vmatprep.subr.mxu0 %v1518_v38  ;;  %v10646_v38 = vld [vmem:[%s11002_s15] sm:$0xff] }
 0x445   : > { %v11765_v24 = vsub.f32 %v15189_v13, %v2014_v5  ;;  %8828 = vmatpush1.msk.msra.mxu0 %vm658_vm7, %v1437_v33  ;;  %v11804_v22 = vpop.trf.xlu0 }
 0x446   : > { %v1352_v40 = vpop.f32.mrb[30].mxu1  ;;  %8829 = vmatmul.mubr.msk.f32.vlgmr.msra.gmra.mrb[40].mxu0 %vm904_vm9, %v11660_v8  ;;  %15201 = vst [vmem:[#allocation41_spill] sm:$0xff] %v11804_v22 }
 0x447   : > { %15190 = vst [vmem:[#allocation15_spill] sm:$0xff] %v11765_v24  ;;  %2082 = vst [vmem:[%s11057_s10 + $0xe8] sm:$0xff] %v11765_v24  ;;  %v2015_v41 = vmul.f32 0.05, %v1352_v40  ;;  %v9406_v56 = vpop.f32.mrb[31].mxu1  ;;  %1650 = vmatprep.mubr.f32.mxu0 %v15171_v15 }
 0x449   : > { %v11772_v14 = vsub.f32 %v15192_v11, %v2015_v41  ;;  %v11815_v46 = vpop.trf.xlu0  ;;  %v10647_v41 = vld [vmem:[%s11002_s15 + $0x8] sm:$0xff] }
 0x44a   : > { %v1357_v4 = vpop.f32.mrb[32].mxu1  ;;  %8830 = vmatmul.mubr.msk.f32.gmra.mrb[42].mxu0 %vm904_vm9, %v11665_v37  ;;  %15204 = vst [vmem:[#allocation32_spill] sm:$0xff] %v11815_v46 }
 0x44b   : > { %15193 = vst [vmem:[#allocation31_spill] sm:$0xff] %v11772_v14  ;;  %2083 = vst [vmem:[%s11057_s10 + $0xf0] sm:$0xff] %v11772_v14  ;;  %v2016_v20 = vmul.f32 0.05, %v1357_v4  ;;  %v9409_v42 = vpop.f32.mrb[33].mxu1  ;;  %1656 = vmatprep.mubr.f32.mxu0 %v15171_v15 }
 0x44c   : > { %v10648_v42 = vld [vmem:[%s11002_s15 + $0x10] sm:$0xff] }
 0x44d   : > { %v11784_v35 = vsub.f32 %v15196_v26, %v2016_v20  ;;  %v11828_v60 = vpop.trf.xlu0 }
 0x44e   : > { %v1362_v17 = vpop.f32.mrb[34].mxu1  ;;  %8831 = vmatmul.mubr.msk.f32.gmra.mrb[44].mxu0 %vm904_vm9, %v11679_v19  ;;  %15205 = vst [vmem:[#allocation30_spill] sm:$0xff] %v11828_v60 }
 0x44f   : > { %15197 = vst [vmem:[#allocation29_spill] sm:$0xff] %v11784_v35  ;;  %2084 = vst [vmem:[%s11057_s10 + $0xf8] sm:$0xff] %v11784_v35  ;;  %v2017_v29 = vmul.f32 0.05, %v1362_v17  ;;  %v9412_v49 = vpop.f32.mrb[35].mxu1  ;;  %1662 = vmatprep.mubr.f32.mxu0 %v15171_v15  ;;  %v10649_v17 = vld [vmem:[%s11002_s15 + $0x18] sm:$0xff] }
 0x451   : > { %v11794_v27 = vsub.f32 %v15199_v53, %v2017_v29  ;;  %v11837_v6 = vpop.trf.xlu0 }
 0x452   : > { %v1367_v39 = vpop.f32.mrb[36].mxu1  ;;  %8832 = vmatmul.mubr.msk.f32.gmra.mrb[46].mxu0 %vm904_vm9, %v11695_v21  ;;  %15206 = vst [vmem:[#allocation42_spill] sm:$0xff] %v11837_v6 }
 0x453   : > { %15200 = vst [vmem:[#allocation28_spill] sm:$0xff] %v11794_v27  ;;  %2085 = vst [vmem:[%s11057_s10 + $0x100] sm:$0xff] %v11794_v27  ;;  %v2018_v7 = vmul.f32 0.05, %v1367_v39  ;;  %v9415_v50 = vpop.f32.mrb[37].mxu1  ;;  %1668 = vmatprep.mubr.f32.mxu0 %v15171_v15 }
 0x454   : > { %v10650_v50 = vld [vmem:[%s11002_s15 + $0x20] sm:$0xff] }
 0x455   : > { %v2052_v59 = vsub.f32 %v11451_v57, %v2018_v7  ;;  %v11848_v5 = vpop.trf.xlu0 }
 0x456   : > { %v1508_v36 = vpop.f32.mrb[38].mxu1  ;;  %8833 = vmatmul.mubr.msk.f32.gmra.mrb[48].mxu0 %vm904_vm9, %v11711_v23  ;;  %15207 = vst [vmem:[#allocation43_spill] sm:$0xff] %v11848_v5 }
 0x457   : > { %2086 = vst [vmem:[%s11057_s10 + $0x108] sm:$0x1] %v2052_v59  ;;  %v1510_v55 = vpop.f32.mrb[39].mxu1  ;;  %1674 = vmatprep.mubr.f32.mxu0 %v15171_v15 }
 0x458   : > { %v1516_v28 = vsel %vm661_vm5, %v1510_v55, 0.0 }
 0x459   : > { %v1520_v1 = vmul.f32 0.0, %v1516_v28  ;;  %v11853_v18 = vpop.trf.xlu0 }
 0x45a   : > { %8834 = vmatmul.mubr.msk.f32.gmra.mrb[50].mxu0 %vm904_vm9, %v11727_v25  ;;  %15208 = vst [vmem:[#allocation44_spill] sm:$0xff] %v11853_v18 }
 0x45b   : > { %1758 = vmatprep.subr.mxu1 %v1520_v1  ;;  %1680 = vmatprep.mubr.f32.mxu0 %v15171_v15 }
 0x45c   : > { %8838 = vmatpush1.msk.msra.mxu1 %vm660_vm6, %v1508_v36  ;;  %v10651_v36 = vld [vmem:[%s11002_s15 + $0x28] sm:$0xff] }
 0x45d   : > { %8839 = vmatmul.mubr.msk.f32.vlgmr.msra.gmra.mrb[40].mxu1 %vm904_vm9, %v11778_v12  ;;  %v11861_v33 = vpop.trf.xlu0 }
 0x45e   : > { %1828 = vmatprep.mubr.f32.mxu1 %v15171_v15  ;;  %8835 = vmatmul.mubr.msk.f32.gmra.mrb[52].mxu0 %vm904_vm9, %v11739_v61  ;;  %15209 = vst [vmem:[#allocation45_spill] sm:$0xff] %v11861_v33 }
 0x45f   : > { %1686 = vmatprep.mubr.f32.mxu0 %v15171_v15 }
 0x461   : > { %8840 = vmatmul.mubr.msk.f32.gmra.mrb[42].mxu1 %vm904_vm9, %v11791_v3 }
 0x462   : > { %1834 = vmatprep.mubr.f32.mxu1 %v15171_v15  ;;  %8836 = vmatmul.mubr.msk.f32.gmra.mrb[54].mxu0 %vm904_vm9, %v11752_v2 }
 0x463   : > { %1692 = vmatprep.mubr.f32.mxu0 %v15171_v15 }
 0x465   : > { %8841 = vmatmul.mubr.msk.f32.gmra.mrb[44].mxu1 %vm904_vm9, %v11804_v22 }
 0x466   : > { %1840 = vmatprep.mubr.f32.mxu1 %v15171_v15  ;;  %8837 = vmatmul.mubr.msk.f32.gmra.mrb[56].mxu0 %vm904_vm9, %v11762_v16 }
 0x467   : > { %2227 = vmatprep.mubr.f32.mxu0 %v15171_v15 }
 0x469   : > { %8842 = vmatmul.mubr.msk.f32.gmra.mrb[46].mxu1 %vm904_vm9, %v11815_v46  ;;  %v12204_v46 = vld [vmem:[%s11057_s10 + $0x108] sm:$0x1] }
 0x46a   : > { %1846 = vmatprep.mubr.f32.mxu1 %v15171_v15 }
 0x46d   : > { %8843 = vmatmul.mubr.msk.f32.gmra.mrb[48].mxu1 %vm904_vm9, %v11828_v60  ;;  %v12201_v60 = vld [vmem:[%s11057_s10 + $0x80] sm:$0x1] }
 0x46e   : > { %1852 = vmatprep.mubr.f32.mxu1 %v15171_v15 }
 0x471   : > { %8844 = vmatmul.mubr.msk.f32.gmra.mrb[50].mxu1 %vm904_vm9, %v11837_v6  ;;  %v12194_v6 = vpack.c.bf16 %v11794_v27, %v11784_v35 }
 0x472   : > { %1858 = vmatprep.mubr.f32.mxu1 %v15171_v15 }
 0x475   : > { %8845 = vmatmul.mubr.msk.f32.gmra.mrb[52].mxu1 %vm904_vm9, %v11848_v5 }
 0x476   : > { %1864 = vmatprep.mubr.f32.mxu1 %v15171_v15 }
 0x479   : > { %8846 = vmatmul.mubr.msk.f32.gmra.mrb[54].mxu1 %vm904_vm9, %v11853_v18  ;;  %v12186_v18 = vld [vmem:[%s11057_s10 + $0x70] sm:$0xff] }
 0x47a   : > { %1870 = vmatprep.mubr.f32.mxu1 %v15171_v15 }
 0x47d   : > { %8847 = vmatmul.mubr.msk.f32.gmra.mrb[56].mxu1 %vm904_vm9, %v11861_v33  ;;  %v12179_v33 = vld [vmem:[%s11057_s10 + $0x78] sm:$0xff] }
 0x47e   : > { %2304 = vmatprep.mubr.f32.mxu1 %v15171_v15  ;;  %v12190_v5 = vpack.c.bf16 %v12179_v33, %v12186_v18 }
 0x519   : > { %v1646_v48 = vpop.f32.mrb[40].mxu0 }
 0x51a   : > { %v1877_v13 = vmul.f32 0.05, %v1646_v48  ;;  %v1648_v45 = vpop.f32.mrb[41].mxu0  ;;  %v10652_v48 = vld [vmem:[%s11002_s15 + $0x30] sm:$0xff] }
 0x51b   : > { %v1878_v9 = vmul.f32 0.05, %v1648_v45  ;;  %v10653_v45 = vld [vmem:[%s11002_s15 + $0x38] sm:$0xff] }
 0x51c   : > { %v1913_v40 = vsub.f32 %v10646_v38, %v1877_v13 }
 0x51d   : > { %v1914_v56 = vsub.f32 %v10647_v41, %v1878_v9  ;;  %v1652_v11 = vpop.f32.mrb[42].mxu0 }
 0x51e   : > { %1949 = vst [vmem:[%s11002_s15] sm:$0xff] %v1913_v40  ;;  %v1879_v32 = vmul.f32 0.05, %v1652_v11  ;;  %v1654_v4 = vpop.f32.mrb[43].mxu0  ;;  %v10654_v11 = vld [vmem:[%s11002_s15 + $0x40] sm:$0xff] }
 0x51f   : > { %1950 = vst.msk [vmem:[%s11002_s15 + $0x8] sm:$0xff] %vm338_vm0, %v1914_v56  ;;  %v1880_v20 = vmul.f32 0.05, %v1654_v4 }
 0x520   : > { %v1915_v26 = vsub.f32 %v10648_v42, %v1879_v32 }
 0x521   : > { %v1916_v29 = vsub.f32 %v10649_v17, %v1880_v20  ;;  %v1658_v49 = vpop.f32.mrb[44].mxu0  ;;  %v10655_v20 = vld [vmem:[%s11002_s15 + $0x48] sm:$0xff] }
 0x522   : > { %1951 = vst [vmem:[%s11002_s15 + $0x10] sm:$0xff] %v1915_v26  ;;  %v1881_v53 = vmul.f32 0.05, %v1658_v49  ;;  %v1660_v39 = vpop.f32.mrb[45].mxu0 }
 0x523   : > { %1952 = vst.msk [vmem:[%s11002_s15 + $0x18] sm:$0xff] %vm338_vm0, %v1916_v29  ;;  %v1882_v7 = vmul.f32 0.05, %v1660_v39 }
 0x524   : > { %v1917_v59 = vsub.f32 %v10650_v50, %v1881_v53 }
 0x525   : > { %v1918_v55 = vsub.f32 %v10651_v36, %v1882_v7  ;;  %v1664_v44 = vpop.f32.mrb[46].mxu0  ;;  %v15210_v7 = vld [vmem:[#allocation5_spill] sm:$0xff]  ;;  %v10656_v36 = vld [vmem:[%s11002_s15 + $0x50] sm:$0xff] }
 0x526   : > { %1953 = vst [vmem:[%s11002_s15 + $0x20] sm:$0xff] %v1917_v59  ;;  %v1883_v28 = vmul.f32 0.05, %v1664_v44  ;;  %v1666_v1 = vpop.f32.mrb[47].mxu0  ;;  %v15212_v44 = vld [vmem:[#allocation17_spill] sm:$0xff] }
 0x527   : > { %1954 = vst.msk [vmem:[%s11002_s15 + $0x28] sm:$0xff] %vm338_vm0, %v1918_v55  ;;  %v1884_v57 = vmul.f32 0.05, %v1666_v1 }
 0x528   : > { %v1919_v13 = vsub.f32 %v10652_v48, %v1883_v28 }
 0x529   : > { %v1920_v9 = vsub.f32 %v10653_v45, %v1884_v57  ;;  %v1670_v38 = vpop.f32.mrb[48].mxu0  ;;  %v10657_v57 = vld [vmem:[%s11002_s15 + $0x58] sm:$0xff] }
 0x52a   : > { %1955 = vst [vmem:[%s11002_s15 + $0x30] sm:$0xff] %v1919_v13  ;;  %v1885_v40 = vmul.f32 0.05, %v1670_v38  ;;  %v1672_v41 = vpop.f32.mrb[49].mxu0 }
 0x52b   : > { %1956 = vst.msk [vmem:[%s11002_s15 + $0x38] sm:$0xff] %vm338_vm0, %v1920_v9  ;;  %v1886_v56 = vmul.f32 0.05, %v1672_v41 }
 0x52c   : > { %v1921_v32 = vsub.f32 %v10654_v11, %v1885_v40 }
 0x52d   : > { %v1922_v42 = vsub.f32 %v10655_v20, %v1886_v56  ;;  %v1676_v17 = vpop.f32.mrb[50].mxu0  ;;  %v15213_v56 = vld [vmem:[#allocation6_spill] sm:$0xff] }
 0x52e   : > { %1957 = vst [vmem:[%s11002_s15 + $0x40] sm:$0xff] %v1921_v32  ;;  %v1887_v49 = vmul.f32 0.05, %v1676_v17  ;;  %v1678_v39 = vpop.f32.mrb[51].mxu0 }
 0x52f   : > { %1958 = vst.msk [vmem:[%s11002_s15 + $0x48] sm:$0xff] %vm338_vm0, %v1922_v42  ;;  %v1888_v59 = vmul.f32 0.05, %v1678_v39  ;;  %v15215_v42 = vld [vmem:[#allocation18_spill] sm:$0xff] }
 0x530   : > { %v1824_v4 = vpop.f32.mrb[40].mxu1  ;;  %v1923_v55 = vsub.f32 %v10656_v36, %v1887_v49 }
 0x531   : > { %v1895_v26 = vmul.f32 0.05, %v1824_v4  ;;  %v1826_v29 = vpop.f32.mrb[41].mxu1  ;;  %v1924_v48 = vsub.f32 %v10657_v57, %v1888_v59  ;;  %v1682_v45 = vpop.f32.mrb[52].mxu0  ;;  %v10658_v4 = vld [vmem:[%s11002_s15 + $0x60] sm:$0xff]  ;;  %v10660_v57 = vld [vmem:[%s11002_s15 + $0x70] sm:$0xff] }
 0x532   : > { %v1896_v53 = vmul.f32 0.05, %v1826_v29  ;;  %1959 = vst [vmem:[%s11002_s15 + $0x50] sm:$0xff] %v1923_v55  ;;  %v1889_v38 = vmul.f32 0.05, %v1682_v45  ;;  %v1684_v41 = vpop.f32.mrb[53].mxu0 }
 0x533   : > { %v11892_v50 = vsub.f32 %v15210_v7, %v1895_v26  ;;  %1960 = vst.msk [vmem:[%s11002_s15 + $0x58] sm:$0xff] %vm338_vm0, %v1924_v48  ;;  %v1890_v32 = vmul.f32 0.05, %v1684_v41  ;;  %v10659_v29 = vld [vmem:[%s11002_s15 + $0x68] sm:$0xff] }
 0x534   : > { %v1932_v28 = vsub.f32 %v15212_v44, %v1896_v53  ;;  %v1830_v1 = vpop.f32.mrb[42].mxu1  ;;  %v1925_v20 = vsub.f32 %v10658_v4, %v1889_v38  ;;  %v15216_v44 = vld [vmem:[#allocation7_spill] sm:$0xff]  ;;  %v10661_v38 = vld [vmem:[%s11002_s15 + $0x78] sm:$0xff] }
 0x535   : > { %15211 = vst [vmem:[#allocation5_spill] sm:$0xff] %v11892_v50  ;;  %1967 = vst [vmem:[%s11002_s15 + $0x90] sm:$0xff] %v11892_v50  ;;  %v1897_v13 = vmul.f32 0.05, %v1830_v1  ;;  %v1832_v9 = vpop.f32.mrb[43].mxu1  ;;  %v1926_v49 = vsub.f32 %v10659_v29, %v1890_v32  ;;  %v1688_v39 = vpop.f32.mrb[54].mxu0 }
 0x536   : > { %1968 = vst.msk [vmem:[%s11002_s15 + $0x98] sm:$0xff] %vm338_vm0, %v1932_v28  ;;  %v1898_v40 = vmul.f32 0.05, %v1832_v9  ;;  %1961 = vst [vmem:[%s11002_s15 + $0x60] sm:$0xff] %v1925_v20  ;;  %v1891_v59 = vmul.f32 0.05, %v1688_v39 }
 0x537   : > { %v11905_v11 = vsub.f32 %v15213_v56, %v1897_v13  ;;  %v1690_v55 = vpop.f32.mrb[55].mxu0  ;;  %1962 = vst.msk [vmem:[%s11002_s15 + $0x68] sm:$0xff] %vm338_vm0, %v1926_v49  ;;  %v15218_v13 = vld [vmem:[#allocation19_spill] sm:$0xff]  ;;  %v10662_v49 = vld [vmem:[%s11002_s15 + $0x80] sm:$0x1]  ;;  %v15221_v39 = vld [vmem:[#allocation20_spill] sm:$0xff] }
 0x538   : > { %v1934_v26 = vsub.f32 %v15215_v42, %v1898_v40  ;;  %v1836_v17 = vpop.f32.mrb[44].mxu1  ;;  %v1892_v1 = vmul.f32 0.05, %v1690_v55  ;;  %v1927_v48 = vsub.f32 %v10660_v57, %v1891_v59  ;;  %v2089_v55 = vld [vmem:[%s11002_s15 + $0x10] sm:$0xff] }
 0x539   : > { %15214 = vst [vmem:[#allocation17_spill] sm:$0xff] %v11905_v11  ;;  %1969 = vst [vmem:[%s11002_s15 + $0xa0] sm:$0xff] %v11905_v11  ;;  %v1899_v53 = vmul.f32 0.05, %v1836_v17  ;;  %v1838_v7 = vpop.f32.mrb[45].mxu1  ;;  %v1694_v56 = vpop.f32.mrb[56].mxu0 }
 0x53a   : > { %1970 = vst.msk [vmem:[%s11002_s15 + $0xa8] sm:$0xff] %vm338_vm0, %v1934_v26  ;;  %v1900_v36 = vmul.f32 0.05, %v1838_v7  ;;  %v1928_v40 = vsub.f32 %v10661_v38, %v1892_v1  ;;  %1963 = vst [vmem:[%s11002_s15 + $0x70] sm:$0xff] %v1927_v48  ;;  %v1893_v4 = vmul.f32 0.05, %v1694_v56 }
 0x53b   : > { %v11918_v28 = vsub.f32 %v15216_v44, %v1899_v53  ;;  %v1696_v42 = vpop.f32.mrb[57].mxu0  ;;  %v15219_v26 = vld [vmem:[#allocation8_spill] sm:$0xff]  ;;  %v10663_v44 = vld [vmem:[%s11002_s15 + $0x88] sm:$0x1]  ;;  %v2087_v56 = vld [vmem:[%s11002_s15] sm:$0xff] }
 0x53c   : > { %v1936_v45 = vsub.f32 %v15218_v13, %v1900_v36  ;;  %v1842_v9 = vpop.f32.mrb[46].mxu1  ;;  %1964 = vst.msk [vmem:[%s11002_s15 + $0x78] sm:$0xff] %vm338_vm0, %v1928_v40  ;;  %v1894_v29 = vmul.f32 0.05, %v1696_v42  ;;  %v1929_v53 = vsub.f32 %v10662_v49, %v1893_v4  ;;  %v2088_v36 = vld [vmem:[%s11002_s15 + $0x8] sm:$0xff]  ;;  %v2090_v13 = vld [vmem:[%s11002_s15 + $0x18] sm:$0xff]  ;;  %v9986_v42 = vpack.c.bf16 %v11905_v11, %v11892_v50 }
 0x53d   : > { %15217 = vst [vmem:[#allocation6_spill] sm:$0xff] %v11918_v28  ;;  %1971 = vst [vmem:[%s11002_s15 + $0xb0] sm:$0xff] %v11918_v28  ;;  %v1901_v41 = vmul.f32 0.05, %v1842_v9  ;;  %v1844_v32 = vpop.f32.mrb[47].mxu1  ;;  %v9968_v40 = vpack.c.bf16 %v2090_v13, %v2088_v36  ;;  %v12168_v11 = vld [vmem:[%s11057_s10 + $0x60] sm:$0xff]  ;;  %v12176_v50 = vpack.c.bf16 %v11772_v14, %v11765_v24 }
 0x53e   : > { %1972 = vst.msk [vmem:[%s11002_s15 + $0xb8] sm:$0xff] %vm338_vm0, %v1936_v45  ;;  %v1902_v20 = vmul.f32 0.05, %v1844_v32  ;;  %v1930_v1 = vsub.f32 %v10663_v44, %v1894_v29  ;;  %v11942_v45 = vld [vmem:[%s11002_s15 + $0x98] sm:$0xff]  ;;  %1965 = vst [vmem:[%s11002_s15 + $0x80] sm:$0x1] %v1929_v53 }
 0x53f   : > { %v11931_v17 = vsub.f32 %v15219_v26, %v1901_v41  ;;  %15222 = vst [vmem:[#allocation7_spill] sm:$0xff] %v11942_v45  ;;  %v15224_v32 = vld [vmem:[#allocation9_spill] sm:$0xff]  ;;  %9969 = vmatprep.subr.bf16.mxu0 %v9968_v40  ;;  %v2094_v40 = vld [vmem:[%s11002_s15 + $0x38] sm:$0xff] }
 0x540   : > { %v1938_v7 = vsub.f32 %v15221_v39, %v1902_v20  ;;  %v1848_v59 = vpop.f32.mrb[48].mxu1  ;;  %1966 = vst.msk [vmem:[%s11002_s15 + $0x88] sm:$0x1] %vm355_vm1, %v1930_v1  ;;  %v9970_v20 = vpack.c.bf16 %v2089_v55, %v2087_v56  ;;  %v15226_v26 = vld [vmem:[#allocation21_spill] sm:$0xff]  ;;  %v15229_v55 = vld [vmem:[#allocation22_spill] sm:$0xff] }
 0x541   : > { %15220 = vst [vmem:[#allocation18_spill] sm:$0xff] %v11931_v17  ;;  %1973 = vst [vmem:[%s11002_s15 + $0xc0] sm:$0xff] %v11931_v17  ;;  %v1903_v57 = vmul.f32 0.05, %v1848_v59  ;;  %v1850_v48 = vpop.f32.mrb[49].mxu1  ;;  %v11945_v9 = vld [vmem:[%s11002_s15 + $0xa8] sm:$0xff] }
 0x542   : > { %15223 = vst [vmem:[#allocation19_spill] sm:$0xff] %v11945_v9  ;;  %1974 = vst.msk [vmem:[%s11002_s15 + $0xc8] sm:$0xff] %vm338_vm0, %v1938_v7  ;;  %v1904_v38 = vmul.f32 0.05, %v1850_v48  ;;  %v9984_v41 = vpack.c.bf16 %v11945_v9, %v11942_v45  ;;  %9971 = vmatpush1.bf16.msra.mxu0 %v9970_v20  ;;  %v15227_v59 = vld [vmem:[#allocation10_spill] sm:$0xff]  ;;  %v2093_v48 = vld [vmem:[%s11002_s15 + $0x30] sm:$0xff] }
 0x543   : > { %v11956_v4 = vsub.f32 %v15224_v32, %v1903_v57  ;;  %v2092_v57 = vld [vmem:[%s11002_s15 + $0x28] sm:$0xff] }
 0x544   : > { %v1940_v29 = vsub.f32 %v15226_v26, %v1904_v38  ;;  %v1854_v49 = vpop.f32.mrb[50].mxu1  ;;  %9985 = vmatprep.subr.bf16.mxu1 %v9984_v41  ;;  %v9972_v20 = vpack.c.bf16 %v2094_v40, %v2092_v57  ;;  %v2091_v26 = vld [vmem:[%s11002_s15 + $0x20] sm:$0xff]  ;;  %v12161_v9 = vld [vmem:[%s11057_s10 + $0x68] sm:$0xff] }
 0x545   : > { %15225 = vst [vmem:[#allocation8_spill] sm:$0xff] %v11956_v4  ;;  %1975 = vst [vmem:[%s11002_s15 + $0xd0] sm:$0xff] %v11956_v4  ;;  %v1905_v53 = vmul.f32 0.05, %v1854_v49  ;;  %v1856_v39 = vpop.f32.mrb[51].mxu1  ;;  %9987 = vmatpush1.bf16.msra.mxu1 %v9986_v42  ;;  %v11975_v41 = vld [vmem:[%s11002_s15 + $0xb8] sm:$0xff]  ;;  %v12172_v45 = vpack.c.bf16 %v12161_v9, %v12168_v11 }
 0x546   : > { %1976 = vst.msk [vmem:[%s11002_s15 + $0xd8] sm:$0xff] %vm338_vm0, %v1940_v29  ;;  %v1906_v7 = vmul.f32 0.05, %v1856_v39  ;;  %15230 = vst [vmem:[#allocation9_spill] sm:$0xff] %v11975_v41  ;;  %v15232_v29 = vld [vmem:[#allocation11_spill] sm:$0xff]  ;;  %v9990_v39 = vpack.c.bf16 %v11931_v17, %v11918_v28  ;;  %9973 = vmatprep.subr.bf16.mxu0 %v9972_v20  ;;  %v2096_v20 = vld [vmem:[%s11002_s15 + $0x48] sm:$0xff]  ;;  %v12158_v28 = vpack.c.bf16 %v11758_v47, %v11749_v62 }
 0x547   : > { %v11966_v36 = vsub.f32 %v15227_v59, %v1905_v53  ;;  %v9974_v53 = vpack.c.bf16 %v2093_v48, %v2091_v26  ;;  %v15235_v48 = vld [vmem:[#allocation12_spill] sm:$0xff] }
 0x548   : > { %v1942_v44 = vsub.f32 %v15229_v55, %v1906_v7  ;;  %v1860_v1 = vpop.f32.mrb[52].mxu1  ;;  %v15234_v7 = vld [vmem:[#allocation23_spill] sm:$0xff] }
 0x549   : > { %15228 = vst [vmem:[#allocation20_spill] sm:$0xff] %v11966_v36  ;;  %1977 = vst [vmem:[%s11002_s15 + $0xe0] sm:$0xff] %v11966_v36  ;;  %v1907_v13 = vmul.f32 0.05, %v1860_v1  ;;  %v1862_v38 = vpop.f32.mrb[53].mxu1  ;;  %v11978_v56 = vld [vmem:[%s11002_s15 + $0xc8] sm:$0xff]  ;;  %9975 = vmatpush1.bf16.msra.mxu0 %v9974_v53 }
 0x54a   : > { %15231 = vst [vmem:[#allocation21_spill] sm:$0xff] %v11978_v56  ;;  %1978 = vst.msk [vmem:[%s11002_s15 + $0xe8] sm:$0xff] %vm338_vm0, %v1942_v44  ;;  %v1908_v32 = vmul.f32 0.05, %v1862_v38  ;;  %v9988_v42 = vpack.c.bf16 %v11978_v56, %v11975_v41  ;;  %v15237_v38 = vld [vmem:[#allocation24_spill] sm:$0xff]  ;;  %v15241_v56 = vld [vmem:[#allocation25_spill] sm:$0xff] }
 0x54b   : > { %v11986_v49 = vsub.f32 %v15232_v29, %v1907_v13 }
 0x54c   : > { %v1944_v59 = vsub.f32 %v15234_v7, %v1908_v32  ;;  %v1866_v55 = vpop.f32.mrb[54].mxu1  ;;  %9989 = vmatprep.subr.bf16.mxu1 %v9988_v42  ;;  %v2097_v42 = vld [vmem:[%s11002_s15 + $0x50] sm:$0xff]  ;;  %v2098_v7 = vld [vmem:[%s11002_s15 + $0x58] sm:$0xff] }
 0x54d   : > { %15233 = vst [vmem:[#allocation10_spill] sm:$0xff] %v11986_v49  ;;  %1979 = vst [vmem:[%s11002_s15 + $0xf0] sm:$0xff] %v11986_v49  ;;  %v1909_v44 = vmul.f32 0.05, %v1866_v55  ;;  %v1868_v1 = vpop.f32.mrb[55].mxu1  ;;  %9991 = vmatpush1.bf16.msra.mxu1 %v9990_v39  ;;  %v12005_v53 = vld [vmem:[%s11002_s15 + $0xd8] sm:$0xff]  ;;  %v9976_v55 = vpack.c.bf16 %v2098_v7, %v2096_v20 }
 0x54e   : > { %1980 = vst.msk [vmem:[%s11002_s15 + $0xf8] sm:$0xff] %vm338_vm0, %v1944_v59  ;;  %v1910_v57 = vmul.f32 0.05, %v1868_v1  ;;  %15238 = vst [vmem:[#allocation11_spill] sm:$0xff] %v12005_v53  ;;  %v2095_v1 = vld [vmem:[%s11002_s15 + $0x40] sm:$0xff]  ;;  %v2101_v20 = vld [vmem:[%s11002_s15 + $0x70] sm:$0xff] }
 0x54f   : > { %v11996_v13 = vsub.f32 %v15235_v48, %v1909_v44  ;;  %9977 = vmatprep.subr.bf16.mxu0 %v9976_v55 }
 0x550   : > { %v1946_v40 = vsub.f32 %v15237_v38, %v1910_v57  ;;  %v1872_v32 = vpop.f32.mrb[56].mxu1  ;;  %v15240_v57 = vld [vmem:[#allocation26_spill] sm:$0xff]  ;;  %v9978_v38 = vpack.c.bf16 %v2097_v42, %v2095_v1 }
 0x551   : > { %15236 = vst [vmem:[#allocation22_spill] sm:$0xff] %v11996_v13  ;;  %1981 = vst [vmem:[%s11002_s15 + $0x100] sm:$0xff] %v11996_v13  ;;  %v1911_v26 = vmul.f32 0.05, %v1872_v32  ;;  %v1874_v29 = vpop.f32.mrb[57].mxu1  ;;  %v12008_v39 = vld [vmem:[%s11002_s15 + $0xe8] sm:$0xff]  ;;  %v9994_v32 = vpack.c.bf16 %v11966_v36, %v11956_v4  ;;  %v12140_v36 = vpack.c.bf16 %v11742_v34, %v11733_v58 }
 0x552   : > { %15239 = vst [vmem:[#allocation23_spill] sm:$0xff] %v12008_v39  ;;  %1982 = vst.msk [vmem:[%s11002_s15 + $0x108] sm:$0xff] %vm338_vm0, %v1946_v40  ;;  %v1912_v59 = vmul.f32 0.05, %v1874_v29  ;;  %v9992_v44 = vpack.c.bf16 %v12008_v39, %v12005_v53  ;;  %9979 = vmatpush1.bf16.msra.mxu0 %v9978_v38  ;;  %v2100_v40 = vld [vmem:[%s11002_s15 + $0x68] sm:$0xff]  ;;  %v2102_v29 = vld [vmem:[%s11002_s15 + $0x78] sm:$0xff] }
 0x553   : > { %v1947_v48 = vsub.f32 %v15240_v57, %v1911_v26  ;;  %v12044_v57 = vld [vmem:[%s11057_s10 + $0x8] sm:$0xff]  ;;  %v12143_v53 = vld [vmem:[%s11057_s10 + $0x58] sm:$0xff]  ;;  %v12150_v4 = vld [vmem:[%s11057_s10 + $0x50] sm:$0xff] }
 0x554   : > { %v1948_v17 = vsub.f32 %v15241_v56, %v1912_v59  ;;  %9993 = vmatprep.subr.bf16.mxu1 %v9992_v44  ;;  %v9980_v56 = vpack.c.bf16 %v2102_v29, %v2100_v40  ;;  %v2099_v59 = vld [vmem:[%s11002_s15 + $0x60] sm:$0xff]  ;;  %v2104_v44 = vld [vmem:[%s11002_s15 + $0x88] sm:$0x1]  ;;  %v12154_v41 = vpack.c.bf16 %v12143_v53, %v12150_v4 }
 0x555   : > { %1983 = vst [vmem:[%s11002_s15 + $0x110] sm:$0x1] %v1947_v48  ;;  %9995 = vmatpush1.bf16.msra.mxu1 %v9994_v32  ;;  %v12026_v42 = vld [vmem:[%s11002_s15 + $0xf8] sm:$0xff]  ;;  %v9982_v55 = vpack.c.bf16 %v2101_v20, %v2099_v59  ;;  %v2103_v48 = vld [vmem:[%s11002_s15 + $0x80] sm:$0x1]  ;;  %v10665_v20 = vld [vmem:[%s11256_s18 + $0x8] sm:$0xff] }
 0x556   : > { %1984 = vst.msk [vmem:[%s11002_s15 + $0x118] sm:$0x1] %vm355_vm1, %v1948_v17  ;;  %15242 = vst [vmem:[#allocation12_spill] sm:$0xff] %v12026_v42  ;;  %v9998_v17 = vpack.c.bf16 %v11996_v13, %v11986_v49  ;;  %9981 = vmatprep.subr.bf16.mxu0 %v9980_v56  ;;  %v12054_v32 = vld [vmem:[%s11057_s10] sm:$0xff]  ;;  %v12066_v56 = vpack.c.bf16 %v11676_v63, %v11669_v51  ;;  %v12078_v59 = vld [vmem:[%s11057_s10 + $0x10] sm:$0xff]  ;;  %v12122_v13 = vpack.c.bf16 %v11724_v0, %v11717_v52 }
 0x557   : > { %9983 = vmatpush1.bf16.msra.mxu0 %v9982_v55  ;;  %v10664_v40 = vld [vmem:[%s11256_s18] sm:$0xff]  ;;  %v12062_v29 = vpack.c.bf16 %v12044_v57, %v12054_v32 }
 0x558   : > { %8848 = vmatprep.subr.msk.mxu0 %vm500_vm2, %v2104_v44  ;;  %v12089_v44 = vld [vmem:[%s11057_s10 + $0x28] sm:$0xff]  ;;  %v12132_v49 = vld [vmem:[%s11057_s10 + $0x40] sm:$0xff] }
 0x559   : > { %v12029_v26 = vld [vmem:[%s11002_s15 + $0x108] sm:$0xff] }
 0x55a   : > { %15243 = vst [vmem:[#allocation24_spill] sm:$0xff] %v12029_v26  ;;  %v9996_v7 = vpack.c.bf16 %v12029_v26, %v12026_v42  ;;  %v12125_v42 = vld [vmem:[%s11057_s10 + $0x48] sm:$0xff] }
 0x55b   : > { %8849 = vmatpush1.msk.msra.mxu0 %vm500_vm2, %v2103_v48  ;;  %v12096_v48 = vld [vmem:[%s11057_s10 + $0x20] sm:$0xff]  ;;  %v12136_v39 = vpack.c.bf16 %v12125_v42, %v12132_v49 }
 0x55c   : > { %9997 = vmatprep.subr.bf16.mxu1 %v9996_v7  ;;  %v12048_v38 = vld [vmem:[%s11002_s15 + $0x110] sm:$0x1]  ;;  %8850 = vmatmul.mubr.msk.f32.vlgmr.msra.gmra.mrb[58].mxu0 %vm496_vm3, %v10664_v40  ;;  %v12071_v7 = vld [vmem:[%s11057_s10 + $0x18] sm:$0xff]  ;;  %v12100_v40 = vpack.c.bf16 %v12089_v44, %v12096_v48 }
 0x55d   : > { %9999 = vmatpush1.bf16.msra.mxu1 %v9998_v17  ;;  %v12038_v1 = vld [vmem:[%s11002_s15 + $0x118] sm:$0x1]  ;;  %15245 = vst [vmem:[#allocation25_spill] sm:$0xff] %v12048_v38  ;;  %10000 = vmatprep.subr.bf16.mxu0 %v15176_v30  ;;  %v12082_v55 = vpack.c.bf16 %v12071_v7, %v12078_v59  ;;  %v12086_v17 = vpack.c.bf16 %v11692_v43, %v11685_v54 }
 0x55e   : > { %15244 = vst [vmem:[#allocation26_spill] sm:$0xff] %v12038_v1  ;;  %8851 = vmatprep.subr.msk.mxu1 %vm500_vm2, %v12038_v1  ;;  %10002 = vmatpush1.bf16.msra.mxu0 %v12062_v29  ;;  %v12107_v1 = vld [vmem:[%s11057_s10 + $0x38] sm:$0xff] }
 0x55f   : > { %10003 = vmatprep.subr.bf16.mxu0 %v15176_v30 }
 0x561   : > { %8852 = vmatpush1.msk.msra.mxu1 %vm500_vm2, %v12048_v38  ;;  %v12114_v38 = vld [vmem:[%s11057_s10 + $0x30] sm:$0xff] }
 0x562   : > { %8853 = vmatmul.mubr.msk.f32.vlgmr.msra.gmra.mrb[58].mxu1 %vm496_vm3, %v10665_v20  ;;  %10024 = vmatprep.subr.bf16.mxu1 %v15176_v30  ;;  %v12104_v20 = vpack.c.bf16 %v11708_v10, %v11701_v31  ;;  %v12118_v26 = vpack.c.bf16 %v12107_v1, %v12114_v38 }
 0x563   : > { %10026 = vmatpush1.bf16.msra.mxu1 %v12066_v56  ;;  %10005 = vmatpush1.bf16.msra.mxu0 %v12082_v55 }
 0x564   : > { %10027 = vmatprep.subr.bf16.mxu1 %v15176_v30  ;;  %10006 = vmatprep.subr.bf16.mxu0 %v15176_v30 }
 0x567   : > { %10029 = vmatpush1.bf16.msra.mxu1 %v12086_v17  ;;  %10008 = vmatpush1.bf16.msra.mxu0 %v12100_v40 }
 0x568   : > { %10030 = vmatprep.subr.bf16.mxu1 %v15176_v30  ;;  %10009 = vmatprep.subr.bf16.mxu0 %v15176_v30 }
 0x56b   : > { %10032 = vmatpush1.bf16.msra.mxu1 %v12104_v20  ;;  %10011 = vmatpush1.bf16.msra.mxu0 %v12118_v26 }
 0x56c   : > { %10033 = vmatprep.subr.bf16.mxu1 %v15176_v30  ;;  %10012 = vmatprep.subr.bf16.mxu0 %v15176_v30 }
 0x56f   : > { %10035 = vmatpush1.bf16.msra.mxu1 %v12122_v13  ;;  %10014 = vmatpush1.bf16.msra.mxu0 %v12136_v39 }
 0x570   : > { %10036 = vmatprep.subr.bf16.mxu1 %v15176_v30  ;;  %10015 = vmatprep.subr.bf16.mxu0 %v15176_v30 }
 0x573   : > { %10038 = vmatpush1.bf16.msra.mxu1 %v12140_v36  ;;  %10017 = vmatpush1.bf16.msra.mxu0 %v12154_v41 }
 0x574   : > { %10039 = vmatprep.subr.bf16.mxu1 %v15176_v30  ;;  %10018 = vmatprep.subr.bf16.mxu0 %v15176_v30 }
 0x577   : > { %10041 = vmatpush1.bf16.msra.mxu1 %v12158_v28  ;;  %10020 = vmatpush1.bf16.msra.mxu0 %v12172_v45 }
 0x578   : > { %10042 = vmatprep.subr.bf16.mxu1 %v15176_v30  ;;  %10021 = vmatprep.subr.bf16.mxu0 %v15176_v30 }
 0x57b   : > { %10044 = vmatpush1.bf16.msra.mxu1 %v12176_v50  ;;  %10023 = vmatpush1.bf16.msra.mxu0 %v12190_v5 }
 0x57c   : > { %10045 = vmatprep.subr.bf16.mxu1 %v15176_v30  ;;  %2357 = vmatprep.subr.mxu0 %v15171_v15 }
 0x57f   : > { %10047 = vmatpush1.bf16.msra.mxu1 %v12194_v6  ;;  %8854 = vmatpush1.msk.msra.mxu0 %vm500_vm2, %v12201_v60 }
 0x580   : > { %2433 = vmatprep.subr.mxu1 %v15171_v15  ;;  %9416 = vmatprep.subr.mxu0 %v15171_v15 }
 0x583   : > { %8857 = vmatpush1.msk.msra.mxu1 %vm500_vm2, %v12204_v46 }
 0x584   : > { %9469 = vmatprep.subr.mxu1 %v15171_v15 }
 0x62f   : > { %v12212_v22 = vpop.f32.mrb[58].mxu0 }
 0x630   : > { %v12216_v12 = vpop.f32.mrb[59].mxu0  ;;  %vm2311_vm13 = vcmp.gt.f32.partialorder %v12212_v22, 0.0 }
 0x631   : > { %vm2312_vm11 = vcmp.gt.f32.partialorder %v12216_v12, 0.0 }
 0x632   : > { %v2316_v35 = vsel %vm2312_vm11, %v12216_v12, 0.0 }
 0x633   : > { %8855 = vmatprep.mubr.msk.f32.mxu0 %vm338_vm0, %v2316_v35 }
 0x634   : > { %8856 = vmatmul.mubr.msk.f32.vlgmr.msra.gmra.mrb[60].mxu0 %vm2311_vm13, %v12212_v22 }
 0x635   : > { %v12214_v3 = vpop.f32.mrb[58].mxu1  ;;  %9418 = vmatprep.mubr.msk.f32.mxu0 %vm10820_vm8, %v15171_v15 }
 0x636   : > { %15246 = vst [vmem:[#allocation46_spill] sm:$0xff] %v12214_v3  ;;  %v12218_v27 = vpop.f32.mrb[59].mxu1  ;;  %vm2313_vm10 = vcmp.gt.f32.partialorder %v12214_v3, 0.0 }
 0x637   : > { %15247 = vst [vmem:[#allocation47_spill] sm:$0xff] %v12218_v27  ;;  %vm2314_vm12 = vcmp.gt.f32.partialorder %v12218_v27, 0.0 }
 0x638   : > { %v2318_v14 = vsel %vm2314_vm12, %v12218_v27, 0.0 }
 0x639   : > { %8858 = vmatprep.mubr.msk.f32.mxu1 %vm338_vm0, %v2318_v14 }
 0x63a   : > { %8859 = vmatmul.mubr.msk.f32.vlgmr.msra.gmra.mrb[60].mxu1 %vm2313_vm10, %v12214_v3 }
 0x63b   : > { %9471 = vmatprep.mubr.msk.f32.mxu1 %vm10820_vm8, %v15171_v15 }
 0x707   : > { %v2391_v27 = vpop.f32.mrb[60].mxu0 }
 0x708   : > { %2471 = vmax.xlane.f32.xlu1 %v2391_v27  ;;  %v2393_v16 = vpop.f32.mrb[61].mxu0 }
 0x70d   : > { %v2467_v24 = vpop.f32.mrb[60].mxu1 }
 0x70e   : > { %2473 = vmax.xlane.f32.xlu0 %v2467_v24  ;;  %v2469_v47 = vpop.f32.mrb[61].mxu1 }
 0x70f   : > { %v2315_v47 = vsel %vm2311_vm13, %v12212_v22, 0.0 }
 0x73b   : > { %2525 = vxpose.xlu0.b32.start.end [1/1] (short) (narrow) %v2316_v35, 8 }
 0x73f   : > { %2790 = vxpose.xlu0.b32.start.end [1/1] (short) (narrow) %v2318_v14, 8 }
 0x795   : > { %v2472_v2 = vpop.xlane.xlu1 %2471 }
 0x796   : > { %v2475_v34 = vsub.f32 %v2391_v27, %v2472_v2  ;;  %v2317_v2 = vsel %vm2313_vm10, %v12214_v3, 0.0  ;;  %v10667_v27 = vld [vmem:[%s11502_s17 + $0x8] sm:$0xff] }
 0x798   : > { %v2477_v58 = vmul.f32 1.442695, %v2475_v34 }
 0x79a   : > { %10614 = vpow2.f32 %v2477_v58 }
 0x79b   : > { %v2474_v62 = vpop.xlane.xlu0 %2473 }
 0x79c   : > { %v2476_v61 = vsub.f32 %v2467_v24, %v2474_v62  ;;  %v10666_v62 = vld [vmem:[%s11502_s17] sm:$0xff] }
 0x79e   : > { %v2479_v25 = vmul.f32 1.442695, %v2476_v61 }
 0x7a0   : > { %10616 = vpow2.f32 %v2479_v25 }
 0x7a4   : > { %v10615_v0 = vpop.eup %10614 }
 0x7a5   : > { %2481 = vadd.xlane.f32.xlu1 %v10615_v0 }
 0x7aa   : > { %v10617_v23 = vpop.eup %10616 }
 0x7ab   : > { %2483 = vadd.xlane.f32.xlu1 %v10617_v23 }
 0x7de   : > { %2493 = vxpose.xlu1.b32.start.end [1/1] (short) %v2315_v47, 128 }
 0x81b   : > { %2758 = vxpose.xlu1.b32.start.end [1/1] (short) %v2317_v2, 128 }
 0x832   : > { %v2482_v34 = vpop.xlane.xlu1 %2481 }
 0x833   : > { %10618 = vrcp.f32 %v2482_v34 }
 0x838   : > { %v2484_v58 = vpop.xlane.xlu1 %2483 }
 0x839   : > { %10620 = vrcp.f32 %v2484_v58 }
 0x83d   : > { %v10619_v25 = vpop.eup %10618 }
 0x83e   : > { %v2487_v61 = vmul.f32 %v10619_v25, %v10615_v0 }
 0x840   : > { %v2489_v16 = vsub.f32 %v2487_v61, %v10666_v62 }
 0x842   : > { %v12249_v14 = vmul.f32 0.125, %v2489_v16 }
 0x843   : > { %v10621_v24 = vpop.eup %10620 }
 0x844   : > { %v2488_v35 = vmul.f32 %v10621_v24, %v10617_v23  ;;  %9417 = vmatpush3.msra.mxu0 %v12249_v14  ;;  %v2541_v24 = vpop.trf.xlu0 }
 0x845   : > { %10048 = vmatprep.subr.bf16.mxu0 %v15176_v30 }
 0x846   : > { %v2490_v47 = vsub.f32 %v2488_v35, %v10667_v27 }
 0x848   : > { %v12254_v3 = vmul.f32 0.125, %v2490_v47 }
 0x84a   : > { %9470 = vmatpush3.msra.mxu1 %v12254_v3 }
 0x84b   : > { %10072 = vmatprep.subr.bf16.mxu1 %v15176_v30 }
 0x85e   : > { %v2509_v2 = vpop.trf.xlu1 }
 0x85f   : > { %9419 = vmatmul.mubr.msk.f32.vlgmr.msra.gmra.mrb[62].mxu0 %vm904_vm9, %v2509_v2 }
 0x860   : > { %10050 = vmatpush1.bf16.xpose.msra.mxu0 %v12062_v29  ;;  %9421 = vmatprep.mubr.msk.f32.mxu0 %vm10820_vm8, %v15171_v15 }
 0x861   : > { %10051 = vmatprep.subr.bf16.mxu0 %v15176_v30 }
 0x862   : > { %v2510_v23 = vpop.trf.xlu1 }
 0x863   : > { %9422 = vmatmul.mubr.msk.f32.gmra.mrb[64].mxu0 %vm904_vm9, %v2510_v23 }
 0x864   : > { %9424 = vmatprep.mubr.msk.f32.mxu0 %vm10820_vm8, %v15171_v15 }
 0x866   : > { %v2511_v0 = vpop.trf.xlu1 }
 0x867   : > { %9425 = vmatmul.mubr.msk.f32.gmra.mrb[66].mxu0 %vm904_vm9, %v2511_v0 }
 0x868   : > { %10053 = vmatpush1.bf16.xpose.msra.mxu0 %v12082_v55  ;;  %9427 = vmatprep.mubr.msk.f32.mxu0 %vm10820_vm8, %v15171_v15 }
 0x869   : > { %10054 = vmatprep.subr.bf16.mxu0 %v15176_v30 }
 0x86a   : > { %v2512_v29 = vpop.trf.xlu1 }
 0x86b   : > { %9428 = vmatmul.mubr.msk.f32.gmra.mrb[68].mxu0 %vm904_vm9, %v2512_v29 }
 0x86c   : > { %9430 = vmatprep.mubr.msk.f32.mxu0 %vm10820_vm8, %v15171_v15 }
 0x86e   : > { %v2513_v34 = vpop.trf.xlu1 }
 0x86f   : > { %9431 = vmatmul.mubr.msk.f32.gmra.mrb[70].mxu0 %vm904_vm9, %v2513_v34  ;;  %v2806_v34 = vpop.trf.xlu0 }
 0x870   : > { %10056 = vmatpush1.bf16.xpose.msra.mxu0 %v12100_v40  ;;  %9433 = vmatprep.mubr.msk.f32.mxu0 %vm10820_vm8, %v15171_v15 }
 0x871   : > { %10057 = vmatprep.subr.bf16.mxu0 %v15176_v30 }
 0x872   : > { %v2514_v55 = vpop.trf.xlu1 }
 0x873   : > { %9434 = vmatmul.mubr.msk.f32.gmra.mrb[72].mxu0 %vm904_vm9, %v2514_v55 }
 0x874   : > { %9436 = vmatprep.mubr.msk.f32.mxu0 %vm10820_vm8, %v15171_v15 }
 0x876   : > { %v2515_v58 = vpop.trf.xlu1 }
 0x877   : > { %9437 = vmatmul.mubr.msk.f32.gmra.mrb[74].mxu0 %vm904_vm9, %v2515_v58 }
 0x878   : > { %10059 = vmatpush1.bf16.xpose.msra.mxu0 %v12118_v26  ;;  %9439 = vmatprep.mubr.msk.f32.mxu0 %vm10820_vm8, %v15171_v15 }
 0x879   : > { %10060 = vmatprep.subr.bf16.mxu0 %v15176_v30 }
 0x87a   : > { %v2516_v40 = vpop.trf.xlu1 }
 0x87b   : > { %9440 = vmatmul.mubr.msk.f32.gmra.mrb[76].mxu0 %vm904_vm9, %v2516_v40 }
 0x87c   : > { %9442 = vmatprep.mubr.msk.f32.mxu0 %vm10820_vm8, %v15171_v15 }
 0x87e   : > { %v2517_v25 = vpop.trf.xlu1 }
 0x87f   : > { %9443 = vmatmul.mubr.msk.f32.gmra.mrb[78].mxu0 %vm904_vm9, %v2517_v25 }
 0x880   : > { %10062 = vmatpush1.bf16.xpose.msra.mxu0 %v12136_v39  ;;  %9445 = vmatprep.mubr.msk.f32.mxu0 %vm10820_vm8, %v15171_v15 }
 0x881   : > { %10063 = vmatprep.subr.bf16.mxu0 %v15176_v30 }
 0x882   : > { %v2518_v26 = vpop.trf.xlu1 }
 0x883   : > { %9446 = vmatmul.mubr.msk.f32.gmra.mrb[80].mxu0 %vm904_vm9, %v2518_v26 }
 0x884   : > { %9448 = vmatprep.mubr.msk.f32.mxu0 %vm10820_vm8, %v15171_v15 }
 0x886   : > { %v2519_v61 = vpop.trf.xlu1 }
 0x887   : > { %9449 = vmatmul.mubr.msk.f32.gmra.mrb[82].mxu0 %vm904_vm9, %v2519_v61 }
 0x888   : > { %10065 = vmatpush1.bf16.xpose.msra.mxu0 %v12154_v41  ;;  %9451 = vmatprep.mubr.msk.f32.mxu0 %vm10820_vm8, %v15171_v15 }
 0x889   : > { %10066 = vmatprep.subr.bf16.mxu0 %v15176_v30 }
 0x88a   : > { %v2520_v39 = vpop.trf.xlu1 }
 0x88b   : > { %9452 = vmatmul.mubr.msk.f32.gmra.mrb[84].mxu0 %vm904_vm9, %v2520_v39 }
 0x88c   : > { %9454 = vmatprep.mubr.msk.f32.mxu0 %vm10820_vm8, %v15171_v15 }
 0x88e   : > { %v2521_v62 = vpop.trf.xlu1 }
 0x88f   : > { %9455 = vmatmul.mubr.msk.f32.gmra.mrb[86].mxu0 %vm904_vm9, %v2521_v62 }
 0x890   : > { %10068 = vmatpush1.bf16.xpose.msra.mxu0 %v12172_v45  ;;  %9457 = vmatprep.mubr.msk.f32.mxu0 %vm10820_vm8, %v15171_v15 }
 0x891   : > { %10069 = vmatprep.subr.bf16.mxu0 %v15176_v30 }
 0x892   : > { %v2522_v41 = vpop.trf.xlu1 }
 0x893   : > { %9458 = vmatmul.mubr.msk.f32.gmra.mrb[88].mxu0 %vm904_vm9, %v2522_v41 }
 0x894   : > { %9460 = vmatprep.mubr.msk.f32.mxu0 %vm10820_vm8, %v15171_v15 }
 0x896   : > { %v2523_v16 = vpop.trf.xlu1 }
 0x897   : > { %9461 = vmatmul.mubr.msk.f32.gmra.mrb[90].mxu0 %vm904_vm9, %v2523_v16 }
 0x898   : > { %10071 = vmatpush1.bf16.xpose.msra.mxu0 %v12190_v5  ;;  %9463 = vmatprep.mubr.msk.f32.mxu0 %vm10820_vm8, %v15171_v15 }
 0x899   : > { %3055 = vmatprep.subr.mxu0 %v15171_v15 }
 0x89a   : > { %v2524_v45 = vpop.trf.xlu1 }
 0x89b   : > { %9464 = vmatmul.mubr.msk.f32.gmra.mrb[92].mxu0 %vm904_vm9, %v2524_v45 }
 0x89c   : > { %9466 = vmatprep.mubr.msk.f32.mxu0 %vm10820_vm8, %v15171_v15 }
 0x89e   : > { %v2774_v35 = vpop.trf.xlu1 }
 0x89f   : > { %9467 = vmatmul.mubr.msk.f32.gmra.mrb[94].mxu0 %vm904_vm9, %v2541_v24  ;;  %9472 = vmatmul.mubr.msk.f32.vlgmr.msra.gmra.mrb[62].mxu1 %vm904_vm9, %v2774_v35 }
 0x8a0   : > { %3056 = vmatpush1.xpose.msra.mxu0 %v12201_v60  ;;  %10074 = vmatpush1.bf16.xpose.msra.mxu1 %v12066_v56 }
 0x8a1   : > { %9474 = vmatprep.mubr.msk.f32.mxu1 %vm10820_vm8, %v15171_v15  ;;  %3087 = vmatprep.mubr.f32.mxu0 %v15171_v15 }
 0x8a2   : > { %v2775_v5 = vpop.trf.xlu1  ;;  %10075 = vmatprep.subr.bf16.mxu1 %v15176_v30 }
 0x8a3   : > { %9475 = vmatmul.mubr.msk.f32.gmra.mrb[64].mxu1 %vm904_vm9, %v2775_v5  ;;  %3088 = vmatmul.mubr.f32.vlgmr.msra.gmra.mrb[96].mxu0 %v12249_v14 }
 0x8a4   : > { %9477 = vmatprep.mubr.msk.f32.mxu1 %vm10820_vm8, %v15171_v15  ;;  %3237 = vmatprep.mubr.f32.mxu0 %v15171_v15 }
 0x8a6   : > { %v2776_v27 = vpop.trf.xlu1 }
 0x8a7   : > { %9478 = vmatmul.mubr.msk.f32.gmra.mrb[66].mxu1 %vm904_vm9, %v2776_v27 }
 0x8a8   : > { %10077 = vmatpush1.bf16.xpose.msra.mxu1 %v12086_v17  ;;  %9480 = vmatprep.mubr.msk.f32.mxu1 %vm10820_vm8, %v15171_v15 }
 0x8a9   : > { %10078 = vmatprep.subr.bf16.mxu1 %v15176_v30 }
 0x8aa   : > { %v2777_v56 = vpop.trf.xlu1 }
 0x8ab   : > { %9481 = vmatmul.mubr.msk.f32.gmra.mrb[68].mxu1 %vm904_vm9, %v2777_v56 }
 0x8ac   : > { %9483 = vmatprep.mubr.msk.f32.mxu1 %vm10820_vm8, %v15171_v15 }
 0x8ae   : > { %v2778_v14 = vpop.trf.xlu1 }
 0x8af   : > { %9484 = vmatmul.mubr.msk.f32.gmra.mrb[70].mxu1 %vm904_vm9, %v2778_v14 }
 0x8b0   : > { %10080 = vmatpush1.bf16.xpose.msra.mxu1 %v12104_v20  ;;  %9486 = vmatprep.mubr.msk.f32.mxu1 %vm10820_vm8, %v15171_v15 }
 0x8b1   : > { %10081 = vmatprep.subr.bf16.mxu1 %v15176_v30 }
 0x8b2   : > { %v2779_v17 = vpop.trf.xlu1 }
 0x8b3   : > { %9487 = vmatmul.mubr.msk.f32.gmra.mrb[72].mxu1 %vm904_vm9, %v2779_v17 }
 0x8b4   : > { %9489 = vmatprep.mubr.msk.f32.mxu1 %vm10820_vm8, %v15171_v15 }
 0x8b6   : > { %v2780_v47 = vpop.trf.xlu1 }
 0x8b7   : > { %9490 = vmatmul.mubr.msk.f32.gmra.mrb[74].mxu1 %vm904_vm9, %v2780_v47 }
 0x8b8   : > { %10083 = vmatpush1.bf16.xpose.msra.mxu1 %v12122_v13  ;;  %9492 = vmatprep.mubr.msk.f32.mxu1 %vm10820_vm8, %v15171_v15 }
 0x8b9   : > { %10084 = vmatprep.subr.bf16.mxu1 %v15176_v30 }
 0x8ba   : > { %v2781_v20 = vpop.trf.xlu1 }
 0x8bb   : > { %9493 = vmatmul.mubr.msk.f32.gmra.mrb[76].mxu1 %vm904_vm9, %v2781_v20 }
 0x8bc   : > { %9495 = vmatprep.mubr.msk.f32.mxu1 %vm10820_vm8, %v15171_v15 }
 0x8be   : > { %v2782_v2 = vpop.trf.xlu1 }
 0x8bf   : > { %9496 = vmatmul.mubr.msk.f32.gmra.mrb[78].mxu1 %vm904_vm9, %v2782_v2 }
 0x8c0   : > { %10086 = vmatpush1.bf16.xpose.msra.mxu1 %v12140_v36  ;;  %9498 = vmatprep.mubr.msk.f32.mxu1 %vm10820_vm8, %v15171_v15 }
 0x8c1   : > { %10087 = vmatprep.subr.bf16.mxu1 %v15176_v30 }
 0x8c2   : > { %v2783_v13 = vpop.trf.xlu1 }
 0x8c3   : > { %9499 = vmatmul.mubr.msk.f32.gmra.mrb[80].mxu1 %vm904_vm9, %v2783_v13 }
 0x8c4   : > { %9501 = vmatprep.mubr.msk.f32.mxu1 %vm10820_vm8, %v15171_v15 }
 0x8c6   : > { %v2784_v23 = vpop.trf.xlu1 }
 0x8c7   : > { %9502 = vmatmul.mubr.msk.f32.gmra.mrb[82].mxu1 %vm904_vm9, %v2784_v23 }
 0x8c8   : > { %10089 = vmatpush1.bf16.xpose.msra.mxu1 %v12158_v28  ;;  %9504 = vmatprep.mubr.msk.f32.mxu1 %vm10820_vm8, %v15171_v15 }
 0x8c9   : > { %10090 = vmatprep.subr.bf16.mxu1 %v15176_v30 }
 0x8ca   : > { %v2785_v36 = vpop.trf.xlu1 }
 0x8cb   : > { %9505 = vmatmul.mubr.msk.f32.gmra.mrb[84].mxu1 %vm904_vm9, %v2785_v36 }
 0x8cc   : > { %9507 = vmatprep.mubr.msk.f32.mxu1 %vm10820_vm8, %v15171_v15 }
 0x8ce   : > { %v2786_v0 = vpop.trf.xlu1 }
 0x8cf   : > { %9508 = vmatmul.mubr.msk.f32.gmra.mrb[86].mxu1 %vm904_vm9, %v2786_v0 }
 0x8d0   : > { %10092 = vmatpush1.bf16.xpose.msra.mxu1 %v12176_v50  ;;  %9510 = vmatprep.mubr.msk.f32.mxu1 %vm10820_vm8, %v15171_v15 }
 0x8d1   : > { %10093 = vmatprep.subr.bf16.mxu1 %v15176_v30 }
 0x8d2   : > { %v2787_v28 = vpop.trf.xlu1 }
 0x8d3   : > { %9511 = vmatmul.mubr.msk.f32.gmra.mrb[88].mxu1 %vm904_vm9, %v2787_v28 }
 0x8d4   : > { %9513 = vmatprep.mubr.msk.f32.mxu1 %vm10820_vm8, %v15171_v15 }
 0x8d6   : > { %v2788_v29 = vpop.trf.xlu1 }
 0x8d7   : > { %9514 = vmatmul.mubr.msk.f32.gmra.mrb[90].mxu1 %vm904_vm9, %v2788_v29 }
 0x8d8   : > { %10095 = vmatpush1.bf16.xpose.msra.mxu1 %v12194_v6  ;;  %9516 = vmatprep.mubr.msk.f32.mxu1 %vm10820_vm8, %v15171_v15 }
 0x8d9   : > { %3126 = vmatprep.subr.mxu1 %v15171_v15 }
 0x8da   : > { %v2789_v50 = vpop.trf.xlu1 }
 0x8db   : > { %9517 = vmatmul.mubr.msk.f32.gmra.mrb[92].mxu1 %vm904_vm9, %v2789_v50 }
 0x8dc   : > { %9519 = vmatprep.mubr.msk.f32.mxu1 %vm10820_vm8, %v15171_v15 }
 0x8df   : > { %9520 = vmatmul.mubr.msk.f32.gmra.mrb[94].mxu1 %vm904_vm9, %v2806_v34 }
 0x8e0   : > { %3127 = vmatpush1.xpose.msra.mxu1 %v12204_v46  ;;  %3158 = vmatprep.mubr.f32.mxu1 %v15171_v15 }
 0x8e3   : > { %3159 = vmatmul.mubr.f32.vlgmr.msra.gmra.mrb[96].mxu1 %v12254_v3 }
 0x8e4   : > { %3356 = vmatprep.mubr.f32.mxu1 %v15171_v15 }
 0x932   : > { %v2674_v6 = vpop.f32.mrb[62].mxu0 }
 0x933   : > { %v3519_v55 = vmul.f32 0.05, %v2674_v6  ;;  %v9420_v58 = vpop.f32.mrb[63].mxu0 }
 0x935   : > { %v3553_v40 = vsub.f32 %v12054_v32, %v3519_v55 }
 0x936   : > { %v2679_v25 = vpop.f32.mrb[64].mxu0 }
 0x937   : > { %3587 = vst [vmem:[%s11057_s10] sm:$0xff] %v3553_v40  ;;  %v3520_v26 = vmul.f32 0.05, %v2679_v25  ;;  %v9423_v61 = vpop.f32.mrb[65].mxu0 }
 0x939   : > { %v3554_v39 = vsub.f32 %v12044_v57, %v3520_v26 }
 0x93a   : > { %v2684_v62 = vpop.f32.mrb[66].mxu0 }
 0x93b   : > { %3588 = vst [vmem:[%s11057_s10 + $0x8] sm:$0xff] %v3554_v39  ;;  %v3521_v41 = vmul.f32 0.05, %v2684_v62  ;;  %v9426_v3 = vpop.f32.mrb[67].mxu0 }
 0x93d   : > { %v3555_v16 = vsub.f32 %v12078_v59, %v3521_v41 }
 0x93e   : > { %v2689_v45 = vpop.f32.mrb[68].mxu0 }
 0x93f   : > { %3589 = vst [vmem:[%s11057_s10 + $0x10] sm:$0xff] %v3555_v16  ;;  %v3522_v24 = vmul.f32 0.05, %v2689_v45  ;;  %v9429_v35 = vpop.f32.mrb[69].mxu0 }
 0x941   : > { %v3556_v32 = vsub.f32 %v12071_v7, %v3522_v24 }
 0x942   : > { %v2694_v5 = vpop.f32.mrb[70].mxu0 }
 0x943   : > { %3590 = vst [vmem:[%s11057_s10 + $0x18] sm:$0xff] %v3556_v32  ;;  %v3523_v27 = vmul.f32 0.05, %v2694_v5  ;;  %v9432_v56 = vpop.f32.mrb[71].mxu0 }
 0x945   : > { %v3557_v57 = vsub.f32 %v12096_v48, %v3523_v27 }
 0x946   : > { %v2699_v14 = vpop.f32.mrb[72].mxu0 }
 0x947   : > { %3591 = vst [vmem:[%s11057_s10 + $0x20] sm:$0xff] %v3557_v57  ;;  %v3524_v17 = vmul.f32 0.05, %v2699_v14  ;;  %v9435_v47 = vpop.f32.mrb[73].mxu0 }
 0x949   : > { %v3558_v59 = vsub.f32 %v12089_v44, %v3524_v17 }
 0x94a   : > { %v2704_v20 = vpop.f32.mrb[74].mxu0 }
 0x94b   : > { %3592 = vst [vmem:[%s11057_s10 + $0x28] sm:$0xff] %v3558_v59  ;;  %v3525_v2 = vmul.f32 0.05, %v2704_v20  ;;  %v9438_v13 = vpop.f32.mrb[75].mxu0 }
 0x94d   : > { %v3559_v7 = vsub.f32 %v12114_v38, %v3525_v2 }
 0x94e   : > { %v2709_v23 = vpop.f32.mrb[76].mxu0 }
 0x94f   : > { %3593 = vst [vmem:[%s11057_s10 + $0x30] sm:$0xff] %v3559_v7  ;;  %v3526_v36 = vmul.f32 0.05, %v2709_v23  ;;  %v9441_v0 = vpop.f32.mrb[77].mxu0 }
 0x951   : > { %v3560_v48 = vsub.f32 %v12107_v1, %v3526_v36 }
 0x952   : > { %v2714_v28 = vpop.f32.mrb[78].mxu0 }
 0x953   : > { %3594 = vst [vmem:[%s11057_s10 + $0x38] sm:$0xff] %v3560_v48  ;;  %v3527_v29 = vmul.f32 0.05, %v2714_v28  ;;  %v9444_v50 = vpop.f32.mrb[79].mxu0 }
 0x955   : > { %v3561_v44 = vsub.f32 %v12132_v49, %v3527_v29 }
 0x956   : > { %v2719_v34 = vpop.f32.mrb[80].mxu0 }
 0x957   : > { %3595 = vst [vmem:[%s11057_s10 + $0x40] sm:$0xff] %v3561_v44  ;;  %v3528_v6 = vmul.f32 0.05, %v2719_v34  ;;  %v9447_v55 = vpop.f32.mrb[81].mxu0 }
 0x959   : > { %v3562_v38 = vsub.f32 %v12125_v42, %v3528_v6 }
 0x95a   : > { %v2724_v58 = vpop.f32.mrb[82].mxu0 }
 0x95b   : > { %3596 = vst [vmem:[%s11057_s10 + $0x48] sm:$0xff] %v3562_v38  ;;  %v3529_v40 = vmul.f32 0.05, %v2724_v58  ;;  %v9450_v25 = vpop.f32.mrb[83].mxu0 }
 0x95d   : > { %v3563_v1 = vsub.f32 %v12150_v4, %v3529_v40 }
 0x95e   : > { %v2729_v26 = vpop.f32.mrb[84].mxu0 }
 0x95f   : > { %3597 = vst [vmem:[%s11057_s10 + $0x50] sm:$0xff] %v3563_v1  ;;  %v3530_v61 = vmul.f32 0.05, %v2729_v26  ;;  %v9453_v39 = vpop.f32.mrb[85].mxu0 }
 0x961   : > { %v3564_v49 = vsub.f32 %v12143_v53, %v3530_v61  ;;  %v15248_v61 = vld [vmem:[#allocation33_spill] sm:$0xff] }
 0x962   : > { %v2734_v62 = vpop.f32.mrb[86].mxu0 }
 0x963   : > { %3598 = vst [vmem:[%s11057_s10 + $0x58] sm:$0xff] %v3564_v49  ;;  %v3531_v41 = vmul.f32 0.05, %v2734_v62  ;;  %v9456_v3 = vpop.f32.mrb[87].mxu0  ;;  %v15249_v62 = vld [vmem:[#allocation34_spill] sm:$0xff] }
 0x964   : > { %v15251_v3 = vld [vmem:[#allocation35_spill] sm:$0xff] }
 0x965   : > { %v3565_v42 = vsub.f32 %v12168_v11, %v3531_v41 }
 0x966   : > { %v2739_v16 = vpop.f32.mrb[88].mxu0 }
 0x967   : > { %3599 = vst [vmem:[%s11057_s10 + $0x60] sm:$0xff] %v3565_v42  ;;  %v3532_v45 = vmul.f32 0.05, %v2739_v16  ;;  %v9459_v24 = vpop.f32.mrb[89].mxu0 }
 0x969   : > { %v3566_v4 = vsub.f32 %v12161_v9, %v3532_v45  ;;  %v15252_v45 = vld [vmem:[#allocation36_spill] sm:$0xff] }
 0x96a   : > { %v2744_v35 = vpop.f32.mrb[90].mxu0 }
 0x96b   : > { %3600 = vst [vmem:[%s11057_s10 + $0x68] sm:$0xff] %v3566_v4  ;;  %v3533_v32 = vmul.f32 0.05, %v2744_v35  ;;  %v9462_v5 = vpop.f32.mrb[91].mxu0  ;;  %v15254_v4 = vld [vmem:[#allocation37_spill] sm:$0xff] }
 0x96d   : > { %v3567_v53 = vsub.f32 %v12186_v18, %v3533_v32 }
 0x96e   : > { %v2749_v27 = vpop.f32.mrb[92].mxu0 }
 0x96f   : > { %3601 = vst [vmem:[%s11057_s10 + $0x70] sm:$0xff] %v3567_v53  ;;  %v3534_v56 = vmul.f32 0.05, %v2749_v27  ;;  %v9465_v57 = vpop.f32.mrb[93].mxu0  ;;  %v15255_v53 = vld [vmem:[#allocation38_spill] sm:$0xff] }
 0x971   : > { %v3568_v11 = vsub.f32 %v12179_v33, %v3534_v56  ;;  %v15257_v56 = vld [vmem:[#allocation39_spill] sm:$0xff] }
 0x972   : > { %v2754_v14 = vpop.f32.mrb[94].mxu0  ;;  %v2939_v17 = vpop.f32.mrb[62].mxu1 }
 0x973   : > { %3602 = vst [vmem:[%s11057_s10 + $0x78] sm:$0xff] %v3568_v11  ;;  %v3535_v47 = vmul.f32 0.05, %v2754_v14  ;;  %v3536_v59 = vmul.f32 0.05, %v2939_v17  ;;  %v9473_v9 = vpop.f32.mrb[63].mxu1 }
 0x974   : > { %v9468_v20 = vpop.f32.mrb[95].mxu0  ;;  %v15258_v17 = vld [vmem:[#allocation13_spill] sm:$0xff] }
 0x975   : > { %v3569_v2 = vsub.f32 %v12201_v60, %v3535_v47  ;;  %v12430_v18 = vsub.f32 %v11669_v51, %v3536_v59  ;;  %v15260_v59 = vld [vmem:[#allocation40_spill] sm:$0xff] }
 0x976   : > { %v2944_v13 = vpop.f32.mrb[64].mxu1  ;;  %v3089_v7 = vpop.f32.mrb[96].mxu0 }
 0x977   : > { %3603 = vst [vmem:[%s11057_s10 + $0x80] sm:$0x1] %v3569_v2  ;;  %3604 = vst [vmem:[%s11057_s10 + $0x88] sm:$0xff] %v12430_v18  ;;  %v3537_v23 = vmul.f32 0.05, %v2944_v13  ;;  %v9476_v33 = vpop.f32.mrb[65].mxu1 }
 0x978   : > { %v3091_v36 = vpop.f32.mrb[97].mxu0  ;;  %v15261_v13 = vld [vmem:[#allocation14_spill] sm:$0xff] }
 0x979   : > { %v3166_v0 = vsel %vm2312_vm11, %v3091_v36, 0.0  ;;  %v12438_v48 = vsub.f32 %v11676_v63, %v3537_v23 }
 0x97a   : > { %v3170_v28 = vmul.f32 0.0, %v3166_v0  ;;  %v2949_v60 = vpop.f32.mrb[66].mxu1  ;;  %v15263_v0 = vld [vmem:[#allocation15_spill] sm:$0xff] }
 0x97b   : > { %3605 = vst [vmem:[%s11057_s10 + $0x90] sm:$0xff] %v12438_v48  ;;  %v3538_v51 = vmul.f32 0.05, %v2949_v60  ;;  %v9479_v29 = vpop.f32.mrb[67].mxu1 }
 0x97c   : > { %3173 = vmatprep.subr.mxu0 %v3170_v28 }
 0x97d   : > { %8894 = vmatpush1.msk.msra.mxu0 %vm2311_vm13, %v3089_v7  ;;  %v12445_v50 = vsub.f32 %v11685_v54, %v3538_v51 }
 0x97e   : > { %8895 = vmatmul.mubr.msk.f32.vlgmr.msra.gmra.mrb[98].mxu0 %vm904_vm9, %v11660_v8  ;;  %v2954_v12 = vpop.f32.mrb[68].mxu1 }
 0x97f   : > { %3243 = vmatprep.mubr.f32.mxu0 %v15171_v15  ;;  %3606 = vst [vmem:[%s11057_s10 + $0x98] sm:$0xff] %v12445_v50  ;;  %v3539_v63 = vmul.f32 0.05, %v2954_v12  ;;  %v9482_v44 = vpop.f32.mrb[69].mxu1  ;;  %v15265_v12 = vld [vmem:[#allocation31_spill] sm:$0xff] }
 0x981   : > { %v12453_v34 = vsub.f32 %v11692_v43, %v3539_v63 }
 0x982   : > { %8896 = vmatmul.mubr.msk.f32.gmra.mrb[100].mxu0 %vm904_vm9, %v11665_v37  ;;  %v2959_v22 = vpop.f32.mrb[70].mxu1 }
 0x983   : > { %3249 = vmatprep.mubr.f32.mxu0 %v15171_v15  ;;  %3607 = vst [vmem:[%s11057_s10 + $0xa0] sm:$0xff] %v12453_v34  ;;  %v3540_v54 = vmul.f32 0.05, %v2959_v22  ;;  %v9485_v6 = vpop.f32.mrb[71].mxu1 }
 0x984   : > { %v15267_v6 = vld [vmem:[#allocation29_spill] sm:$0xff] }
 0x985   : > { %v12461_v55 = vsub.f32 %v11701_v31, %v3540_v54 }
 0x986   : > { %8897 = vmatmul.mubr.msk.f32.gmra.mrb[102].mxu0 %vm904_vm9, %v11679_v19  ;;  %v2964_v38 = vpop.f32.mrb[72].mxu1 }
 0x987   : > { %3255 = vmatprep.mubr.f32.mxu0 %v15171_v15  ;;  %3608 = vst [vmem:[%s11057_s10 + $0xa8] sm:$0xff] %v12461_v55  ;;  %v3541_v43 = vmul.f32 0.05, %v2964_v38  ;;  %v9488_v58 = vpop.f32.mrb[73].mxu1 }
 0x989   : > { %v12469_v40 = vsub.f32 %v11708_v10, %v3541_v43 }
 0x98a   : > { %8898 = vmatmul.mubr.msk.f32.gmra.mrb[104].mxu0 %vm904_vm9, %v11695_v21  ;;  %v2969_v25 = vpop.f32.mrb[74].mxu1 }
 0x98b   : > { %3261 = vmatprep.mubr.f32.mxu0 %v15171_v15  ;;  %3609 = vst [vmem:[%s11057_s10 + $0xb0] sm:$0xff] %v12469_v40  ;;  %v3542_v31 = vmul.f32 0.05, %v2969_v25  ;;  %v9491_v1 = vpop.f32.mrb[75].mxu1 }
 0x98d   : > { %v12477_v26 = vsub.f32 %v11717_v52, %v3542_v31  ;;  %v15269_v31 = vld [vmem:[#allocation28_spill] sm:$0xff] }
 0x98e   : > { %8899 = vmatmul.mubr.msk.f32.gmra.mrb[106].mxu0 %vm904_vm9, %v15248_v61  ;;  %v2974_v39 = vpop.f32.mrb[76].mxu1 }
 0x98f   : > { %3267 = vmatprep.mubr.f32.mxu0 %v15171_v15  ;;  %3610 = vst [vmem:[%s11057_s10 + $0xb8] sm:$0xff] %v12477_v26  ;;  %v3543_v10 = vmul.f32 0.05, %v2974_v39  ;;  %v9494_v49 = vpop.f32.mrb[77].mxu1 }
 0x991   : > { %v12485_v41 = vsub.f32 %v15249_v62, %v3543_v10 }
 0x992   : > { %8900 = vmatmul.mubr.msk.f32.gmra.mrb[108].mxu0 %vm904_vm9, %v15251_v3  ;;  %v2979_v42 = vpop.f32.mrb[78].mxu1 }
 0x993   : > { %15250 = vst [vmem:[#allocation34_spill] sm:$0xff] %v12485_v41  ;;  %3273 = vmatprep.mubr.f32.mxu0 %v15171_v15  ;;  %3611 = vst [vmem:[%s11057_s10 + $0xc0] sm:$0xff] %v12485_v41  ;;  %v3544_v52 = vmul.f32 0.05, %v2979_v42  ;;  %v9497_v16 = vpop.f32.mrb[79].mxu1 }
 0x995   : > { %v12493_v24 = vsub.f32 %v15252_v45, %v3544_v52 }
 0x996   : > { %8901 = vmatmul.mubr.msk.f32.gmra.mrb[110].mxu0 %vm904_vm9, %v15254_v4  ;;  %v2984_v35 = vpop.f32.mrb[80].mxu1 }
 0x997   : > { %15253 = vst [vmem:[#allocation36_spill] sm:$0xff] %v12493_v24  ;;  %3279 = vmatprep.mubr.f32.mxu0 %v15171_v15  ;;  %3612 = vst [vmem:[%s11057_s10 + $0xc8] sm:$0xff] %v12493_v24  ;;  %v3545_v32 = vmul.f32 0.05, %v2984_v35  ;;  %v9500_v5 = vpop.f32.mrb[81].mxu1 }
 0x998   : > { %v15273_v5 = vld [vmem:[#allocation16_spill] sm:$0xff] }
 0x999   : > { %v12501_v27 = vsub.f32 %v15255_v53, %v3545_v32  ;;  %v15274_v53 = vld [vmem:[#allocation27_spill] sm:$0xff] }
 0x99a   : > { %8902 = vmatmul.mubr.msk.f32.gmra.mrb[112].mxu0 %vm904_vm9, %v15257_v56  ;;  %v2989_v57 = vpop.f32.mrb[82].mxu1 }
 0x99b   : > { %15256 = vst [vmem:[#allocation38_spill] sm:$0xff] %v12501_v27  ;;  %3285 = vmatprep.mubr.f32.mxu0 %v15171_v15  ;;  %3613 = vst [vmem:[%s11057_s10 + $0xd0] sm:$0xff] %v12501_v27  ;;  %v3546_v11 = vmul.f32 0.05, %v2989_v57  ;;  %v9503_v14 = vpop.f32.mrb[83].mxu1  ;;  %v15276_v57 = vld [vmem:[#allocation32_spill] sm:$0xff] }
 0x99c   : > { %v15278_v14 = vld [vmem:[#allocation42_spill] sm:$0xff] }
 0x99d   : > { %v12509_v47 = vsub.f32 %v15258_v17, %v3546_v11  ;;  %v15277_v11 = vld [vmem:[#allocation30_spill] sm:$0xff]  ;;  %v15279_v17 = vld [vmem:[#allocation43_spill] sm:$0xff] }
 0x99e   : > { %8903 = vmatmul.mubr.msk.f32.gmra.mrb[114].mxu0 %vm904_vm9, %v15260_v59  ;;  %v2994_v9 = vpop.f32.mrb[84].mxu1 }
 0x99f   : > { %15259 = vst [vmem:[#allocation13_spill] sm:$0xff] %v12509_v47  ;;  %3761 = vmatprep.mubr.f32.mxu0 %v15171_v15  ;;  %3614 = vst [vmem:[%s11057_s10 + $0xd8] sm:$0xff] %v12509_v47  ;;  %v3547_v20 = vmul.f32 0.05, %v2994_v9  ;;  %v9506_v2 = vpop.f32.mrb[85].mxu1  ;;  %v15280_v9 = vld [vmem:[#allocation44_spill] sm:$0xff] }
 0x9a1   : > { %v12517_v7 = vsub.f32 %v15261_v13, %v3547_v20  ;;  %v15281_v20 = vld [vmem:[#allocation45_spill] sm:$0xff] }
 0x9a2   : > { %v2999_v23 = vpop.f32.mrb[86].mxu1 }
 0x9a3   : > { %15262 = vst [vmem:[#allocation14_spill] sm:$0xff] %v12517_v7  ;;  %3615 = vst [vmem:[%s11057_s10 + $0xe0] sm:$0xff] %v12517_v7  ;;  %v3548_v33 = vmul.f32 0.05, %v2999_v23  ;;  %v9509_v36 = vpop.f32.mrb[87].mxu1 }
 0x9a4   : > { %v10668_v36 = vld [vmem:[%s11002_s15] sm:$0xff] }
 0x9a5   : > { %v12522_v28 = vsub.f32 %v15263_v0, %v3548_v33 }
 0x9a6   : > { %v3004_v60 = vpop.f32.mrb[88].mxu1 }
 0x9a7   : > { %15264 = vst [vmem:[#allocation15_spill] sm:$0xff] %v12522_v28  ;;  %3616 = vst [vmem:[%s11057_s10 + $0xe8] sm:$0xff] %v12522_v28  ;;  %v3549_v51 = vmul.f32 0.05, %v3004_v60  ;;  %v9512_v29 = vpop.f32.mrb[89].mxu1  ;;  %v10669_v60 = vld [vmem:[%s11002_s15 + $0x8] sm:$0xff] }
 0x9a9   : > { %v12527_v63 = vsub.f32 %v15265_v12, %v3549_v51 }
 0x9aa   : > { %v3009_v44 = vpop.f32.mrb[90].mxu1 }
 0x9ab   : > { %15266 = vst [vmem:[#allocation31_spill] sm:$0xff] %v12527_v63  ;;  %3617 = vst [vmem:[%s11057_s10 + $0xf0] sm:$0xff] %v12527_v63  ;;  %v3550_v22 = vmul.f32 0.05, %v3009_v44  ;;  %v9515_v54 = vpop.f32.mrb[91].mxu1 }
 0x9ac   : > { %v10670_v54 = vld [vmem:[%s11002_s15 + $0x10] sm:$0xff] }
 0x9ad   : > { %v12532_v38 = vsub.f32 %v15267_v6, %v3550_v22 }
 0x9ae   : > { %v3014_v43 = vpop.f32.mrb[92].mxu1 }
 0x9af   : > { %15268 = vst [vmem:[#allocation29_spill] sm:$0xff] %v12532_v38  ;;  %3618 = vst [vmem:[%s11057_s10 + $0xf8] sm:$0xff] %v12532_v38  ;;  %v3551_v58 = vmul.f32 0.05, %v3014_v43  ;;  %v9518_v25 = vpop.f32.mrb[93].mxu1  ;;  %v10671_v43 = vld [vmem:[%s11002_s15 + $0x18] sm:$0xff] }
 0x9b1   : > { %v12537_v1 = vsub.f32 %v15269_v31, %v3551_v58 }
 0x9b2   : > { %v3019_v39 = vpop.f32.mrb[94].mxu1 }
 0x9b3   : > { %15270 = vst [vmem:[#allocation28_spill] sm:$0xff] %v12537_v1  ;;  %3619 = vst [vmem:[%s11057_s10 + $0x100] sm:$0xff] %v12537_v1  ;;  %v3552_v10 = vmul.f32 0.05, %v3019_v39  ;;  %v9521_v49 = vpop.f32.mrb[95].mxu1 }
 0x9b4   : > { %v10672_v49 = vld [vmem:[%s11002_s15 + $0x20] sm:$0xff] }
 0x9b5   : > { %v3586_v62 = vsub.f32 %v12204_v46, %v3552_v10  ;;  %v15275_v46 = vld [vmem:[#allocation41_spill] sm:$0xff] }
 0x9b6   : > { %v3160_v42 = vpop.f32.mrb[96].mxu1 }
 0x9b7   : > { %3620 = vst [vmem:[%s11057_s10 + $0x108] sm:$0x1] %v3586_v62  ;;  %v3162_v52 = vpop.f32.mrb[97].mxu1 }
 0x9b8   : > { %v3168_v45 = vsel %vm2314_vm12, %v3162_v52, 0.0 }
 0x9b9   : > { %v3172_v35 = vmul.f32 0.0, %v3168_v45 }
 0x9bb   : > { %3292 = vmatprep.subr.mxu1 %v3172_v35 }
 0x9bc   : > { %8904 = vmatpush1.msk.msra.mxu1 %vm2313_vm10, %v3160_v42  ;;  %v10673_v42 = vld [vmem:[%s11002_s15 + $0x28] sm:$0xff] }
 0x9bd   : > { %8905 = vmatmul.mubr.msk.f32.vlgmr.msra.gmra.mrb[98].mxu1 %vm904_vm9, %v15273_v5 }
 0x9be   : > { %3362 = vmatprep.mubr.f32.mxu1 %v15171_v15 }
 0x9c1   : > { %8906 = vmatmul.mubr.msk.f32.gmra.mrb[100].mxu1 %vm904_vm9, %v15274_v53 }
 0x9c2   : > { %3368 = vmatprep.mubr.f32.mxu1 %v15171_v15 }
 0x9c5   : > { %8907 = vmatmul.mubr.msk.f32.gmra.mrb[102].mxu1 %vm904_vm9, %v15275_v46 }
 0x9c6   : > { %3374 = vmatprep.mubr.f32.mxu1 %v15171_v15 }
 0x9c9   : > { %8908 = vmatmul.mubr.msk.f32.gmra.mrb[104].mxu1 %vm904_vm9, %v15276_v57  ;;  %v12912_v57 = vld [vmem:[%s11057_s10 + $0x108] sm:$0x1] }
 0x9ca   : > { %3380 = vmatprep.mubr.f32.mxu1 %v15171_v15 }
 0x9cd   : > { %8909 = vmatmul.mubr.msk.f32.gmra.mrb[106].mxu1 %vm904_vm9, %v15277_v11  ;;  %v12909_v11 = vld [vmem:[%s11057_s10 + $0x80] sm:$0x1] }
 0x9ce   : > { %3386 = vmatprep.mubr.f32.mxu1 %v15171_v15 }
 0x9d1   : > { %8910 = vmatmul.mubr.msk.f32.gmra.mrb[108].mxu1 %vm904_vm9, %v15278_v14  ;;  %v12902_v14 = vpack.c.bf16 %v12537_v1, %v12532_v38 }
 0x9d2   : > { %3392 = vmatprep.mubr.f32.mxu1 %v15171_v15 }
 0x9d5   : > { %8911 = vmatmul.mubr.msk.f32.gmra.mrb[110].mxu1 %vm904_vm9, %v15279_v17 }
 0x9d6   : > { %3398 = vmatprep.mubr.f32.mxu1 %v15171_v15 }
 0x9d9   : > { %8912 = vmatmul.mubr.msk.f32.gmra.mrb[112].mxu1 %vm904_vm9, %v15280_v9  ;;  %v12894_v9 = vld [vmem:[%s11057_s10 + $0x70] sm:$0xff] }
 0x9da   : > { %3404 = vmatprep.mubr.f32.mxu1 %v15171_v15 }
 0x9dd   : > { %8913 = vmatmul.mubr.msk.f32.gmra.mrb[114].mxu1 %vm904_vm9, %v15281_v20  ;;  %v12887_v20 = vld [vmem:[%s11057_s10 + $0x78] sm:$0xff] }
 0x9de   : > { %3838 = vmatprep.mubr.f32.mxu1 %v15171_v15  ;;  %v12898_v17 = vpack.c.bf16 %v12887_v20, %v12894_v9 }
 0xa51   : > { %v3239_v2 = vpop.f32.mrb[98].mxu0 }
 0xa52   : > { %v3411_v13 = vmul.f32 0.05, %v3239_v2  ;;  %v3241_v23 = vpop.f32.mrb[99].mxu0  ;;  %v10674_v2 = vld [vmem:[%s11002_s15 + $0x30] sm:$0xff] }
 0xa53   : > { %v3412_v33 = vmul.f32 0.05, %v3241_v23  ;;  %v10675_v23 = vld [vmem:[%s11002_s15 + $0x38] sm:$0xff] }
 0xa54   : > { %v3447_v0 = vsub.f32 %v10668_v36, %v3411_v13 }
 0xa55   : > { %v3448_v51 = vsub.f32 %v10669_v60, %v3412_v33  ;;  %v3245_v29 = vpop.f32.mrb[100].mxu0 }
 0xa56   : > { %3483 = vst [vmem:[%s11002_s15] sm:$0xff] %v3447_v0  ;;  %v3413_v12 = vmul.f32 0.05, %v3245_v29  ;;  %v3247_v44 = vpop.f32.mrb[101].mxu0  ;;  %v10676_v29 = vld [vmem:[%s11002_s15 + $0x40] sm:$0xff] }
 0xa57   : > { %3484 = vst.msk [vmem:[%s11002_s15 + $0x8] sm:$0xff] %vm338_vm0, %v3448_v51  ;;  %v3414_v22 = vmul.f32 0.05, %v3247_v44  ;;  %v10677_v44 = vld [vmem:[%s11002_s15 + $0x48] sm:$0xff] }
 0xa58   : > { %v3449_v6 = vsub.f32 %v10670_v54, %v3413_v12 }
 0xa59   : > { %v3450_v58 = vsub.f32 %v10671_v43, %v3414_v22  ;;  %v3251_v25 = vpop.f32.mrb[102].mxu0 }
 0xa5a   : > { %3485 = vst [vmem:[%s11002_s15 + $0x10] sm:$0xff] %v3449_v6  ;;  %v3415_v31 = vmul.f32 0.05, %v3251_v25  ;;  %v3253_v39 = vpop.f32.mrb[103].mxu0  ;;  %v10678_v25 = vld [vmem:[%s11002_s15 + $0x50] sm:$0xff] }
 0xa5b   : > { %3486 = vst.msk [vmem:[%s11002_s15 + $0x18] sm:$0xff] %vm338_vm0, %v3450_v58  ;;  %v3416_v10 = vmul.f32 0.05, %v3253_v39  ;;  %v10679_v39 = vld [vmem:[%s11002_s15 + $0x58] sm:$0xff] }
 0xa5c   : > { %v3451_v62 = vsub.f32 %v10672_v49, %v3415_v31 }
 0xa5d   : > { %v3452_v52 = vsub.f32 %v10673_v42, %v3416_v10  ;;  %v3257_v16 = vpop.f32.mrb[104].mxu0 }
 0xa5e   : > { %3487 = vst [vmem:[%s11002_s15 + $0x20] sm:$0xff] %v3451_v62  ;;  %v3417_v45 = vmul.f32 0.05, %v3257_v16  ;;  %v3259_v35 = vpop.f32.mrb[105].mxu0  ;;  %v10680_v16 = vld [vmem:[%s11002_s15 + $0x60] sm:$0xff] }
 0xa5f   : > { %3488 = vst.msk [vmem:[%s11002_s15 + $0x28] sm:$0xff] %vm338_vm0, %v3452_v52  ;;  %v3418_v32 = vmul.f32 0.05, %v3259_v35  ;;  %v10681_v35 = vld [vmem:[%s11002_s15 + $0x68] sm:$0xff] }
 0xa60   : > { %v3453_v13 = vsub.f32 %v10674_v2, %v3417_v45 }
 0xa61   : > { %v3454_v33 = vsub.f32 %v10675_v23, %v3418_v32  ;;  %v3263_v36 = vpop.f32.mrb[106].mxu0 }
 0xa62   : > { %3489 = vst [vmem:[%s11002_s15 + $0x30] sm:$0xff] %v3453_v13  ;;  %v3419_v0 = vmul.f32 0.05, %v3263_v36  ;;  %v3265_v60 = vpop.f32.mrb[107].mxu0  ;;  %v10682_v36 = vld [vmem:[%s11002_s15 + $0x70] sm:$0xff] }
 0xa63   : > { %3490 = vst.msk [vmem:[%s11002_s15 + $0x38] sm:$0xff] %vm338_vm0, %v3454_v33  ;;  %v3420_v51 = vmul.f32 0.05, %v3265_v60  ;;  %v10683_v60 = vld [vmem:[%s11002_s15 + $0x78] sm:$0xff] }
 0xa64   : > { %v3455_v12 = vsub.f32 %v10676_v29, %v3419_v0 }
 0xa65   : > { %v3456_v22 = vsub.f32 %v10677_v44, %v3420_v51  ;;  %v3269_v54 = vpop.f32.mrb[108].mxu0 }
 0xa66   : > { %3491 = vst [vmem:[%s11002_s15 + $0x40] sm:$0xff] %v3455_v12  ;;  %v3421_v6 = vmul.f32 0.05, %v3269_v54  ;;  %v3271_v43 = vpop.f32.mrb[109].mxu0  ;;  %v10684_v54 = vld [vmem:[%s11002_s15 + $0x80] sm:$0x1] }
 0xa67   : > { %3492 = vst.msk [vmem:[%s11002_s15 + $0x48] sm:$0xff] %vm338_vm0, %v3456_v22  ;;  %v3422_v58 = vmul.f32 0.05, %v3271_v43  ;;  %v10685_v43 = vld [vmem:[%s11002_s15 + $0x88] sm:$0x1] }
 0xa68   : > { %v3457_v31 = vsub.f32 %v10678_v25, %v3421_v6 }
 0xa69   : > { %v3458_v10 = vsub.f32 %v10679_v39, %v3422_v58  ;;  %v3275_v49 = vpop.f32.mrb[110].mxu0 }
 0xa6a   : > { %3493 = vst [vmem:[%s11002_s15 + $0x50] sm:$0xff] %v3457_v31  ;;  %v3423_v62 = vmul.f32 0.05, %v3275_v49  ;;  %v3277_v42 = vpop.f32.mrb[111].mxu0  ;;  %v15282_v49 = vld [vmem:[#allocation5_spill] sm:$0xff] }
 0xa6b   : > { %3494 = vst.msk [vmem:[%s11002_s15 + $0x58] sm:$0xff] %vm338_vm0, %v3458_v10  ;;  %v3424_v52 = vmul.f32 0.05, %v3277_v42  ;;  %v15284_v42 = vld [vmem:[#allocation7_spill] sm:$0xff] }
 0xa6c   : > { %v3459_v45 = vsub.f32 %v10680_v16, %v3423_v62 }
 0xa6d   : > { %v3460_v32 = vsub.f32 %v10681_v35, %v3424_v52  ;;  %v3281_v2 = vpop.f32.mrb[112].mxu0 }
 0xa6e   : > { %3495 = vst [vmem:[%s11002_s15 + $0x60] sm:$0xff] %v3459_v45  ;;  %v3425_v13 = vmul.f32 0.05, %v3281_v2  ;;  %v3283_v23 = vpop.f32.mrb[113].mxu0  ;;  %v15285_v2 = vld [vmem:[#allocation17_spill] sm:$0xff] }
 0xa6f   : > { %3496 = vst.msk [vmem:[%s11002_s15 + $0x68] sm:$0xff] %vm338_vm0, %v3460_v32  ;;  %v3426_v33 = vmul.f32 0.05, %v3283_v23  ;;  %v15287_v23 = vld [vmem:[#allocation19_spill] sm:$0xff] }
 0xa70   : > { %v3461_v0 = vsub.f32 %v10682_v36, %v3425_v13 }
 0xa71   : > { %v3462_v51 = vsub.f32 %v10683_v60, %v3426_v33  ;;  %v3287_v29 = vpop.f32.mrb[114].mxu0 }
 0xa72   : > { %3497 = vst [vmem:[%s11002_s15 + $0x70] sm:$0xff] %v3461_v0  ;;  %v3427_v12 = vmul.f32 0.05, %v3287_v29  ;;  %v3289_v44 = vpop.f32.mrb[115].mxu0  ;;  %v15288_v29 = vld [vmem:[#allocation6_spill] sm:$0xff] }
 0xa73   : > { %3498 = vst.msk [vmem:[%s11002_s15 + $0x78] sm:$0xff] %vm338_vm0, %v3462_v51  ;;  %v3428_v22 = vmul.f32 0.05, %v3289_v44  ;;  %v15290_v44 = vld [vmem:[#allocation9_spill] sm:$0xff] }
 0xa74   : > { %v3463_v6 = vsub.f32 %v10684_v54, %v3427_v12 }
 0xa75   : > { %v3464_v58 = vsub.f32 %v10685_v43, %v3428_v22 }
 0xa76   : > { %3499 = vst [vmem:[%s11002_s15 + $0x80] sm:$0x1] %v3463_v6 }
 0xa77   : > { %3500 = vst.msk [vmem:[%s11002_s15 + $0x88] sm:$0x1] %vm355_vm1, %v3464_v58 }
 0xa90   : > { %v3358_v25 = vpop.f32.mrb[98].mxu1 }
 0xa91   : > { %v3429_v31 = vmul.f32 0.05, %v3358_v25  ;;  %v3360_v39 = vpop.f32.mrb[99].mxu1  ;;  %v15291_v25 = vld [vmem:[#allocation18_spill] sm:$0xff] }
 0xa92   : > { %v3430_v10 = vmul.f32 0.05, %v3360_v39  ;;  %v15293_v39 = vld [vmem:[#allocation21_spill] sm:$0xff] }
 0xa93   : > { %v12620_v62 = vsub.f32 %v15282_v49, %v3429_v31 }
 0xa94   : > { %v3466_v52 = vsub.f32 %v15284_v42, %v3430_v10  ;;  %v3364_v16 = vpop.f32.mrb[100].mxu1  ;;  %v3622_v42 = vld [vmem:[%s11002_s15 + $0x8] sm:$0xff] }
 0xa95   : > { %15283 = vst [vmem:[#allocation47_spill] sm:$0xff] %v12620_v62  ;;  %3501 = vst [vmem:[%s11002_s15 + $0x90] sm:$0xff] %v12620_v62  ;;  %v3431_v45 = vmul.f32 0.05, %v3364_v16  ;;  %v3366_v35 = vpop.f32.mrb[101].mxu1 }
 0xa96   : > { %3502 = vst.msk [vmem:[%s11002_s15 + $0x98] sm:$0xff] %vm338_vm0, %v3466_v52  ;;  %v3432_v32 = vmul.f32 0.05, %v3366_v35  ;;  %v3623_v52 = vld [vmem:[%s11002_s15 + $0x10] sm:$0xff]  ;;  %v3624_v35 = vld [vmem:[%s11002_s15 + $0x18] sm:$0xff] }
 0xa97   : > { %v12628_v13 = vsub.f32 %v15285_v2, %v3431_v45 }
 0xa98   : > { %v3468_v33 = vsub.f32 %v15287_v23, %v3432_v32  ;;  %v3370_v36 = vpop.f32.mrb[102].mxu1 }
 0xa99   : > { %15286 = vst [vmem:[#allocation46_spill] sm:$0xff] %v12628_v13  ;;  %3503 = vst [vmem:[%s11002_s15 + $0xa0] sm:$0xff] %v12628_v13  ;;  %v3433_v0 = vmul.f32 0.05, %v3370_v36  ;;  %v3372_v60 = vpop.f32.mrb[103].mxu1 }
 0xa9a   : > { %3504 = vst.msk [vmem:[%s11002_s15 + $0xa8] sm:$0xff] %vm338_vm0, %v3468_v33  ;;  %v3434_v51 = vmul.f32 0.05, %v3372_v60  ;;  %v10096_v33 = vpack.c.bf16 %v3624_v35, %v3622_v42  ;;  %v15296_v60 = vld [vmem:[#allocation8_spill] sm:$0xff] }
 0xa9b   : > { %v12636_v12 = vsub.f32 %v15288_v29, %v3433_v0  ;;  %v3621_v0 = vld [vmem:[%s11002_s15] sm:$0xff] }
 0xa9c   : > { %v3470_v22 = vsub.f32 %v15290_v44, %v3434_v51  ;;  %v3376_v54 = vpop.f32.mrb[104].mxu1  ;;  %v10098_v29 = vpack.c.bf16 %v3623_v52, %v3621_v0  ;;  %v10114_v44 = vpack.c.bf16 %v12628_v13, %v12620_v62  ;;  %10097 = vmatprep.subr.bf16.mxu0 %v10096_v33  ;;  %v3628_v33 = vld [vmem:[%s11002_s15 + $0x38] sm:$0xff]  ;;  %v12876_v13 = vld [vmem:[%s11057_s10 + $0x60] sm:$0xff]  ;;  %v12884_v62 = vpack.c.bf16 %v12527_v63, %v12522_v28 }
 0xa9d   : > { %15289 = vst [vmem:[#allocation5_spill] sm:$0xff] %v12636_v12  ;;  %3505 = vst [vmem:[%s11002_s15 + $0xb0] sm:$0xff] %v12636_v12  ;;  %v3435_v6 = vmul.f32 0.05, %v3376_v54  ;;  %v3378_v43 = vpop.f32.mrb[105].mxu1  ;;  %v12653_v32 = vld [vmem:[%s11002_s15 + $0x98] sm:$0xff] }
 0xa9e   : > { %3506 = vst.msk [vmem:[%s11002_s15 + $0xb8] sm:$0xff] %vm338_vm0, %v3470_v22  ;;  %v3436_v58 = vmul.f32 0.05, %v3378_v43  ;;  %15294 = vst [vmem:[#allocation17_spill] sm:$0xff] %v12653_v32  ;;  %v15298_v22 = vld [vmem:[#allocation11_spill] sm:$0xff]  ;;  %10099 = vmatpush1.bf16.msra.mxu0 %v10098_v29 }
 0xa9f   : > { %v12644_v31 = vsub.f32 %v15291_v25, %v3435_v6 }
 0xaa0   : > { %v3472_v10 = vsub.f32 %v15293_v39, %v3436_v58  ;;  %v3382_v49 = vpop.f32.mrb[106].mxu1  ;;  %v15299_v39 = vld [vmem:[#allocation20_spill] sm:$0xff] }
 0xaa1   : > { %15292 = vst [vmem:[#allocation7_spill] sm:$0xff] %v12644_v31  ;;  %3507 = vst [vmem:[%s11002_s15 + $0xc0] sm:$0xff] %v12644_v31  ;;  %v3437_v16 = vmul.f32 0.05, %v3382_v49  ;;  %v3384_v45 = vpop.f32.mrb[107].mxu1  ;;  %v12656_v2 = vld [vmem:[%s11002_s15 + $0xa8] sm:$0xff] }
 0xaa2   : > { %15295 = vst [vmem:[#allocation19_spill] sm:$0xff] %v12656_v2  ;;  %3508 = vst.msk [vmem:[%s11002_s15 + $0xc8] sm:$0xff] %vm338_vm0, %v3472_v10  ;;  %v3438_v23 = vmul.f32 0.05, %v3384_v45  ;;  %v10112_v36 = vpack.c.bf16 %v12656_v2, %v12653_v32  ;;  %v15301_v49 = vld [vmem:[#allocation23_spill] sm:$0xff]  ;;  %v12869_v2 = vld [vmem:[%s11057_s10 + $0x68] sm:$0xff] }
 0xaa3   : > { %v12664_v51 = vsub.f32 %v15296_v60, %v3437_v16  ;;  %v3626_v16 = vld [vmem:[%s11002_s15 + $0x28] sm:$0xff]  ;;  %v3627_v45 = vld [vmem:[%s11002_s15 + $0x30] sm:$0xff]  ;;  %v12880_v32 = vpack.c.bf16 %v12869_v2, %v12876_v13 }
 0xaa4   : > { %v3474_v54 = vsub.f32 %v15298_v22, %v3438_v23  ;;  %v3388_v6 = vpop.f32.mrb[108].mxu1  ;;  %10113 = vmatprep.subr.bf16.mxu1 %v10112_v36  ;;  %v10100_v29 = vpack.c.bf16 %v3628_v33, %v3626_v16  ;;  %v3625_v22 = vld [vmem:[%s11002_s15 + $0x20] sm:$0xff] }
 0xaa5   : > { %15297 = vst [vmem:[#allocation6_spill] sm:$0xff] %v12664_v51  ;;  %3509 = vst [vmem:[%s11002_s15 + $0xd0] sm:$0xff] %v12664_v51  ;;  %v3439_v43 = vmul.f32 0.05, %v3388_v6  ;;  %v3390_v58 = vpop.f32.mrb[109].mxu1  ;;  %10115 = vmatpush1.bf16.msra.mxu1 %v10114_v44  ;;  %v12683_v36 = vld [vmem:[%s11002_s15 + $0xb8] sm:$0xff] }
 0xaa6   : > { %3510 = vst.msk [vmem:[%s11002_s15 + $0xd8] sm:$0xff] %vm338_vm0, %v3474_v54  ;;  %v3440_v25 = vmul.f32 0.05, %v3390_v58  ;;  %15302 = vst [vmem:[#allocation18_spill] sm:$0xff] %v12683_v36  ;;  %v15304_v54 = vld [vmem:[#allocation10_spill] sm:$0xff]  ;;  %v10118_v58 = vpack.c.bf16 %v12644_v31, %v12636_v12  ;;  %10101 = vmatprep.subr.bf16.mxu0 %v10100_v29  ;;  %v12866_v12 = vpack.c.bf16 %v12517_v7, %v12509_v47 }
 0xaa7   : > { %v12674_v10 = vsub.f32 %v15299_v39, %v3439_v43  ;;  %v10102_v43 = vpack.c.bf16 %v3627_v45, %v3625_v22  ;;  %v15307_v45 = vld [vmem:[#allocation22_spill] sm:$0xff] }
 0xaa8   : > { %v3476_v42 = vsub.f32 %v15301_v49, %v3440_v25  ;;  %v3394_v52 = vpop.f32.mrb[110].mxu1  ;;  %v15306_v25 = vld [vmem:[#allocation12_spill] sm:$0xff]  ;;  %v3630_v29 = vld [vmem:[%s11002_s15 + $0x48] sm:$0xff] }
 0xaa9   : > { %15300 = vst [vmem:[#allocation9_spill] sm:$0xff] %v12674_v10  ;;  %3511 = vst [vmem:[%s11002_s15 + $0xe0] sm:$0xff] %v12674_v10  ;;  %v3441_v35 = vmul.f32 0.05, %v3394_v52  ;;  %v3396_v23 = vpop.f32.mrb[111].mxu1  ;;  %v12686_v0 = vld [vmem:[%s11002_s15 + $0xc8] sm:$0xff]  ;;  %10103 = vmatpush1.bf16.msra.mxu0 %v10102_v43 }
 0xaaa   : > { %15303 = vst [vmem:[#allocation21_spill] sm:$0xff] %v12686_v0  ;;  %3512 = vst.msk [vmem:[%s11002_s15 + $0xe8] sm:$0xff] %vm338_vm0, %v3476_v42  ;;  %v3442_v60 = vmul.f32 0.05, %v3396_v23  ;;  %v10116_v44 = vpack.c.bf16 %v12686_v0, %v12683_v36  ;;  %v15309_v23 = vld [vmem:[#allocation24_spill] sm:$0xff]  ;;  %v15313_v0 = vld [vmem:[#allocation26_spill] sm:$0xff] }
 0xaab   : > { %v12694_v6 = vsub.f32 %v15304_v54, %v3441_v35 }
 0xaac   : > { %v3478_v39 = vsub.f32 %v15306_v25, %v3442_v60  ;;  %v3400_v49 = vpop.f32.mrb[112].mxu1  ;;  %10117 = vmatprep.subr.bf16.mxu1 %v10116_v44  ;;  %v3631_v44 = vld [vmem:[%s11002_s15 + $0x50] sm:$0xff]  ;;  %v3632_v25 = vld [vmem:[%s11002_s15 + $0x58] sm:$0xff] }
 0xaad   : > { %15305 = vst [vmem:[#allocation8_spill] sm:$0xff] %v12694_v6  ;;  %3513 = vst [vmem:[%s11002_s15 + $0xf0] sm:$0xff] %v12694_v6  ;;  %v3443_v42 = vmul.f32 0.05, %v3400_v49  ;;  %v3402_v52 = vpop.f32.mrb[113].mxu1  ;;  %10119 = vmatpush1.bf16.msra.mxu1 %v10118_v58  ;;  %v12713_v43 = vld [vmem:[%s11002_s15 + $0xd8] sm:$0xff]  ;;  %v10104_v49 = vpack.c.bf16 %v3632_v25, %v3630_v29 }
 0xaae   : > { %3514 = vst.msk [vmem:[%s11002_s15 + $0xf8] sm:$0xff] %vm338_vm0, %v3478_v39  ;;  %v3444_v16 = vmul.f32 0.05, %v3402_v52  ;;  %15310 = vst [vmem:[#allocation20_spill] sm:$0xff] %v12713_v43  ;;  %v3629_v52 = vld [vmem:[%s11002_s15 + $0x40] sm:$0xff]  ;;  %v3635_v29 = vld [vmem:[%s11002_s15 + $0x70] sm:$0xff] }
 0xaaf   : > { %v12704_v35 = vsub.f32 %v15307_v45, %v3443_v42  ;;  %10105 = vmatprep.subr.bf16.mxu0 %v10104_v49 }
 0xab0   : > { %v3480_v33 = vsub.f32 %v15309_v23, %v3444_v16  ;;  %v3406_v60 = vpop.f32.mrb[114].mxu1  ;;  %v15312_v16 = vld [vmem:[#allocation25_spill] sm:$0xff]  ;;  %v10106_v23 = vpack.c.bf16 %v3631_v44, %v3629_v52 }
 0xab1   : > { %15308 = vst [vmem:[#allocation11_spill] sm:$0xff] %v12704_v35  ;;  %3515 = vst [vmem:[%s11002_s15 + $0x100] sm:$0xff] %v12704_v35  ;;  %v3445_v22 = vmul.f32 0.05, %v3406_v60  ;;  %v3408_v54 = vpop.f32.mrb[115].mxu1  ;;  %v12716_v58 = vld [vmem:[%s11002_s15 + $0xe8] sm:$0xff]  ;;  %v10122_v60 = vpack.c.bf16 %v12674_v10, %v12664_v51  ;;  %v12848_v10 = vpack.c.bf16 %v12501_v27, %v12493_v24 }
 0xab2   : > { %15311 = vst [vmem:[#allocation23_spill] sm:$0xff] %v12716_v58  ;;  %3516 = vst.msk [vmem:[%s11002_s15 + $0x108] sm:$0xff] %vm338_vm0, %v3480_v33  ;;  %v3446_v39 = vmul.f32 0.05, %v3408_v54  ;;  %v10120_v42 = vpack.c.bf16 %v12716_v58, %v12713_v43  ;;  %10107 = vmatpush1.bf16.msra.mxu0 %v10106_v23  ;;  %v3634_v33 = vld [vmem:[%s11002_s15 + $0x68] sm:$0xff]  ;;  %v3636_v54 = vld [vmem:[%s11002_s15 + $0x78] sm:$0xff] }
 0xab3   : > { %v3481_v45 = vsub.f32 %v15312_v16, %v3445_v22  ;;  %v12752_v16 = vld [vmem:[%s11057_s10 + $0x8] sm:$0xff]  ;;  %v12851_v43 = vld [vmem:[%s11057_s10 + $0x58] sm:$0xff]  ;;  %v12858_v51 = vld [vmem:[%s11057_s10 + $0x50] sm:$0xff] }
 0xab4   : > { %v3482_v31 = vsub.f32 %v15313_v0, %v3446_v39  ;;  %10121 = vmatprep.subr.bf16.mxu1 %v10120_v42  ;;  %v10108_v0 = vpack.c.bf16 %v3636_v54, %v3634_v33  ;;  %v3633_v39 = vld [vmem:[%s11002_s15 + $0x60] sm:$0xff]  ;;  %v3638_v42 = vld [vmem:[%s11002_s15 + $0x88] sm:$0x1]  ;;  %v12862_v36 = vpack.c.bf16 %v12851_v43, %v12858_v51 }
 0xab5   : > { %3517 = vst [vmem:[%s11002_s15 + $0x110] sm:$0x1] %v3481_v45  ;;  %10123 = vmatpush1.bf16.msra.mxu1 %v10122_v60  ;;  %v12734_v44 = vld [vmem:[%s11002_s15 + $0xf8] sm:$0xff]  ;;  %v10110_v49 = vpack.c.bf16 %v3635_v29, %v3633_v39  ;;  %v3637_v45 = vld [vmem:[%s11002_s15 + $0x80] sm:$0x1]  ;;  %v10687_v29 = vld [vmem:[%s11256_s18 + $0x8] sm:$0xff] }
 0xab6   : > { %3518 = vst.msk [vmem:[%s11002_s15 + $0x118] sm:$0x1] %vm355_vm1, %v3482_v31  ;;  %15314 = vst [vmem:[#allocation10_spill] sm:$0xff] %v12734_v44  ;;  %v10126_v31 = vpack.c.bf16 %v12704_v35, %v12694_v6  ;;  %10109 = vmatprep.subr.bf16.mxu0 %v10108_v0  ;;  %v12762_v60 = vld [vmem:[%s11057_s10] sm:$0xff]  ;;  %v12774_v0 = vpack.c.bf16 %v12438_v48, %v12430_v18  ;;  %v12786_v39 = vld [vmem:[%s11057_s10 + $0x10] sm:$0xff]  ;;  %v12830_v35 = vpack.c.bf16 %v12485_v41, %v12477_v26 }
 0xab7   : > { %10111 = vmatpush1.bf16.msra.mxu0 %v10110_v49  ;;  %v10686_v33 = vld [vmem:[%s11256_s18] sm:$0xff]  ;;  %v12770_v54 = vpack.c.bf16 %v12752_v16, %v12762_v60 }
 0xab8   : > { %8914 = vmatprep.subr.msk.mxu0 %vm500_vm2, %v3638_v42  ;;  %v12797_v42 = vld [vmem:[%s11057_s10 + $0x28] sm:$0xff]  ;;  %v12840_v6 = vld [vmem:[%s11057_s10 + $0x40] sm:$0xff] }
 0xab9   : > { %v12737_v22 = vld [vmem:[%s11002_s15 + $0x108] sm:$0xff] }
 0xaba   : > { %15315 = vst [vmem:[#allocation12_spill] sm:$0xff] %v12737_v22  ;;  %v10124_v25 = vpack.c.bf16 %v12737_v22, %v12734_v44  ;;  %v12833_v44 = vld [vmem:[%s11057_s10 + $0x48] sm:$0xff] }
 0xabb   : > { %8915 = vmatpush1.msk.msra.mxu0 %vm500_vm2, %v3637_v45  ;;  %v12804_v45 = vld [vmem:[%s11057_s10 + $0x20] sm:$0xff]  ;;  %v12844_v58 = vpack.c.bf16 %v12833_v44, %v12840_v6 }
 0xabc   : > { %10125 = vmatprep.subr.bf16.mxu1 %v10124_v25  ;;  %v12756_v23 = vld [vmem:[%s11002_s15 + $0x110] sm:$0x1]  ;;  %8916 = vmatmul.mubr.msk.f32.vlgmr.msra.gmra.mrb[116].mxu0 %vm496_vm3, %v10686_v33  ;;  %v12779_v25 = vld [vmem:[%s11057_s10 + $0x18] sm:$0xff]  ;;  %v12808_v33 = vpack.c.bf16 %v12797_v42, %v12804_v45 }
 0xabd   : > { %10127 = vmatpush1.bf16.msra.mxu1 %v10126_v31  ;;  %v12746_v52 = vld [vmem:[%s11002_s15 + $0x118] sm:$0x1]  ;;  %15317 = vst [vmem:[#allocation24_spill] sm:$0xff] %v12756_v23  ;;  %10128 = vmatprep.subr.bf16.mxu0 %v15176_v30  ;;  %v12790_v49 = vpack.c.bf16 %v12779_v25, %v12786_v39  ;;  %v12794_v31 = vpack.c.bf16 %v12453_v34, %v12445_v50 }
 0xabe   : > { %15316 = vst [vmem:[#allocation22_spill] sm:$0xff] %v12746_v52  ;;  %8917 = vmatprep.subr.msk.mxu1 %vm500_vm2, %v12746_v52  ;;  %10130 = vmatpush1.bf16.msra.mxu0 %v12770_v54  ;;  %v12815_v52 = vld [vmem:[%s11057_s10 + $0x38] sm:$0xff] }
 0xabf   : > { %10131 = vmatprep.subr.bf16.mxu0 %v15176_v30 }
 0xac1   : > { %8918 = vmatpush1.msk.msra.mxu1 %vm500_vm2, %v12756_v23  ;;  %v12822_v23 = vld [vmem:[%s11057_s10 + $0x30] sm:$0xff] }
 0xac2   : > { %8919 = vmatmul.mubr.msk.f32.vlgmr.msra.gmra.mrb[116].mxu1 %vm496_vm3, %v10687_v29  ;;  %10152 = vmatprep.subr.bf16.mxu1 %v15176_v30  ;;  %v12812_v29 = vpack.c.bf16 %v12469_v40, %v12461_v55  ;;  %v12826_v22 = vpack.c.bf16 %v12815_v52, %v12822_v23 }
 0xac3   : > { %10154 = vmatpush1.bf16.msra.mxu1 %v12774_v0  ;;  %10133 = vmatpush1.bf16.msra.mxu0 %v12790_v49 }
 0xac4   : > { %10155 = vmatprep.subr.bf16.mxu1 %v15176_v30  ;;  %10134 = vmatprep.subr.bf16.mxu0 %v15176_v30 }
 0xac7   : > { %10157 = vmatpush1.bf16.msra.mxu1 %v12794_v31  ;;  %10136 = vmatpush1.bf16.msra.mxu0 %v12808_v33 }
 0xac8   : > { %10158 = vmatprep.subr.bf16.mxu1 %v15176_v30  ;;  %10137 = vmatprep.subr.bf16.mxu0 %v15176_v30 }
 0xacb   : > { %10160 = vmatpush1.bf16.msra.mxu1 %v12812_v29  ;;  %10139 = vmatpush1.bf16.msra.mxu0 %v12826_v22 }
 0xacc   : > { %10161 = vmatprep.subr.bf16.mxu1 %v15176_v30  ;;  %10140 = vmatprep.subr.bf16.mxu0 %v15176_v30 }
 0xacf   : > { %10163 = vmatpush1.bf16.msra.mxu1 %v12830_v35  ;;  %10142 = vmatpush1.bf16.msra.mxu0 %v12844_v58 }
 0xad0   : > { %10164 = vmatprep.subr.bf16.mxu1 %v15176_v30  ;;  %10143 = vmatprep.subr.bf16.mxu0 %v15176_v30 }
 0xad3   : > { %10166 = vmatpush1.bf16.msra.mxu1 %v12848_v10  ;;  %10145 = vmatpush1.bf16.msra.mxu0 %v12862_v36 }
 0xad4   : > { %10167 = vmatprep.subr.bf16.mxu1 %v15176_v30  ;;  %10146 = vmatprep.subr.bf16.mxu0 %v15176_v30 }
 0xad7   : > { %10169 = vmatpush1.bf16.msra.mxu1 %v12866_v12  ;;  %10148 = vmatpush1.bf16.msra.mxu0 %v12880_v32 }
 0xad8   : > { %10170 = vmatprep.subr.bf16.mxu1 %v15176_v30  ;;  %10149 = vmatprep.subr.bf16.mxu0 %v15176_v30 }
 0xadb   : > { %10172 = vmatpush1.bf16.msra.mxu1 %v12884_v62  ;;  %10151 = vmatpush1.bf16.msra.mxu0 %v12898_v17 }
 0xadc   : > { %10173 = vmatprep.subr.bf16.mxu1 %v15176_v30  ;;  %3891 = vmatprep.subr.mxu0 %v15171_v15 }
 0xadf   : > { %10175 = vmatpush1.bf16.msra.mxu1 %v12902_v14  ;;  %8920 = vmatpush1.msk.msra.mxu0 %vm500_vm2, %v12909_v11 }
 0xae0   : > { %3967 = vmatprep.subr.mxu1 %v15171_v15  ;;  %9522 = vmatprep.subr.mxu0 %v15171_v15 }
 0xae3   : > { %8923 = vmatpush1.msk.msra.mxu1 %vm500_vm2, %v12912_v57 }
 0xae4   : > { %9575 = vmatprep.subr.mxu1 %v15171_v15 }
 0xb8f   : > { %v12920_v46 = vpop.f32.mrb[116].mxu0 }
 0xb90   : > { %v12924_v5 = vpop.f32.mrb[117].mxu0  ;;  %vm3845_vm5 = vcmp.gt.f32.partialorder %v12920_v46, 0.0 }
 0xb91   : > { %vm3846_vm15 = vcmp.gt.f32.partialorder %v12924_v5, 0.0 }
 0xb92   : > { %v3850_v38 = vsel %vm3846_vm15, %v12924_v5, 0.0 }
 0xb93   : > { %8921 = vmatprep.mubr.msk.f32.mxu0 %vm338_vm0, %v3850_v38 }
 0xb94   : > { %8922 = vmatmul.mubr.msk.f32.vlgmr.msra.gmra.mrb[118].mxu0 %vm3845_vm5, %v12920_v46 }
 0xb95   : > { %v12922_v53 = vpop.f32.mrb[116].mxu1  ;;  %9524 = vmatprep.mubr.msk.f32.mxu0 %vm10820_vm8, %v15171_v15 }
 0xb96   : > { %15318 = vst [vmem:[#allocation25_spill] sm:$0xff] %v12922_v53  ;;  %v12926_v1 = vpop.f32.mrb[117].mxu1  ;;  %vm3847_vm14 = vcmp.gt.f32.partialorder %v12922_v53, 0.0 }
 0xb97   : > { %15319 = vst [vmem:[#allocation26_spill] sm:$0xff] %v12926_v1  ;;  %vm3848_vm4 = vcmp.gt.f32.partialorder %v12926_v1, 0.0 }
 0xb98   : > { %v3852_v63 = vsel %vm3848_vm4, %v12926_v1, 0.0 }
 0xb99   : > { %8924 = vmatprep.mubr.msk.f32.mxu1 %vm338_vm0, %v3852_v63 }
 0xb9a   : > { %8925 = vmatmul.mubr.msk.f32.vlgmr.msra.gmra.mrb[118].mxu1 %vm3847_vm14, %v12922_v53 }
 0xb9b   : > { %9577 = vmatprep.mubr.msk.f32.mxu1 %vm10820_vm8, %v15171_v15 }
 0xc67   : > { %v3925_v1 = vpop.f32.mrb[118].mxu0 }
 0xc68   : > { %4005 = vmax.xlane.f32.xlu0 %v3925_v1  ;;  %v3927_v59 = vpop.f32.mrb[119].mxu0 }
 0xc6d   : > { %v4001_v28 = vpop.f32.mrb[118].mxu1 }
 0xc6e   : > { %4007 = vmax.xlane.f32.xlu1 %v4001_v28  ;;  %v4003_v7 = vpop.f32.mrb[119].mxu1 }
 0xc6f   : > { %v3849_v7 = vsel %vm3845_vm5, %v12920_v46, 0.0 }
 0xca1   : > { %4059 = vxpose.xlu1.b32.start.end [1/1] (short) (narrow) %v3850_v38, 8 }
 0xca5   : > { %4324 = vxpose.xlu1.b32.start.end [1/1] (short) (narrow) %v3852_v63, 8 }
 0xcf5   : > { %v4006_v56 = vpop.xlane.xlu0 %4005 }
 0xcf6   : > { %v4009_v27 = vsub.f32 %v3925_v1, %v4006_v56  ;;  %v3851_v56 = vsel %vm3847_vm14, %v12922_v53, 0.0  ;;  %v10689_v1 = vld [vmem:[%s11502_s17 + $0x8] sm:$0xff] }
 0xcf8   : > { %v4011_v24 = vmul.f32 1.442695, %v4009_v27 }
 0xcfa   : > { %10622 = vpow2.f32 %v4011_v24 }
 0xcfb   : > { %v4008_v47 = vpop.xlane.xlu1 %4007 }
 0xcfc   : > { %v4010_v4 = vsub.f32 %v4001_v28, %v4008_v47  ;;  %v10688_v47 = vld [vmem:[%s11502_s17] sm:$0xff] }
 0xcfe   : > { %v4013_v3 = vmul.f32 1.442695, %v4010_v4 }
 0xd00   : > { %10624 = vpow2.f32 %v4013_v3 }
 0xd04   : > { %v10623_v41 = vpop.eup %10622 }
 0xd05   : > { %4015 = vadd.xlane.f32.xlu0 %v10623_v41 }
 0xd0a   : > { %v10625_v61 = vpop.eup %10624 }
 0xd0b   : > { %4017 = vadd.xlane.f32.xlu0 %v10625_v61 }
 0xd38   : > { %4027 = vxpose.xlu0.b32.start.end [1/1] (short) %v3849_v7, 128 }
 0xd75   : > { %4292 = vxpose.xlu0.b32.start.end [1/1] (short) %v3851_v56, 128 }
 0xd92   : > { %v4016_v27 = vpop.xlane.xlu0 %4015 }
 0xd93   : > { %10626 = vrcp.f32 %v4016_v27 }
 0xd98   : > { %v4018_v24 = vpop.xlane.xlu0 %4017 }
 0xd99   : > { %10628 = vrcp.f32 %v4018_v24 }
 0xd9d   : > { %v10627_v3 = vpop.eup %10626 }
 0xd9e   : > { %v4021_v4 = vmul.f32 %v10627_v3, %v10623_v41 }
 0xda0   : > { %v4023_v59 = vsub.f32 %v4021_v4, %v10688_v47 }
 0xda2   : > { %v12957_v63 = vmul.f32 0.125, %v4023_v59 }
 0xda3   : > { %v10629_v28 = vpop.eup %10628 }
 0xda4   : > { %v4022_v38 = vmul.f32 %v10629_v28, %v10625_v61  ;;  %9523 = vmatpush3.msra.mxu0 %v12957_v63  ;;  %v4075_v28 = vpop.trf.xlu1 }
 0xda5   : > { %10176 = vmatprep.subr.bf16.mxu0 %v15176_v30 }
 0xda6   : > { %v4024_v7 = vsub.f32 %v4022_v38, %v10689_v1 }
 0xda8   : > { %v12962_v53 = vmul.f32 0.125, %v4024_v7 }
 0xdaa   : > { %9576 = vmatpush3.msra.mxu1 %v12962_v53 }
 0xdab   : > { %10200 = vmatprep.subr.bf16.mxu1 %v15176_v30 }
 0xdb8   : > { %v4043_v56 = vpop.trf.xlu0 }
 0xdb9   : > { %9525 = vmatmul.mubr.msk.f32.vlgmr.msra.gmra.mrb[120].mxu0 %vm904_vm9, %v4043_v56 }
 0xdba   : > { %10178 = vmatpush1.bf16.xpose.msra.mxu0 %v12770_v54  ;;  %9527 = vmatprep.mubr.msk.f32.mxu0 %vm10820_vm8, %v15171_v15 }
 0xdbb   : > { %10179 = vmatprep.subr.bf16.mxu0 %v15176_v30 }
 0xdbc   : > { %v4044_v61 = vpop.trf.xlu0 }
 0xdbd   : > { %9528 = vmatmul.mubr.msk.f32.gmra.mrb[122].mxu0 %vm904_vm9, %v4044_v61 }
 0xdbe   : > { %9530 = vmatprep.mubr.msk.f32.mxu0 %vm10820_vm8, %v15171_v15 }
 0xdc0   : > { %v4045_v41 = vpop.trf.xlu0 }
 0xdc1   : > { %9531 = vmatmul.mubr.msk.f32.gmra.mrb[124].mxu0 %vm904_vm9, %v4045_v41 }
 0xdc2   : > { %10181 = vmatpush1.bf16.xpose.msra.mxu0 %v12790_v49  ;;  %9533 = vmatprep.mubr.msk.f32.mxu0 %vm10820_vm8, %v15171_v15 }
 0xdc3   : > { %10182 = vmatprep.subr.bf16.mxu0 %v15176_v30 }
 0xdc4   : > { %v4046_v54 = vpop.trf.xlu0 }
 0xdc5   : > { %9534 = vmatmul.mubr.msk.f32.gmra.mrb[126].mxu0 %vm904_vm9, %v4046_v54 }
 0xdc6   : > { %9536 = vmatprep.mubr.msk.f32.mxu0 %vm10820_vm8, %v15171_v15 }
 0xdc8   : > { %v4047_v27 = vpop.trf.xlu0 }
 0xdc9   : > { %9537 = vmatmul.mubr.msk.f32.gmra.mrb[128].mxu0 %vm904_vm9, %v4047_v27  ;;  %v4340_v27 = vpop.trf.xlu1 }
 0xdca   : > { %10184 = vmatpush1.bf16.xpose.msra.mxu0 %v12808_v33  ;;  %9539 = vmatprep.mubr.msk.f32.mxu0 %vm10820_vm8, %v15171_v15 }
 0xdcb   : > { %10185 = vmatprep.subr.bf16.mxu0 %v15176_v30 }
 0xdcc   : > { %v4048_v49 = vpop.trf.xlu0 }
 0xdcd   : > { %9540 = vmatmul.mubr.msk.f32.gmra.mrb[130].mxu0 %vm904_vm9, %v4048_v49 }
 0xdce   : > { %9542 = vmatprep.mubr.msk.f32.mxu0 %vm10820_vm8, %v15171_v15 }
 0xdd0   : > { %v4049_v24 = vpop.trf.xlu0 }
 0xdd1   : > { %9543 = vmatmul.mubr.msk.f32.gmra.mrb[132].mxu0 %vm904_vm9, %v4049_v24 }
 0xdd2   : > { %10187 = vmatpush1.bf16.xpose.msra.mxu0 %v12826_v22  ;;  %9545 = vmatprep.mubr.msk.f32.mxu0 %vm10820_vm8, %v15171_v15 }
 0xdd3   : > { %10188 = vmatprep.subr.bf16.mxu0 %v15176_v30 }
 0xdd4   : > { %v4050_v33 = vpop.trf.xlu0 }
 0xdd5   : > { %9546 = vmatmul.mubr.msk.f32.gmra.mrb[134].mxu0 %vm904_vm9, %v4050_v33 }
 0xdd6   : > { %9548 = vmatprep.mubr.msk.f32.mxu0 %vm10820_vm8, %v15171_v15 }
 0xdd8   : > { %v4051_v3 = vpop.trf.xlu0 }
 0xdd9   : > { %9549 = vmatmul.mubr.msk.f32.gmra.mrb[136].mxu0 %vm904_vm9, %v4051_v3 }
 0xdda   : > { %10190 = vmatpush1.bf16.xpose.msra.mxu0 %v12844_v58  ;;  %9551 = vmatprep.mubr.msk.f32.mxu0 %vm10820_vm8, %v15171_v15 }
 0xddb   : > { %10191 = vmatprep.subr.bf16.mxu0 %v15176_v30 }
 0xddc   : > { %v4052_v22 = vpop.trf.xlu0 }
 0xddd   : > { %9552 = vmatmul.mubr.msk.f32.gmra.mrb[138].mxu0 %vm904_vm9, %v4052_v22 }
 0xdde   : > { %9554 = vmatprep.mubr.msk.f32.mxu0 %vm10820_vm8, %v15171_v15 }
 0xde0   : > { %v4053_v4 = vpop.trf.xlu0 }
 0xde1   : > { %9555 = vmatmul.mubr.msk.f32.gmra.mrb[140].mxu0 %vm904_vm9, %v4053_v4 }
 0xde2   : > { %10193 = vmatpush1.bf16.xpose.msra.mxu0 %v12862_v36  ;;  %9557 = vmatprep.mubr.msk.f32.mxu0 %vm10820_vm8, %v15171_v15 }
 0xde3   : > { %10194 = vmatprep.subr.bf16.mxu0 %v15176_v30 }
 0xde4   : > { %v4054_v58 = vpop.trf.xlu0 }
 0xde5   : > { %9558 = vmatmul.mubr.msk.f32.gmra.mrb[142].mxu0 %vm904_vm9, %v4054_v58 }
 0xde6   : > { %9560 = vmatprep.mubr.msk.f32.mxu0 %vm10820_vm8, %v15171_v15 }
 0xde8   : > { %v4055_v47 = vpop.trf.xlu0 }
 0xde9   : > { %9561 = vmatmul.mubr.msk.f32.gmra.mrb[144].mxu0 %vm904_vm9, %v4055_v47 }
 0xdea   : > { %10196 = vmatpush1.bf16.xpose.msra.mxu0 %v12880_v32  ;;  %9563 = vmatprep.mubr.msk.f32.mxu0 %vm10820_vm8, %v15171_v15 }
 0xdeb   : > { %10197 = vmatprep.subr.bf16.mxu0 %v15176_v30 }
 0xdec   : > { %v4056_v36 = vpop.trf.xlu0 }
 0xded   : > { %9564 = vmatmul.mubr.msk.f32.gmra.mrb[146].mxu0 %vm904_vm9, %v4056_v36 }
 0xdee   : > { %9566 = vmatprep.mubr.msk.f32.mxu0 %vm10820_vm8, %v15171_v15 }
 0xdf0   : > { %v4057_v59 = vpop.trf.xlu0 }
 0xdf1   : > { %9567 = vmatmul.mubr.msk.f32.gmra.mrb[148].mxu0 %vm904_vm9, %v4057_v59 }
 0xdf2   : > { %10199 = vmatpush1.bf16.xpose.msra.mxu0 %v12898_v17  ;;  %9569 = vmatprep.mubr.msk.f32.mxu0 %vm10820_vm8, %v15171_v15 }
 0xdf3   : > { %4589 = vmatprep.subr.mxu0 %v15171_v15 }
 0xdf4   : > { %v4058_v32 = vpop.trf.xlu0 }
 0xdf5   : > { %9570 = vmatmul.mubr.msk.f32.gmra.mrb[150].mxu0 %vm904_vm9, %v4058_v32 }
 0xdf6   : > { %9572 = vmatprep.mubr.msk.f32.mxu0 %vm10820_vm8, %v15171_v15 }
 0xdf8   : > { %v4308_v38 = vpop.trf.xlu0 }
 0xdf9   : > { %9573 = vmatmul.mubr.msk.f32.gmra.mrb[152].mxu0 %vm904_vm9, %v4075_v28  ;;  %9578 = vmatmul.mubr.msk.f32.vlgmr.msra.gmra.mrb[120].mxu1 %vm904_vm9, %v4308_v38 }
 0xdfa   : > { %4590 = vmatpush1.xpose.msra.mxu0 %v12909_v11  ;;  %10202 = vmatpush1.bf16.xpose.msra.mxu1 %v12774_v0 }
 0xdfb   : > { %9580 = vmatprep.mubr.msk.f32.mxu1 %vm10820_vm8, %v15171_v15  ;;  %4621 = vmatprep.mubr.f32.mxu0 %v15171_v15 }
 0xdfc   : > { %v4309_v17 = vpop.trf.xlu0  ;;  %10203 = vmatprep.subr.bf16.mxu1 %v15176_v30 }
 0xdfd   : > { %9581 = vmatmul.mubr.msk.f32.gmra.mrb[122].mxu1 %vm904_vm9, %v4309_v17  ;;  %4622 = vmatmul.mubr.f32.vlgmr.msra.gmra.mrb[154].mxu0 %v12957_v63 }
 0xdfe   : > { %9583 = vmatprep.mubr.msk.f32.mxu1 %vm10820_vm8, %v15171_v15  ;;  %4771 = vmatprep.mubr.f32.mxu0 %v15171_v15 }
 0xe00   : > { %v4310_v1 = vpop.trf.xlu0 }
 0xe01   : > { %9584 = vmatmul.mubr.msk.f32.gmra.mrb[124].mxu1 %vm904_vm9, %v4310_v1 }
 0xe02   : > { %10205 = vmatpush1.bf16.xpose.msra.mxu1 %v12794_v31  ;;  %9586 = vmatprep.mubr.msk.f32.mxu1 %vm10820_vm8, %v15171_v15 }
 0xe03   : > { %10206 = vmatprep.subr.bf16.mxu1 %v15176_v30 }
 0xe04   : > { %v4311_v0 = vpop.trf.xlu0 }
 0xe05   : > { %9587 = vmatmul.mubr.msk.f32.gmra.mrb[126].mxu1 %vm904_vm9, %v4311_v0 }
 0xe06   : > { %9589 = vmatprep.mubr.msk.f32.mxu1 %vm10820_vm8, %v15171_v15 }
 0xe08   : > { %v4312_v63 = vpop.trf.xlu0 }
 0xe09   : > { %9590 = vmatmul.mubr.msk.f32.gmra.mrb[128].mxu1 %vm904_vm9, %v4312_v63 }
 0xe0a   : > { %10208 = vmatpush1.bf16.xpose.msra.mxu1 %v12812_v29  ;;  %9592 = vmatprep.mubr.msk.f32.mxu1 %vm10820_vm8, %v15171_v15 }
 0xe0b   : > { %10209 = vmatprep.subr.bf16.mxu1 %v15176_v30 }
 0xe0c   : > { %v4313_v31 = vpop.trf.xlu0 }
 0xe0d   : > { %9593 = vmatmul.mubr.msk.f32.gmra.mrb[130].mxu1 %vm904_vm9, %v4313_v31 }
 0xe0e   : > { %9595 = vmatprep.mubr.msk.f32.mxu1 %vm10820_vm8, %v15171_v15 }
 0xe10   : > { %v4314_v7 = vpop.trf.xlu0 }
 0xe11   : > { %9596 = vmatmul.mubr.msk.f32.gmra.mrb[132].mxu1 %vm904_vm9, %v4314_v7 }
 0xe12   : > { %10211 = vmatpush1.bf16.xpose.msra.mxu1 %v12830_v35  ;;  %9598 = vmatprep.mubr.msk.f32.mxu1 %vm10820_vm8, %v15171_v15 }
 0xe13   : > { %10212 = vmatprep.subr.bf16.mxu1 %v15176_v30 }
 0xe14   : > { %v4315_v29 = vpop.trf.xlu0 }
 0xe15   : > { %9599 = vmatmul.mubr.msk.f32.gmra.mrb[134].mxu1 %vm904_vm9, %v4315_v29 }
 0xe16   : > { %9601 = vmatprep.mubr.msk.f32.mxu1 %vm10820_vm8, %v15171_v15 }
 0xe18   : > { %v4316_v56 = vpop.trf.xlu0 }
 0xe19   : > { %9602 = vmatmul.mubr.msk.f32.gmra.mrb[136].mxu1 %vm904_vm9, %v4316_v56 }
 0xe1a   : > { %10214 = vmatpush1.bf16.xpose.msra.mxu1 %v12848_v10  ;;  %9604 = vmatprep.mubr.msk.f32.mxu1 %vm10820_vm8, %v15171_v15 }
 0xe1b   : > { %10215 = vmatprep.subr.bf16.mxu1 %v15176_v30 }
 0xe1c   : > { %v4317_v35 = vpop.trf.xlu0 }
 0xe1d   : > { %9605 = vmatmul.mubr.msk.f32.gmra.mrb[138].mxu1 %vm904_vm9, %v4317_v35 }
 0xe1e   : > { %9607 = vmatprep.mubr.msk.f32.mxu1 %vm10820_vm8, %v15171_v15 }
 0xe20   : > { %v4318_v61 = vpop.trf.xlu0 }
 0xe21   : > { %9608 = vmatmul.mubr.msk.f32.gmra.mrb[140].mxu1 %vm904_vm9, %v4318_v61 }
 0xe22   : > { %10217 = vmatpush1.bf16.xpose.msra.mxu1 %v12866_v12  ;;  %9610 = vmatprep.mubr.msk.f32.mxu1 %vm10820_vm8, %v15171_v15 }
 0xe23   : > { %10218 = vmatprep.subr.bf16.mxu1 %v15176_v30 }
 0xe24   : > { %v4319_v10 = vpop.trf.xlu0 }
 0xe25   : > { %9611 = vmatmul.mubr.msk.f32.gmra.mrb[142].mxu1 %vm904_vm9, %v4319_v10 }
 0xe26   : > { %9613 = vmatprep.mubr.msk.f32.mxu1 %vm10820_vm8, %v15171_v15 }
 0xe28   : > { %v4320_v41 = vpop.trf.xlu0 }
 0xe29   : > { %9614 = vmatmul.mubr.msk.f32.gmra.mrb[144].mxu1 %vm904_vm9, %v4320_v41 }
 0xe2a   : > { %10220 = vmatpush1.bf16.xpose.msra.mxu1 %v12884_v62  ;;  %9616 = vmatprep.mubr.msk.f32.mxu1 %vm10820_vm8, %v15171_v15 }
 0xe2b   : > { %10221 = vmatprep.subr.bf16.mxu1 %v15176_v30 }
 0xe2c   : > { %v4321_v12 = vpop.trf.xlu0 }
 0xe2d   : > { %9617 = vmatmul.mubr.msk.f32.gmra.mrb[146].mxu1 %vm904_vm9, %v4321_v12 }
 0xe2e   : > { %9619 = vmatprep.mubr.msk.f32.mxu1 %vm10820_vm8, %v15171_v15 }
 0xe30   : > { %v4322_v54 = vpop.trf.xlu0 }
 0xe31   : > { %9620 = vmatmul.mubr.msk.f32.gmra.mrb[148].mxu1 %vm904_vm9, %v4322_v54 }
 0xe32   : > { %10223 = vmatpush1.bf16.xpose.msra.mxu1 %v12902_v14  ;;  %9622 = vmatprep.mubr.msk.f32.mxu1 %vm10820_vm8, %v15171_v15 }
 0xe33   : > { %4660 = vmatprep.subr.mxu1 %v15171_v15 }
 0xe34   : > { %v4323_v62 = vpop.trf.xlu0 }
 0xe35   : > { %9623 = vmatmul.mubr.msk.f32.gmra.mrb[150].mxu1 %vm904_vm9, %v4323_v62 }
 0xe36   : > { %9625 = vmatprep.mubr.msk.f32.mxu1 %vm10820_vm8, %v15171_v15 }
 0xe39   : > { %9626 = vmatmul.mubr.msk.f32.gmra.mrb[152].mxu1 %vm904_vm9, %v4340_v27 }
 0xe3a   : > { %4661 = vmatpush1.xpose.msra.mxu1 %v12912_v57  ;;  %4692 = vmatprep.mubr.f32.mxu1 %v15171_v15 }
 0xe3d   : > { %4693 = vmatmul.mubr.f32.vlgmr.msra.gmra.mrb[154].mxu1 %v12962_v53 }
 0xe3e   : > { %4890 = vmatprep.mubr.f32.mxu1 %v15171_v15 }
 0xe8c   : > { %v4208_v14 = vpop.f32.mrb[120].mxu0 }
 0xe8d   : > { %v5053_v49 = vmul.f32 0.05, %v4208_v14  ;;  %v9526_v24 = vpop.f32.mrb[121].mxu0 }
 0xe8f   : > { %v5087_v33 = vsub.f32 %v12762_v60, %v5053_v49 }
 0xe90   : > { %v4213_v3 = vpop.f32.mrb[122].mxu0 }
 0xe91   : > { %5121 = vst [vmem:[%s11057_s10] sm:$0xff] %v5087_v33  ;;  %v5054_v22 = vmul.f32 0.05, %v4213_v3  ;;  %v9529_v4 = vpop.f32.mrb[123].mxu0 }
 0xe93   : > { %v5088_v58 = vsub.f32 %v12752_v16, %v5054_v22 }
 0xe94   : > { %v4218_v47 = vpop.f32.mrb[124].mxu0 }
 0xe95   : > { %5122 = vst [vmem:[%s11057_s10 + $0x8] sm:$0xff] %v5088_v58  ;;  %v5055_v36 = vmul.f32 0.05, %v4218_v47  ;;  %v9532_v53 = vpop.f32.mrb[125].mxu0 }
 0xe97   : > { %v5089_v59 = vsub.f32 %v12786_v39, %v5055_v36 }
 0xe98   : > { %v4223_v32 = vpop.f32.mrb[126].mxu0 }
 0xe99   : > { %5123 = vst [vmem:[%s11057_s10 + $0x10] sm:$0xff] %v5089_v59  ;;  %v5056_v28 = vmul.f32 0.05, %v4223_v32  ;;  %v9535_v38 = vpop.f32.mrb[127].mxu0 }
 0xe9b   : > { %v5090_v60 = vsub.f32 %v12779_v25, %v5056_v28 }
 0xe9c   : > { %v4228_v17 = vpop.f32.mrb[128].mxu0 }
 0xe9d   : > { %5124 = vst [vmem:[%s11057_s10 + $0x18] sm:$0xff] %v5090_v60  ;;  %v5057_v1 = vmul.f32 0.05, %v4228_v17  ;;  %v9538_v0 = vpop.f32.mrb[129].mxu0 }
 0xe9f   : > { %v5091_v16 = vsub.f32 %v12804_v45, %v5057_v1 }
 0xea0   : > { %v4233_v63 = vpop.f32.mrb[130].mxu0 }
 0xea1   : > { %5125 = vst [vmem:[%s11057_s10 + $0x20] sm:$0xff] %v5091_v16  ;;  %v5058_v31 = vmul.f32 0.05, %v4233_v63  ;;  %v9541_v7 = vpop.f32.mrb[131].mxu0 }
 0xea3   : > { %v5092_v39 = vsub.f32 %v12797_v42, %v5058_v31 }
 0xea4   : > { %v4238_v29 = vpop.f32.mrb[132].mxu0 }
 0xea5   : > { %5126 = vst [vmem:[%s11057_s10 + $0x28] sm:$0xff] %v5092_v39  ;;  %v5059_v56 = vmul.f32 0.05, %v4238_v29  ;;  %v9544_v35 = vpop.f32.mrb[133].mxu0 }
 0xea7   : > { %v5093_v25 = vsub.f32 %v12822_v23, %v5059_v56 }
 0xea8   : > { %v4243_v61 = vpop.f32.mrb[134].mxu0 }
 0xea9   : > { %5127 = vst [vmem:[%s11057_s10 + $0x30] sm:$0xff] %v5093_v25  ;;  %v5060_v10 = vmul.f32 0.05, %v4243_v61  ;;  %v9547_v41 = vpop.f32.mrb[135].mxu0 }
 0xeab   : > { %v5094_v45 = vsub.f32 %v12815_v52, %v5060_v10 }
 0xeac   : > { %v4248_v12 = vpop.f32.mrb[136].mxu0 }
 0xead   : > { %5128 = vst [vmem:[%s11057_s10 + $0x38] sm:$0xff] %v5094_v45  ;;  %v5061_v54 = vmul.f32 0.05, %v4248_v12  ;;  %v9550_v62 = vpop.f32.mrb[137].mxu0 }
 0xeaf   : > { %v5095_v42 = vsub.f32 %v12840_v6, %v5061_v54 }
 0xeb0   : > { %v4253_v27 = vpop.f32.mrb[138].mxu0 }
 0xeb1   : > { %5129 = vst [vmem:[%s11057_s10 + $0x40] sm:$0xff] %v5095_v42  ;;  %v5062_v14 = vmul.f32 0.05, %v4253_v27  ;;  %v9553_v49 = vpop.f32.mrb[139].mxu0 }
 0xeb3   : > { %v5096_v23 = vsub.f32 %v12833_v44, %v5062_v14 }
 0xeb4   : > { %v4258_v24 = vpop.f32.mrb[140].mxu0 }
 0xeb5   : > { %5130 = vst [vmem:[%s11057_s10 + $0x48] sm:$0xff] %v5096_v23  ;;  %v5063_v33 = vmul.f32 0.05, %v4258_v24  ;;  %v9556_v3 = vpop.f32.mrb[141].mxu0 }
 0xeb7   : > { %v5097_v52 = vsub.f32 %v12858_v51, %v5063_v33 }
 0xeb8   : > { %v4263_v22 = vpop.f32.mrb[142].mxu0 }
 0xeb9   : > { %5131 = vst [vmem:[%s11057_s10 + $0x50] sm:$0xff] %v5097_v52  ;;  %v5064_v4 = vmul.f32 0.05, %v4263_v22  ;;  %v9559_v58 = vpop.f32.mrb[143].mxu0 }
 0xebb   : > { %v5098_v6 = vsub.f32 %v12851_v43, %v5064_v4  ;;  %v15320_v4 = vld [vmem:[#allocation33_spill] sm:$0xff] }
 0xebc   : > { %v4268_v47 = vpop.f32.mrb[144].mxu0 }
 0xebd   : > { %5132 = vst [vmem:[%s11057_s10 + $0x58] sm:$0xff] %v5098_v6  ;;  %v5065_v36 = vmul.f32 0.05, %v4268_v47  ;;  %v9562_v53 = vpop.f32.mrb[145].mxu0  ;;  %v15321_v47 = vld [vmem:[#allocation34_spill] sm:$0xff] }
 0xebe   : > { %v15323_v53 = vld [vmem:[#allocation35_spill] sm:$0xff] }
 0xebf   : > { %v5099_v44 = vsub.f32 %v12876_v13, %v5065_v36 }
 0xec0   : > { %v4273_v59 = vpop.f32.mrb[146].mxu0 }
 0xec1   : > { %5133 = vst [vmem:[%s11057_s10 + $0x60] sm:$0xff] %v5099_v44  ;;  %v5066_v32 = vmul.f32 0.05, %v4273_v59  ;;  %v9565_v28 = vpop.f32.mrb[147].mxu0 }
 0xec3   : > { %v5100_v51 = vsub.f32 %v12869_v2, %v5066_v32  ;;  %v15324_v32 = vld [vmem:[#allocation36_spill] sm:$0xff] }
 0xec4   : > { %v4278_v38 = vpop.f32.mrb[148].mxu0 }
 0xec5   : > { %5134 = vst [vmem:[%s11057_s10 + $0x68] sm:$0xff] %v5100_v51  ;;  %v5067_v60 = vmul.f32 0.05, %v4278_v38  ;;  %v9568_v17 = vpop.f32.mrb[149].mxu0  ;;  %v15326_v51 = vld [vmem:[#allocation37_spill] sm:$0xff] }
 0xec7   : > { %v5101_v43 = vsub.f32 %v12894_v9, %v5067_v60 }
 0xec8   : > { %v4283_v1 = vpop.f32.mrb[150].mxu0 }
 0xec9   : > { %5135 = vst [vmem:[%s11057_s10 + $0x70] sm:$0xff] %v5101_v43  ;;  %v5068_v0 = vmul.f32 0.05, %v4283_v1  ;;  %v9571_v16 = vpop.f32.mrb[151].mxu0  ;;  %v15327_v43 = vld [vmem:[#allocation38_spill] sm:$0xff] }
 0xecb   : > { %v5102_v13 = vsub.f32 %v12887_v20, %v5068_v0  ;;  %v15329_v0 = vld [vmem:[#allocation39_spill] sm:$0xff] }
 0xecc   : > { %v4288_v63 = vpop.f32.mrb[152].mxu0  ;;  %v4473_v31 = vpop.f32.mrb[120].mxu1 }
 0xecd   : > { %5136 = vst [vmem:[%s11057_s10 + $0x78] sm:$0xff] %v5102_v13  ;;  %v5069_v7 = vmul.f32 0.05, %v4288_v63  ;;  %v5070_v39 = vmul.f32 0.05, %v4473_v31  ;;  %v9579_v2 = vpop.f32.mrb[121].mxu1 }
 0xece   : > { %v9574_v29 = vpop.f32.mrb[153].mxu0  ;;  %v15330_v31 = vld [vmem:[#allocation13_spill] sm:$0xff] }
 0xecf   : > { %v5103_v56 = vsub.f32 %v12909_v11, %v5069_v7  ;;  %v13138_v9 = vsub.f32 %v12430_v18, %v5070_v39  ;;  %v15332_v39 = vld [vmem:[#allocation40_spill] sm:$0xff] }
 0xed0   : > { %v4478_v35 = vpop.f32.mrb[122].mxu1  ;;  %v4623_v25 = vpop.f32.mrb[154].mxu0 }
 0xed1   : > { %5137 = vst [vmem:[%s11057_s10 + $0x80] sm:$0x1] %v5103_v56  ;;  %5138 = vst [vmem:[%s11057_s10 + $0x88] sm:$0xff] %v13138_v9  ;;  %v5071_v61 = vmul.f32 0.05, %v4478_v35  ;;  %v9582_v20 = vpop.f32.mrb[123].mxu1 }
 0xed2   : > { %v4625_v10 = vpop.f32.mrb[155].mxu0  ;;  %v15333_v35 = vld [vmem:[#allocation14_spill] sm:$0xff] }
 0xed3   : > { %v4700_v41 = vsel %vm3846_vm15, %v4625_v10, 0.0  ;;  %v13146_v45 = vsub.f32 %v12438_v48, %v5071_v61 }
 0xed4   : > { %v4704_v12 = vmul.f32 0.0, %v4700_v41  ;;  %v4483_v11 = vpop.f32.mrb[124].mxu1  ;;  %v15335_v41 = vld [vmem:[#allocation15_spill] sm:$0xff] }
 0xed5   : > { %5139 = vst [vmem:[%s11057_s10 + $0x90] sm:$0xff] %v13146_v45  ;;  %v5072_v18 = vmul.f32 0.05, %v4483_v11  ;;  %v9585_v54 = vpop.f32.mrb[125].mxu1 }
 0xed6   : > { %4707 = vmatprep.subr.mxu0 %v4704_v12 }
 0xed7   : > { %8960 = vmatpush1.msk.msra.mxu0 %vm3845_vm5, %v4623_v25  ;;  %v13153_v62 = vsub.f32 %v12445_v50, %v5072_v18 }
 0xed8   : > { %8961 = vmatmul.mubr.msk.f32.vlgmr.msra.gmra.mrb[156].mxu0 %vm904_vm9, %v11660_v8  ;;  %v4488_v5 = vpop.f32.mrb[126].mxu1 }
 0xed9   : > { %4777 = vmatprep.mubr.f32.mxu0 %v15171_v15  ;;  %5140 = vst [vmem:[%s11057_s10 + $0x98] sm:$0xff] %v13153_v62  ;;  %v5073_v48 = vmul.f32 0.05, %v4488_v5  ;;  %v9588_v42 = vpop.f32.mrb[127].mxu1  ;;  %v15337_v5 = vld [vmem:[#allocation31_spill] sm:$0xff] }
 0xedb   : > { %v13161_v27 = vsub.f32 %v12453_v34, %v5073_v48 }
 0xedc   : > { %8962 = vmatmul.mubr.msk.f32.gmra.mrb[158].mxu0 %vm904_vm9, %v11665_v37  ;;  %v4493_v46 = vpop.f32.mrb[128].mxu1 }
 0xedd   : > { %4783 = vmatprep.mubr.f32.mxu0 %v15171_v15  ;;  %5141 = vst [vmem:[%s11057_s10 + $0xa0] sm:$0xff] %v13161_v27  ;;  %v5074_v50 = vmul.f32 0.05, %v4493_v46  ;;  %v9591_v14 = vpop.f32.mrb[129].mxu1 }
 0xede   : > { %v15339_v14 = vld [vmem:[#allocation29_spill] sm:$0xff] }
 0xedf   : > { %v13169_v49 = vsub.f32 %v12461_v55, %v5074_v50 }
 0xee0   : > { %8963 = vmatmul.mubr.msk.f32.gmra.mrb[160].mxu0 %vm904_vm9, %v11679_v19  ;;  %v4498_v23 = vpop.f32.mrb[130].mxu1 }
 0xee1   : > { %4789 = vmatprep.mubr.f32.mxu0 %v15171_v15  ;;  %5142 = vst [vmem:[%s11057_s10 + $0xa8] sm:$0xff] %v13169_v49  ;;  %v5075_v34 = vmul.f32 0.05, %v4498_v23  ;;  %v9594_v24 = vpop.f32.mrb[131].mxu1 }
 0xee3   : > { %v13177_v33 = vsub.f32 %v12469_v40, %v5075_v34 }
 0xee4   : > { %8964 = vmatmul.mubr.msk.f32.gmra.mrb[162].mxu0 %vm904_vm9, %v11695_v21  ;;  %v4503_v3 = vpop.f32.mrb[132].mxu1 }
 0xee5   : > { %4795 = vmatprep.mubr.f32.mxu0 %v15171_v15  ;;  %5143 = vst [vmem:[%s11057_s10 + $0xb0] sm:$0xff] %v13177_v33  ;;  %v5076_v55 = vmul.f32 0.05, %v4503_v3  ;;  %v9597_v52 = vpop.f32.mrb[133].mxu1 }
 0xee7   : > { %v13185_v22 = vsub.f32 %v12477_v26, %v5076_v55  ;;  %v15341_v55 = vld [vmem:[#allocation28_spill] sm:$0xff] }
 0xee8   : > { %8965 = vmatmul.mubr.msk.f32.gmra.mrb[164].mxu0 %vm904_vm9, %v15320_v4  ;;  %v4508_v58 = vpop.f32.mrb[134].mxu1 }
 0xee9   : > { %4801 = vmatprep.mubr.f32.mxu0 %v15171_v15  ;;  %5144 = vst [vmem:[%s11057_s10 + $0xb8] sm:$0xff] %v13185_v22  ;;  %v5077_v40 = vmul.f32 0.05, %v4508_v58  ;;  %v9600_v6 = vpop.f32.mrb[135].mxu1 }
 0xeeb   : > { %v13193_v36 = vsub.f32 %v15321_v47, %v5077_v40 }
 0xeec   : > { %8966 = vmatmul.mubr.msk.f32.gmra.mrb[166].mxu0 %vm904_vm9, %v15323_v53  ;;  %v4513_v44 = vpop.f32.mrb[136].mxu1 }
 0xeed   : > { %15322 = vst [vmem:[#allocation34_spill] sm:$0xff] %v13193_v36  ;;  %4807 = vmatprep.mubr.f32.mxu0 %v15171_v15  ;;  %5145 = vst [vmem:[%s11057_s10 + $0xc0] sm:$0xff] %v13193_v36  ;;  %v5078_v26 = vmul.f32 0.05, %v4513_v44  ;;  %v9603_v59 = vpop.f32.mrb[137].mxu1 }
 0xeef   : > { %v13201_v28 = vsub.f32 %v15324_v32, %v5078_v26 }
 0xef0   : > { %8967 = vmatmul.mubr.msk.f32.gmra.mrb[168].mxu0 %vm904_vm9, %v15326_v51  ;;  %v4518_v38 = vpop.f32.mrb[138].mxu1 }
 0xef1   : > { %15325 = vst [vmem:[#allocation36_spill] sm:$0xff] %v13201_v28  ;;  %4813 = vmatprep.mubr.f32.mxu0 %v15171_v15  ;;  %5146 = vst [vmem:[%s11057_s10 + $0xc8] sm:$0xff] %v13201_v28  ;;  %v5079_v60 = vmul.f32 0.05, %v4518_v38  ;;  %v9606_v17 = vpop.f32.mrb[139].mxu1 }
 0xef2   : > { %v15345_v17 = vld [vmem:[#allocation16_spill] sm:$0xff] }
 0xef3   : > { %v13209_v1 = vsub.f32 %v15327_v43, %v5079_v60  ;;  %v15346_v43 = vld [vmem:[#allocation27_spill] sm:$0xff] }
 0xef4   : > { %8968 = vmatmul.mubr.msk.f32.gmra.mrb[170].mxu0 %vm904_vm9, %v15329_v0  ;;  %v4523_v16 = vpop.f32.mrb[140].mxu1 }
 0xef5   : > { %15328 = vst [vmem:[#allocation38_spill] sm:$0xff] %v13209_v1  ;;  %4819 = vmatprep.mubr.f32.mxu0 %v15171_v15  ;;  %5147 = vst [vmem:[%s11057_s10 + $0xd0] sm:$0xff] %v13209_v1  ;;  %v5080_v13 = vmul.f32 0.05, %v4523_v16  ;;  %v9609_v63 = vpop.f32.mrb[141].mxu1  ;;  %v15348_v16 = vld [vmem:[#allocation32_spill] sm:$0xff] }
 0xef6   : > { %v15350_v63 = vld [vmem:[#allocation42_spill] sm:$0xff] }
 0xef7   : > { %v13217_v7 = vsub.f32 %v15330_v31, %v5080_v13  ;;  %v15349_v13 = vld [vmem:[#allocation30_spill] sm:$0xff]  ;;  %v15351_v31 = vld [vmem:[#allocation43_spill] sm:$0xff] }
 0xef8   : > { %8969 = vmatmul.mubr.msk.f32.gmra.mrb[172].mxu0 %vm904_vm9, %v15332_v39  ;;  %v4528_v2 = vpop.f32.mrb[142].mxu1 }
 0xef9   : > { %15331 = vst [vmem:[#allocation13_spill] sm:$0xff] %v13217_v7  ;;  %5295 = vmatprep.mubr.f32.mxu0 %v15171_v15  ;;  %5148 = vst [vmem:[%s11057_s10 + $0xd8] sm:$0xff] %v13217_v7  ;;  %v5081_v29 = vmul.f32 0.05, %v4528_v2  ;;  %v9612_v56 = vpop.f32.mrb[143].mxu1  ;;  %v15352_v2 = vld [vmem:[#allocation44_spill] sm:$0xff] }
 0xefb   : > { %v13225_v25 = vsub.f32 %v15333_v35, %v5081_v29  ;;  %v15353_v29 = vld [vmem:[#allocation45_spill] sm:$0xff] }
 0xefc   : > { %v4533_v61 = vpop.f32.mrb[144].mxu1 }
 0xefd   : > { %15334 = vst [vmem:[#allocation14_spill] sm:$0xff] %v13225_v25  ;;  %5149 = vst [vmem:[%s11057_s10 + $0xe0] sm:$0xff] %v13225_v25  ;;  %v5082_v20 = vmul.f32 0.05, %v4533_v61  ;;  %v9615_v10 = vpop.f32.mrb[145].mxu1 }
 0xefe   : > { %v10690_v10 = vld [vmem:[%s11002_s15] sm:$0xff] }
 0xeff   : > { %v13230_v12 = vsub.f32 %v15335_v41, %v5082_v20 }
 0xf00   : > { %v4538_v11 = vpop.f32.mrb[146].mxu1 }
 0xf01   : > { %15336 = vst [vmem:[#allocation15_spill] sm:$0xff] %v13230_v12  ;;  %5150 = vst [vmem:[%s11057_s10 + $0xe8] sm:$0xff] %v13230_v12  ;;  %v5083_v18 = vmul.f32 0.05, %v4538_v11  ;;  %v9618_v54 = vpop.f32.mrb[147].mxu1  ;;  %v10691_v11 = vld [vmem:[%s11002_s15 + $0x8] sm:$0xff] }
 0xf03   : > { %v13235_v48 = vsub.f32 %v15337_v5, %v5083_v18 }
 0xf04   : > { %v4543_v42 = vpop.f32.mrb[148].mxu1 }
 0xf05   : > { %15338 = vst [vmem:[#allocation31_spill] sm:$0xff] %v13235_v48  ;;  %5151 = vst [vmem:[%s11057_s10 + $0xf0] sm:$0xff] %v13235_v48  ;;  %v5084_v46 = vmul.f32 0.05, %v4543_v42  ;;  %v9621_v50 = vpop.f32.mrb[149].mxu1 }
 0xf06   : > { %v10692_v50 = vld [vmem:[%s11002_s15 + $0x10] sm:$0xff] }
 0xf07   : > { %v13240_v23 = vsub.f32 %v15339_v14, %v5084_v46 }
 0xf08   : > { %v4548_v34 = vpop.f32.mrb[150].mxu1 }
 0xf09   : > { %15340 = vst [vmem:[#allocation29_spill] sm:$0xff] %v13240_v23  ;;  %5152 = vst [vmem:[%s11057_s10 + $0xf8] sm:$0xff] %v13240_v23  ;;  %v5085_v24 = vmul.f32 0.05, %v4548_v34  ;;  %v9624_v3 = vpop.f32.mrb[151].mxu1  ;;  %v10693_v34 = vld [vmem:[%s11002_s15 + $0x18] sm:$0xff] }
 0xf0b   : > { %v13245_v52 = vsub.f32 %v15341_v55, %v5085_v24 }
 0xf0c   : > { %v4553_v58 = vpop.f32.mrb[152].mxu1 }
 0xf0d   : > { %15342 = vst [vmem:[#allocation28_spill] sm:$0xff] %v13245_v52  ;;  %5153 = vst [vmem:[%s11057_s10 + $0x100] sm:$0xff] %v13245_v52  ;;  %v5086_v40 = vmul.f32 0.05, %v4553_v58  ;;  %v9627_v6 = vpop.f32.mrb[153].mxu1 }
 0xf0e   : > { %v10694_v6 = vld [vmem:[%s11002_s15 + $0x20] sm:$0xff] }
 0xf0f   : > { %v5120_v47 = vsub.f32 %v12912_v57, %v5086_v40  ;;  %v15347_v57 = vld [vmem:[#allocation41_spill] sm:$0xff] }
 0xf10   : > { %v4694_v44 = vpop.f32.mrb[154].mxu1 }
 0xf11   : > { %5154 = vst [vmem:[%s11057_s10 + $0x108] sm:$0x1] %v5120_v47  ;;  %v4696_v26 = vpop.f32.mrb[155].mxu1 }
 0xf12   : > { %v4702_v32 = vsel %vm3848_vm4, %v4696_v26, 0.0 }
 0xf13   : > { %v4706_v38 = vmul.f32 0.0, %v4702_v32 }
 0xf15   : > { %4826 = vmatprep.subr.mxu1 %v4706_v38 }
 0xf16   : > { %8970 = vmatpush1.msk.msra.mxu1 %vm3847_vm14, %v4694_v44  ;;  %v10695_v44 = vld [vmem:[%s11002_s15 + $0x28] sm:$0xff] }
 0xf17   : > { %8971 = vmatmul.mubr.msk.f32.vlgmr.msra.gmra.mrb[156].mxu1 %vm904_vm9, %v15345_v17 }
 0xf18   : > { %4896 = vmatprep.mubr.f32.mxu1 %v15171_v15 }
 0xf1b   : > { %8972 = vmatmul.mubr.msk.f32.gmra.mrb[158].mxu1 %vm904_vm9, %v15346_v43 }
 0xf1c   : > { %4902 = vmatprep.mubr.f32.mxu1 %v15171_v15 }
 0xf1f   : > { %8973 = vmatmul.mubr.msk.f32.gmra.mrb[160].mxu1 %vm904_vm9, %v15347_v57 }
 0xf20   : > { %4908 = vmatprep.mubr.f32.mxu1 %v15171_v15 }
 0xf23   : > { %8974 = vmatmul.mubr.msk.f32.gmra.mrb[162].mxu1 %vm904_vm9, %v15348_v16  ;;  %v13620_v16 = vld [vmem:[%s11057_s10 + $0x108] sm:$0x1] }
 0xf24   : > { %4914 = vmatprep.mubr.f32.mxu1 %v15171_v15 }
 0xf27   : > { %8975 = vmatmul.mubr.msk.f32.gmra.mrb[164].mxu1 %vm904_vm9, %v15349_v13  ;;  %v13617_v13 = vld [vmem:[%s11057_s10 + $0x80] sm:$0x1] }
 0xf28   : > { %4920 = vmatprep.mubr.f32.mxu1 %v15171_v15 }
 0xf2b   : > { %8976 = vmatmul.mubr.msk.f32.gmra.mrb[166].mxu1 %vm904_vm9, %v15350_v63  ;;  %v13610_v63 = vpack.c.bf16 %v13245_v52, %v13240_v23 }
 0xf2c   : > { %4926 = vmatprep.mubr.f32.mxu1 %v15171_v15 }
 0xf2f   : > { %8977 = vmatmul.mubr.msk.f32.gmra.mrb[168].mxu1 %vm904_vm9, %v15351_v31 }
 0xf30   : > { %4932 = vmatprep.mubr.f32.mxu1 %v15171_v15 }
 0xf33   : > { %8978 = vmatmul.mubr.msk.f32.gmra.mrb[170].mxu1 %vm904_vm9, %v15352_v2  ;;  %v13602_v2 = vld [vmem:[%s11057_s10 + $0x70] sm:$0xff] }
 0xf34   : > { %4938 = vmatprep.mubr.f32.mxu1 %v15171_v15 }
 0xf37   : > { %8979 = vmatmul.mubr.msk.f32.gmra.mrb[172].mxu1 %vm904_vm9, %v15353_v29  ;;  %v13595_v29 = vld [vmem:[%s11057_s10 + $0x78] sm:$0xff] }
 0xf38   : > { %5372 = vmatprep.mubr.f32.mxu1 %v15171_v15  ;;  %v13606_v31 = vpack.c.bf16 %v13595_v29, %v13602_v2 }
 0xfab   : > { %v4773_v56 = vpop.f32.mrb[156].mxu0 }
 0xfac   : > { %v4945_v35 = vmul.f32 0.05, %v4773_v56  ;;  %v4775_v61 = vpop.f32.mrb[157].mxu0  ;;  %v10696_v56 = vld [vmem:[%s11002_s15 + $0x30] sm:$0xff] }
 0xfad   : > { %v4946_v20 = vmul.f32 0.05, %v4775_v61  ;;  %v10697_v61 = vld [vmem:[%s11002_s15 + $0x38] sm:$0xff] }
 0xfae   : > { %v4981_v41 = vsub.f32 %v10690_v10, %v4945_v35 }
 0xfaf   : > { %v4982_v18 = vsub.f32 %v10691_v11, %v4946_v20  ;;  %v4779_v54 = vpop.f32.mrb[158].mxu0 }
 0xfb0   : > { %5017 = vst [vmem:[%s11002_s15] sm:$0xff] %v4981_v41  ;;  %v4947_v5 = vmul.f32 0.05, %v4779_v54  ;;  %v4781_v42 = vpop.f32.mrb[159].mxu0  ;;  %v10698_v54 = vld [vmem:[%s11002_s15 + $0x40] sm:$0xff] }
 0xfb1   : > { %5018 = vst.msk [vmem:[%s11002_s15 + $0x8] sm:$0xff] %vm338_vm0, %v4982_v18  ;;  %v4948_v46 = vmul.f32 0.05, %v4781_v42  ;;  %v10699_v42 = vld [vmem:[%s11002_s15 + $0x48] sm:$0xff] }
 0xfb2   : > { %v4983_v14 = vsub.f32 %v10692_v50, %v4947_v5 }
 0xfb3   : > { %v4984_v24 = vsub.f32 %v10693_v34, %v4948_v46  ;;  %v4785_v3 = vpop.f32.mrb[160].mxu0 }
 0xfb4   : > { %5019 = vst [vmem:[%s11002_s15 + $0x10] sm:$0xff] %v4983_v14  ;;  %v4949_v55 = vmul.f32 0.05, %v4785_v3  ;;  %v4787_v58 = vpop.f32.mrb[161].mxu0  ;;  %v10700_v3 = vld [vmem:[%s11002_s15 + $0x50] sm:$0xff] }
 0xfb5   : > { %5020 = vst.msk [vmem:[%s11002_s15 + $0x18] sm:$0xff] %vm338_vm0, %v4984_v24  ;;  %v4950_v40 = vmul.f32 0.05, %v4787_v58  ;;  %v10701_v58 = vld [vmem:[%s11002_s15 + $0x58] sm:$0xff] }
 0xfb6   : > { %v4985_v47 = vsub.f32 %v10694_v6, %v4949_v55 }
 0xfb7   : > { %v4986_v26 = vsub.f32 %v10695_v44, %v4950_v40  ;;  %v4791_v59 = vpop.f32.mrb[162].mxu0 }
 0xfb8   : > { %5021 = vst [vmem:[%s11002_s15 + $0x20] sm:$0xff] %v4985_v47  ;;  %v4951_v32 = vmul.f32 0.05, %v4791_v59  ;;  %v4793_v38 = vpop.f32.mrb[163].mxu0  ;;  %v10702_v59 = vld [vmem:[%s11002_s15 + $0x60] sm:$0xff] }
 0xfb9   : > { %5022 = vst.msk [vmem:[%s11002_s15 + $0x28] sm:$0xff] %vm338_vm0, %v4986_v26  ;;  %v4952_v60 = vmul.f32 0.05, %v4793_v38  ;;  %v10703_v38 = vld [vmem:[%s11002_s15 + $0x68] sm:$0xff] }
 0xfba   : > { %v4987_v35 = vsub.f32 %v10696_v56, %v4951_v32 }
 0xfbb   : > { %v4988_v20 = vsub.f32 %v10697_v61, %v4952_v60  ;;  %v4797_v10 = vpop.f32.mrb[164].mxu0 }
 0xfbc   : > { %5023 = vst [vmem:[%s11002_s15 + $0x30] sm:$0xff] %v4987_v35  ;;  %v4953_v41 = vmul.f32 0.05, %v4797_v10  ;;  %v4799_v11 = vpop.f32.mrb[165].mxu0  ;;  %v10704_v10 = vld [vmem:[%s11002_s15 + $0x70] sm:$0xff] }
 0xfbd   : > { %5024 = vst.msk [vmem:[%s11002_s15 + $0x38] sm:$0xff] %vm338_vm0, %v4988_v20  ;;  %v4954_v18 = vmul.f32 0.05, %v4799_v11  ;;  %v10705_v11 = vld [vmem:[%s11002_s15 + $0x78] sm:$0xff] }
 0xfbe   : > { %v4989_v5 = vsub.f32 %v10698_v54, %v4953_v41 }
 0xfbf   : > { %v4990_v46 = vsub.f32 %v10699_v42, %v4954_v18  ;;  %v4803_v50 = vpop.f32.mrb[166].mxu0 }
 0xfc0   : > { %5025 = vst [vmem:[%s11002_s15 + $0x40] sm:$0xff] %v4989_v5  ;;  %v4955_v14 = vmul.f32 0.05, %v4803_v50  ;;  %v4805_v34 = vpop.f32.mrb[167].mxu0  ;;  %v10706_v50 = vld [vmem:[%s11002_s15 + $0x80] sm:$0x1] }
 0xfc1   : > { %5026 = vst.msk [vmem:[%s11002_s15 + $0x48] sm:$0xff] %vm338_vm0, %v4990_v46  ;;  %v4956_v24 = vmul.f32 0.05, %v4805_v34  ;;  %v10707_v34 = vld [vmem:[%s11002_s15 + $0x88] sm:$0x1] }
 0xfc2   : > { %v4991_v55 = vsub.f32 %v10700_v3, %v4955_v14 }
 0xfc3   : > { %v4992_v40 = vsub.f32 %v10701_v58, %v4956_v24  ;;  %v4809_v6 = vpop.f32.mrb[168].mxu0 }
 0xfc4   : > { %5027 = vst [vmem:[%s11002_s15 + $0x50] sm:$0xff] %v4991_v55  ;;  %v4957_v47 = vmul.f32 0.05, %v4809_v6  ;;  %v4811_v44 = vpop.f32.mrb[169].mxu0  ;;  %v15354_v6 = vld [vmem:[#allocation47_spill] sm:$0xff] }
 0xfc5   : > { %5028 = vst.msk [vmem:[%s11002_s15 + $0x58] sm:$0xff] %vm338_vm0, %v4992_v40  ;;  %v4958_v26 = vmul.f32 0.05, %v4811_v44  ;;  %v15356_v44 = vld [vmem:[#allocation17_spill] sm:$0xff] }
 0xfc6   : > { %v4993_v32 = vsub.f32 %v10702_v59, %v4957_v47 }
 0xfc7   : > { %v4994_v60 = vsub.f32 %v10703_v38, %v4958_v26  ;;  %v4815_v56 = vpop.f32.mrb[170].mxu0 }
 0xfc8   : > { %5029 = vst [vmem:[%s11002_s15 + $0x60] sm:$0xff] %v4993_v32  ;;  %v4959_v35 = vmul.f32 0.05, %v4815_v56  ;;  %v4817_v61 = vpop.f32.mrb[171].mxu0  ;;  %v15357_v56 = vld [vmem:[#allocation46_spill] sm:$0xff] }
 0xfc9   : > { %5030 = vst.msk [vmem:[%s11002_s15 + $0x68] sm:$0xff] %vm338_vm0, %v4994_v60  ;;  %v4960_v20 = vmul.f32 0.05, %v4817_v61  ;;  %v15359_v61 = vld [vmem:[#allocation19_spill] sm:$0xff] }
 0xfca   : > { %v4995_v41 = vsub.f32 %v10704_v10, %v4959_v35 }
 0xfcb   : > { %v4996_v18 = vsub.f32 %v10705_v11, %v4960_v20  ;;  %v4821_v54 = vpop.f32.mrb[172].mxu0 }
 0xfcc   : > { %5031 = vst [vmem:[%s11002_s15 + $0x70] sm:$0xff] %v4995_v41  ;;  %v4961_v5 = vmul.f32 0.05, %v4821_v54  ;;  %v4823_v42 = vpop.f32.mrb[173].mxu0  ;;  %v15360_v54 = vld [vmem:[#allocation5_spill] sm:$0xff] }
 0xfcd   : > { %5032 = vst.msk [vmem:[%s11002_s15 + $0x78] sm:$0xff] %vm338_vm0, %v4996_v18  ;;  %v4962_v46 = vmul.f32 0.05, %v4823_v42  ;;  %v15362_v42 = vld [vmem:[#allocation18_spill] sm:$0xff] }
 0xfce   : > { %v4997_v14 = vsub.f32 %v10706_v50, %v4961_v5 }
 0xfcf   : > { %v4998_v24 = vsub.f32 %v10707_v34, %v4962_v46 }
 0xfd0   : > { %5033 = vst [vmem:[%s11002_s15 + $0x80] sm:$0x1] %v4997_v14 }
 0xfd1   : > { %5034 = vst.msk [vmem:[%s11002_s15 + $0x88] sm:$0x1] %vm355_vm1, %v4998_v24 }
 0xfea   : > { %v4892_v3 = vpop.f32.mrb[156].mxu1 }
 0xfeb   : > { %v4963_v55 = vmul.f32 0.05, %v4892_v3  ;;  %v4894_v58 = vpop.f32.mrb[157].mxu1  ;;  %v15363_v3 = vld [vmem:[#allocation7_spill] sm:$0xff] }
 0xfec   : > { %v4964_v40 = vmul.f32 0.05, %v4894_v58  ;;  %v15365_v58 = vld [vmem:[#allocation21_spill] sm:$0xff] }
 0xfed   : > { %v13328_v47 = vsub.f32 %v15354_v6, %v4963_v55 }
 0xfee   : > { %v5000_v26 = vsub.f32 %v15356_v44, %v4964_v40  ;;  %v4898_v59 = vpop.f32.mrb[158].mxu1  ;;  %v5156_v44 = vld [vmem:[%s11002_s15 + $0x8] sm:$0xff] }
 0xfef   : > { %15355 = vst [vmem:[#allocation26_spill] sm:$0xff] %v13328_v47  ;;  %5035 = vst [vmem:[%s11002_s15 + $0x90] sm:$0xff] %v13328_v47  ;;  %v4965_v32 = vmul.f32 0.05, %v4898_v59  ;;  %v4900_v38 = vpop.f32.mrb[159].mxu1 }
 0xff0   : > { %5036 = vst.msk [vmem:[%s11002_s15 + $0x98] sm:$0xff] %vm338_vm0, %v5000_v26  ;;  %v4966_v60 = vmul.f32 0.05, %v4900_v38  ;;  %v5157_v26 = vld [vmem:[%s11002_s15 + $0x10] sm:$0xff]  ;;  %v5158_v38 = vld [vmem:[%s11002_s15 + $0x18] sm:$0xff] }
 0xff1   : > { %v13336_v35 = vsub.f32 %v15357_v56, %v4965_v32 }
 0xff2   : > { %v5002_v20 = vsub.f32 %v15359_v61, %v4966_v60  ;;  %v4904_v10 = vpop.f32.mrb[160].mxu1 }
 0xff3   : > { %15358 = vst [vmem:[#allocation25_spill] sm:$0xff] %v13336_v35  ;;  %5037 = vst [vmem:[%s11002_s15 + $0xa0] sm:$0xff] %v13336_v35  ;;  %v4967_v41 = vmul.f32 0.05, %v4904_v10  ;;  %v4906_v11 = vpop.f32.mrb[161].mxu1 }
 0xff4   : > { %5038 = vst.msk [vmem:[%s11002_s15 + $0xa8] sm:$0xff] %vm338_vm0, %v5002_v20  ;;  %v4968_v18 = vmul.f32 0.05, %v4906_v11  ;;  %v10224_v20 = vpack.c.bf16 %v5158_v38, %v5156_v44  ;;  %v15368_v11 = vld [vmem:[#allocation6_spill] sm:$0xff] }
 0xff5   : > { %v13344_v5 = vsub.f32 %v15360_v54, %v4967_v41  ;;  %v5155_v41 = vld [vmem:[%s11002_s15] sm:$0xff] }
 0xff6   : > { %v5004_v46 = vsub.f32 %v15362_v42, %v4968_v18  ;;  %v4910_v50 = vpop.f32.mrb[162].mxu1  ;;  %v10226_v54 = vpack.c.bf16 %v5157_v26, %v5155_v41  ;;  %v10242_v42 = vpack.c.bf16 %v13336_v35, %v13328_v47  ;;  %10225 = vmatprep.subr.bf16.mxu0 %v10224_v20  ;;  %v5162_v20 = vld [vmem:[%s11002_s15 + $0x38] sm:$0xff]  ;;  %v13584_v35 = vld [vmem:[%s11057_s10 + $0x60] sm:$0xff]  ;;  %v13592_v47 = vpack.c.bf16 %v13235_v48, %v13230_v12 }
 0xff7   : > { %15361 = vst [vmem:[#allocation47_spill] sm:$0xff] %v13344_v5  ;;  %5039 = vst [vmem:[%s11002_s15 + $0xb0] sm:$0xff] %v13344_v5  ;;  %v4969_v14 = vmul.f32 0.05, %v4910_v50  ;;  %v4912_v34 = vpop.f32.mrb[163].mxu1  ;;  %v13361_v60 = vld [vmem:[%s11002_s15 + $0x98] sm:$0xff] }
 0xff8   : > { %5040 = vst.msk [vmem:[%s11002_s15 + $0xb8] sm:$0xff] %vm338_vm0, %v5004_v46  ;;  %v4970_v24 = vmul.f32 0.05, %v4912_v34  ;;  %15366 = vst [vmem:[#allocation46_spill] sm:$0xff] %v13361_v60  ;;  %v15370_v46 = vld [vmem:[#allocation20_spill] sm:$0xff]  ;;  %10227 = vmatpush1.bf16.msra.mxu0 %v10226_v54 }
 0xff9   : > { %v13352_v55 = vsub.f32 %v15363_v3, %v4969_v14 }
 0xffa   : > { %v5006_v40 = vsub.f32 %v15365_v58, %v4970_v24  ;;  %v4916_v6 = vpop.f32.mrb[164].mxu1  ;;  %v15371_v58 = vld [vmem:[#allocation9_spill] sm:$0xff] }
 0xffb   : > { %15364 = vst [vmem:[#allocation17_spill] sm:$0xff] %v13352_v55  ;;  %5041 = vst [vmem:[%s11002_s15 + $0xc0] sm:$0xff] %v13352_v55  ;;  %v4971_v59 = vmul.f32 0.05, %v4916_v6  ;;  %v4918_v32 = vpop.f32.mrb[165].mxu1  ;;  %v13364_v56 = vld [vmem:[%s11002_s15 + $0xa8] sm:$0xff] }
 0xffc   : > { %15367 = vst [vmem:[#allocation19_spill] sm:$0xff] %v13364_v56  ;;  %5042 = vst.msk [vmem:[%s11002_s15 + $0xc8] sm:$0xff] %vm338_vm0, %v5006_v40  ;;  %v4972_v61 = vmul.f32 0.05, %v4918_v32  ;;  %v10240_v10 = vpack.c.bf16 %v13364_v56, %v13361_v60  ;;  %v15373_v6 = vld [vmem:[#allocation23_spill] sm:$0xff]  ;;  %v13577_v56 = vld [vmem:[%s11057_s10 + $0x68] sm:$0xff] }
 0xffd   : > { %v13372_v18 = vsub.f32 %v15368_v11, %v4971_v59  ;;  %v5160_v59 = vld [vmem:[%s11002_s15 + $0x28] sm:$0xff]  ;;  %v5161_v32 = vld [vmem:[%s11002_s15 + $0x30] sm:$0xff]  ;;  %v13588_v60 = vpack.c.bf16 %v13577_v56, %v13584_v35 }
 0xffe   : > { %v5008_v50 = vsub.f32 %v15370_v46, %v4972_v61  ;;  %v4922_v14 = vpop.f32.mrb[166].mxu1  ;;  %10241 = vmatprep.subr.bf16.mxu1 %v10240_v10  ;;  %v10228_v54 = vpack.c.bf16 %v5162_v20, %v5160_v59  ;;  %v5159_v46 = vld [vmem:[%s11002_s15 + $0x20] sm:$0xff] }
 0xfff   : > { %15369 = vst [vmem:[#allocation5_spill] sm:$0xff] %v13372_v18  ;;  %5043 = vst [vmem:[%s11002_s15 + $0xd0] sm:$0xff] %v13372_v18  ;;  %v4973_v34 = vmul.f32 0.05, %v4922_v14  ;;  %v4924_v24 = vpop.f32.mrb[167].mxu1  ;;  %10243 = vmatpush1.bf16.msra.mxu1 %v10242_v42  ;;  %v13391_v10 = vld [vmem:[%s11002_s15 + $0xb8] sm:$0xff] }
0x1000   : > { %5044 = vst.msk [vmem:[%s11002_s15 + $0xd8] sm:$0xff] %vm338_vm0, %v5008_v50  ;;  %v4974_v3 = vmul.f32 0.05, %v4924_v24  ;;  %15374 = vst [vmem:[#allocation7_spill] sm:$0xff] %v13391_v10  ;;  %v15376_v50 = vld [vmem:[#allocation8_spill] sm:$0xff]  ;;  %v10246_v24 = vpack.c.bf16 %v13352_v55, %v13344_v5  ;;  %10229 = vmatprep.subr.bf16.mxu0 %v10228_v54  ;;  %v5164_v54 = vld [vmem:[%s11002_s15 + $0x48] sm:$0xff]  ;;  %v13574_v5 = vpack.c.bf16 %v13225_v25, %v13217_v7 }
0x1001   : > { %v13382_v40 = vsub.f32 %v15371_v58, %v4973_v34  ;;  %v10230_v34 = vpack.c.bf16 %v5161_v32, %v5159_v46  ;;  %v15379_v32 = vld [vmem:[#allocation11_spill] sm:$0xff] }
0x1002   : > { %v5010_v44 = vsub.f32 %v15373_v6, %v4974_v3  ;;  %v4928_v26 = vpop.f32.mrb[168].mxu1  ;;  %v15378_v3 = vld [vmem:[#allocation10_spill] sm:$0xff] }
0x1003   : > { %15372 = vst [vmem:[#allocation18_spill] sm:$0xff] %v13382_v40  ;;  %5045 = vst [vmem:[%s11002_s15 + $0xe0] sm:$0xff] %v13382_v40  ;;  %v4975_v38 = vmul.f32 0.05, %v4928_v26  ;;  %v4930_v61 = vpop.f32.mrb[169].mxu1  ;;  %v13394_v41 = vld [vmem:[%s11002_s15 + $0xc8] sm:$0xff]  ;;  %10231 = vmatpush1.bf16.msra.mxu0 %v10230_v34 }
0x1004   : > { %15375 = vst [vmem:[#allocation21_spill] sm:$0xff] %v13394_v41  ;;  %5046 = vst.msk [vmem:[%s11002_s15 + $0xe8] sm:$0xff] %vm338_vm0, %v5010_v44  ;;  %v4976_v11 = vmul.f32 0.05, %v4930_v61  ;;  %v10244_v42 = vpack.c.bf16 %v13394_v41, %v13391_v10  ;;  %v15381_v61 = vld [vmem:[#allocation12_spill] sm:$0xff]  ;;  %v15385_v41 = vld [vmem:[#allocation22_spill] sm:$0xff] }
0x1005   : > { %v13402_v14 = vsub.f32 %v15376_v50, %v4975_v38 }
0x1006   : > { %v5012_v58 = vsub.f32 %v15378_v3, %v4976_v11  ;;  %v4934_v6 = vpop.f32.mrb[170].mxu1  ;;  %10245 = vmatprep.subr.bf16.mxu1 %v10244_v42  ;;  %v5165_v42 = vld [vmem:[%s11002_s15 + $0x50] sm:$0xff]  ;;  %v5166_v3 = vld [vmem:[%s11002_s15 + $0x58] sm:$0xff] }
0x1007   : > { %15377 = vst [vmem:[#allocation6_spill] sm:$0xff] %v13402_v14  ;;  %5047 = vst [vmem:[%s11002_s15 + $0xf0] sm:$0xff] %v13402_v14  ;;  %v4977_v44 = vmul.f32 0.05, %v4934_v6  ;;  %v4936_v26 = vpop.f32.mrb[171].mxu1  ;;  %10247 = vmatpush1.bf16.msra.mxu1 %v10246_v24  ;;  %v13421_v34 = vld [vmem:[%s11002_s15 + $0xd8] sm:$0xff]  ;;  %v10232_v6 = vpack.c.bf16 %v5166_v3, %v5164_v54 }
0x1008   : > { %5048 = vst.msk [vmem:[%s11002_s15 + $0xf8] sm:$0xff] %vm338_vm0, %v5012_v58  ;;  %v4978_v59 = vmul.f32 0.05, %v4936_v26  ;;  %15382 = vst [vmem:[#allocation9_spill] sm:$0xff] %v13421_v34  ;;  %v5163_v26 = vld [vmem:[%s11002_s15 + $0x40] sm:$0xff]  ;;  %v5169_v54 = vld [vmem:[%s11002_s15 + $0x70] sm:$0xff] }
0x1009   : > { %v13412_v38 = vsub.f32 %v15379_v32, %v4977_v44  ;;  %10233 = vmatprep.subr.bf16.mxu0 %v10232_v6 }
0x100a   : > { %v5014_v20 = vsub.f32 %v15381_v61, %v4978_v59  ;;  %v4940_v11 = vpop.f32.mrb[172].mxu1  ;;  %v15384_v59 = vld [vmem:[#allocation24_spill] sm:$0xff]  ;;  %v10234_v61 = vpack.c.bf16 %v5165_v42, %v5163_v26 }
0x100b   : > { %15380 = vst [vmem:[#allocation20_spill] sm:$0xff] %v13412_v38  ;;  %5049 = vst [vmem:[%s11002_s15 + $0x100] sm:$0xff] %v13412_v38  ;;  %v4979_v46 = vmul.f32 0.05, %v4940_v11  ;;  %v4942_v50 = vpop.f32.mrb[173].mxu1  ;;  %v13424_v24 = vld [vmem:[%s11002_s15 + $0xe8] sm:$0xff]  ;;  %v10250_v11 = vpack.c.bf16 %v13382_v40, %v13372_v18  ;;  %v13556_v40 = vpack.c.bf16 %v13209_v1, %v13201_v28 }
0x100c   : > { %15383 = vst [vmem:[#allocation23_spill] sm:$0xff] %v13424_v24  ;;  %5050 = vst.msk [vmem:[%s11002_s15 + $0x108] sm:$0xff] %vm338_vm0, %v5014_v20  ;;  %v4980_v58 = vmul.f32 0.05, %v4942_v50  ;;  %v10248_v44 = vpack.c.bf16 %v13424_v24, %v13421_v34  ;;  %10235 = vmatpush1.bf16.msra.mxu0 %v10234_v61  ;;  %v5168_v20 = vld [vmem:[%s11002_s15 + $0x68] sm:$0xff]  ;;  %v5170_v50 = vld [vmem:[%s11002_s15 + $0x78] sm:$0xff] }
0x100d   : > { %v5015_v32 = vsub.f32 %v15384_v59, %v4979_v46  ;;  %v13460_v59 = vld [vmem:[%s11057_s10 + $0x8] sm:$0xff]  ;;  %v13559_v34 = vld [vmem:[%s11057_s10 + $0x58] sm:$0xff]  ;;  %v13566_v18 = vld [vmem:[%s11057_s10 + $0x50] sm:$0xff] }
0x100e   : > { %v5016_v55 = vsub.f32 %v15385_v41, %v4980_v58  ;;  %10249 = vmatprep.subr.bf16.mxu1 %v10248_v44  ;;  %v10236_v41 = vpack.c.bf16 %v5170_v50, %v5168_v20  ;;  %v5167_v58 = vld [vmem:[%s11002_s15 + $0x60] sm:$0xff]  ;;  %v5172_v44 = vld [vmem:[%s11002_s15 + $0x88] sm:$0x1]  ;;  %v13570_v10 = vpack.c.bf16 %v13559_v34, %v13566_v18 }
0x100f   : > { %5051 = vst [vmem:[%s11002_s15 + $0x110] sm:$0x1] %v5015_v32  ;;  %10251 = vmatpush1.bf16.msra.mxu1 %v10250_v11  ;;  %v13442_v42 = vld [vmem:[%s11002_s15 + $0xf8] sm:$0xff]  ;;  %v10238_v6 = vpack.c.bf16 %v5169_v54, %v5167_v58  ;;  %v5171_v32 = vld [vmem:[%s11002_s15 + $0x80] sm:$0x1]  ;;  %v10709_v54 = vld [vmem:[%s11256_s18 + $0x8] sm:$0xff] }
0x1010   : > { %5052 = vst.msk [vmem:[%s11002_s15 + $0x118] sm:$0x1] %vm355_vm1, %v5016_v55  ;;  %15386 = vst [vmem:[#allocation8_spill] sm:$0xff] %v13442_v42  ;;  %v10254_v55 = vpack.c.bf16 %v13412_v38, %v13402_v14  ;;  %10237 = vmatprep.subr.bf16.mxu0 %v10236_v41  ;;  %v13470_v11 = vld [vmem:[%s11057_s10] sm:$0xff]  ;;  %v13482_v41 = vpack.c.bf16 %v13146_v45, %v13138_v9  ;;  %v13494_v58 = vld [vmem:[%s11057_s10 + $0x10] sm:$0xff]  ;;  %v13538_v38 = vpack.c.bf16 %v13193_v36, %v13185_v22 }
0x1011   : > { %10239 = vmatpush1.bf16.msra.mxu0 %v10238_v6  ;;  %v10708_v20 = vld [vmem:[%s11256_s18] sm:$0xff]  ;;  %v13478_v50 = vpack.c.bf16 %v13460_v59, %v13470_v11 }
0x1012   : > { %8980 = vmatprep.subr.msk.mxu0 %vm500_vm2, %v5172_v44  ;;  %v13505_v44 = vld [vmem:[%s11057_s10 + $0x28] sm:$0xff]  ;;  %v13548_v14 = vld [vmem:[%s11057_s10 + $0x40] sm:$0xff] }
0x1013   : > { %v13445_v46 = vld [vmem:[%s11002_s15 + $0x108] sm:$0xff] }
0x1014   : > { %15387 = vst [vmem:[#allocation10_spill] sm:$0xff] %v13445_v46  ;;  %v10252_v3 = vpack.c.bf16 %v13445_v46, %v13442_v42  ;;  %v13541_v42 = vld [vmem:[%s11057_s10 + $0x48] sm:$0xff] }
0x1015   : > { %8981 = vmatpush1.msk.msra.mxu0 %vm500_vm2, %v5171_v32  ;;  %v13512_v32 = vld [vmem:[%s11057_s10 + $0x20] sm:$0xff]  ;;  %v13552_v24 = vpack.c.bf16 %v13541_v42, %v13548_v14 }
0x1016   : > { %10253 = vmatprep.subr.bf16.mxu1 %v10252_v3  ;;  %v13464_v61 = vld [vmem:[%s11002_s15 + $0x110] sm:$0x1]  ;;  %8982 = vmatmul.mubr.msk.f32.vlgmr.msra.gmra.mrb[174].mxu0 %vm496_vm3, %v10708_v20  ;;  %v13487_v3 = vld [vmem:[%s11057_s10 + $0x18] sm:$0xff]  ;;  %v13516_v20 = vpack.c.bf16 %v13505_v44, %v13512_v32 }
0x1017   : > { %10255 = vmatpush1.bf16.msra.mxu1 %v10254_v55  ;;  %v13454_v26 = vld [vmem:[%s11002_s15 + $0x118] sm:$0x1]  ;;  %15389 = vst [vmem:[#allocation12_spill] sm:$0xff] %v13464_v61  ;;  %10256 = vmatprep.subr.bf16.mxu0 %v15176_v30  ;;  %v13498_v6 = vpack.c.bf16 %v13487_v3, %v13494_v58  ;;  %v13502_v55 = vpack.c.bf16 %v13161_v27, %v13153_v62 }
0x1018   : > { %15388 = vst [vmem:[#allocation11_spill] sm:$0xff] %v13454_v26  ;;  %8983 = vmatprep.subr.msk.mxu1 %vm500_vm2, %v13454_v26  ;;  %10258 = vmatpush1.bf16.msra.mxu0 %v13478_v50  ;;  %v13523_v26 = vld [vmem:[%s11057_s10 + $0x38] sm:$0xff] }
0x1019   : > { %10259 = vmatprep.subr.bf16.mxu0 %v15176_v30 }
0x101b   : > { %8984 = vmatpush1.msk.msra.mxu1 %vm500_vm2, %v13464_v61  ;;  %v13530_v61 = vld [vmem:[%s11057_s10 + $0x30] sm:$0xff] }
0x101c   : > { %8985 = vmatmul.mubr.msk.f32.vlgmr.msra.gmra.mrb[174].mxu1 %vm496_vm3, %v10709_v54  ;;  %10280 = vmatprep.subr.bf16.mxu1 %v15176_v30  ;;  %v13520_v54 = vpack.c.bf16 %v13177_v33, %v13169_v49  ;;  %v13534_v46 = vpack.c.bf16 %v13523_v26, %v13530_v61 }
0x101d   : > { %10282 = vmatpush1.bf16.msra.mxu1 %v13482_v41  ;;  %10261 = vmatpush1.bf16.msra.mxu0 %v13498_v6 }
0x101e   : > { %10283 = vmatprep.subr.bf16.mxu1 %v15176_v30  ;;  %10262 = vmatprep.subr.bf16.mxu0 %v15176_v30 }
0x1021   : > { %10285 = vmatpush1.bf16.msra.mxu1 %v13502_v55  ;;  %10264 = vmatpush1.bf16.msra.mxu0 %v13516_v20 }
0x1022   : > { %10286 = vmatprep.subr.bf16.mxu1 %v15176_v30  ;;  %10265 = vmatprep.subr.bf16.mxu0 %v15176_v30 }
0x1025   : > { %10288 = vmatpush1.bf16.msra.mxu1 %v13520_v54  ;;  %10267 = vmatpush1.bf16.msra.mxu0 %v13534_v46 }
0x1026   : > { %10289 = vmatprep.subr.bf16.mxu1 %v15176_v30  ;;  %10268 = vmatprep.subr.bf16.mxu0 %v15176_v30 }
0x1029   : > { %10291 = vmatpush1.bf16.msra.mxu1 %v13538_v38  ;;  %10270 = vmatpush1.bf16.msra.mxu0 %v13552_v24 }
0x102a   : > { %10292 = vmatprep.subr.bf16.mxu1 %v15176_v30  ;;  %10271 = vmatprep.subr.bf16.mxu0 %v15176_v30 }
0x102d   : > { %10294 = vmatpush1.bf16.msra.mxu1 %v13556_v40  ;;  %10273 = vmatpush1.bf16.msra.mxu0 %v13570_v10 }
0x102e   : > { %10295 = vmatprep.subr.bf16.mxu1 %v15176_v30  ;;  %10274 = vmatprep.subr.bf16.mxu0 %v15176_v30 }
0x1031   : > { %10297 = vmatpush1.bf16.msra.mxu1 %v13574_v5  ;;  %10276 = vmatpush1.bf16.msra.mxu0 %v13588_v60 }
0x1032   : > { %10298 = vmatprep.subr.bf16.mxu1 %v15176_v30  ;;  %10277 = vmatprep.subr.bf16.mxu0 %v15176_v30 }
0x1035   : > { %10300 = vmatpush1.bf16.msra.mxu1 %v13592_v47  ;;  %10279 = vmatpush1.bf16.msra.mxu0 %v13606_v31 }
0x1036   : > { %10301 = vmatprep.subr.bf16.mxu1 %v15176_v30  ;;  %5425 = vmatprep.subr.mxu0 %v15171_v15 }
0x1039   : > { %10303 = vmatpush1.bf16.msra.mxu1 %v13610_v63  ;;  %8986 = vmatpush1.msk.msra.mxu0 %vm500_vm2, %v13617_v13 }
0x103a   : > { %5501 = vmatprep.subr.mxu1 %v15171_v15  ;;  %9628 = vmatprep.subr.mxu0 %v15171_v15 }
0x103d   : > { %8989 = vmatpush1.msk.msra.mxu1 %vm500_vm2, %v13620_v16 }
0x103e   : > { %9681 = vmatprep.subr.mxu1 %v15171_v15 }
0x10e9   : > { %v13628_v57 = vpop.f32.mrb[174].mxu0 }
0x10ea   : > { %v13632_v17 = vpop.f32.mrb[175].mxu0  ;;  %vm5379_vm11 = vcmp.gt.f32.partialorder %v13628_v57, 0.0 }
0x10eb   : > { %vm5380_vm7 = vcmp.gt.f32.partialorder %v13632_v17, 0.0 }
0x10ec   : > { %v5384_v23 = vsel %vm5380_vm7, %v13632_v17, 0.0 }
0x10ed   : > { %8987 = vmatprep.mubr.msk.f32.mxu0 %vm338_vm0, %v5384_v23 }
0x10ee   : > { %8988 = vmatmul.mubr.msk.f32.vlgmr.msra.gmra.mrb[176].mxu0 %vm5379_vm11, %v13628_v57 }
0x10ef   : > { %v13630_v43 = vpop.f32.mrb[174].mxu1  ;;  %9630 = vmatprep.mubr.msk.f32.mxu0 %vm10820_vm8, %v15171_v15 }
0x10f0   : > { %15390 = vst [vmem:[#allocation24_spill] sm:$0xff] %v13630_v43  ;;  %v13634_v52 = vpop.f32.mrb[175].mxu1  ;;  %vm5381_vm6 = vcmp.gt.f32.partialorder %v13630_v43, 0.0 }
0x10f1   : > { %15391 = vst [vmem:[#allocation22_spill] sm:$0xff] %v13634_v52  ;;  %vm5382_vm10 = vcmp.gt.f32.partialorder %v13634_v52, 0.0 }
0x10f2   : > { %v5386_v48 = vsel %vm5382_vm10, %v13634_v52, 0.0 }
0x10f3   : > { %8990 = vmatprep.mubr.msk.f32.mxu1 %vm338_vm0, %v5386_v48 }
0x10f4   : > { %8991 = vmatmul.mubr.msk.f32.vlgmr.msra.gmra.mrb[176].mxu1 %vm5381_vm6, %v13630_v43 }
0x10f5   : > { %9683 = vmatprep.mubr.msk.f32.mxu1 %vm10820_vm8, %v15171_v15 }
0x11c1   : > { %v5459_v52 = vpop.f32.mrb[176].mxu0 }
0x11c2   : > { %5539 = vmax.xlane.f32.xlu1 %v5459_v52  ;;  %v5461_v39 = vpop.f32.mrb[177].mxu0 }
0x11c7   : > { %v5535_v12 = vpop.f32.mrb[176].mxu1 }
0x11c8   : > { %5541 = vmax.xlane.f32.xlu0 %v5535_v12  ;;  %v5537_v25 = vpop.f32.mrb[177].mxu1 }
0x11c9   : > { %v5383_v25 = vsel %vm5379_vm11, %v13628_v57, 0.0 }
0x11f5   : > { %5593 = vxpose.xlu0.b32.start.end [1/1] (short) (narrow) %v5384_v23, 8 }
0x11f9   : > { %5858 = vxpose.xlu0.b32.start.end [1/1] (short) (narrow) %v5386_v48, 8 }
0x124f   : > { %v5540_v0 = vpop.xlane.xlu1 %5539 }
0x1250   : > { %v5543_v1 = vsub.f32 %v5459_v52, %v5540_v0  ;;  %v5385_v0 = vsel %vm5381_vm6, %v13630_v43, 0.0  ;;  %v10711_v52 = vld [vmem:[%s11502_s17 + $0x8] sm:$0xff] }
0x1252   : > { %v5545_v28 = vmul.f32 1.442695, %v5543_v1 }
0x1254   : > { %10630 = vpow2.f32 %v5545_v28 }
0x1255   : > { %v5542_v7 = vpop.xlane.xlu0 %5541 }
0x1256   : > { %v5544_v51 = vsub.f32 %v5535_v12, %v5542_v7  ;;  %v10710_v7 = vld [vmem:[%s11502_s17] sm:$0xff] }
0x1258   : > { %v5547_v53 = vmul.f32 1.442695, %v5544_v51 }
0x125a   : > { %10632 = vpow2.f32 %v5547_v53 }
0x125e   : > { %v10631_v36 = vpop.eup %10630 }
0x125f   : > { %5549 = vadd.xlane.f32.xlu1 %v10631_v36 }
0x1264   : > { %v10633_v4 = vpop.eup %10632 }
0x1265   : > { %5551 = vadd.xlane.f32.xlu1 %v10633_v4 }
0x1298   : > { %5561 = vxpose.xlu1.b32.start.end [1/1] (short) %v5383_v25, 128 }
0x12d5   : > { %5826 = vxpose.xlu1.b32.start.end [1/1] (short) %v5385_v0, 128 }
0x12ec   : > { %v5550_v1 = vpop.xlane.xlu1 %5549 }
0x12ed   : > { %10634 = vrcp.f32 %v5550_v1 }
0x12f2   : > { %v5552_v28 = vpop.xlane.xlu1 %5551 }
0x12f3   : > { %10636 = vrcp.f32 %v5552_v28 }
0x12f7   : > { %v10635_v53 = vpop.eup %10634 }
0x12f8   : > { %v5555_v51 = vmul.f32 %v10635_v53, %v10631_v36 }
0x12fa   : > { %v5557_v39 = vsub.f32 %v5555_v51, %v10710_v7 }
0x12fc   : > { %v13665_v48 = vmul.f32 0.125, %v5557_v39 }
0x12fd   : > { %v10637_v12 = vpop.eup %10636 }
0x12fe   : > { %v5556_v23 = vmul.f32 %v10637_v12, %v10633_v4  ;;  %9629 = vmatpush3.msra.mxu0 %v13665_v48  ;;  %v5609_v12 = vpop.trf.xlu0 }
0x12ff   : > { %10304 = vmatprep.subr.bf16.mxu0 %v15176_v30 }
0x1300   : > { %v5558_v25 = vsub.f32 %v5556_v23, %v10711_v52 }
0x1302   : > { %v13670_v43 = vmul.f32 0.125, %v5558_v25 }
0x1304   : > { %9682 = vmatpush3.msra.mxu1 %v13670_v43 }
0x1305   : > { %10328 = vmatprep.subr.bf16.mxu1 %v15176_v30 }
0x1318   : > { %v5577_v0 = vpop.trf.xlu1 }
0x1319   : > { %9631 = vmatmul.mubr.msk.f32.vlgmr.msra.gmra.mrb[178].mxu0 %vm904_vm9, %v5577_v0 }
0x131a   : > { %10306 = vmatpush1.bf16.xpose.msra.mxu0 %v13478_v50  ;;  %9633 = vmatprep.mubr.msk.f32.mxu0 %vm10820_vm8, %v15171_v15 }
0x131b   : > { %10307 = vmatprep.subr.bf16.mxu0 %v15176_v30 }
0x131c   : > { %v5578_v4 = vpop.trf.xlu1 }
0x131d   : > { %9634 = vmatmul.mubr.msk.f32.gmra.mrb[180].mxu0 %vm904_vm9, %v5578_v4 }
0x131e   : > { %9636 = vmatprep.mubr.msk.f32.mxu0 %vm10820_vm8, %v15171_v15 }
0x1320   : > { %v5579_v36 = vpop.trf.xlu1 }
0x1321   : > { %9637 = vmatmul.mubr.msk.f32.gmra.mrb[182].mxu0 %vm904_vm9, %v5579_v36 }
0x1322   : > { %10309 = vmatpush1.bf16.xpose.msra.mxu0 %v13498_v6  ;;  %9639 = vmatprep.mubr.msk.f32.mxu0 %vm10820_vm8, %v15171_v15 }
0x1323   : > { %10310 = vmatprep.subr.bf16.mxu0 %v15176_v30 }
0x1324   : > { %v5580_v50 = vpop.trf.xlu1 }
0x1325   : > { %9640 = vmatmul.mubr.msk.f32.gmra.mrb[184].mxu0 %vm904_vm9, %v5580_v50 }
0x1326   : > { %9642 = vmatprep.mubr.msk.f32.mxu0 %vm10820_vm8, %v15171_v15 }
0x1328   : > { %v5581_v1 = vpop.trf.xlu1 }
0x1329   : > { %9643 = vmatmul.mubr.msk.f32.gmra.mrb[186].mxu0 %vm904_vm9, %v5581_v1  ;;  %v5874_v1 = vpop.trf.xlu0 }
0x132a   : > { %10312 = vmatpush1.bf16.xpose.msra.mxu0 %v13516_v20  ;;  %9645 = vmatprep.mubr.msk.f32.mxu0 %vm10820_vm8, %v15171_v15 }
0x132b   : > { %10313 = vmatprep.subr.bf16.mxu0 %v15176_v30 }
0x132c   : > { %v5582_v6 = vpop.trf.xlu1 }
0x132d   : > { %9646 = vmatmul.mubr.msk.f32.gmra.mrb[188].mxu0 %vm904_vm9, %v5582_v6 }
0x132e   : > { %9648 = vmatprep.mubr.msk.f32.mxu0 %vm10820_vm8, %v15171_v15 }
0x1330   : > { %v5583_v28 = vpop.trf.xlu1 }
0x1331   : > { %9649 = vmatmul.mubr.msk.f32.gmra.mrb[190].mxu0 %vm904_vm9, %v5583_v28 }
0x1332   : > { %10315 = vmatpush1.bf16.xpose.msra.mxu0 %v13534_v46  ;;  %9651 = vmatprep.mubr.msk.f32.mxu0 %vm10820_vm8, %v15171_v15 }
0x1333   : > { %10316 = vmatprep.subr.bf16.mxu0 %v15176_v30 }
0x1334   : > { %v5584_v20 = vpop.trf.xlu1 }
0x1335   : > { %9652 = vmatmul.mubr.msk.f32.gmra.mrb[192].mxu0 %vm904_vm9, %v5584_v20 }
0x1336   : > { %9654 = vmatprep.mubr.msk.f32.mxu0 %vm10820_vm8, %v15171_v15 }
0x1338   : > { %v5585_v53 = vpop.trf.xlu1 }
0x1339   : > { %9655 = vmatmul.mubr.msk.f32.gmra.mrb[194].mxu0 %vm904_vm9, %v5585_v53 }
0x133a   : > { %10318 = vmatpush1.bf16.xpose.msra.mxu0 %v13552_v24  ;;  %9657 = vmatprep.mubr.msk.f32.mxu0 %vm10820_vm8, %v15171_v15 }
0x133b   : > { %10319 = vmatprep.subr.bf16.mxu0 %v15176_v30 }
0x133c   : > { %v5586_v46 = vpop.trf.xlu1 }
0x133d   : > { %9658 = vmatmul.mubr.msk.f32.gmra.mrb[196].mxu0 %vm904_vm9, %v5586_v46 }
0x133e   : > { %9660 = vmatprep.mubr.msk.f32.mxu0 %vm10820_vm8, %v15171_v15 }
0x1340   : > { %v5587_v51 = vpop.trf.xlu1 }
0x1341   : > { %9661 = vmatmul.mubr.msk.f32.gmra.mrb[198].mxu0 %vm904_vm9, %v5587_v51 }
0x1342   : > { %10321 = vmatpush1.bf16.xpose.msra.mxu0 %v13570_v10  ;;  %9663 = vmatprep.mubr.msk.f32.mxu0 %vm10820_vm8, %v15171_v15 }
0x1343   : > { %10322 = vmatprep.subr.bf16.mxu0 %v15176_v30 }
0x1344   : > { %v5588_v24 = vpop.trf.xlu1 }
0x1345   : > { %9664 = vmatmul.mubr.msk.f32.gmra.mrb[200].mxu0 %vm904_vm9, %v5588_v24 }
0x1346   : > { %9666 = vmatprep.mubr.msk.f32.mxu0 %vm10820_vm8, %v15171_v15 }
0x1348   : > { %v5589_v7 = vpop.trf.xlu1 }
0x1349   : > { %9667 = vmatmul.mubr.msk.f32.gmra.mrb[202].mxu0 %vm904_vm9, %v5589_v7 }
0x134a   : > { %10324 = vmatpush1.bf16.xpose.msra.mxu0 %v13588_v60  ;;  %9669 = vmatprep.mubr.msk.f32.mxu0 %vm10820_vm8, %v15171_v15 }
0x134b   : > { %10325 = vmatprep.subr.bf16.mxu0 %v15176_v30 }
0x134c   : > { %v5590_v10 = vpop.trf.xlu1 }
0x134d   : > { %9670 = vmatmul.mubr.msk.f32.gmra.mrb[204].mxu0 %vm904_vm9, %v5590_v10 }
0x134e   : > { %9672 = vmatprep.mubr.msk.f32.mxu0 %vm10820_vm8, %v15171_v15 }
0x1350   : > { %v5591_v39 = vpop.trf.xlu1 }
0x1351   : > { %9673 = vmatmul.mubr.msk.f32.gmra.mrb[206].mxu0 %vm904_vm9, %v5591_v39 }
0x1352   : > { %10327 = vmatpush1.bf16.xpose.msra.mxu0 %v13606_v31  ;;  %9675 = vmatprep.mubr.msk.f32.mxu0 %vm10820_vm8, %v15171_v15 }
0x1353   : > { %6123 = vmatprep.subr.mxu0 %v15171_v15 }
0x1354   : > { %v5592_v60 = vpop.trf.xlu1 }
0x1355   : > { %9676 = vmatmul.mubr.msk.f32.gmra.mrb[208].mxu0 %vm904_vm9, %v5592_v60 }
0x1356   : > { %9678 = vmatprep.mubr.msk.f32.mxu0 %vm10820_vm8, %v15171_v15 }
0x1358   : > { %v5842_v23 = vpop.trf.xlu1 }
0x1359   : > { %9679 = vmatmul.mubr.msk.f32.gmra.mrb[210].mxu0 %vm904_vm9, %v5609_v12  ;;  %9684 = vmatmul.mubr.msk.f32.vlgmr.msra.gmra.mrb[178].mxu1 %vm904_vm9, %v5842_v23 }
0x135a   : > { %6124 = vmatpush1.xpose.msra.mxu0 %v13617_v13  ;;  %10330 = vmatpush1.bf16.xpose.msra.mxu1 %v13482_v41 }
0x135b   : > { %9686 = vmatprep.mubr.msk.f32.mxu1 %vm10820_vm8, %v15171_v15  ;;  %6155 = vmatprep.mubr.f32.mxu0 %v15171_v15 }
0x135c   : > { %v5843_v31 = vpop.trf.xlu1  ;;  %10331 = vmatprep.subr.bf16.mxu1 %v15176_v30 }
0x135d   : > { %9687 = vmatmul.mubr.msk.f32.gmra.mrb[180].mxu1 %vm904_vm9, %v5843_v31  ;;  %6156 = vmatmul.mubr.f32.vlgmr.msra.gmra.mrb[212].mxu0 %v13665_v48 }
0x135e   : > { %9689 = vmatprep.mubr.msk.f32.mxu1 %vm10820_vm8, %v15171_v15  ;;  %6305 = vmatprep.mubr.f32.mxu0 %v15171_v15 }
0x1360   : > { %v5844_v52 = vpop.trf.xlu1 }
0x1361   : > { %9690 = vmatmul.mubr.msk.f32.gmra.mrb[182].mxu1 %vm904_vm9, %v5844_v52 }
0x1362   : > { %10333 = vmatpush1.bf16.xpose.msra.mxu1 %v13502_v55  ;;  %9692 = vmatprep.mubr.msk.f32.mxu1 %vm10820_vm8, %v15171_v15 }
0x1363   : > { %10334 = vmatprep.subr.bf16.mxu1 %v15176_v30 }
0x1364   : > { %v5845_v41 = vpop.trf.xlu1 }
0x1365   : > { %9693 = vmatmul.mubr.msk.f32.gmra.mrb[184].mxu1 %vm904_vm9, %v5845_v41 }
0x1366   : > { %9695 = vmatprep.mubr.msk.f32.mxu1 %vm10820_vm8, %v15171_v15 }
0x1368   : > { %v5846_v48 = vpop.trf.xlu1 }
0x1369   : > { %9696 = vmatmul.mubr.msk.f32.gmra.mrb[186].mxu1 %vm904_vm9, %v5846_v48 }
0x136a   : > { %10336 = vmatpush1.bf16.xpose.msra.mxu1 %v13520_v54  ;;  %9698 = vmatprep.mubr.msk.f32.mxu1 %vm10820_vm8, %v15171_v15 }
0x136b   : > { %10337 = vmatprep.subr.bf16.mxu1 %v15176_v30 }
0x136c   : > { %v5847_v55 = vpop.trf.xlu1 }
0x136d   : > { %9699 = vmatmul.mubr.msk.f32.gmra.mrb[188].mxu1 %vm904_vm9, %v5847_v55 }
0x136e   : > { %9701 = vmatprep.mubr.msk.f32.mxu1 %vm10820_vm8, %v15171_v15 }
0x1370   : > { %v5848_v25 = vpop.trf.xlu1 }
0x1371   : > { %9702 = vmatmul.mubr.msk.f32.gmra.mrb[190].mxu1 %vm904_vm9, %v5848_v25 }
0x1372   : > { %10339 = vmatpush1.bf16.xpose.msra.mxu1 %v13538_v38  ;;  %9704 = vmatprep.mubr.msk.f32.mxu1 %vm10820_vm8, %v15171_v15 }
0x1373   : > { %10340 = vmatprep.subr.bf16.mxu1 %v15176_v30 }
0x1374   : > { %v5849_v54 = vpop.trf.xlu1 }
0x1375   : > { %9705 = vmatmul.mubr.msk.f32.gmra.mrb[192].mxu1 %vm904_vm9, %v5849_v54 }
0x1376   : > { %9707 = vmatprep.mubr.msk.f32.mxu1 %vm10820_vm8, %v15171_v15 }
0x1378   : > { %v5850_v0 = vpop.trf.xlu1 }
0x1379   : > { %9708 = vmatmul.mubr.msk.f32.gmra.mrb[194].mxu1 %vm904_vm9, %v5850_v0 }
0x137a   : > { %10342 = vmatpush1.bf16.xpose.msra.mxu1 %v13556_v40  ;;  %9710 = vmatprep.mubr.msk.f32.mxu1 %vm10820_vm8, %v15171_v15 }
0x137b   : > { %10343 = vmatprep.subr.bf16.mxu1 %v15176_v30 }
0x137c   : > { %v5851_v38 = vpop.trf.xlu1 }
0x137d   : > { %9711 = vmatmul.mubr.msk.f32.gmra.mrb[196].mxu1 %vm904_vm9, %v5851_v38 }
0x137e   : > { %9713 = vmatprep.mubr.msk.f32.mxu1 %vm10820_vm8, %v15171_v15 }
0x1380   : > { %v5852_v4 = vpop.trf.xlu1 }
0x1381   : > { %9714 = vmatmul.mubr.msk.f32.gmra.mrb[198].mxu1 %vm904_vm9, %v5852_v4 }
0x1382   : > { %10345 = vmatpush1.bf16.xpose.msra.mxu1 %v13574_v5  ;;  %9716 = vmatprep.mubr.msk.f32.mxu1 %vm10820_vm8, %v15171_v15 }
0x1383   : > { %10346 = vmatprep.subr.bf16.mxu1 %v15176_v30 }
0x1384   : > { %v5853_v40 = vpop.trf.xlu1 }
0x1385   : > { %9717 = vmatmul.mubr.msk.f32.gmra.mrb[200].mxu1 %vm904_vm9, %v5853_v40 }
0x1386   : > { %9719 = vmatprep.mubr.msk.f32.mxu1 %vm10820_vm8, %v15171_v15 }
0x1388   : > { %v5854_v36 = vpop.trf.xlu1 }
0x1389   : > { %9720 = vmatmul.mubr.msk.f32.gmra.mrb[202].mxu1 %vm904_vm9, %v5854_v36 }
0x138a   : > { %10348 = vmatpush1.bf16.xpose.msra.mxu1 %v13592_v47  ;;  %9722 = vmatprep.mubr.msk.f32.mxu1 %vm10820_vm8, %v15171_v15 }
0x138b   : > { %10349 = vmatprep.subr.bf16.mxu1 %v15176_v30 }
0x138c   : > { %v5855_v5 = vpop.trf.xlu1 }
0x138d   : > { %9723 = vmatmul.mubr.msk.f32.gmra.mrb[204].mxu1 %vm904_vm9, %v5855_v5 }
0x138e   : > { %9725 = vmatprep.mubr.msk.f32.mxu1 %vm10820_vm8, %v15171_v15 }
0x1390   : > { %v5856_v50 = vpop.trf.xlu1 }
0x1391   : > { %9726 = vmatmul.mubr.msk.f32.gmra.mrb[206].mxu1 %vm904_vm9, %v5856_v50 }
0x1392   : > { %10351 = vmatpush1.bf16.xpose.msra.mxu1 %v13610_v63  ;;  %9728 = vmatprep.mubr.msk.f32.mxu1 %vm10820_vm8, %v15171_v15 }
0x1393   : > { %6194 = vmatprep.subr.mxu1 %v15171_v15 }
0x1394   : > { %v5857_v47 = vpop.trf.xlu1 }
0x1395   : > { %9729 = vmatmul.mubr.msk.f32.gmra.mrb[208].mxu1 %vm904_vm9, %v5857_v47 }
0x1396   : > { %9731 = vmatprep.mubr.msk.f32.mxu1 %vm10820_vm8, %v15171_v15 }
0x1399   : > { %9732 = vmatmul.mubr.msk.f32.gmra.mrb[210].mxu1 %vm904_vm9, %v5874_v1 }
0x139a   : > { %6195 = vmatpush1.xpose.msra.mxu1 %v13620_v16  ;;  %6226 = vmatprep.mubr.f32.mxu1 %v15171_v15 }
0x139d   : > { %6227 = vmatmul.mubr.f32.vlgmr.msra.gmra.mrb[212].mxu1 %v13670_v43 }
0x139e   : > { %6424 = vmatprep.mubr.f32.mxu1 %v15171_v15 }
0x13ec   : > { %v5742_v63 = vpop.f32.mrb[178].mxu0 }
0x13ed   : > { %v6587_v6 = vmul.f32 0.05, %v5742_v63  ;;  %v9632_v28 = vpop.f32.mrb[179].mxu0 }
0x13ef   : > { %v6621_v20 = vsub.f32 %v13470_v11, %v6587_v6 }
0x13f0   : > { %v5747_v53 = vpop.f32.mrb[180].mxu0 }
0x13f1   : > { %6655 = vst [vmem:[%s11057_s10] sm:$0xff] %v6621_v20  ;;  %v6588_v46 = vmul.f32 0.05, %v5747_v53  ;;  %v9635_v51 = vpop.f32.mrb[181].mxu0 }
0x13f3   : > { %v6622_v24 = vsub.f32 %v13460_v59, %v6588_v46 }
0x13f4   : > { %v5752_v7 = vpop.f32.mrb[182].mxu0 }
0x13f5   : > { %6656 = vst [vmem:[%s11057_s10 + $0x8] sm:$0xff] %v6622_v24  ;;  %v6589_v10 = vmul.f32 0.05, %v5752_v7  ;;  %v9638_v43 = vpop.f32.mrb[183].mxu0 }
0x13f7   : > { %v6623_v39 = vsub.f32 %v13494_v58, %v6589_v10 }
0x13f8   : > { %v5757_v60 = vpop.f32.mrb[184].mxu0 }
0x13f9   : > { %6657 = vst [vmem:[%s11057_s10 + $0x10] sm:$0xff] %v6623_v39  ;;  %v6590_v12 = vmul.f32 0.05, %v5757_v60  ;;  %v9641_v23 = vpop.f32.mrb[185].mxu0 }
0x13fb   : > { %v6624_v11 = vsub.f32 %v13487_v3, %v6590_v12 }
0x13fc   : > { %v5762_v31 = vpop.f32.mrb[186].mxu0 }
0x13fd   : > { %6658 = vst [vmem:[%s11057_s10 + $0x18] sm:$0xff] %v6624_v11  ;;  %v6591_v52 = vmul.f32 0.05, %v5762_v31  ;;  %v9644_v41 = vpop.f32.mrb[187].mxu0 }
0x13ff   : > { %v6625_v59 = vsub.f32 %v13512_v32, %v6591_v52 }
0x1400   : > { %v5767_v48 = vpop.f32.mrb[188].mxu0 }
0x1401   : > { %6659 = vst [vmem:[%s11057_s10 + $0x20] sm:$0xff] %v6625_v59  ;;  %v6592_v55 = vmul.f32 0.05, %v5767_v48  ;;  %v9647_v25 = vpop.f32.mrb[189].mxu0 }
0x1403   : > { %v6626_v58 = vsub.f32 %v13505_v44, %v6592_v55 }
0x1404   : > { %v5772_v54 = vpop.f32.mrb[190].mxu0 }
0x1405   : > { %6660 = vst [vmem:[%s11057_s10 + $0x28] sm:$0xff] %v6626_v58  ;;  %v6593_v0 = vmul.f32 0.05, %v5772_v54  ;;  %v9650_v38 = vpop.f32.mrb[191].mxu0 }
0x1407   : > { %v6627_v3 = vsub.f32 %v13530_v61, %v6593_v0 }
0x1408   : > { %v5777_v4 = vpop.f32.mrb[192].mxu0 }
0x1409   : > { %6661 = vst [vmem:[%s11057_s10 + $0x30] sm:$0xff] %v6627_v3  ;;  %v6594_v40 = vmul.f32 0.05, %v5777_v4  ;;  %v9653_v36 = vpop.f32.mrb[193].mxu0 }
0x140b   : > { %v6628_v32 = vsub.f32 %v13523_v26, %v6594_v40 }
0x140c   : > { %v5782_v5 = vpop.f32.mrb[194].mxu0 }
0x140d   : > { %6662 = vst [vmem:[%s11057_s10 + $0x38] sm:$0xff] %v6628_v32  ;;  %v6595_v50 = vmul.f32 0.05, %v5782_v5  ;;  %v9656_v47 = vpop.f32.mrb[195].mxu0 }
0x140f   : > { %v6629_v44 = vsub.f32 %v13548_v14, %v6595_v50 }
0x1410   : > { %v5787_v1 = vpop.f32.mrb[196].mxu0 }
0x1411   : > { %6663 = vst [vmem:[%s11057_s10 + $0x40] sm:$0xff] %v6629_v44  ;;  %v6596_v63 = vmul.f32 0.05, %v5787_v1  ;;  %v9659_v6 = vpop.f32.mrb[197].mxu0 }
0x1413   : > { %v6630_v61 = vsub.f32 %v13541_v42, %v6596_v63 }
0x1414   : > { %v5792_v28 = vpop.f32.mrb[198].mxu0 }
0x1415   : > { %6664 = vst [vmem:[%s11057_s10 + $0x48] sm:$0xff] %v6630_v61  ;;  %v6597_v20 = vmul.f32 0.05, %v5792_v28  ;;  %v9662_v53 = vpop.f32.mrb[199].mxu0 }
0x1417   : > { %v6631_v26 = vsub.f32 %v13566_v18, %v6597_v20 }
0x1418   : > { %v5797_v46 = vpop.f32.mrb[200].mxu0 }
0x1419   : > { %6665 = vst [vmem:[%s11057_s10 + $0x50] sm:$0xff] %v6631_v26  ;;  %v6598_v51 = vmul.f32 0.05, %v5797_v46  ;;  %v9665_v24 = vpop.f32.mrb[201].mxu0 }
0x141b   : > { %v6632_v14 = vsub.f32 %v13559_v34, %v6598_v51  ;;  %v15392_v51 = vld [vmem:[#allocation33_spill] sm:$0xff] }
0x141c   : > { %v5802_v7 = vpop.f32.mrb[202].mxu0 }
0x141d   : > { %6666 = vst [vmem:[%s11057_s10 + $0x58] sm:$0xff] %v6632_v14  ;;  %v6599_v10 = vmul.f32 0.05, %v5802_v7  ;;  %v9668_v43 = vpop.f32.mrb[203].mxu0  ;;  %v15393_v7 = vld [vmem:[#allocation34_spill] sm:$0xff] }
0x141e   : > { %v15395_v43 = vld [vmem:[#allocation35_spill] sm:$0xff] }
0x141f   : > { %v6633_v42 = vsub.f32 %v13584_v35, %v6599_v10 }
0x1420   : > { %v5807_v39 = vpop.f32.mrb[204].mxu0 }
0x1421   : > { %6667 = vst [vmem:[%s11057_s10 + $0x60] sm:$0xff] %v6633_v42  ;;  %v6600_v60 = vmul.f32 0.05, %v5807_v39  ;;  %v9671_v12 = vpop.f32.mrb[205].mxu0 }
0x1423   : > { %v6634_v18 = vsub.f32 %v13577_v56, %v6600_v60  ;;  %v15396_v60 = vld [vmem:[#allocation36_spill] sm:$0xff] }
0x1424   : > { %v5812_v23 = vpop.f32.mrb[206].mxu0 }
0x1425   : > { %6668 = vst [vmem:[%s11057_s10 + $0x68] sm:$0xff] %v6634_v18  ;;  %v6601_v11 = vmul.f32 0.05, %v5812_v23  ;;  %v9674_v31 = vpop.f32.mrb[207].mxu0  ;;  %v15398_v18 = vld [vmem:[#allocation37_spill] sm:$0xff] }
0x1427   : > { %v6635_v34 = vsub.f32 %v13602_v2, %v6601_v11 }
0x1428   : > { %v5817_v52 = vpop.f32.mrb[208].mxu0 }
0x1429   : > { %6669 = vst [vmem:[%s11057_s10 + $0x70] sm:$0xff] %v6635_v34  ;;  %v6602_v41 = vmul.f32 0.05, %v5817_v52  ;;  %v9677_v59 = vpop.f32.mrb[209].mxu0  ;;  %v15399_v34 = vld [vmem:[#allocation38_spill] sm:$0xff] }
0x142b   : > { %v6636_v35 = vsub.f32 %v13595_v29, %v6602_v41  ;;  %v15401_v41 = vld [vmem:[#allocation39_spill] sm:$0xff] }
0x142c   : > { %v5822_v48 = vpop.f32.mrb[210].mxu0  ;;  %v6007_v55 = vpop.f32.mrb[178].mxu1 }
0x142d   : > { %6670 = vst [vmem:[%s11057_s10 + $0x78] sm:$0xff] %v6636_v35  ;;  %v6603_v25 = vmul.f32 0.05, %v5822_v48  ;;  %v6604_v58 = vmul.f32 0.05, %v6007_v55  ;;  %v9685_v56 = vpop.f32.mrb[179].mxu1 }
0x142e   : > { %v9680_v54 = vpop.f32.mrb[211].mxu0  ;;  %v15402_v55 = vld [vmem:[#allocation13_spill] sm:$0xff] }
0x142f   : > { %v6637_v0 = vsub.f32 %v13617_v13, %v6603_v25  ;;  %v13846_v2 = vsub.f32 %v13138_v9, %v6604_v58  ;;  %v15404_v58 = vld [vmem:[#allocation40_spill] sm:$0xff] }
0x1430   : > { %v6012_v38 = vpop.f32.mrb[180].mxu1  ;;  %v6157_v3 = vpop.f32.mrb[212].mxu0 }
0x1431   : > { %6671 = vst [vmem:[%s11057_s10 + $0x80] sm:$0x1] %v6637_v0  ;;  %6672 = vst [vmem:[%s11057_s10 + $0x88] sm:$0xff] %v13846_v2  ;;  %v6605_v4 = vmul.f32 0.05, %v6012_v38  ;;  %v9688_v29 = vpop.f32.mrb[181].mxu1 }
0x1432   : > { %v6159_v40 = vpop.f32.mrb[213].mxu0  ;;  %v15405_v38 = vld [vmem:[#allocation14_spill] sm:$0xff] }
0x1433   : > { %v6234_v36 = vsel %vm5380_vm7, %v6159_v40, 0.0  ;;  %v13854_v32 = vsub.f32 %v13146_v45, %v6605_v4 }
0x1434   : > { %v6238_v5 = vmul.f32 0.0, %v6234_v36  ;;  %v6017_v13 = vpop.f32.mrb[182].mxu1  ;;  %v15407_v36 = vld [vmem:[#allocation15_spill] sm:$0xff] }
0x1435   : > { %6673 = vst [vmem:[%s11057_s10 + $0x90] sm:$0xff] %v13854_v32  ;;  %v6606_v9 = vmul.f32 0.05, %v6017_v13  ;;  %v9691_v50 = vpop.f32.mrb[183].mxu1 }
0x1436   : > { %6241 = vmatprep.subr.mxu0 %v6238_v5 }
0x1437   : > { %9026 = vmatpush1.msk.msra.mxu0 %vm5379_vm11, %v6157_v3  ;;  %v13861_v47 = vsub.f32 %v13153_v62, %v6606_v9 }
0x1438   : > { %9027 = vmatmul.mubr.msk.f32.vlgmr.msra.gmra.mrb[214].mxu0 %vm904_vm9, %v11660_v8  ;;  %v6022_v17 = vpop.f32.mrb[184].mxu1 }
0x1439   : > { %6311 = vmatprep.mubr.f32.mxu0 %v15171_v15  ;;  %6674 = vst [vmem:[%s11057_s10 + $0x98] sm:$0xff] %v13861_v47  ;;  %v6607_v45 = vmul.f32 0.05, %v6022_v17  ;;  %v9694_v44 = vpop.f32.mrb[185].mxu1  ;;  %v15409_v17 = vld [vmem:[#allocation31_spill] sm:$0xff] }
0x143b   : > { %v13869_v1 = vsub.f32 %v13161_v27, %v6607_v45 }
0x143c   : > { %9028 = vmatmul.mubr.msk.f32.gmra.mrb[216].mxu0 %vm904_vm9, %v11665_v37  ;;  %v6027_v57 = vpop.f32.mrb[186].mxu1 }
0x143d   : > { %6317 = vmatprep.mubr.f32.mxu0 %v15171_v15  ;;  %6675 = vst [vmem:[%s11057_s10 + $0xa0] sm:$0xff] %v13869_v1  ;;  %v6608_v62 = vmul.f32 0.05, %v6027_v57  ;;  %v9697_v63 = vpop.f32.mrb[187].mxu1 }
0x143e   : > { %v15411_v63 = vld [vmem:[#allocation29_spill] sm:$0xff] }
0x143f   : > { %v13877_v6 = vsub.f32 %v13169_v49, %v6608_v62 }
0x1440   : > { %9029 = vmatmul.mubr.msk.f32.gmra.mrb[218].mxu0 %vm904_vm9, %v11679_v19  ;;  %v6032_v61 = vpop.f32.mrb[188].mxu1 }
0x1441   : > { %6323 = vmatprep.mubr.f32.mxu0 %v15171_v15  ;;  %6676 = vst [vmem:[%s11057_s10 + $0xa8] sm:$0xff] %v13877_v6  ;;  %v6609_v27 = vmul.f32 0.05, %v6032_v61  ;;  %v9700_v28 = vpop.f32.mrb[189].mxu1 }
0x1443   : > { %v13885_v20 = vsub.f32 %v13177_v33, %v6609_v27 }
0x1444   : > { %9030 = vmatmul.mubr.msk.f32.gmra.mrb[220].mxu0 %vm904_vm9, %v11695_v21  ;;  %v6037_v53 = vpop.f32.mrb[190].mxu1 }
0x1445   : > { %6329 = vmatprep.mubr.f32.mxu0 %v15171_v15  ;;  %6677 = vst [vmem:[%s11057_s10 + $0xb0] sm:$0xff] %v13885_v20  ;;  %v6610_v49 = vmul.f32 0.05, %v6037_v53  ;;  %v9703_v26 = vpop.f32.mrb[191].mxu1 }
0x1447   : > { %v13893_v46 = vsub.f32 %v13185_v22, %v6610_v49  ;;  %v15413_v49 = vld [vmem:[#allocation28_spill] sm:$0xff] }
0x1448   : > { %9031 = vmatmul.mubr.msk.f32.gmra.mrb[222].mxu0 %vm904_vm9, %v15392_v51  ;;  %v6042_v24 = vpop.f32.mrb[192].mxu1 }
0x1449   : > { %6335 = vmatprep.mubr.f32.mxu0 %v15171_v15  ;;  %6678 = vst [vmem:[%s11057_s10 + $0xb8] sm:$0xff] %v13893_v46  ;;  %v6611_v33 = vmul.f32 0.05, %v6042_v24  ;;  %v9706_v14 = vpop.f32.mrb[193].mxu1 }
0x144b   : > { %v13901_v10 = vsub.f32 %v15393_v7, %v6611_v33 }
0x144c   : > { %9032 = vmatmul.mubr.msk.f32.gmra.mrb[224].mxu0 %vm904_vm9, %v15395_v43  ;;  %v6047_v42 = vpop.f32.mrb[194].mxu1 }
0x144d   : > { %15394 = vst [vmem:[#allocation34_spill] sm:$0xff] %v13901_v10  ;;  %6341 = vmatprep.mubr.f32.mxu0 %v15171_v15  ;;  %6679 = vst [vmem:[%s11057_s10 + $0xc0] sm:$0xff] %v13901_v10  ;;  %v6612_v22 = vmul.f32 0.05, %v6047_v42  ;;  %v9709_v39 = vpop.f32.mrb[195].mxu1 }
0x144f   : > { %v13909_v12 = vsub.f32 %v15396_v60, %v6612_v22 }
0x1450   : > { %9033 = vmatmul.mubr.msk.f32.gmra.mrb[226].mxu0 %vm904_vm9, %v15398_v18  ;;  %v6052_v23 = vpop.f32.mrb[196].mxu1 }
0x1451   : > { %15397 = vst [vmem:[#allocation36_spill] sm:$0xff] %v13909_v12  ;;  %6347 = vmatprep.mubr.f32.mxu0 %v15171_v15  ;;  %6680 = vst [vmem:[%s11057_s10 + $0xc8] sm:$0xff] %v13909_v12  ;;  %v6613_v11 = vmul.f32 0.05, %v6052_v23  ;;  %v9712_v31 = vpop.f32.mrb[197].mxu1 }
0x1452   : > { %v15417_v31 = vld [vmem:[#allocation16_spill] sm:$0xff] }
0x1453   : > { %v13917_v52 = vsub.f32 %v15399_v34, %v6613_v11  ;;  %v15418_v34 = vld [vmem:[#allocation27_spill] sm:$0xff] }
0x1454   : > { %9034 = vmatmul.mubr.msk.f32.gmra.mrb[228].mxu0 %vm904_vm9, %v15401_v41  ;;  %v6057_v59 = vpop.f32.mrb[198].mxu1 }
0x1455   : > { %15400 = vst [vmem:[#allocation38_spill] sm:$0xff] %v13917_v52  ;;  %6353 = vmatprep.mubr.f32.mxu0 %v15171_v15  ;;  %6681 = vst [vmem:[%s11057_s10 + $0xd0] sm:$0xff] %v13917_v52  ;;  %v6614_v35 = vmul.f32 0.05, %v6057_v59  ;;  %v9715_v48 = vpop.f32.mrb[199].mxu1  ;;  %v15420_v59 = vld [vmem:[#allocation32_spill] sm:$0xff] }
0x1456   : > { %v15422_v48 = vld [vmem:[#allocation42_spill] sm:$0xff] }
0x1457   : > { %v13925_v25 = vsub.f32 %v15402_v55, %v6614_v35  ;;  %v15421_v35 = vld [vmem:[#allocation30_spill] sm:$0xff]  ;;  %v15423_v55 = vld [vmem:[#allocation43_spill] sm:$0xff] }
0x1458   : > { %9035 = vmatmul.mubr.msk.f32.gmra.mrb[230].mxu0 %vm904_vm9, %v15404_v58  ;;  %v6062_v56 = vpop.f32.mrb[200].mxu1 }
0x1459   : > { %15403 = vst [vmem:[#allocation13_spill] sm:$0xff] %v13925_v25  ;;  %6829 = vmatprep.mubr.f32.mxu0 %v15171_v15  ;;  %6682 = vst [vmem:[%s11057_s10 + $0xd8] sm:$0xff] %v13925_v25  ;;  %v6615_v54 = vmul.f32 0.05, %v6062_v56  ;;  %v9718_v0 = vpop.f32.mrb[201].mxu1  ;;  %v15424_v56 = vld [vmem:[#allocation44_spill] sm:$0xff] }
0x145b   : > { %v13933_v3 = vsub.f32 %v15405_v38, %v6615_v54  ;;  %v15425_v54 = vld [vmem:[#allocation45_spill] sm:$0xff] }
0x145c   : > { %v6067_v4 = vpop.f32.mrb[202].mxu1 }
0x145d   : > { %15406 = vst [vmem:[#allocation14_spill] sm:$0xff] %v13933_v3  ;;  %6683 = vst [vmem:[%s11057_s10 + $0xe0] sm:$0xff] %v13933_v3  ;;  %v6616_v29 = vmul.f32 0.05, %v6067_v4  ;;  %v9721_v40 = vpop.f32.mrb[203].mxu1 }
0x145e   : > { %v10712_v40 = vld [vmem:[%s11002_s15] sm:$0xff] }
0x145f   : > { %v13938_v5 = vsub.f32 %v15407_v36, %v6616_v29 }
0x1460   : > { %v6072_v13 = vpop.f32.mrb[204].mxu1 }
0x1461   : > { %15408 = vst [vmem:[#allocation15_spill] sm:$0xff] %v13938_v5  ;;  %6684 = vst [vmem:[%s11057_s10 + $0xe8] sm:$0xff] %v13938_v5  ;;  %v6617_v9 = vmul.f32 0.05, %v6072_v13  ;;  %v9724_v50 = vpop.f32.mrb[205].mxu1  ;;  %v10713_v13 = vld [vmem:[%s11002_s15 + $0x8] sm:$0xff] }
0x1463   : > { %v13943_v45 = vsub.f32 %v15409_v17, %v6617_v9 }
0x1464   : > { %v6077_v44 = vpop.f32.mrb[206].mxu1 }
0x1465   : > { %15410 = vst [vmem:[#allocation31_spill] sm:$0xff] %v13943_v45  ;;  %6685 = vst [vmem:[%s11057_s10 + $0xf0] sm:$0xff] %v13943_v45  ;;  %v6618_v57 = vmul.f32 0.05, %v6077_v44  ;;  %v9727_v62 = vpop.f32.mrb[207].mxu1 }
0x1466   : > { %v10714_v62 = vld [vmem:[%s11002_s15 + $0x10] sm:$0xff] }
0x1467   : > { %v13948_v61 = vsub.f32 %v15411_v63, %v6618_v57 }
0x1468   : > { %v6082_v27 = vpop.f32.mrb[208].mxu1 }
0x1469   : > { %15412 = vst [vmem:[#allocation29_spill] sm:$0xff] %v13948_v61  ;;  %6686 = vst [vmem:[%s11057_s10 + $0xf8] sm:$0xff] %v13948_v61  ;;  %v6619_v28 = vmul.f32 0.05, %v6082_v27  ;;  %v9730_v53 = vpop.f32.mrb[209].mxu1  ;;  %v10715_v27 = vld [vmem:[%s11002_s15 + $0x18] sm:$0xff] }
0x146b   : > { %v13953_v26 = vsub.f32 %v15413_v49, %v6619_v28 }
0x146c   : > { %v6087_v24 = vpop.f32.mrb[210].mxu1 }
0x146d   : > { %15414 = vst [vmem:[#allocation28_spill] sm:$0xff] %v13953_v26  ;;  %6687 = vst [vmem:[%s11057_s10 + $0x100] sm:$0xff] %v13953_v26  ;;  %v6620_v33 = vmul.f32 0.05, %v6087_v24  ;;  %v9733_v14 = vpop.f32.mrb[211].mxu1 }
0x146e   : > { %v10716_v14 = vld [vmem:[%s11002_s15 + $0x20] sm:$0xff] }
0x146f   : > { %v6654_v7 = vsub.f32 %v13620_v16, %v6620_v33  ;;  %v15419_v16 = vld [vmem:[#allocation41_spill] sm:$0xff] }
0x1470   : > { %v6228_v42 = vpop.f32.mrb[212].mxu1 }
0x1471   : > { %6688 = vst [vmem:[%s11057_s10 + $0x108] sm:$0x1] %v6654_v7  ;;  %v6230_v22 = vpop.f32.mrb[213].mxu1 }
0x1472   : > { %v6236_v60 = vsel %vm5382_vm10, %v6230_v22, 0.0 }
0x1473   : > { %v6240_v23 = vmul.f32 0.0, %v6236_v60 }
0x1475   : > { %6360 = vmatprep.subr.mxu1 %v6240_v23 }
0x1476   : > { %9036 = vmatpush1.msk.msra.mxu1 %vm5381_vm6, %v6228_v42  ;;  %v10717_v42 = vld [vmem:[%s11002_s15 + $0x28] sm:$0xff] }
0x1477   : > { %9037 = vmatmul.mubr.msk.f32.vlgmr.msra.gmra.mrb[214].mxu1 %vm904_vm9, %v15417_v31 }
0x1478   : > { %6430 = vmatprep.mubr.f32.mxu1 %v15171_v15 }
0x147b   : > { %9038 = vmatmul.mubr.msk.f32.gmra.mrb[216].mxu1 %vm904_vm9, %v15418_v34 }
0x147c   : > { %6436 = vmatprep.mubr.f32.mxu1 %v15171_v15 }
0x147f   : > { %9039 = vmatmul.mubr.msk.f32.gmra.mrb[218].mxu1 %vm904_vm9, %v15419_v16 }
0x1480   : > { %6442 = vmatprep.mubr.f32.mxu1 %v15171_v15 }
0x1483   : > { %9040 = vmatmul.mubr.msk.f32.gmra.mrb[220].mxu1 %vm904_vm9, %v15420_v59  ;;  %v14328_v59 = vld [vmem:[%s11057_s10 + $0x108] sm:$0x1] }
0x1484   : > { %6448 = vmatprep.mubr.f32.mxu1 %v15171_v15 }
0x1487   : > { %9041 = vmatmul.mubr.msk.f32.gmra.mrb[222].mxu1 %vm904_vm9, %v15421_v35  ;;  %v14325_v35 = vld [vmem:[%s11057_s10 + $0x80] sm:$0x1] }
0x1488   : > { %6454 = vmatprep.mubr.f32.mxu1 %v15171_v15 }
0x148b   : > { %9042 = vmatmul.mubr.msk.f32.gmra.mrb[224].mxu1 %vm904_vm9, %v15422_v48  ;;  %v14318_v48 = vpack.c.bf16 %v13953_v26, %v13948_v61 }
0x148c   : > { %6460 = vmatprep.mubr.f32.mxu1 %v15171_v15 }
0x148f   : > { %9043 = vmatmul.mubr.msk.f32.gmra.mrb[226].mxu1 %vm904_vm9, %v15423_v55 }
0x1490   : > { %6466 = vmatprep.mubr.f32.mxu1 %v15171_v15 }
0x1493   : > { %9044 = vmatmul.mubr.msk.f32.gmra.mrb[228].mxu1 %vm904_vm9, %v15424_v56  ;;  %v14310_v56 = vld [vmem:[%s11057_s10 + $0x70] sm:$0xff] }
0x1494   : > { %6472 = vmatprep.mubr.f32.mxu1 %v15171_v15 }
0x1497   : > { %9045 = vmatmul.mubr.msk.f32.gmra.mrb[230].mxu1 %vm904_vm9, %v15425_v54  ;;  %v14303_v54 = vld [vmem:[%s11057_s10 + $0x78] sm:$0xff] }
0x1498   : > { %6906 = vmatprep.mubr.f32.mxu1 %v15171_v15  ;;  %v14314_v55 = vpack.c.bf16 %v14303_v54, %v14310_v56 }
0x150b   : > { %v6307_v0 = vpop.f32.mrb[214].mxu0 }
0x150c   : > { %v6479_v38 = vmul.f32 0.05, %v6307_v0  ;;  %v6309_v4 = vpop.f32.mrb[215].mxu0  ;;  %v10718_v0 = vld [vmem:[%s11002_s15 + $0x30] sm:$0xff] }
0x150d   : > { %v6480_v29 = vmul.f32 0.05, %v6309_v4  ;;  %v10719_v4 = vld [vmem:[%s11002_s15 + $0x38] sm:$0xff] }
0x150e   : > { %v6515_v36 = vsub.f32 %v10712_v40, %v6479_v38 }
0x150f   : > { %v6516_v9 = vsub.f32 %v10713_v13, %v6480_v29  ;;  %v6313_v50 = vpop.f32.mrb[216].mxu0 }
0x1510   : > { %6551 = vst [vmem:[%s11002_s15] sm:$0xff] %v6515_v36  ;;  %v6481_v17 = vmul.f32 0.05, %v6313_v50  ;;  %v6315_v44 = vpop.f32.mrb[217].mxu0  ;;  %v10720_v50 = vld [vmem:[%s11002_s15 + $0x40] sm:$0xff] }
0x1511   : > { %6552 = vst.msk [vmem:[%s11002_s15 + $0x8] sm:$0xff] %vm338_vm0, %v6516_v9  ;;  %v6482_v57 = vmul.f32 0.05, %v6315_v44  ;;  %v10721_v44 = vld [vmem:[%s11002_s15 + $0x48] sm:$0xff] }
0x1512   : > { %v6517_v63 = vsub.f32 %v10714_v62, %v6481_v17 }
0x1513   : > { %v6518_v28 = vsub.f32 %v10715_v27, %v6482_v57  ;;  %v6319_v53 = vpop.f32.mrb[218].mxu0 }
0x1514   : > { %6553 = vst [vmem:[%s11002_s15 + $0x10] sm:$0xff] %v6517_v63  ;;  %v6483_v49 = vmul.f32 0.05, %v6319_v53  ;;  %v6321_v24 = vpop.f32.mrb[219].mxu0  ;;  %v10722_v53 = vld [vmem:[%s11002_s15 + $0x50] sm:$0xff] }
0x1515   : > { %6554 = vst.msk [vmem:[%s11002_s15 + $0x18] sm:$0xff] %vm338_vm0, %v6518_v28  ;;  %v6484_v33 = vmul.f32 0.05, %v6321_v24  ;;  %v10723_v24 = vld [vmem:[%s11002_s15 + $0x58] sm:$0xff] }
0x1516   : > { %v6519_v7 = vsub.f32 %v10716_v14, %v6483_v49 }
0x1517   : > { %v6520_v22 = vsub.f32 %v10717_v42, %v6484_v33  ;;  %v6325_v39 = vpop.f32.mrb[220].mxu0 }
0x1518   : > { %6555 = vst [vmem:[%s11002_s15 + $0x20] sm:$0xff] %v6519_v7  ;;  %v6485_v60 = vmul.f32 0.05, %v6325_v39  ;;  %v6327_v23 = vpop.f32.mrb[221].mxu0  ;;  %v10724_v39 = vld [vmem:[%s11002_s15 + $0x60] sm:$0xff] }
0x1519   : > { %6556 = vst.msk [vmem:[%s11002_s15 + $0x28] sm:$0xff] %vm338_vm0, %v6520_v22  ;;  %v6486_v11 = vmul.f32 0.05, %v6327_v23  ;;  %v10725_v23 = vld [vmem:[%s11002_s15 + $0x68] sm:$0xff] }
0x151a   : > { %v6521_v38 = vsub.f32 %v10718_v0, %v6485_v60 }
0x151b   : > { %v6522_v29 = vsub.f32 %v10719_v4, %v6486_v11  ;;  %v6331_v40 = vpop.f32.mrb[222].mxu0 }
0x151c   : > { %6557 = vst [vmem:[%s11002_s15 + $0x30] sm:$0xff] %v6521_v38  ;;  %v6487_v36 = vmul.f32 0.05, %v6331_v40  ;;  %v6333_v13 = vpop.f32.mrb[223].mxu0  ;;  %v10726_v40 = vld [vmem:[%s11002_s15 + $0x70] sm:$0xff] }
0x151d   : > { %6558 = vst.msk [vmem:[%s11002_s15 + $0x38] sm:$0xff] %vm338_vm0, %v6522_v29  ;;  %v6488_v9 = vmul.f32 0.05, %v6333_v13  ;;  %v10727_v13 = vld [vmem:[%s11002_s15 + $0x78] sm:$0xff] }
0x151e   : > { %v6523_v17 = vsub.f32 %v10720_v50, %v6487_v36 }
0x151f   : > { %v6524_v57 = vsub.f32 %v10721_v44, %v6488_v9  ;;  %v6337_v62 = vpop.f32.mrb[224].mxu0 }
0x1520   : > { %6559 = vst [vmem:[%s11002_s15 + $0x40] sm:$0xff] %v6523_v17  ;;  %v6489_v63 = vmul.f32 0.05, %v6337_v62  ;;  %v6339_v27 = vpop.f32.mrb[225].mxu0  ;;  %v10728_v62 = vld [vmem:[%s11002_s15 + $0x80] sm:$0x1] }
0x1521   : > { %6560 = vst.msk [vmem:[%s11002_s15 + $0x48] sm:$0xff] %vm338_vm0, %v6524_v57  ;;  %v6490_v28 = vmul.f32 0.05, %v6339_v27  ;;  %v10729_v27 = vld [vmem:[%s11002_s15 + $0x88] sm:$0x1] }
0x1522   : > { %v6525_v49 = vsub.f32 %v10722_v53, %v6489_v63 }
0x1523   : > { %v6526_v33 = vsub.f32 %v10723_v24, %v6490_v28  ;;  %v6343_v14 = vpop.f32.mrb[226].mxu0 }
0x1524   : > { %6561 = vst [vmem:[%s11002_s15 + $0x50] sm:$0xff] %v6525_v49  ;;  %v6491_v7 = vmul.f32 0.05, %v6343_v14  ;;  %v6345_v42 = vpop.f32.mrb[227].mxu0  ;;  %v15426_v14 = vld [vmem:[#allocation26_spill] sm:$0xff] }
0x1525   : > { %6562 = vst.msk [vmem:[%s11002_s15 + $0x58] sm:$0xff] %vm338_vm0, %v6526_v33  ;;  %v6492_v22 = vmul.f32 0.05, %v6345_v42  ;;  %v15428_v42 = vld [vmem:[#allocation46_spill] sm:$0xff] }
0x1526   : > { %v6527_v60 = vsub.f32 %v10724_v39, %v6491_v7 }
0x1527   : > { %v6528_v11 = vsub.f32 %v10725_v23, %v6492_v22  ;;  %v6349_v0 = vpop.f32.mrb[228].mxu0 }
0x1528   : > { %6563 = vst [vmem:[%s11002_s15 + $0x60] sm:$0xff] %v6527_v60  ;;  %v6493_v38 = vmul.f32 0.05, %v6349_v0  ;;  %v6351_v4 = vpop.f32.mrb[229].mxu0  ;;  %v15429_v0 = vld [vmem:[#allocation25_spill] sm:$0xff] }
0x1529   : > { %6564 = vst.msk [vmem:[%s11002_s15 + $0x68] sm:$0xff] %vm338_vm0, %v6528_v11  ;;  %v6494_v29 = vmul.f32 0.05, %v6351_v4  ;;  %v15431_v4 = vld [vmem:[#allocation19_spill] sm:$0xff] }
0x152a   : > { %v6529_v36 = vsub.f32 %v10726_v40, %v6493_v38 }
0x152b   : > { %v6530_v9 = vsub.f32 %v10727_v13, %v6494_v29  ;;  %v6355_v50 = vpop.f32.mrb[230].mxu0 }
0x152c   : > { %6565 = vst [vmem:[%s11002_s15 + $0x70] sm:$0xff] %v6529_v36  ;;  %v6495_v17 = vmul.f32 0.05, %v6355_v50  ;;  %v6357_v44 = vpop.f32.mrb[231].mxu0  ;;  %v15432_v50 = vld [vmem:[#allocation47_spill] sm:$0xff] }
0x152d   : > { %6566 = vst.msk [vmem:[%s11002_s15 + $0x78] sm:$0xff] %vm338_vm0, %v6530_v9  ;;  %v6496_v57 = vmul.f32 0.05, %v6357_v44  ;;  %v15434_v44 = vld [vmem:[#allocation7_spill] sm:$0xff] }
0x152e   : > { %v6531_v63 = vsub.f32 %v10728_v62, %v6495_v17 }
0x152f   : > { %v6532_v28 = vsub.f32 %v10729_v27, %v6496_v57 }
0x1530   : > { %6567 = vst [vmem:[%s11002_s15 + $0x80] sm:$0x1] %v6531_v63 }
0x1531   : > { %6568 = vst.msk [vmem:[%s11002_s15 + $0x88] sm:$0x1] %vm355_vm1, %v6532_v28 }
0x154a   : > { %v6426_v53 = vpop.f32.mrb[214].mxu1 }
0x154b   : > { %v6497_v49 = vmul.f32 0.05, %v6426_v53  ;;  %v6428_v24 = vpop.f32.mrb[215].mxu1  ;;  %v15435_v53 = vld [vmem:[#allocation17_spill] sm:$0xff] }
0x154c   : > { %v6498_v33 = vmul.f32 0.05, %v6428_v24  ;;  %v15437_v24 = vld [vmem:[#allocation21_spill] sm:$0xff] }
0x154d   : > { %v14036_v7 = vsub.f32 %v15426_v14, %v6497_v49 }
0x154e   : > { %v6534_v22 = vsub.f32 %v15428_v42, %v6498_v33  ;;  %v6432_v39 = vpop.f32.mrb[216].mxu1  ;;  %v6690_v42 = vld [vmem:[%s11002_s15 + $0x8] sm:$0xff] }
0x154f   : > { %15427 = vst [vmem:[#allocation22_spill] sm:$0xff] %v14036_v7  ;;  %6569 = vst [vmem:[%s11002_s15 + $0x90] sm:$0xff] %v14036_v7  ;;  %v6499_v60 = vmul.f32 0.05, %v6432_v39  ;;  %v6434_v23 = vpop.f32.mrb[217].mxu1 }
0x1550   : > { %6570 = vst.msk [vmem:[%s11002_s15 + $0x98] sm:$0xff] %vm338_vm0, %v6534_v22  ;;  %v6500_v11 = vmul.f32 0.05, %v6434_v23  ;;  %v6691_v22 = vld [vmem:[%s11002_s15 + $0x10] sm:$0xff]  ;;  %v6692_v23 = vld [vmem:[%s11002_s15 + $0x18] sm:$0xff] }
0x1551   : > { %v14044_v38 = vsub.f32 %v15429_v0, %v6499_v60 }
0x1552   : > { %v6536_v29 = vsub.f32 %v15431_v4, %v6500_v11  ;;  %v6438_v40 = vpop.f32.mrb[218].mxu1 }
0x1553   : > { %15430 = vst [vmem:[#allocation24_spill] sm:$0xff] %v14044_v38  ;;  %6571 = vst [vmem:[%s11002_s15 + $0xa0] sm:$0xff] %v14044_v38  ;;  %v6501_v36 = vmul.f32 0.05, %v6438_v40  ;;  %v6440_v13 = vpop.f32.mrb[219].mxu1 }
0x1554   : > { %6572 = vst.msk [vmem:[%s11002_s15 + $0xa8] sm:$0xff] %vm338_vm0, %v6536_v29  ;;  %v6502_v9 = vmul.f32 0.05, %v6440_v13  ;;  %v10352_v29 = vpack.c.bf16 %v6692_v23, %v6690_v42  ;;  %v15440_v13 = vld [vmem:[#allocation5_spill] sm:$0xff] }
0x1555   : > { %v14052_v17 = vsub.f32 %v15432_v50, %v6501_v36  ;;  %v6689_v36 = vld [vmem:[%s11002_s15] sm:$0xff] }
0x1556   : > { %v6538_v57 = vsub.f32 %v15434_v44, %v6502_v9  ;;  %v6444_v62 = vpop.f32.mrb[220].mxu1  ;;  %v10354_v50 = vpack.c.bf16 %v6691_v22, %v6689_v36  ;;  %v10370_v44 = vpack.c.bf16 %v14044_v38, %v14036_v7  ;;  %10353 = vmatprep.subr.bf16.mxu0 %v10352_v29  ;;  %v6696_v29 = vld [vmem:[%s11002_s15 + $0x38] sm:$0xff]  ;;  %v14292_v38 = vld [vmem:[%s11057_s10 + $0x60] sm:$0xff]  ;;  %v14300_v7 = vpack.c.bf16 %v13943_v45, %v13938_v5 }
0x1557   : > { %15433 = vst [vmem:[#allocation26_spill] sm:$0xff] %v14052_v17  ;;  %6573 = vst [vmem:[%s11002_s15 + $0xb0] sm:$0xff] %v14052_v17  ;;  %v6503_v63 = vmul.f32 0.05, %v6444_v62  ;;  %v6446_v27 = vpop.f32.mrb[221].mxu1  ;;  %v14069_v11 = vld [vmem:[%s11002_s15 + $0x98] sm:$0xff] }
0x1558   : > { %6574 = vst.msk [vmem:[%s11002_s15 + $0xb8] sm:$0xff] %vm338_vm0, %v6538_v57  ;;  %v6504_v28 = vmul.f32 0.05, %v6446_v27  ;;  %15438 = vst [vmem:[#allocation25_spill] sm:$0xff] %v14069_v11  ;;  %v15442_v57 = vld [vmem:[#allocation9_spill] sm:$0xff]  ;;  %10355 = vmatpush1.bf16.msra.mxu0 %v10354_v50 }
0x1559   : > { %v14060_v49 = vsub.f32 %v15435_v53, %v6503_v63 }
0x155a   : > { %v6540_v33 = vsub.f32 %v15437_v24, %v6504_v28  ;;  %v6450_v14 = vpop.f32.mrb[222].mxu1  ;;  %v15443_v24 = vld [vmem:[#allocation18_spill] sm:$0xff] }
0x155b   : > { %15436 = vst [vmem:[#allocation46_spill] sm:$0xff] %v14060_v49  ;;  %6575 = vst [vmem:[%s11002_s15 + $0xc0] sm:$0xff] %v14060_v49  ;;  %v6505_v39 = vmul.f32 0.05, %v6450_v14  ;;  %v6452_v60 = vpop.f32.mrb[223].mxu1  ;;  %v14072_v0 = vld [vmem:[%s11002_s15 + $0xa8] sm:$0xff] }
0x155c   : > { %15439 = vst [vmem:[#allocation19_spill] sm:$0xff] %v14072_v0  ;;  %6576 = vst.msk [vmem:[%s11002_s15 + $0xc8] sm:$0xff] %vm338_vm0, %v6540_v33  ;;  %v6506_v4 = vmul.f32 0.05, %v6452_v60  ;;  %v10368_v40 = vpack.c.bf16 %v14072_v0, %v14069_v11  ;;  %v15445_v14 = vld [vmem:[#allocation23_spill] sm:$0xff]  ;;  %v14285_v0 = vld [vmem:[%s11057_s10 + $0x68] sm:$0xff] }
0x155d   : > { %v14080_v9 = vsub.f32 %v15440_v13, %v6505_v39  ;;  %v6694_v39 = vld [vmem:[%s11002_s15 + $0x28] sm:$0xff]  ;;  %v6695_v60 = vld [vmem:[%s11002_s15 + $0x30] sm:$0xff]  ;;  %v14296_v11 = vpack.c.bf16 %v14285_v0, %v14292_v38 }
0x155e   : > { %v6542_v62 = vsub.f32 %v15442_v57, %v6506_v4  ;;  %v6456_v63 = vpop.f32.mrb[224].mxu1  ;;  %10369 = vmatprep.subr.bf16.mxu1 %v10368_v40  ;;  %v10356_v50 = vpack.c.bf16 %v6696_v29, %v6694_v39  ;;  %v6693_v57 = vld [vmem:[%s11002_s15 + $0x20] sm:$0xff] }
0x155f   : > { %15441 = vst [vmem:[#allocation47_spill] sm:$0xff] %v14080_v9  ;;  %6577 = vst [vmem:[%s11002_s15 + $0xd0] sm:$0xff] %v14080_v9  ;;  %v6507_v27 = vmul.f32 0.05, %v6456_v63  ;;  %v6458_v28 = vpop.f32.mrb[225].mxu1  ;;  %10371 = vmatpush1.bf16.msra.mxu1 %v10370_v44  ;;  %v14099_v40 = vld [vmem:[%s11002_s15 + $0xb8] sm:$0xff] }
0x1560   : > { %6578 = vst.msk [vmem:[%s11002_s15 + $0xd8] sm:$0xff] %vm338_vm0, %v6542_v62  ;;  %v6508_v53 = vmul.f32 0.05, %v6458_v28  ;;  %15446 = vst [vmem:[#allocation17_spill] sm:$0xff] %v14099_v40  ;;  %v15448_v62 = vld [vmem:[#allocation6_spill] sm:$0xff]  ;;  %v10374_v28 = vpack.c.bf16 %v14060_v49, %v14052_v17  ;;  %10357 = vmatprep.subr.bf16.mxu0 %v10356_v50  ;;  %v14282_v17 = vpack.c.bf16 %v13933_v3, %v13925_v25 }
0x1561   : > { %v14090_v33 = vsub.f32 %v15443_v24, %v6507_v27  ;;  %v10358_v27 = vpack.c.bf16 %v6695_v60, %v6693_v57  ;;  %v15451_v60 = vld [vmem:[#allocation20_spill] sm:$0xff]  ;;  %v6698_v50 = vld [vmem:[%s11002_s15 + $0x48] sm:$0xff] }
0x1562   : > { %v6544_v42 = vsub.f32 %v15445_v14, %v6508_v53  ;;  %v6462_v22 = vpop.f32.mrb[226].mxu1  ;;  %v15450_v53 = vld [vmem:[#allocation8_spill] sm:$0xff] }
0x1563   : > { %15444 = vst [vmem:[#allocation7_spill] sm:$0xff] %v14090_v33  ;;  %6579 = vst [vmem:[%s11002_s15 + $0xe0] sm:$0xff] %v14090_v33  ;;  %v6509_v23 = vmul.f32 0.05, %v6462_v22  ;;  %v6464_v4 = vpop.f32.mrb[227].mxu1  ;;  %v14102_v36 = vld [vmem:[%s11002_s15 + $0xc8] sm:$0xff]  ;;  %10359 = vmatpush1.bf16.msra.mxu0 %v10358_v27 }
0x1564   : > { %15447 = vst [vmem:[#allocation21_spill] sm:$0xff] %v14102_v36  ;;  %6580 = vst.msk [vmem:[%s11002_s15 + $0xe8] sm:$0xff] %vm338_vm0, %v6544_v42  ;;  %v6510_v13 = vmul.f32 0.05, %v6464_v4  ;;  %v10372_v44 = vpack.c.bf16 %v14102_v36, %v14099_v40  ;;  %v15453_v4 = vld [vmem:[#allocation10_spill] sm:$0xff]  ;;  %v15457_v36 = vld [vmem:[#allocation11_spill] sm:$0xff] }
0x1565   : > { %v14110_v63 = vsub.f32 %v15448_v62, %v6509_v23 }
0x1566   : > { %v6546_v24 = vsub.f32 %v15450_v53, %v6510_v13  ;;  %v6468_v14 = vpop.f32.mrb[228].mxu1  ;;  %10373 = vmatprep.subr.bf16.mxu1 %v10372_v44  ;;  %v6699_v44 = vld [vmem:[%s11002_s15 + $0x50] sm:$0xff]  ;;  %v6700_v53 = vld [vmem:[%s11002_s15 + $0x58] sm:$0xff] }
0x1567   : > { %15449 = vst [vmem:[#allocation5_spill] sm:$0xff] %v14110_v63  ;;  %6581 = vst [vmem:[%s11002_s15 + $0xf0] sm:$0xff] %v14110_v63  ;;  %v6511_v42 = vmul.f32 0.05, %v6468_v14  ;;  %v6470_v22 = vpop.f32.mrb[229].mxu1  ;;  %10375 = vmatpush1.bf16.msra.mxu1 %v10374_v28  ;;  %v14129_v27 = vld [vmem:[%s11002_s15 + $0xd8] sm:$0xff]  ;;  %v10360_v14 = vpack.c.bf16 %v6700_v53, %v6698_v50 }
0x1568   : > { %6582 = vst.msk [vmem:[%s11002_s15 + $0xf8] sm:$0xff] %vm338_vm0, %v6546_v24  ;;  %v6512_v39 = vmul.f32 0.05, %v6470_v22  ;;  %15454 = vst [vmem:[#allocation18_spill] sm:$0xff] %v14129_v27  ;;  %v6697_v22 = vld [vmem:[%s11002_s15 + $0x40] sm:$0xff]  ;;  %v6703_v50 = vld [vmem:[%s11002_s15 + $0x70] sm:$0xff] }
0x1569   : > { %v14120_v23 = vsub.f32 %v15451_v60, %v6511_v42  ;;  %10361 = vmatprep.subr.bf16.mxu0 %v10360_v14 }
0x156a   : > { %v6548_v29 = vsub.f32 %v15453_v4, %v6512_v39  ;;  %v6474_v13 = vpop.f32.mrb[230].mxu1  ;;  %v15456_v39 = vld [vmem:[#allocation12_spill] sm:$0xff]  ;;  %v10362_v4 = vpack.c.bf16 %v6699_v44, %v6697_v22 }
0x156b   : > { %15452 = vst [vmem:[#allocation9_spill] sm:$0xff] %v14120_v23  ;;  %6583 = vst [vmem:[%s11002_s15 + $0x100] sm:$0xff] %v14120_v23  ;;  %v6513_v57 = vmul.f32 0.05, %v6474_v13  ;;  %v6476_v62 = vpop.f32.mrb[231].mxu1  ;;  %v14132_v28 = vld [vmem:[%s11002_s15 + $0xe8] sm:$0xff]  ;;  %v10378_v13 = vpack.c.bf16 %v14090_v33, %v14080_v9  ;;  %v14264_v33 = vpack.c.bf16 %v13917_v52, %v13909_v12 }
0x156c   : > { %15455 = vst [vmem:[#allocation23_spill] sm:$0xff] %v14132_v28  ;;  %6584 = vst.msk [vmem:[%s11002_s15 + $0x108] sm:$0xff] %vm338_vm0, %v6548_v29  ;;  %v6514_v24 = vmul.f32 0.05, %v6476_v62  ;;  %v10376_v42 = vpack.c.bf16 %v14132_v28, %v14129_v27  ;;  %10363 = vmatpush1.bf16.msra.mxu0 %v10362_v4  ;;  %v6702_v29 = vld [vmem:[%s11002_s15 + $0x68] sm:$0xff]  ;;  %v6704_v62 = vld [vmem:[%s11002_s15 + $0x78] sm:$0xff] }
0x156d   : > { %v6549_v60 = vsub.f32 %v15456_v39, %v6513_v57  ;;  %v14168_v39 = vld [vmem:[%s11057_s10 + $0x8] sm:$0xff]  ;;  %v14267_v27 = vld [vmem:[%s11057_s10 + $0x58] sm:$0xff]  ;;  %v14274_v9 = vld [vmem:[%s11057_s10 + $0x50] sm:$0xff] }
0x156e   : > { %v6550_v49 = vsub.f32 %v15457_v36, %v6514_v24  ;;  %10377 = vmatprep.subr.bf16.mxu1 %v10376_v42  ;;  %v10364_v36 = vpack.c.bf16 %v6704_v62, %v6702_v29  ;;  %v6701_v24 = vld [vmem:[%s11002_s15 + $0x60] sm:$0xff]  ;;  %v6706_v42 = vld [vmem:[%s11002_s15 + $0x88] sm:$0x1]  ;;  %v14278_v40 = vpack.c.bf16 %v14267_v27, %v14274_v9 }
0x156f   : > { %6585 = vst [vmem:[%s11002_s15 + $0x110] sm:$0x1] %v6549_v60  ;;  %10379 = vmatpush1.bf16.msra.mxu1 %v10378_v13  ;;  %v14150_v44 = vld [vmem:[%s11002_s15 + $0xf8] sm:$0xff]  ;;  %v10366_v14 = vpack.c.bf16 %v6703_v50, %v6701_v24  ;;  %v6705_v60 = vld [vmem:[%s11002_s15 + $0x80] sm:$0x1]  ;;  %v10731_v50 = vld [vmem:[%s11256_s18 + $0x8] sm:$0xff] }
0x1570   : > { %6586 = vst.msk [vmem:[%s11002_s15 + $0x118] sm:$0x1] %vm355_vm1, %v6550_v49  ;;  %15458 = vst [vmem:[#allocation6_spill] sm:$0xff] %v14150_v44  ;;  %v10382_v49 = vpack.c.bf16 %v14120_v23, %v14110_v63  ;;  %10365 = vmatprep.subr.bf16.mxu0 %v10364_v36  ;;  %v14178_v13 = vld [vmem:[%s11057_s10] sm:$0xff]  ;;  %v14190_v36 = vpack.c.bf16 %v13854_v32, %v13846_v2  ;;  %v14202_v24 = vld [vmem:[%s11057_s10 + $0x10] sm:$0xff]  ;;  %v14246_v23 = vpack.c.bf16 %v13901_v10, %v13893_v46 }
0x1571   : > { %10367 = vmatpush1.bf16.msra.mxu0 %v10366_v14  ;;  %v10730_v29 = vld [vmem:[%s11256_s18] sm:$0xff]  ;;  %v14186_v62 = vpack.c.bf16 %v14168_v39, %v14178_v13 }
0x1572   : > { %9046 = vmatprep.subr.msk.mxu0 %vm500_vm2, %v6706_v42  ;;  %v14213_v42 = vld [vmem:[%s11057_s10 + $0x28] sm:$0xff]  ;;  %v14256_v63 = vld [vmem:[%s11057_s10 + $0x40] sm:$0xff] }
0x1573   : > { %v14153_v57 = vld [vmem:[%s11002_s15 + $0x108] sm:$0xff] }
0x1574   : > { %15459 = vst [vmem:[#allocation8_spill] sm:$0xff] %v14153_v57  ;;  %v10380_v53 = vpack.c.bf16 %v14153_v57, %v14150_v44  ;;  %v14249_v44 = vld [vmem:[%s11057_s10 + $0x48] sm:$0xff] }
0x1575   : > { %9047 = vmatpush1.msk.msra.mxu0 %vm500_vm2, %v6705_v60  ;;  %v14220_v60 = vld [vmem:[%s11057_s10 + $0x20] sm:$0xff]  ;;  %v14260_v28 = vpack.c.bf16 %v14249_v44, %v14256_v63 }
0x1576   : > { %10381 = vmatprep.subr.bf16.mxu1 %v10380_v53  ;;  %v14172_v4 = vld [vmem:[%s11002_s15 + $0x110] sm:$0x1]  ;;  %9048 = vmatmul.mubr.msk.f32.vlgmr.msra.gmra.mrb[232].mxu0 %vm496_vm3, %v10730_v29  ;;  %v14195_v53 = vld [vmem:[%s11057_s10 + $0x18] sm:$0xff]  ;;  %v14224_v29 = vpack.c.bf16 %v14213_v42, %v14220_v60 }
0x1577   : > { %10383 = vmatpush1.bf16.msra.mxu1 %v10382_v49  ;;  %v14162_v22 = vld [vmem:[%s11002_s15 + $0x118] sm:$0x1]  ;;  %15461 = vst [vmem:[#allocation10_spill] sm:$0xff] %v14172_v4  ;;  %10384 = vmatprep.subr.bf16.mxu0 %v15176_v30  ;;  %v14206_v14 = vpack.c.bf16 %v14195_v53, %v14202_v24  ;;  %v14210_v49 = vpack.c.bf16 %v13869_v1, %v13861_v47 }
0x1578   : > { %15460 = vst [vmem:[#allocation20_spill] sm:$0xff] %v14162_v22  ;;  %9049 = vmatprep.subr.msk.mxu1 %vm500_vm2, %v14162_v22  ;;  %10386 = vmatpush1.bf16.msra.mxu0 %v14186_v62  ;;  %v14231_v22 = vld [vmem:[%s11057_s10 + $0x38] sm:$0xff] }
0x1579   : > { %10387 = vmatprep.subr.bf16.mxu0 %v15176_v30 }
0x157b   : > { %9050 = vmatpush1.msk.msra.mxu1 %vm500_vm2, %v14172_v4  ;;  %v14238_v4 = vld [vmem:[%s11057_s10 + $0x30] sm:$0xff] }
0x157c   : > { %9051 = vmatmul.mubr.msk.f32.vlgmr.msra.gmra.mrb[232].mxu1 %vm496_vm3, %v10731_v50  ;;  %10408 = vmatprep.subr.bf16.mxu1 %v15176_v30  ;;  %v14228_v50 = vpack.c.bf16 %v13885_v20, %v13877_v6  ;;  %v14242_v57 = vpack.c.bf16 %v14231_v22, %v14238_v4 }
0x157d   : > { %10410 = vmatpush1.bf16.msra.mxu1 %v14190_v36  ;;  %10389 = vmatpush1.bf16.msra.mxu0 %v14206_v14 }
0x157e   : > { %10411 = vmatprep.subr.bf16.mxu1 %v15176_v30  ;;  %10390 = vmatprep.subr.bf16.mxu0 %v15176_v30 }
0x1581   : > { %10413 = vmatpush1.bf16.msra.mxu1 %v14210_v49  ;;  %10392 = vmatpush1.bf16.msra.mxu0 %v14224_v29 }
0x1582   : > { %10414 = vmatprep.subr.bf16.mxu1 %v15176_v30  ;;  %10393 = vmatprep.subr.bf16.mxu0 %v15176_v30 }
0x1585   : > { %10416 = vmatpush1.bf16.msra.mxu1 %v14228_v50  ;;  %10395 = vmatpush1.bf16.msra.mxu0 %v14242_v57 }
0x1586   : > { %10417 = vmatprep.subr.bf16.mxu1 %v15176_v30  ;;  %10396 = vmatprep.subr.bf16.mxu0 %v15176_v30 }
0x1589   : > { %10419 = vmatpush1.bf16.msra.mxu1 %v14246_v23  ;;  %10398 = vmatpush1.bf16.msra.mxu0 %v14260_v28 }
0x158a   : > { %10420 = vmatprep.subr.bf16.mxu1 %v15176_v30  ;;  %10399 = vmatprep.subr.bf16.mxu0 %v15176_v30 }
0x158d   : > { %10422 = vmatpush1.bf16.msra.mxu1 %v14264_v33  ;;  %10401 = vmatpush1.bf16.msra.mxu0 %v14278_v40 }
0x158e   : > { %10423 = vmatprep.subr.bf16.mxu1 %v15176_v30  ;;  %10402 = vmatprep.subr.bf16.mxu0 %v15176_v30 }
0x1591   : > { %10425 = vmatpush1.bf16.msra.mxu1 %v14282_v17  ;;  %10404 = vmatpush1.bf16.msra.mxu0 %v14296_v11 }
0x1592   : > { %10426 = vmatprep.subr.bf16.mxu1 %v15176_v30  ;;  %10405 = vmatprep.subr.bf16.mxu0 %v15176_v30 }
0x1595   : > { %10428 = vmatpush1.bf16.msra.mxu1 %v14300_v7  ;;  %10407 = vmatpush1.bf16.msra.mxu0 %v14314_v55 }
0x1596   : > { %10429 = vmatprep.subr.bf16.mxu1 %v15176_v30  ;;  %6959 = vmatprep.subr.mxu0 %v15171_v15 }
0x1599   : > { %10431 = vmatpush1.bf16.msra.mxu1 %v14318_v48  ;;  %9052 = vmatpush1.msk.msra.mxu0 %vm500_vm2, %v14325_v35 }
0x159a   : > { %7035 = vmatprep.subr.mxu1 %v15171_v15  ;;  %9734 = vmatprep.subr.mxu0 %v15171_v15 }
0x159d   : > { %9055 = vmatpush1.msk.msra.mxu1 %vm500_vm2, %v14328_v59 }
0x159e   : > { %9787 = vmatprep.subr.mxu1 %v15171_v15 }
0x1649   : > { %v14336_v16 = vpop.f32.mrb[232].mxu0 }
0x164a   : > { %v14340_v31 = vpop.f32.mrb[233].mxu0  ;;  %vm6913_vm15 = vcmp.gt.f32.partialorder %v14336_v16, 0.0 }
0x164b   : > { %vm6914_vm13 = vcmp.gt.f32.partialorder %v14340_v31, 0.0 }
0x164c   : > { %v6918_v61 = vsel %vm6914_vm13, %v14340_v31, 0.0 }
0x164d   : > { %9053 = vmatprep.mubr.msk.f32.mxu0 %vm338_vm0, %v6918_v61 }
0x164e   : > { %9054 = vmatmul.mubr.msk.f32.vlgmr.msra.gmra.mrb[234].mxu0 %vm6913_vm15, %v14336_v16 }
0x164f   : > { %v14338_v34 = vpop.f32.mrb[232].mxu1  ;;  %9736 = vmatprep.mubr.msk.f32.mxu0 %vm10820_vm8, %v15171_v15 }
0x1650   : > { %15462 = vst [vmem:[#allocation12_spill] sm:$0xff] %v14338_v34  ;;  %v14342_v26 = vpop.f32.mrb[233].mxu1  ;;  %vm6915_vm12 = vcmp.gt.f32.partialorder %v14338_v34, 0.0 }
0x1651   : > { %15463 = vst [vmem:[#allocation11_spill] sm:$0xff] %v14342_v26  ;;  %vm6916_vm14 = vcmp.gt.f32.partialorder %v14342_v26, 0.0 }
0x1652   : > { %v6920_v45 = vsel %vm6916_vm14, %v14342_v26, 0.0 }
0x1653   : > { %9056 = vmatprep.mubr.msk.f32.mxu1 %vm338_vm0, %v6920_v45 }
0x1654   : > { %9057 = vmatmul.mubr.msk.f32.vlgmr.msra.gmra.mrb[234].mxu1 %vm6915_vm12, %v14338_v34 }
0x1655   : > { %9789 = vmatprep.mubr.msk.f32.mxu1 %vm10820_vm8, %v15171_v15 }
0x1721   : > { %v6993_v26 = vpop.f32.mrb[234].mxu0 }
0x1722   : > { %7073 = vmax.xlane.f32.xlu0 %v6993_v26  ;;  %v6995_v58 = vpop.f32.mrb[235].mxu0 }
0x1727   : > { %v7069_v5 = vpop.f32.mrb[234].mxu1 }
0x1728   : > { %7075 = vmax.xlane.f32.xlu1 %v7069_v5  ;;  %v7071_v3 = vpop.f32.mrb[235].mxu1 }
0x1729   : > { %v6917_v3 = vsel %vm6913_vm15, %v14336_v16, 0.0 }
0x175b   : > { %7127 = vxpose.xlu1.b32.start.end [1/1] (short) (narrow) %v6918_v61, 8 }
0x175f   : > { %7392 = vxpose.xlu1.b32.start.end [1/1] (short) (narrow) %v6920_v45, 8 }
0x17af   : > { %v7074_v41 = vpop.xlane.xlu0 %7073 }
0x17b0   : > { %v7077_v52 = vsub.f32 %v6993_v26, %v7074_v41  ;;  %v6919_v41 = vsel %vm6915_vm12, %v14338_v34, 0.0  ;;  %v10733_v26 = vld [vmem:[%s11502_s17 + $0x8] sm:$0xff] }
0x17b2   : > { %v7079_v12 = vmul.f32 1.442695, %v7077_v52 }
0x17b4   : > { %10638 = vpow2.f32 %v7079_v12 }
0x17b5   : > { %v7076_v25 = vpop.xlane.xlu1 %7075 }
0x17b6   : > { %v7078_v18 = vsub.f32 %v7069_v5, %v7076_v25  ;;  %v10732_v25 = vld [vmem:[%s11502_s17] sm:$0xff] }
0x17b8   : > { %v7081_v43 = vmul.f32 1.442695, %v7078_v18 }
0x17ba   : > { %10640 = vpow2.f32 %v7081_v43 }
0x17be   : > { %v10639_v10 = vpop.eup %10638 }
0x17bf   : > { %7083 = vadd.xlane.f32.xlu0 %v10639_v10 }
0x17c4   : > { %v10641_v51 = vpop.eup %10640 }
0x17c5   : > { %7085 = vadd.xlane.f32.xlu0 %v10641_v51 }
0x17f2   : > { %7095 = vxpose.xlu0.b32.start.end [1/1] (short) %v6917_v3, 128 }
0x182f   : > { %7360 = vxpose.xlu0.b32.start.end [1/1] (short) %v6919_v41, 128 }
0x184c   : > { %v7084_v52 = vpop.xlane.xlu0 %7083 }
0x184d   : > { %10642 = vrcp.f32 %v7084_v52 }
0x1852   : > { %v7086_v12 = vpop.xlane.xlu0 %7085 }
0x1853   : > { %10644 = vrcp.f32 %v7086_v12 }
0x1857   : > { %v10643_v43 = vpop.eup %10642 }
0x1858   : > { %v7089_v18 = vmul.f32 %v10643_v43, %v10639_v10 }
0x185a   : > { %v7091_v58 = vsub.f32 %v7089_v18, %v10732_v25 }
0x185c   : > { %v14373_v45 = vmul.f32 0.125, %v7091_v58 }
0x185d   : > { %v10645_v5 = vpop.eup %10644 }
0x185e   : > { %v7090_v61 = vmul.f32 %v10645_v5, %v10641_v51  ;;  %9735 = vmatpush3.msra.mxu0 %v14373_v45  ;;  %v7143_v5 = vpop.trf.xlu1 }
0x185f   : > { %10432 = vmatprep.subr.bf16.mxu0 %v15176_v30 }
0x1860   : > { %v7092_v3 = vsub.f32 %v7090_v61, %v10733_v26 }
0x1862   : > { %v14378_v34 = vmul.f32 0.125, %v7092_v3 }
0x1864   : > { %9788 = vmatpush3.msra.mxu1 %v14378_v34 }
0x1865   : > { %10456 = vmatprep.subr.bf16.mxu1 %v15176_v30 }
0x1872   : > { %v7111_v41 = vpop.trf.xlu0 }
0x1873   : > { %9737 = vmatmul.mubr.msk.f32.vlgmr.msra.gmra.mrb[236].mxu0 %vm904_vm9, %v7111_v41 }
0x1874   : > { %10434 = vmatpush1.bf16.xpose.msra.mxu0 %v14186_v62  ;;  %9739 = vmatprep.mubr.msk.f32.mxu0 %vm10820_vm8, %v15171_v15 }
0x1875   : > { %10435 = vmatprep.subr.bf16.mxu0 %v15176_v30 }
0x1876   : > { %v7112_v51 = vpop.trf.xlu0 }
0x1877   : > { %9740 = vmatmul.mubr.msk.f32.gmra.mrb[238].mxu0 %vm904_vm9, %v7112_v51 }
0x1878   : > { %9742 = vmatprep.mubr.msk.f32.mxu0 %vm10820_vm8, %v15171_v15 }
0x187a   : > { %v7113_v10 = vpop.trf.xlu0 }
0x187b   : > { %9743 = vmatmul.mubr.msk.f32.gmra.mrb[240].mxu0 %vm904_vm9, %v7113_v10 }
0x187c   : > { %10437 = vmatpush1.bf16.xpose.msra.mxu0 %v14206_v14  ;;  %9745 = vmatprep.mubr.msk.f32.mxu0 %vm10820_vm8, %v15171_v15 }
0x187d   : > { %10438 = vmatprep.subr.bf16.mxu0 %v15176_v30 }
0x187e   : > { %v7114_v62 = vpop.trf.xlu0 }
0x187f   : > { %9746 = vmatmul.mubr.msk.f32.gmra.mrb[242].mxu0 %vm904_vm9, %v7114_v62 }
0x1880   : > { %9748 = vmatprep.mubr.msk.f32.mxu0 %vm10820_vm8, %v15171_v15 }
0x1882   : > { %v7115_v52 = vpop.trf.xlu0 }
0x1883   : > { %9749 = vmatmul.mubr.msk.f32.gmra.mrb[244].mxu0 %vm904_vm9, %v7115_v52  ;;  %v7408_v52 = vpop.trf.xlu1 }
0x1884   : > { %10440 = vmatpush1.bf16.xpose.msra.mxu0 %v14224_v29  ;;  %9751 = vmatprep.mubr.msk.f32.mxu0 %vm10820_vm8, %v15171_v15 }
0x1885   : > { %10441 = vmatprep.subr.bf16.mxu0 %v15176_v30 }
0x1886   : > { %v7116_v14 = vpop.trf.xlu0 }
0x1887   : > { %9752 = vmatmul.mubr.msk.f32.gmra.mrb[246].mxu0 %vm904_vm9, %v7116_v14 }
0x1888   : > { %9754 = vmatprep.mubr.msk.f32.mxu0 %vm10820_vm8, %v15171_v15 }
0x188a   : > { %v7117_v12 = vpop.trf.xlu0 }
0x188b   : > { %9755 = vmatmul.mubr.msk.f32.gmra.mrb[248].mxu0 %vm904_vm9, %v7117_v12 }
0x188c   : > { %10443 = vmatpush1.bf16.xpose.msra.mxu0 %v14242_v57  ;;  %9757 = vmatprep.mubr.msk.f32.mxu0 %vm10820_vm8, %v15171_v15 }
0x188d   : > { %10444 = vmatprep.subr.bf16.mxu0 %v15176_v30 }
0x188e   : > { %v7118_v29 = vpop.trf.xlu0 }
0x188f   : > { %9758 = vmatmul.mubr.msk.f32.gmra.mrb[250].mxu0 %vm904_vm9, %v7118_v29 }
0x1890   : > { %9760 = vmatprep.mubr.msk.f32.mxu0 %vm10820_vm8, %v15171_v15 }
0x1892   : > { %v7119_v43 = vpop.trf.xlu0 }
0x1893   : > { %9761 = vmatmul.mubr.msk.f32.gmra.mrb[252].mxu0 %vm904_vm9, %v7119_v43 }
0x1894   : > { %10446 = vmatpush1.bf16.xpose.msra.mxu0 %v14260_v28  ;;  %9763 = vmatprep.mubr.msk.f32.mxu0 %vm10820_vm8, %v15171_v15 }
0x1895   : > { %10447 = vmatprep.subr.bf16.mxu0 %v15176_v30 }
0x1896   : > { %v7120_v57 = vpop.trf.xlu0 }
0x1897   : > { %9764 = vmatmul.mubr.msk.f32.gmra.mrb[254].mxu0 %vm904_vm9, %v7120_v57 }
0x1898   : > { %9766 = vmatprep.mubr.msk.f32.mxu0 %vm10820_vm8, %v15171_v15 }
0x189a   : > { %v7121_v18 = vpop.trf.xlu0 }
0x189b   : > { %9767 = vmatmul.mubr.msk.f32.gmra.mrb[0].mxu0 %vm904_vm9, %v7121_v18 }
0x189c   : > { %10449 = vmatpush1.bf16.xpose.msra.mxu0 %v14278_v40  ;;  %9769 = vmatprep.mubr.msk.f32.mxu0 %vm10820_vm8, %v15171_v15 }
0x189d   : > { %10450 = vmatprep.subr.bf16.mxu0 %v15176_v30 }
0x189e   : > { %v7122_v28 = vpop.trf.xlu0 }
0x189f   : > { %9770 = vmatmul.mubr.msk.f32.gmra.mrb[2].mxu0 %vm904_vm9, %v7122_v28 }
0x18a0   : > { %9772 = vmatprep.mubr.msk.f32.mxu0 %vm10820_vm8, %v15171_v15 }
0x18a2   : > { %v7123_v25 = vpop.trf.xlu0 }
0x18a3   : > { %9773 = vmatmul.mubr.msk.f32.gmra.mrb[4].mxu0 %vm904_vm9, %v7123_v25 }
0x18a4   : > { %10452 = vmatpush1.bf16.xpose.msra.mxu0 %v14296_v11  ;;  %9775 = vmatprep.mubr.msk.f32.mxu0 %vm10820_vm8, %v15171_v15 }
0x18a5   : > { %10453 = vmatprep.subr.bf16.mxu0 %v15176_v30 }
0x18a6   : > { %v7124_v40 = vpop.trf.xlu0 }
0x18a7   : > { %9776 = vmatmul.mubr.msk.f32.gmra.mrb[6].mxu0 %vm904_vm9, %v7124_v40 }
0x18a8   : > { %9778 = vmatprep.mubr.msk.f32.mxu0 %vm10820_vm8, %v15171_v15 }
0x18aa   : > { %v7125_v58 = vpop.trf.xlu0 }
0x18ab   : > { %9779 = vmatmul.mubr.msk.f32.gmra.mrb[8].mxu0 %vm904_vm9, %v7125_v58 }
0x18ac   : > { %10455 = vmatpush1.bf16.xpose.msra.mxu0 %v14314_v55  ;;  %9781 = vmatprep.mubr.msk.f32.mxu0 %vm10820_vm8, %v15171_v15 }
0x18ad   : > { %7657 = vmatprep.subr.mxu0 %v15171_v15 }
0x18ae   : > { %v7126_v11 = vpop.trf.xlu0 }
0x18af   : > { %9782 = vmatmul.mubr.msk.f32.gmra.mrb[10].mxu0 %vm904_vm9, %v7126_v11 }
0x18b0   : > { %9784 = vmatprep.mubr.msk.f32.mxu0 %vm10820_vm8, %v15171_v15 }
0x18b2   : > { %v7376_v61 = vpop.trf.xlu0 }
0x18b3   : > { %9785 = vmatmul.mubr.msk.f32.gmra.mrb[12].mxu0 %vm904_vm9, %v7143_v5  ;;  %9790 = vmatmul.mubr.msk.f32.vlgmr.msra.gmra.mrb[236].mxu1 %vm904_vm9, %v7376_v61 }
0x18b4   : > { %7658 = vmatpush1.xpose.msra.mxu0 %v14325_v35  ;;  %10458 = vmatpush1.bf16.xpose.msra.mxu1 %v14190_v36 }
0x18b5   : > { %9792 = vmatprep.mubr.msk.f32.mxu1 %vm10820_vm8, %v15171_v15  ;;  %7689 = vmatprep.mubr.f32.mxu0 %v15171_v15 }
0x18b6   : > { %v7377_v55 = vpop.trf.xlu0  ;;  %10459 = vmatprep.subr.bf16.mxu1 %v15176_v30 }
0x18b7   : > { %9793 = vmatmul.mubr.msk.f32.gmra.mrb[238].mxu1 %vm904_vm9, %v7377_v55  ;;  %7690 = vmatmul.mubr.f32.vlgmr.msra.gmra.mrb[14].mxu0 %v14373_v45 }
0x18b8   : > { %9795 = vmatprep.mubr.msk.f32.mxu1 %vm10820_vm8, %v15171_v15  ;;  %7839 = vmatprep.mubr.f32.mxu0 %v15171_v15 }
0x18ba   : > { %v7378_v26 = vpop.trf.xlu0 }
0x18bb   : > { %9796 = vmatmul.mubr.msk.f32.gmra.mrb[240].mxu1 %vm904_vm9, %v7378_v26 }
0x18bc   : > { %10461 = vmatpush1.bf16.xpose.msra.mxu1 %v14210_v49  ;;  %9798 = vmatprep.mubr.msk.f32.mxu1 %vm10820_vm8, %v15171_v15 }
0x18bd   : > { %10462 = vmatprep.subr.bf16.mxu1 %v15176_v30 }
0x18be   : > { %v7379_v36 = vpop.trf.xlu0 }
0x18bf   : > { %9799 = vmatmul.mubr.msk.f32.gmra.mrb[242].mxu1 %vm904_vm9, %v7379_v36 }
0x18c0   : > { %9801 = vmatprep.mubr.msk.f32.mxu1 %vm10820_vm8, %v15171_v15 }
0x18c2   : > { %v7380_v45 = vpop.trf.xlu0 }
0x18c3   : > { %9802 = vmatmul.mubr.msk.f32.gmra.mrb[244].mxu1 %vm904_vm9, %v7380_v45 }
0x18c4   : > { %10464 = vmatpush1.bf16.xpose.msra.mxu1 %v14228_v50  ;;  %9804 = vmatprep.mubr.msk.f32.mxu1 %vm10820_vm8, %v15171_v15 }
0x18c5   : > { %10465 = vmatprep.subr.bf16.mxu1 %v15176_v30 }
0x18c6   : > { %v7381_v49 = vpop.trf.xlu0 }
0x18c7   : > { %9805 = vmatmul.mubr.msk.f32.gmra.mrb[246].mxu1 %vm904_vm9, %v7381_v49 }
0x18c8   : > { %9807 = vmatprep.mubr.msk.f32.mxu1 %vm10820_vm8, %v15171_v15 }
0x18ca   : > { %v7382_v3 = vpop.trf.xlu0 }
0x18cb   : > { %9808 = vmatmul.mubr.msk.f32.gmra.mrb[248].mxu1 %vm904_vm9, %v7382_v3 }
0x18cc   : > { %10467 = vmatpush1.bf16.xpose.msra.mxu1 %v14246_v23  ;;  %9810 = vmatprep.mubr.msk.f32.mxu1 %vm10820_vm8, %v15171_v15 }
0x18cd   : > { %10468 = vmatprep.subr.bf16.mxu1 %v15176_v30 }
0x18ce   : > { %v7383_v50 = vpop.trf.xlu0 }
0x18cf   : > { %9811 = vmatmul.mubr.msk.f32.gmra.mrb[250].mxu1 %vm904_vm9, %v7383_v50 }
0x18d0   : > { %9813 = vmatprep.mubr.msk.f32.mxu1 %vm10820_vm8, %v15171_v15 }
0x18d2   : > { %v7384_v41 = vpop.trf.xlu0 }
0x18d3   : > { %9814 = vmatmul.mubr.msk.f32.gmra.mrb[252].mxu1 %vm904_vm9, %v7384_v41 }
0x18d4   : > { %10470 = vmatpush1.bf16.xpose.msra.mxu1 %v14264_v33  ;;  %9816 = vmatprep.mubr.msk.f32.mxu1 %vm10820_vm8, %v15171_v15 }
0x18d5   : > { %10471 = vmatprep.subr.bf16.mxu1 %v15176_v30 }
0x18d6   : > { %v7385_v23 = vpop.trf.xlu0 }
0x18d7   : > { %9817 = vmatmul.mubr.msk.f32.gmra.mrb[254].mxu1 %vm904_vm9, %v7385_v23 }
0x18d8   : > { %9819 = vmatprep.mubr.msk.f32.mxu1 %vm10820_vm8, %v15171_v15 }
0x18da   : > { %v7386_v51 = vpop.trf.xlu0 }
0x18db   : > { %9820 = vmatmul.mubr.msk.f32.gmra.mrb[0].mxu1 %vm904_vm9, %v7386_v51 }
0x18dc   : > { %10473 = vmatpush1.bf16.xpose.msra.mxu1 %v14282_v17  ;;  %9822 = vmatprep.mubr.msk.f32.mxu1 %vm10820_vm8, %v15171_v15 }
0x18dd   : > { %10474 = vmatprep.subr.bf16.mxu1 %v15176_v30 }
0x18de   : > { %v7387_v33 = vpop.trf.xlu0 }
0x18df   : > { %9823 = vmatmul.mubr.msk.f32.gmra.mrb[2].mxu1 %vm904_vm9, %v7387_v33 }
0x18e0   : > { %9825 = vmatprep.mubr.msk.f32.mxu1 %vm10820_vm8, %v15171_v15 }
0x18e2   : > { %v7388_v10 = vpop.trf.xlu0 }
0x18e3   : > { %9826 = vmatmul.mubr.msk.f32.gmra.mrb[4].mxu1 %vm904_vm9, %v7388_v10 }
0x18e4   : > { %10476 = vmatpush1.bf16.xpose.msra.mxu1 %v14300_v7  ;;  %9828 = vmatprep.mubr.msk.f32.mxu1 %vm10820_vm8, %v15171_v15 }
0x18e5   : > { %10477 = vmatprep.subr.bf16.mxu1 %v15176_v30 }
0x18e6   : > { %v7389_v17 = vpop.trf.xlu0 }
0x18e7   : > { %9829 = vmatmul.mubr.msk.f32.gmra.mrb[6].mxu1 %vm904_vm9, %v7389_v17 }
0x18e8   : > { %9831 = vmatprep.mubr.msk.f32.mxu1 %vm10820_vm8, %v15171_v15 }
0x18ea   : > { %v7390_v62 = vpop.trf.xlu0 }
0x18eb   : > { %9832 = vmatmul.mubr.msk.f32.gmra.mrb[8].mxu1 %vm904_vm9, %v7390_v62 }
0x18ec   : > { %10479 = vmatpush1.bf16.xpose.msra.mxu1 %v14318_v48  ;;  %9834 = vmatprep.mubr.msk.f32.mxu1 %vm10820_vm8, %v15171_v15 }
0x18ed   : > { %7728 = vmatprep.subr.mxu1 %v15171_v15 }
0x18ee   : > { %v7391_v7 = vpop.trf.xlu0 }
0x18ef   : > { %9835 = vmatmul.mubr.msk.f32.gmra.mrb[10].mxu1 %vm904_vm9, %v7391_v7 }
0x18f0   : > { %9837 = vmatprep.mubr.msk.f32.mxu1 %vm10820_vm8, %v15171_v15 }
0x18f3   : > { %9838 = vmatmul.mubr.msk.f32.gmra.mrb[12].mxu1 %vm904_vm9, %v7408_v52 }
0x18f4   : > { %7729 = vmatpush1.xpose.msra.mxu1 %v14328_v59  ;;  %7760 = vmatprep.mubr.f32.mxu1 %v15171_v15 }
0x18f7   : > { %7761 = vmatmul.mubr.f32.vlgmr.msra.gmra.mrb[14].mxu1 %v14378_v34 }
0x18f8   : > { %7958 = vmatprep.mubr.f32.mxu1 %v15171_v15 }
0x1946   : > { %v7276_v48 = vpop.f32.mrb[236].mxu0 }
0x1947   : > { %v8121_v14 = vmul.f32 0.05, %v7276_v48  ;;  %v9738_v12 = vpop.f32.mrb[237].mxu0 }
0x1949   : > { %v8155_v29 = vsub.f32 %v14178_v13, %v8121_v14 }
0x194a   : > { %v7281_v43 = vpop.f32.mrb[238].mxu0 }
0x194b   : > { %8189 = vst [vmem:[%s11057_s10] sm:$0xff] %v8155_v29  ;;  %v8122_v57 = vmul.f32 0.05, %v7281_v43  ;;  %v9741_v18 = vpop.f32.mrb[239].mxu0 }
0x194d   : > { %v8156_v28 = vsub.f32 %v14168_v39, %v8122_v57 }
0x194e   : > { %v7286_v25 = vpop.f32.mrb[240].mxu0 }
0x194f   : > { %8190 = vst [vmem:[%s11057_s10 + $0x8] sm:$0xff] %v8156_v28  ;;  %v8123_v40 = vmul.f32 0.05, %v7286_v25  ;;  %v9744_v34 = vpop.f32.mrb[241].mxu0 }
0x1951   : > { %v8157_v58 = vsub.f32 %v14202_v24, %v8123_v40 }
0x1952   : > { %v7291_v11 = vpop.f32.mrb[242].mxu0 }
0x1953   : > { %8191 = vst [vmem:[%s11057_s10 + $0x10] sm:$0xff] %v8157_v58  ;;  %v8124_v5 = vmul.f32 0.05, %v7291_v11  ;;  %v9747_v61 = vpop.f32.mrb[243].mxu0 }
0x1955   : > { %v8158_v13 = vsub.f32 %v14195_v53, %v8124_v5 }
0x1956   : > { %v7296_v55 = vpop.f32.mrb[244].mxu0 }
0x1957   : > { %8192 = vst [vmem:[%s11057_s10 + $0x18] sm:$0xff] %v8158_v13  ;;  %v8125_v26 = vmul.f32 0.05, %v7296_v55  ;;  %v9750_v36 = vpop.f32.mrb[245].mxu0 }
0x1959   : > { %v8159_v39 = vsub.f32 %v14220_v60, %v8125_v26 }
0x195a   : > { %v7301_v45 = vpop.f32.mrb[246].mxu0 }
0x195b   : > { %8193 = vst [vmem:[%s11057_s10 + $0x20] sm:$0xff] %v8159_v39  ;;  %v8126_v49 = vmul.f32 0.05, %v7301_v45  ;;  %v9753_v3 = vpop.f32.mrb[247].mxu0 }
0x195d   : > { %v8160_v24 = vsub.f32 %v14213_v42, %v8126_v49 }
0x195e   : > { %v7306_v50 = vpop.f32.mrb[248].mxu0 }
0x195f   : > { %8194 = vst [vmem:[%s11057_s10 + $0x28] sm:$0xff] %v8160_v24  ;;  %v8127_v41 = vmul.f32 0.05, %v7306_v50  ;;  %v9756_v23 = vpop.f32.mrb[249].mxu0 }
0x1961   : > { %v8161_v53 = vsub.f32 %v14238_v4, %v8127_v41 }
0x1962   : > { %v7311_v51 = vpop.f32.mrb[250].mxu0 }
0x1963   : > { %8195 = vst [vmem:[%s11057_s10 + $0x30] sm:$0xff] %v8161_v53  ;;  %v8128_v33 = vmul.f32 0.05, %v7311_v51  ;;  %v9759_v10 = vpop.f32.mrb[251].mxu0 }
0x1965   : > { %v8162_v60 = vsub.f32 %v14231_v22, %v8128_v33 }
0x1966   : > { %v7316_v17 = vpop.f32.mrb[252].mxu0 }
0x1967   : > { %8196 = vst [vmem:[%s11057_s10 + $0x38] sm:$0xff] %v8162_v60  ;;  %v8129_v62 = vmul.f32 0.05, %v7316_v17  ;;  %v9762_v7 = vpop.f32.mrb[253].mxu0 }
0x1969   : > { %v8163_v42 = vsub.f32 %v14256_v63, %v8129_v62 }
0x196a   : > { %v7321_v52 = vpop.f32.mrb[254].mxu0 }
0x196b   : > { %8197 = vst [vmem:[%s11057_s10 + $0x40] sm:$0xff] %v8163_v42  ;;  %v8130_v48 = vmul.f32 0.05, %v7321_v52  ;;  %v9765_v14 = vpop.f32.mrb[255].mxu0 }
0x196d   : > { %v8164_v4 = vsub.f32 %v14249_v44, %v8130_v48 }
0x196e   : > { %v7326_v12 = vpop.f32.mrb[0].mxu0 }
0x196f   : > { %8198 = vst [vmem:[%s11057_s10 + $0x48] sm:$0xff] %v8164_v4  ;;  %v8131_v29 = vmul.f32 0.05, %v7326_v12  ;;  %v9768_v43 = vpop.f32.mrb[1].mxu0 }
0x1971   : > { %v8165_v22 = vsub.f32 %v14274_v9, %v8131_v29 }
0x1972   : > { %v7331_v57 = vpop.f32.mrb[2].mxu0 }
0x1973   : > { %8199 = vst [vmem:[%s11057_s10 + $0x50] sm:$0xff] %v8165_v22  ;;  %v8132_v18 = vmul.f32 0.05, %v7331_v57  ;;  %v9771_v28 = vpop.f32.mrb[3].mxu0 }
0x1975   : > { %v8166_v63 = vsub.f32 %v14267_v27, %v8132_v18  ;;  %v15464_v18 = vld [vmem:[#allocation33_spill] sm:$0xff] }
0x1976   : > { %v7336_v25 = vpop.f32.mrb[4].mxu0 }
0x1977   : > { %8200 = vst [vmem:[%s11057_s10 + $0x58] sm:$0xff] %v8166_v63  ;;  %v8133_v40 = vmul.f32 0.05, %v7336_v25  ;;  %v9774_v34 = vpop.f32.mrb[5].mxu0  ;;  %v15465_v63 = vld [vmem:[#allocation34_spill] sm:$0xff] }
0x1979   : > { %v8167_v44 = vsub.f32 %v14292_v38, %v8133_v40  ;;  %v15466_v40 = vld [vmem:[#allocation35_spill] sm:$0xff] }
0x197a   : > { %v7341_v58 = vpop.f32.mrb[6].mxu0 }
0x197b   : > { %8201 = vst [vmem:[%s11057_s10 + $0x60] sm:$0xff] %v8167_v44  ;;  %v8134_v11 = vmul.f32 0.05, %v7341_v58  ;;  %v9777_v5 = vpop.f32.mrb[7].mxu0 }
0x197d   : > { %v8168_v9 = vsub.f32 %v14285_v0, %v8134_v11  ;;  %v15467_v11 = vld [vmem:[#allocation36_spill] sm:$0xff] }
0x197e   : > { %v7346_v61 = vpop.f32.mrb[8].mxu0 }
0x197f   : > { %8202 = vst [vmem:[%s11057_s10 + $0x68] sm:$0xff] %v8168_v9  ;;  %v8135_v13 = vmul.f32 0.05, %v7346_v61  ;;  %v9780_v55 = vpop.f32.mrb[9].mxu0  ;;  %v15468_v9 = vld [vmem:[#allocation37_spill] sm:$0xff] }
0x1981   : > { %v8169_v27 = vsub.f32 %v14310_v56, %v8135_v13 }
0x1982   : > { %v7351_v26 = vpop.f32.mrb[10].mxu0 }
0x1983   : > { %8203 = vst [vmem:[%s11057_s10 + $0x70] sm:$0xff] %v8169_v27  ;;  %v8136_v36 = vmul.f32 0.05, %v7351_v26  ;;  %v9783_v39 = vpop.f32.mrb[11].mxu0  ;;  %v15469_v27 = vld [vmem:[#allocation38_spill] sm:$0xff] }
0x1985   : > { %v8170_v38 = vsub.f32 %v14303_v54, %v8136_v36  ;;  %v15470_v36 = vld [vmem:[#allocation39_spill] sm:$0xff] }
0x1986   : > { %v7356_v45 = vpop.f32.mrb[12].mxu0  ;;  %v7541_v49 = vpop.f32.mrb[236].mxu1 }
0x1987   : > { %8204 = vst [vmem:[%s11057_s10 + $0x78] sm:$0xff] %v8170_v38  ;;  %v8137_v3 = vmul.f32 0.05, %v7356_v45  ;;  %v8138_v24 = vmul.f32 0.05, %v7541_v49  ;;  %v9791_v0 = vpop.f32.mrb[237].mxu1 }
0x1988   : > { %v9786_v50 = vpop.f32.mrb[13].mxu0  ;;  %v15472_v0 = vld [vmem:[#allocation40_spill] sm:$0xff] }
0x1989   : > { %v8171_v41 = vsub.f32 %v14325_v35, %v8137_v3  ;;  %v14554_v56 = vsub.f32 %v13846_v2, %v8138_v24  ;;  %v15471_v3 = vld [vmem:[#allocation13_spill] sm:$0xff] }
0x198a   : > { %v7546_v23 = vpop.f32.mrb[238].mxu1  ;;  %v7691_v53 = vpop.f32.mrb[14].mxu0 }
0x198b   : > { %8205 = vst [vmem:[%s11057_s10 + $0x80] sm:$0x1] %v8171_v41  ;;  %8206 = vst [vmem:[%s11057_s10 + $0x88] sm:$0xff] %v14554_v56  ;;  %v8139_v51 = vmul.f32 0.05, %v7546_v23  ;;  %v9794_v54 = vpop.f32.mrb[239].mxu1 }
0x198c   : > { %v7693_v33 = vpop.f32.mrb[15].mxu0 }
0x198d   : > { %v7768_v10 = vsel %vm6914_vm13, %v7693_v33, 0.0  ;;  %v14562_v60 = vsub.f32 %v13854_v32, %v8139_v51 }
0x198e   : > { %v7772_v17 = vmul.f32 0.0, %v7768_v10  ;;  %v7551_v35 = vpop.f32.mrb[240].mxu1 }
0x198f   : > { %8207 = vst [vmem:[%s11057_s10 + $0x90] sm:$0xff] %v14562_v60  ;;  %v8140_v2 = vmul.f32 0.05, %v7551_v35  ;;  %v9797_v62 = vpop.f32.mrb[241].mxu1  ;;  %v10537_v7 = vpack.c.bf16 %v14562_v60, %v14554_v56  ;;  %v15474_v35 = vld [vmem:[#allocation15_spill] sm:$0xff]  ;;  %v8263_v56 = vld [vmem:[%s11057_s10 + $0x20] sm:$0xff] }
0x1990   : > { %7775 = vmatprep.subr.mxu0 %v7772_v17 }
0x1991   : > { %9092 = vmatpush1.msk.msra.mxu0 %vm6913_vm15, %v7691_v53  ;;  %v14571_v31 = vsub.f32 %v13861_v47, %v8140_v2  ;;  %v15473_v53 = vld [vmem:[#allocation14_spill] sm:$0xff] }
0x1992   : > { %9093 = vmatmul.mubr.msk.f32.vlgmr.msra.gmra.mrb[16].mxu0 %vm904_vm9, %v11660_v8  ;;  %v7556_v32 = vpop.f32.mrb[242].mxu1 }
0x1993   : > { %7845 = vmatprep.mubr.f32.mxu0 %v15171_v15  ;;  %8208 = vst [vmem:[%s11057_s10 + $0x98] sm:$0xff] %v14571_v31  ;;  %v8141_v42 = vmul.f32 0.05, %v7556_v32  ;;  %v9800_v52 = vpop.f32.mrb[243].mxu1 }
0x1994   : > { %v15475_v52 = vld [vmem:[#allocation31_spill] sm:$0xff] }
0x1995   : > { %v14579_v48 = vsub.f32 %v13869_v1, %v8141_v42 }
0x1996   : > { %9094 = vmatmul.mubr.msk.f32.gmra.mrb[18].mxu0 %vm904_vm9, %v11665_v37  ;;  %v7561_v16 = vpop.f32.mrb[244].mxu1 }
0x1997   : > { %7851 = vmatprep.mubr.f32.mxu0 %v15171_v15  ;;  %8209 = vst [vmem:[%s11057_s10 + $0xa0] sm:$0xff] %v14579_v48  ;;  %v8142_v8 = vmul.f32 0.05, %v7561_v16  ;;  %v9803_v47 = vpop.f32.mrb[245].mxu1  ;;  %v10540_v14 = vpack.c.bf16 %v14579_v48, %v14571_v31  ;;  %v8265_v31 = vld [vmem:[%s11057_s10 + $0x30] sm:$0xff] }
0x1999   : > { %v14589_v4 = vsub.f32 %v13877_v6, %v8142_v8 }
0x199a   : > { %9095 = vmatmul.mubr.msk.f32.gmra.mrb[20].mxu0 %vm904_vm9, %v11679_v19  ;;  %v7566_v1 = vpop.f32.mrb[246].mxu1 }
0x199b   : > { %7857 = vmatprep.mubr.f32.mxu0 %v15171_v15  ;;  %8210 = vst [vmem:[%s11057_s10 + $0xa8] sm:$0xff] %v14589_v4  ;;  %v8143_v37 = vmul.f32 0.05, %v7566_v1  ;;  %v9806_v12 = vpop.f32.mrb[247].mxu1 }
0x199c   : > { %v15476_v12 = vld [vmem:[#allocation29_spill] sm:$0xff] }
0x199d   : > { %v14597_v29 = vsub.f32 %v13885_v20, %v8143_v37 }
0x199e   : > { %9096 = vmatmul.mubr.msk.f32.gmra.mrb[22].mxu0 %vm904_vm9, %v11695_v21  ;;  %v7571_v43 = vpop.f32.mrb[248].mxu1 }
0x199f   : > { %7863 = vmatprep.mubr.f32.mxu0 %v15171_v15  ;;  %8211 = vst [vmem:[%s11057_s10 + $0xb0] sm:$0xff] %v14597_v29  ;;  %v8144_v19 = vmul.f32 0.05, %v7571_v43  ;;  %v9809_v6 = vpop.f32.mrb[249].mxu1  ;;  %v10543_v22 = vpack.c.bf16 %v14597_v29, %v14589_v4  ;;  %v8267_v4 = vld [vmem:[%s11057_s10 + $0x40] sm:$0xff] }
0x19a1   : > { %v14607_v57 = vsub.f32 %v13893_v46, %v8144_v19 }
0x19a2   : > { %9097 = vmatmul.mubr.msk.f32.gmra.mrb[24].mxu0 %vm904_vm9, %v15464_v18  ;;  %v7576_v20 = vpop.f32.mrb[250].mxu1 }
0x19a3   : > { %7869 = vmatprep.mubr.f32.mxu0 %v15171_v15  ;;  %8212 = vst [vmem:[%s11057_s10 + $0xb8] sm:$0xff] %v14607_v57  ;;  %v8145_v21 = vmul.f32 0.05, %v7576_v20  ;;  %v9812_v28 = vpop.f32.mrb[251].mxu1  ;;  %v15477_v20 = vld [vmem:[#allocation28_spill] sm:$0xff] }
0x19a5   : > { %v14615_v25 = vsub.f32 %v15465_v63, %v8145_v21 }
0x19a6   : > { %9098 = vmatmul.mubr.msk.f32.gmra.mrb[26].mxu0 %vm904_vm9, %v15466_v40  ;;  %v7581_v34 = vpop.f32.mrb[252].mxu1 }
0x19a7   : > { %7875 = vmatprep.mubr.f32.mxu0 %v15171_v15  ;;  %8213 = vst [vmem:[%s11057_s10 + $0xc0] sm:$0xff] %v14615_v25  ;;  %v8146_v46 = vmul.f32 0.05, %v7581_v34  ;;  %v9815_v44 = vpop.f32.mrb[253].mxu1  ;;  %v10546_v58 = vpack.c.bf16 %v14615_v25, %v14607_v57  ;;  %v8269_v57 = vld [vmem:[%s11057_s10 + $0x50] sm:$0xff] }
0x19a9   : > { %v14625_v5 = vsub.f32 %v15467_v11, %v8146_v46 }
0x19aa   : > { %9099 = vmatmul.mubr.msk.f32.gmra.mrb[28].mxu0 %vm904_vm9, %v15468_v9  ;;  %v7586_v61 = vpop.f32.mrb[254].mxu1 }
0x19ab   : > { %7881 = vmatprep.mubr.f32.mxu0 %v15171_v15  ;;  %8214 = vst [vmem:[%s11057_s10 + $0xc8] sm:$0xff] %v14625_v5  ;;  %v8147_v13 = vmul.f32 0.05, %v7586_v61  ;;  %v9818_v55 = vpop.f32.mrb[255].mxu1 }
0x19ac   : > { %v10740_v55 = vld [vmem:[%s11002_s15 + $0x30] sm:$0xff] }
0x19ad   : > { %v14633_v26 = vsub.f32 %v15469_v27, %v8147_v13  ;;  %v15480_v27 = vld [vmem:[#allocation16_spill] sm:$0xff] }
0x19ae   : > { %9100 = vmatmul.mubr.msk.f32.gmra.mrb[30].mxu0 %vm904_vm9, %v15470_v36  ;;  %v7591_v39 = vpop.f32.mrb[0].mxu1  ;;  %v15481_v36 = vld [vmem:[#allocation27_spill] sm:$0xff] }
0x19af   : > { %7887 = vmatprep.mubr.f32.mxu0 %v15171_v15  ;;  %8215 = vst [vmem:[%s11057_s10 + $0xd0] sm:$0xff] %v14633_v26  ;;  %v8148_v38 = vmul.f32 0.05, %v7591_v39  ;;  %v9821_v45 = vpop.f32.mrb[1].mxu1  ;;  %v10549_v49 = vpack.c.bf16 %v14633_v26, %v14625_v5  ;;  %v15483_v39 = vld [vmem:[#allocation32_spill] sm:$0xff]  ;;  %v8271_v5 = vld [vmem:[%s11057_s10 + $0x60] sm:$0xff] }
0x19b0   : > { %v15485_v45 = vld [vmem:[#allocation42_spill] sm:$0xff] }
0x19b1   : > { %v14643_v24 = vsub.f32 %v15471_v3, %v8148_v38  ;;  %v15484_v38 = vld [vmem:[#allocation30_spill] sm:$0xff]  ;;  %v15486_v3 = vld [vmem:[#allocation43_spill] sm:$0xff] }
0x19b2   : > { %9101 = vmatmul.mubr.msk.f32.gmra.mrb[32].mxu0 %vm904_vm9, %v15472_v0  ;;  %v7596_v50 = vpop.f32.mrb[2].mxu1  ;;  %v15487_v0 = vld [vmem:[#allocation44_spill] sm:$0xff] }
0x19b3   : > { %8363 = vmatprep.mubr.f32.mxu0 %v15171_v15  ;;  %8216 = vst [vmem:[%s11057_s10 + $0xd8] sm:$0xff] %v14643_v24  ;;  %v8149_v41 = vmul.f32 0.05, %v7596_v50  ;;  %v9824_v23 = vpop.f32.mrb[3].mxu1  ;;  %v15488_v50 = vld [vmem:[#allocation45_spill] sm:$0xff] }
0x19b5   : > { %v14651_v51 = vsub.f32 %v15473_v53, %v8149_v41 }
0x19b6   : > { %v7601_v54 = vpop.f32.mrb[4].mxu1 }
0x19b7   : > { %8217 = vst [vmem:[%s11057_s10 + $0xe0] sm:$0xff] %v14651_v51  ;;  %v8150_v33 = vmul.f32 0.05, %v7601_v54  ;;  %v9827_v10 = vpop.f32.mrb[5].mxu1  ;;  %v10552_v17 = vpack.c.bf16 %v14651_v51, %v14643_v24  ;;  %v8273_v24 = vld [vmem:[%s11057_s10 + $0x70] sm:$0xff] }
0x19b9   : > { %v14658_v2 = vsub.f32 %v15474_v35, %v8150_v33  ;;  %v10734_v33 = vld [vmem:[%s11002_s15] sm:$0xff]  ;;  %v10735_v35 = vld [vmem:[%s11002_s15 + $0x8] sm:$0xff] }
0x19ba   : > { %v7606_v62 = vpop.f32.mrb[6].mxu1 }
0x19bb   : > { %8218 = vst [vmem:[%s11057_s10 + $0xe8] sm:$0xff] %v14658_v2  ;;  %v8151_v32 = vmul.f32 0.05, %v7606_v62  ;;  %v9830_v42 = vpop.f32.mrb[7].mxu1 }
0x19bd   : > { %v14663_v16 = vsub.f32 %v15475_v52, %v8151_v32 }
0x19be   : > { %v7611_v8 = vpop.f32.mrb[8].mxu1 }
0x19bf   : > { %8219 = vst [vmem:[%s11057_s10 + $0xf0] sm:$0xff] %v14663_v16  ;;  %v8152_v47 = vmul.f32 0.05, %v7611_v8  ;;  %v9833_v1 = vpop.f32.mrb[9].mxu1  ;;  %v10555_v37 = vpack.c.bf16 %v14663_v16, %v14658_v2 }
0x19c1   : > { %v14670_v43 = vsub.f32 %v15476_v12, %v8152_v47  ;;  %v10736_v47 = vld [vmem:[%s11002_s15 + $0x10] sm:$0xff]  ;;  %v10737_v12 = vld [vmem:[%s11002_s15 + $0x18] sm:$0xff] }
0x19c2   : > { %v7616_v19 = vpop.f32.mrb[10].mxu1 }
0x19c3   : > { %8220 = vst [vmem:[%s11057_s10 + $0xf8] sm:$0xff] %v14670_v43  ;;  %v8153_v6 = vmul.f32 0.05, %v7616_v19  ;;  %v9836_v18 = vpop.f32.mrb[11].mxu1 }
0x19c5   : > { %v14675_v21 = vsub.f32 %v15477_v20, %v8153_v6 }
0x19c6   : > { %v7621_v28 = vpop.f32.mrb[12].mxu1 }
0x19c7   : > { %8221 = vst [vmem:[%s11057_s10 + $0x100] sm:$0xff] %v14675_v21  ;;  %v8154_v63 = vmul.f32 0.05, %v7621_v28  ;;  %v9839_v40 = vpop.f32.mrb[13].mxu1  ;;  %v10558_v34 = vpack.c.bf16 %v14675_v21, %v14670_v43 }
0x19c9   : > { %v8188_v46 = vsub.f32 %v14328_v59, %v8154_v63  ;;  %v15482_v59 = vld [vmem:[#allocation41_spill] sm:$0xff] }
0x19ca   : > { %v7762_v44 = vpop.f32.mrb[14].mxu1  ;;  %v10738_v63 = vld [vmem:[%s11002_s15 + $0x20] sm:$0xff] }
0x19cb   : > { %8222 = vst [vmem:[%s11057_s10 + $0x108] sm:$0x1] %v8188_v46  ;;  %v7764_v11 = vpop.f32.mrb[15].mxu1  ;;  %v10739_v46 = vld [vmem:[%s11002_s15 + $0x28] sm:$0xff] }
0x19cc   : > { %v7770_v61 = vsel %vm6916_vm14, %v7764_v11, 0.0 }
0x19cd   : > { %v7774_v13 = vmul.f32 0.0, %v7770_v61 }
0x19cf   : > { %7894 = vmatprep.subr.mxu1 %v7774_v13 }
0x19d0   : > { %9102 = vmatpush1.msk.msra.mxu1 %vm6915_vm12, %v7762_v44 }
0x19d1   : > { %9103 = vmatmul.mubr.msk.f32.vlgmr.msra.gmra.mrb[16].mxu1 %vm904_vm9, %v15480_v27 }
0x19d2   : > { %7964 = vmatprep.mubr.f32.mxu1 %v15171_v15 }
0x19d5   : > { %9104 = vmatmul.mubr.msk.f32.gmra.mrb[18].mxu1 %vm904_vm9, %v15481_v36  ;;  %v10741_v36 = vld [vmem:[%s11002_s15 + $0x38] sm:$0xff] }
0x19d6   : > { %7970 = vmatprep.mubr.f32.mxu1 %v15171_v15 }
0x19d9   : > { %9105 = vmatmul.mubr.msk.f32.gmra.mrb[20].mxu1 %vm904_vm9, %v15482_v59 }
0x19da   : > { %7976 = vmatprep.mubr.f32.mxu1 %v15171_v15 }
0x19dd   : > { %9106 = vmatmul.mubr.msk.f32.gmra.mrb[22].mxu1 %vm904_vm9, %v15483_v39 }
0x19de   : > { %7982 = vmatprep.mubr.f32.mxu1 %v15171_v15 }
0x19e1   : > { %9107 = vmatmul.mubr.msk.f32.gmra.mrb[24].mxu1 %vm904_vm9, %v15484_v38 }
0x19e2   : > { %7988 = vmatprep.mubr.f32.mxu1 %v15171_v15 }
0x19e5   : > { %9108 = vmatmul.mubr.msk.f32.gmra.mrb[26].mxu1 %vm904_vm9, %v15485_v45 }
0x19e6   : > { %7994 = vmatprep.mubr.f32.mxu1 %v15171_v15 }
0x19e9   : > { %9109 = vmatmul.mubr.msk.f32.gmra.mrb[28].mxu1 %vm904_vm9, %v15486_v3 }
0x19ea   : > { %8000 = vmatprep.mubr.f32.mxu1 %v15171_v15 }
0x19ed   : > { %9110 = vmatmul.mubr.msk.f32.gmra.mrb[30].mxu1 %vm904_vm9, %v15487_v0  ;;  %v10742_v0 = vld [vmem:[%s11002_s15 + $0x40] sm:$0xff] }
0x19ee   : > { %8006 = vmatprep.mubr.f32.mxu1 %v15171_v15 }
0x19f1   : > { %9111 = vmatmul.mubr.msk.f32.gmra.mrb[32].mxu1 %vm904_vm9, %v15488_v50 }
0x19f2   : > { %8440 = vmatprep.mubr.f32.mxu1 %v15171_v15 }
0x1a65   : > { %v7841_v41 = vpop.f32.mrb[16].mxu0 }
0x1a66   : > { %v8013_v23 = vmul.f32 0.05, %v7841_v41  ;;  %v7843_v53 = vpop.f32.mrb[17].mxu0  ;;  %v10743_v41 = vld [vmem:[%s11002_s15 + $0x48] sm:$0xff] }
0x1a67   : > { %v8014_v54 = vmul.f32 0.05, %v7843_v53 }
0x1a68   : > { %v8049_v10 = vsub.f32 %v10734_v33, %v8013_v23 }
0x1a69   : > { %v8050_v62 = vsub.f32 %v10735_v35, %v8014_v54  ;;  %v7847_v32 = vpop.f32.mrb[18].mxu0  ;;  %v10744_v35 = vld [vmem:[%s11002_s15 + $0x50] sm:$0xff] }
0x1a6a   : > { %8085 = vst [vmem:[%s11002_s15] sm:$0xff] %v8049_v10  ;;  %v8015_v42 = vmul.f32 0.05, %v7847_v32  ;;  %v7849_v52 = vpop.f32.mrb[19].mxu0  ;;  %v10745_v32 = vld [vmem:[%s11002_s15 + $0x58] sm:$0xff] }
0x1a6b   : > { %8086 = vst.msk [vmem:[%s11002_s15 + $0x8] sm:$0xff] %vm338_vm0, %v8050_v62  ;;  %v8016_v8 = vmul.f32 0.05, %v7849_v52 }
0x1a6c   : > { %v8051_v1 = vsub.f32 %v10736_v47, %v8015_v42 }
0x1a6d   : > { %v8052_v19 = vsub.f32 %v10737_v12, %v8016_v8  ;;  %v7853_v6 = vpop.f32.mrb[20].mxu0  ;;  %v10746_v12 = vld [vmem:[%s11002_s15 + $0x60] sm:$0xff] }
0x1a6e   : > { %8087 = vst [vmem:[%s11002_s15 + $0x10] sm:$0xff] %v8051_v1  ;;  %v8017_v18 = vmul.f32 0.05, %v7853_v6  ;;  %v7855_v20 = vpop.f32.mrb[21].mxu0  ;;  %v10747_v6 = vld [vmem:[%s11002_s15 + $0x68] sm:$0xff] }
0x1a6f   : > { %8088 = vst.msk [vmem:[%s11002_s15 + $0x18] sm:$0xff] %vm338_vm0, %v8052_v19  ;;  %v8018_v28 = vmul.f32 0.05, %v7855_v20 }
0x1a70   : > { %v8053_v40 = vsub.f32 %v10738_v63, %v8017_v18 }
0x1a71   : > { %v8054_v44 = vsub.f32 %v10739_v46, %v8018_v28  ;;  %v7859_v11 = vpop.f32.mrb[22].mxu0  ;;  %v10748_v46 = vld [vmem:[%s11002_s15 + $0x70] sm:$0xff] }
0x1a72   : > { %8089 = vst [vmem:[%s11002_s15 + $0x20] sm:$0xff] %v8053_v40  ;;  %v8019_v9 = vmul.f32 0.05, %v7859_v11  ;;  %v7861_v61 = vpop.f32.mrb[23].mxu0  ;;  %v10749_v11 = vld [vmem:[%s11002_s15 + $0x78] sm:$0xff] }
0x1a73   : > { %8090 = vst.msk [vmem:[%s11002_s15 + $0x28] sm:$0xff] %vm338_vm0, %v8054_v44  ;;  %v8020_v13 = vmul.f32 0.05, %v7861_v61 }
0x1a74   : > { %v8055_v27 = vsub.f32 %v10740_v55, %v8019_v9 }
0x1a75   : > { %v8056_v59 = vsub.f32 %v10741_v36, %v8020_v13  ;;  %v7865_v39 = vpop.f32.mrb[24].mxu0  ;;  %v10750_v36 = vld [vmem:[%s11002_s15 + $0x80] sm:$0x1] }
0x1a76   : > { %8091 = vst [vmem:[%s11002_s15 + $0x30] sm:$0xff] %v8055_v27  ;;  %v8021_v38 = vmul.f32 0.05, %v7865_v39  ;;  %v7867_v45 = vpop.f32.mrb[25].mxu0  ;;  %v10751_v39 = vld [vmem:[%s11002_s15 + $0x88] sm:$0x1] }
0x1a77   : > { %8092 = vst.msk [vmem:[%s11002_s15 + $0x38] sm:$0xff] %vm338_vm0, %v8056_v59  ;;  %v8022_v3 = vmul.f32 0.05, %v7867_v45 }
0x1a78   : > { %v8057_v50 = vsub.f32 %v10742_v0, %v8021_v38 }
0x1a79   : > { %v8058_v23 = vsub.f32 %v10743_v41, %v8022_v3  ;;  %v7871_v53 = vpop.f32.mrb[26].mxu0  ;;  %v15489_v41 = vld [vmem:[#allocation22_spill] sm:$0xff] }
0x1a7a   : > { %8093 = vst [vmem:[%s11002_s15 + $0x40] sm:$0xff] %v8057_v50  ;;  %v8023_v54 = vmul.f32 0.05, %v7871_v53  ;;  %v7873_v33 = vpop.f32.mrb[27].mxu0  ;;  %v15490_v53 = vld [vmem:[#allocation25_spill] sm:$0xff] }
0x1a7b   : > { %8094 = vst.msk [vmem:[%s11002_s15 + $0x48] sm:$0xff] %vm338_vm0, %v8058_v23  ;;  %v8024_v10 = vmul.f32 0.05, %v7873_v33 }
0x1a7c   : > { %v8059_v62 = vsub.f32 %v10744_v35, %v8023_v54 }
0x1a7d   : > { %v8060_v42 = vsub.f32 %v10745_v32, %v8024_v10  ;;  %v7877_v52 = vpop.f32.mrb[28].mxu0  ;;  %v15491_v32 = vld [vmem:[#allocation24_spill] sm:$0xff] }
0x1a7e   : > { %8095 = vst [vmem:[%s11002_s15 + $0x50] sm:$0xff] %v8059_v62  ;;  %v8025_v8 = vmul.f32 0.05, %v7877_v52  ;;  %v7879_v47 = vpop.f32.mrb[29].mxu0  ;;  %v15492_v52 = vld [vmem:[#allocation19_spill] sm:$0xff] }
0x1a7f   : > { %8096 = vst.msk [vmem:[%s11002_s15 + $0x58] sm:$0xff] %vm338_vm0, %v8060_v42  ;;  %v8026_v1 = vmul.f32 0.05, %v7879_v47 }
0x1a80   : > { %v8061_v19 = vsub.f32 %v10746_v12, %v8025_v8 }
0x1a81   : > { %v8062_v18 = vsub.f32 %v10747_v6, %v8026_v1  ;;  %v7883_v20 = vpop.f32.mrb[30].mxu0 }
0x1a82   : > { %8097 = vst [vmem:[%s11002_s15 + $0x60] sm:$0xff] %v8061_v19  ;;  %v8027_v28 = vmul.f32 0.05, %v7883_v20  ;;  %v7885_v63 = vpop.f32.mrb[31].mxu0 }
0x1a83   : > { %8098 = vst.msk [vmem:[%s11002_s15 + $0x68] sm:$0xff] %vm338_vm0, %v8062_v18  ;;  %v8028_v40 = vmul.f32 0.05, %v7885_v63  ;;  %v15493_v18 = vld [vmem:[#allocation26_spill] sm:$0xff] }
0x1a84   : > { %v8063_v44 = vsub.f32 %v10748_v46, %v8027_v28  ;;  %v15494_v28 = vld [vmem:[#allocation17_spill] sm:$0xff] }
0x1a85   : > { %v8064_v9 = vsub.f32 %v10749_v11, %v8028_v40  ;;  %v7889_v61 = vpop.f32.mrb[32].mxu0 }
0x1a86   : > { %8099 = vst [vmem:[%s11002_s15 + $0x70] sm:$0xff] %v8063_v44  ;;  %v8029_v13 = vmul.f32 0.05, %v7889_v61  ;;  %v7891_v55 = vpop.f32.mrb[33].mxu0 }
0x1a87   : > { %8100 = vst.msk [vmem:[%s11002_s15 + $0x78] sm:$0xff] %vm338_vm0, %v8064_v9  ;;  %v8030_v27 = vmul.f32 0.05, %v7891_v55  ;;  %v15495_v9 = vld [vmem:[#allocation46_spill] sm:$0xff] }
0x1a88   : > { %v8065_v59 = vsub.f32 %v10750_v36, %v8029_v13  ;;  %v15496_v13 = vld [vmem:[#allocation21_spill] sm:$0xff]  ;;  %v8224_v36 = vld [vmem:[%s11002_s15 + $0x8] sm:$0xff] }
0x1a89   : > { %v8066_v38 = vsub.f32 %v10751_v39, %v8030_v27 }
0x1a8a   : > { %8101 = vst [vmem:[%s11002_s15 + $0x80] sm:$0x1] %v8065_v59  ;;  %v8225_v59 = vld [vmem:[%s11002_s15 + $0x10] sm:$0xff] }
0x1a8b   : > { %8102 = vst.msk [vmem:[%s11002_s15 + $0x88] sm:$0x1] %vm355_vm1, %v8066_v38 }
0x1aa4   : > { %v7960_v45 = vpop.f32.mrb[16].mxu1 }
0x1aa5   : > { %v8031_v3 = vmul.f32 0.05, %v7960_v45  ;;  %v7962_v0 = vpop.f32.mrb[17].mxu1  ;;  %v8226_v45 = vld [vmem:[%s11002_s15 + $0x18] sm:$0xff] }
0x1aa6   : > { %v8032_v50 = vmul.f32 0.05, %v7962_v0 }
0x1aa7   : > { %v8067_v23 = vsub.f32 %v15489_v41, %v8031_v3 }
0x1aa8   : > { %v8068_v54 = vsub.f32 %v15490_v53, %v8032_v50  ;;  %v7966_v33 = vpop.f32.mrb[18].mxu1 }
0x1aa9   : > { %8103 = vst [vmem:[%s11002_s15 + $0x90] sm:$0xff] %v8067_v23  ;;  %v8033_v10 = vmul.f32 0.05, %v7966_v33  ;;  %v7968_v35 = vpop.f32.mrb[19].mxu1  ;;  %v15497_v33 = vld [vmem:[#allocation47_spill] sm:$0xff] }
0x1aaa   : > { %8104 = vst.msk [vmem:[%s11002_s15 + $0x98] sm:$0xff] %vm338_vm0, %v8068_v54  ;;  %v8034_v62 = vmul.f32 0.05, %v7968_v35  ;;  %v8223_v54 = vld [vmem:[%s11002_s15] sm:$0xff] }
0x1aab   : > { %v8069_v42 = vsub.f32 %v15491_v32, %v8033_v10  ;;  %v10482_v35 = vpack.c.bf16 %v8225_v59, %v8223_v54 }
0x1aac   : > { %v8070_v8 = vsub.f32 %v15492_v52, %v8034_v62  ;;  %v7972_v47 = vpop.f32.mrb[20].mxu1  ;;  %v15498_v62 = vld [vmem:[#allocation18_spill] sm:$0xff] }
0x1aad   : > { %8105 = vst [vmem:[%s11002_s15 + $0xa0] sm:$0xff] %v8069_v42  ;;  %v8035_v1 = vmul.f32 0.05, %v7972_v47  ;;  %v7974_v12 = vpop.f32.mrb[21].mxu1  ;;  %v10498_v19 = vpack.c.bf16 %v8069_v42, %v8067_v23  ;;  %v10480_v23 = vpack.c.bf16 %v8226_v45, %v8224_v36  ;;  %v15501_v36 = vld [vmem:[#allocation5_spill] sm:$0xff] }
0x1aae   : > { %8106 = vst.msk [vmem:[%s11002_s15 + $0xa8] sm:$0xff] %vm338_vm0, %v8070_v8  ;;  %v8036_v6 = vmul.f32 0.05, %v7974_v12 }
0x1aaf   : > { %v14770_v20 = vsub.f32 %v15493_v18, %v8035_v1  ;;  %10481 = vmatprep.subr.bf16.mxu0 %v10480_v23  ;;  %v15499_v1 = vld [vmem:[#allocation7_spill] sm:$0xff] }
0x1ab0   : > { %v8072_v63 = vsub.f32 %v15494_v28, %v8036_v6  ;;  %v7978_v40 = vpop.f32.mrb[22].mxu1  ;;  %10483 = vmatpush1.bf16.msra.mxu0 %v10482_v35  ;;  %v15500_v6 = vld [vmem:[#allocation23_spill] sm:$0xff]  ;;  %v8228_v28 = vld [vmem:[%s11002_s15 + $0x28] sm:$0xff] }
0x1ab1   : > { %8107 = vst [vmem:[%s11002_s15 + $0xb0] sm:$0xff] %v14770_v20  ;;  %v8037_v46 = vmul.f32 0.05, %v7978_v40  ;;  %v7980_v44 = vpop.f32.mrb[23].mxu1  ;;  %v8242_v3 = vld [vmem:[%s11002_s15 + $0x98] sm:$0xff] }
0x1ab2   : > { %8108 = vst.msk [vmem:[%s11002_s15 + $0xb8] sm:$0xff] %vm338_vm0, %v8072_v63  ;;  %v8038_v11 = vmul.f32 0.05, %v7980_v44  ;;  %v8229_v63 = vld [vmem:[%s11002_s15 + $0x30] sm:$0xff]  ;;  %v8230_v44 = vld [vmem:[%s11002_s15 + $0x38] sm:$0xff] }
0x1ab3   : > { %v8073_v61 = vsub.f32 %v15495_v9, %v8037_v46 }
0x1ab4   : > { %v8074_v55 = vsub.f32 %v15496_v13, %v8038_v11  ;;  %v7984_v27 = vpop.f32.mrb[24].mxu1  ;;  %v10484_v13 = vpack.c.bf16 %v8230_v44, %v8228_v28  ;;  %v15505_v28 = vld [vmem:[#allocation10_spill] sm:$0xff] }
0x1ab5   : > { %8109 = vst [vmem:[%s11002_s15 + $0xc0] sm:$0xff] %v8073_v61  ;;  %v8039_v39 = vmul.f32 0.05, %v7984_v27  ;;  %v7986_v38 = vpop.f32.mrb[25].mxu1  ;;  %v8244_v0 = vld [vmem:[%s11002_s15 + $0xa8] sm:$0xff]  ;;  %v10502_v50 = vpack.c.bf16 %v8073_v61, %v14770_v20  ;;  %v8227_v27 = vld [vmem:[%s11002_s15 + $0x20] sm:$0xff] }
0x1ab6   : > { %8110 = vst.msk [vmem:[%s11002_s15 + $0xc8] sm:$0xff] %vm338_vm0, %v8074_v55  ;;  %v8040_v41 = vmul.f32 0.05, %v7986_v38  ;;  %v10496_v53 = vpack.c.bf16 %v8244_v0, %v8242_v3  ;;  %v15502_v38 = vld [vmem:[#allocation6_spill] sm:$0xff]  ;;  %10485 = vmatprep.subr.bf16.mxu0 %v10484_v13 }
0x1ab7   : > { %v14790_v10 = vsub.f32 %v15497_v33, %v8039_v39  ;;  %v10486_v39 = vpack.c.bf16 %v8229_v63, %v8227_v27  ;;  %v15504_v33 = vld [vmem:[#allocation8_spill] sm:$0xff] }
0x1ab8   : > { %v8076_v32 = vsub.f32 %v15498_v62, %v8040_v41  ;;  %v7990_v42 = vpop.f32.mrb[26].mxu1  ;;  %10497 = vmatprep.subr.bf16.mxu1 %v10496_v53  ;;  %v15503_v53 = vld [vmem:[#allocation9_spill] sm:$0xff]  ;;  %v8232_v62 = vld [vmem:[%s11002_s15 + $0x48] sm:$0xff] }
0x1ab9   : > { %8111 = vst [vmem:[%s11002_s15 + $0xd0] sm:$0xff] %v14790_v10  ;;  %v8041_v52 = vmul.f32 0.05, %v7990_v42  ;;  %v7992_v8 = vpop.f32.mrb[27].mxu1  ;;  %10499 = vmatpush1.bf16.msra.mxu1 %v10498_v19  ;;  %v8246_v11 = vld [vmem:[%s11002_s15 + $0xb8] sm:$0xff]  ;;  %10487 = vmatpush1.bf16.msra.mxu0 %v10486_v39 }
0x1aba   : > { %8112 = vst.msk [vmem:[%s11002_s15 + $0xd8] sm:$0xff] %vm338_vm0, %v8076_v32  ;;  %v8042_v47 = vmul.f32 0.05, %v7992_v8  ;;  %v8233_v32 = vld [vmem:[%s11002_s15 + $0x50] sm:$0xff]  ;;  %v8234_v8 = vld [vmem:[%s11002_s15 + $0x58] sm:$0xff] }
0x1abb   : > { %v8077_v12 = vsub.f32 %v15499_v1, %v8041_v52 }
0x1abc   : > { %v8078_v18 = vsub.f32 %v15500_v6, %v8042_v47  ;;  %v7996_v20 = vpop.f32.mrb[28].mxu1  ;;  %v10488_v6 = vpack.c.bf16 %v8234_v8, %v8232_v62  ;;  %v8264_v62 = vld [vmem:[%s11057_s10 + $0x28] sm:$0xff] }
0x1abd   : > { %8113 = vst [vmem:[%s11002_s15 + $0xe0] sm:$0xff] %v8077_v12  ;;  %v8043_v40 = vmul.f32 0.05, %v7996_v20  ;;  %v7998_v46 = vpop.f32.mrb[29].mxu1  ;;  %v8248_v9 = vld [vmem:[%s11002_s15 + $0xc8] sm:$0xff]  ;;  %v10506_v19 = vpack.c.bf16 %v8077_v12, %v14790_v10  ;;  %v8231_v20 = vld [vmem:[%s11002_s15 + $0x40] sm:$0xff]  ;;  %v10519_v60 = vpack.c.bf16 %v8264_v62, %v8263_v56 }
0x1abe   : > { %8114 = vst.msk [vmem:[%s11002_s15 + $0xe8] sm:$0xff] %vm338_vm0, %v8078_v18  ;;  %v8044_v61 = vmul.f32 0.05, %v7998_v46  ;;  %v10500_v55 = vpack.c.bf16 %v8248_v9, %v8246_v11  ;;  %v15506_v46 = vld [vmem:[#allocation20_spill] sm:$0xff]  ;;  %10489 = vmatprep.subr.bf16.mxu0 %v10488_v6  ;;  %v8236_v11 = vld [vmem:[%s11002_s15 + $0x68] sm:$0xff]  ;;  %v8237_v9 = vld [vmem:[%s11002_s15 + $0x70] sm:$0xff] }
0x1abf   : > { %v8079_v59 = vsub.f32 %v15501_v36, %v8043_v40  ;;  %v10490_v40 = vpack.c.bf16 %v8233_v32, %v8231_v20  ;;  %v8292_v32 = vld [vmem:[%s11057_s10 + $0x108] sm:$0x1] }
0x1ac0   : > { %v8080_v45 = vsub.f32 %v15502_v38, %v8044_v61  ;;  %v8002_v3 = vpop.f32.mrb[30].mxu1  ;;  %10501 = vmatprep.subr.bf16.mxu1 %v10500_v55  ;;  %v8238_v61 = vld [vmem:[%s11002_s15 + $0x78] sm:$0xff] }
0x1ac1   : > { %8115 = vst [vmem:[%s11002_s15 + $0xf0] sm:$0xff] %v8079_v59  ;;  %v8045_v0 = vmul.f32 0.05, %v8002_v3  ;;  %v8004_v41 = vpop.f32.mrb[31].mxu1  ;;  %10503 = vmatpush1.bf16.msra.mxu1 %v10502_v50  ;;  %v8250_v47 = vld [vmem:[%s11002_s15 + $0xd8] sm:$0xff]  ;;  %10491 = vmatpush1.bf16.msra.mxu0 %v10490_v40  ;;  %v10492_v27 = vpack.c.bf16 %v8238_v61, %v8236_v11 }
0x1ac2   : > { %8116 = vst.msk [vmem:[%s11002_s15 + $0xf8] sm:$0xff] %vm338_vm0, %v8080_v45  ;;  %v8046_v23 = vmul.f32 0.05, %v8004_v41  ;;  %v8260_v45 = vld [vmem:[%s11057_s10 + $0x8] sm:$0xff]  ;;  %v8239_v3 = vld [vmem:[%s11002_s15 + $0x80] sm:$0x1] }
0x1ac3   : > { %v8081_v54 = vsub.f32 %v15503_v53, %v8045_v0  ;;  %10493 = vmatprep.subr.bf16.mxu0 %v10492_v27  ;;  %v8259_v41 = vld [vmem:[%s11057_s10] sm:$0xff] }
0x1ac4   : > { %v8082_v10 = vsub.f32 %v15504_v33, %v8046_v23  ;;  %v8008_v35 = vpop.f32.mrb[32].mxu1  ;;  %v10513_v23 = vpack.c.bf16 %v8260_v45, %v8259_v41  ;;  %v10752_v53 = vld [vmem:[%s11256_s18] sm:$0xff]  ;;  %v8262_v33 = vld [vmem:[%s11057_s10 + $0x18] sm:$0xff] }
0x1ac5   : > { %8117 = vst [vmem:[%s11002_s15 + $0x100] sm:$0xff] %v8081_v54  ;;  %v8047_v42 = vmul.f32 0.05, %v8008_v35  ;;  %v8010_v52 = vpop.f32.mrb[33].mxu1  ;;  %v8252_v1 = vld [vmem:[%s11002_s15 + $0xe8] sm:$0xff]  ;;  %v10510_v50 = vpack.c.bf16 %v8081_v54, %v8079_v59  ;;  %v8235_v59 = vld [vmem:[%s11002_s15 + $0x60] sm:$0xff] }
0x1ac6   : > { %8118 = vst.msk [vmem:[%s11002_s15 + $0x108] sm:$0xff] %vm338_vm0, %v8082_v10  ;;  %v8048_v12 = vmul.f32 0.05, %v8010_v52  ;;  %v10504_v18 = vpack.c.bf16 %v8252_v1, %v8250_v47  ;;  %v10494_v39 = vpack.c.bf16 %v8237_v9, %v8235_v59  ;;  %v10753_v54 = vld [vmem:[%s11256_s18 + $0x8] sm:$0xff]  ;;  %v8261_v10 = vld [vmem:[%s11057_s10 + $0x10] sm:$0xff] }
0x1ac7   : > { %v8083_v63 = vsub.f32 %v15505_v28, %v8047_v42  ;;  %v10516_v35 = vpack.c.bf16 %v8262_v33, %v8261_v10 }
0x1ac8   : > { %v8084_v44 = vsub.f32 %v15506_v46, %v8048_v12  ;;  %10505 = vmatprep.subr.bf16.mxu1 %v10504_v18  ;;  %10495 = vmatpush1.bf16.msra.mxu0 %v10494_v39 }
0x1ac9   : > { %8119 = vst [vmem:[%s11002_s15 + $0x110] sm:$0x1] %v8083_v63  ;;  %10507 = vmatpush1.bf16.msra.mxu1 %v10506_v19  ;;  %v8254_v13 = vld [vmem:[%s11002_s15 + $0xf8] sm:$0xff]  ;;  %v8240_v19 = vld [vmem:[%s11002_s15 + $0x88] sm:$0x1] }
0x1aca   : > { %8120 = vst.msk [vmem:[%s11002_s15 + $0x118] sm:$0x1] %vm355_vm1, %v8084_v44  ;;  %9112 = vmatprep.subr.msk.mxu0 %vm500_vm2, %v8240_v19 }
0x1acc   : > { %9113 = vmatpush1.msk.msra.mxu0 %vm500_vm2, %v8239_v3 }
0x1acd   : > { %v8256_v55 = vld [vmem:[%s11002_s15 + $0x108] sm:$0xff]  ;;  %10512 = vmatprep.subr.bf16.mxu0 %v15176_v30  ;;  %9114 = vmatmul.mubr.msk.f32.vlgmr.msra.gmra.mrb[34].mxu0 %vm496_vm3, %v10752_v53 }
0x1ace   : > { %v10508_v36 = vpack.c.bf16 %v8256_v55, %v8254_v13  ;;  %10514 = vmatpush1.bf16.msra.mxu0 %v10513_v23 }
0x1acf   : > { %10515 = vmatprep.subr.bf16.mxu0 %v15176_v30 }
0x1ad0   : > { %10509 = vmatprep.subr.bf16.mxu1 %v10508_v36  ;;  %v8257_v0 = vld [vmem:[%s11002_s15 + $0x110] sm:$0x1] }
0x1ad1   : > { %10511 = vmatpush1.bf16.msra.mxu1 %v10510_v50  ;;  %v8258_v38 = vld [vmem:[%s11002_s15 + $0x118] sm:$0x1]  ;;  %s8773_s15 = sshll.u32 %s276_s9, 4 }
0x1ad2   : > { %9115 = vmatprep.subr.msk.mxu1 %vm500_vm2, %v8258_v38  ;;  %10517 = vmatpush1.bf16.msra.mxu0 %v10516_v35 }
0x1ad3   : > { %10518 = vmatprep.subr.bf16.mxu0 %v15176_v30 }
0x1ad5   : > { %9116 = vmatpush1.msk.msra.mxu1 %vm500_vm2, %v8257_v0 }
0x1ad6   : > { %10536 = vmatprep.subr.bf16.mxu1 %v15176_v30  ;;  %9117 = vmatmul.mubr.msk.f32.vlgmr.msra.gmra.mrb[34].mxu1 %vm496_vm3, %v10753_v54 }
0x1ad7   : > { %10538 = vmatpush1.bf16.msra.mxu1 %v10537_v7  ;;  %v8266_v7 = vld [vmem:[%s11057_s10 + $0x38] sm:$0xff]  ;;  %10520 = vmatpush1.bf16.msra.mxu0 %v10519_v60 }
0x1ad8   : > { %10539 = vmatprep.subr.bf16.mxu1 %v15176_v30  ;;  %10521 = vmatprep.subr.bf16.mxu0 %v15176_v30  ;;  %v10522_v48 = vpack.c.bf16 %v8266_v7, %v8265_v31 }
0x1adb   : > { %10541 = vmatpush1.bf16.msra.mxu1 %v10540_v14  ;;  %v8268_v14 = vld [vmem:[%s11057_s10 + $0x48] sm:$0xff]  ;;  %10523 = vmatpush1.bf16.msra.mxu0 %v10522_v48 }
0x1adc   : > { %10542 = vmatprep.subr.bf16.mxu1 %v15176_v30  ;;  %10524 = vmatprep.subr.bf16.mxu0 %v15176_v30  ;;  %v10525_v29 = vpack.c.bf16 %v8268_v14, %v8267_v4 }
0x1adf   : > { %10544 = vmatpush1.bf16.msra.mxu1 %v10543_v22  ;;  %v8270_v22 = vld [vmem:[%s11057_s10 + $0x58] sm:$0xff]  ;;  %10526 = vmatpush1.bf16.msra.mxu0 %v10525_v29 }
0x1ae0   : > { %10545 = vmatprep.subr.bf16.mxu1 %v15176_v30  ;;  %10527 = vmatprep.subr.bf16.mxu0 %v15176_v30  ;;  %v10528_v25 = vpack.c.bf16 %v8270_v22, %v8269_v57 }
0x1ae3   : > { %10547 = vmatpush1.bf16.msra.mxu1 %v10546_v58  ;;  %v8272_v58 = vld [vmem:[%s11057_s10 + $0x68] sm:$0xff]  ;;  %10529 = vmatpush1.bf16.msra.mxu0 %v10528_v25 }
0x1ae4   : > { %10548 = vmatprep.subr.bf16.mxu1 %v15176_v30  ;;  %10530 = vmatprep.subr.bf16.mxu0 %v15176_v30  ;;  %v10531_v26 = vpack.c.bf16 %v8272_v58, %v8271_v5 }
0x1ae7   : > { %10550 = vmatpush1.bf16.msra.mxu1 %v10549_v49  ;;  %v8274_v49 = vld [vmem:[%s11057_s10 + $0x78] sm:$0xff]  ;;  %10532 = vmatpush1.bf16.msra.mxu0 %v10531_v26 }
0x1ae8   : > { %10551 = vmatprep.subr.bf16.mxu1 %v15176_v30  ;;  %10533 = vmatprep.subr.bf16.mxu0 %v15176_v30  ;;  %v10534_v51 = vpack.c.bf16 %v8274_v49, %v8273_v24 }
0x1aeb   : > { %10553 = vmatpush1.bf16.msra.mxu1 %v10552_v17  ;;  %10535 = vmatpush1.bf16.msra.mxu0 %v10534_v51  ;;  %v8275_v17 = vld [vmem:[%s11057_s10 + $0x80] sm:$0x1]  ;;  %s278_s10 = scalar_lea.vmem [#allocation2], %s8773_s15 }
0x1aec   : > { %10554 = vmatprep.subr.bf16.mxu1 %v15176_v30  ;;  %8493 = vmatprep.subr.mxu0 %v15171_v15  ;;  %s8643_s16 = sshll.u32 %s278_s10, 4  ;;  %s14914_s16 = int_to_ptr.vmem [resolvable:$true] %s8643_s16 }
0x1aed   : > { %s10754_s29 = scalar_lea.vmem %s14914_s16, 256  ;;  %p10761_p0 = scmp.lt.s32.totalorder %s14914_s16, %s10759_s11 }
0x1aee   : > { %p10755_p11 = scmp.ne.s32.totalorder %s14914_s16, %s10754_s29  ;;  %p10762_p1 = scmp.lt.s32.totalorder %s10760_s13, %s10754_s29 }
0x1aef   : > { %10556 = vmatpush1.bf16.msra.mxu1 %v10555_v37  ;;  %9118 = vmatpush1.msk.msra.mxu0 %vm500_vm2, %v8275_v17 }
0x1af0   : > { %10557 = vmatprep.subr.bf16.mxu1 %v15176_v30  ;;  %p10756_p12 = pnand %p10755_p11, %p10897_p5  ;;  %p10763_p2 = por %p10762_p1, %p10761_p0 }
0x1af2   : > { %p10757_p13 = pneg %p10756_p12 }
0x1af3   : > { %10559 = vmatpush1.bf16.msra.mxu1 %v10558_v34 }
0x1af4   : > { %8569 = vmatprep.subr.mxu1 %v15171_v15  ;;  %p10764_p3 = pnand %p10763_p2, %p10757_p13 }
0x1af7   : > { %9121 = vmatpush1.msk.msra.mxu1 %vm500_vm2, %v8292_v32 }
0x1ba0   : > { %v8365_v2 = vpop.f32.mrb[34].mxu0 }
0x1ba1   : > { %v8367_v16 = vpop.f32.mrb[35].mxu0  ;;  %vm8447_vm8 = vcmp.gt.f32.partialorder %v8365_v2, 0.0 }
0x1ba2   : > { %vm8448_vm1 = vcmp.gt.f32.partialorder %v8367_v16, 0.0 }
0x1ba3   : > { %v8452_v43 = vsel %vm8448_vm1, %v8367_v16, 0.0 }
0x1ba4   : > { %9119 = vmatprep.mubr.msk.f32.mxu0 %vm338_vm0, %v8452_v43 }
0x1ba5   : > { %9120 = vmatmul.mubr.msk.f32.vlgmr.msra.gmra.mrb[36].mxu0 %vm8447_vm8, %v8365_v2 }
0x1ba9   : > { %v8442_v30 = vpop.f32.mrb[34].mxu1 }
0x1baa   : > { %v8444_v37 = vpop.f32.mrb[35].mxu1  ;;  %vm8449_vm9 = vcmp.gt.f32.partialorder %v8442_v30, 0.0 }
0x1bab   : > { %vm8450_vm3 = vcmp.gt.f32.partialorder %v8444_v37, 0.0 }
0x1bac   : > { %v8454_v21 = vsel %vm8450_vm3, %v8444_v37, 0.0 }
0x1bad   : > { %9122 = vmatprep.mubr.msk.f32.mxu1 %vm338_vm0, %v8454_v21 }
0x1bae   : > { %9123 = vmatmul.mubr.msk.f32.vlgmr.msra.gmra.mrb[36].mxu1 %vm8449_vm9, %v8442_v30 }
0x1c78   : > { %v8527_v15 = vpop.f32.mrb[36].mxu0 }
0x1c79   : > { %8607 = vst [vmem:[%s278_s10] sm:$0xff] %v8527_v15  ;;  %v8529_v42 = vpop.f32.mrb[37].mxu0 }
0x1c81   : > { %v8603_v34 = vpop.f32.mrb[36].mxu1 }
0x1c82   : > { %8608 = vst [vmem:[%s278_s10 + $0x8] sm:$0xff] %v8603_v34  ;;  %v8605_v52 = vpop.f32.mrb[37].mxu1 }
0x1c83   : > { %10767 = shalt.err (!%p10764_p3)
}
0x1c84   : > { %s10768_s19 = scalar_lea.hbm %s14919_s26, 256  ;;  %s10772_s9 = scalar_lea.hbm %s14968_s6, 1024 }
0x1c85   : > { %p10769_p4 = scmp.ne.s32.totalorder %s14919_s26, %s10768_s19  ;;  %p10773_p9 = scmp.lt.u32.totalorder %s14919_s26, %s14968_s6 }
0x1c86   : > { %p10774_p10 = scmp.lt.u32.totalorder %s10772_s9, %s10768_s19  ;;  %p10776_p12 = scmp.lt.u32.totalorder %s10768_s19, %s14919_s26 }
0x1c87   : > { %p10770_p7 = pnand %p10769_p4, %p10897_p5 }
0x1c88   : > { %p10775_p11 = por %p10774_p10, %p10773_p9 }
0x1c89   : > { %p10771_p8 = pneg %p10770_p7 }
0x1c8a   : > { %p10777_p13 = por %p10776_p12, %p10775_p11 }
0x1c8c   : > { %p10778_p0 = pnand %p10777_p13, %p10771_p8 }
0x1c8e   : > { %10781 = shalt.err (!%p10778_p0)
}
0x1c8f   : > { %s10822_s12 = smov 128   ;;  %s10823_s18 = smov 8  }
0x1c90   : > { %10562 = dma.vmem_to_hbm [thread:$0]  (%p10897_p5), %s14914_s16, 256, %s14919_s26, %s14921_s28, %s10822_s12, %s10822_s12, %s10823_s18  }
0x1c91 PF: > { %p10568_p1 = scmp.ge.s32.totalorder %s10816_s24, 2  ;;  %s8676_s20 = sand.u32 1, %s10804_s21  }
0x1c92   : > { %s8677_s29 = scalar_lea.sflag [#allocation3], %s8676_s20 }
0x1c93   : > { %p10565_p2 = pnand %p10568_p1, %p10901_p6 }
0x1c95   : > { %10799 = dma.done.wait (!%p10565_p2), %s8677_s29, 256  }
0x1c96   : > { %10801 = vsyncadd (!%p10565_p2), %s8677_s29, 4294967040  ;;  %p17_p3 = scmp.ge.s32.totalorder %s10884_s27, 6   ;;  %s15507_s21 = smov %s10808_s22 }
0x1c97   : > { %s15508_s22 = smov %s10812_s23  ;;  %s15509_s23 = smov %s10895_s30 }
0x1c98   : > { %s15510_s24 = smov %s10884_s27  ;;  %19 = sbr.rel (!%p17_p3) target bundleno = 3 (0x3), region = 98 }
0x1c9f   :  { %8682 = vsyncpa [#allocation3], 1 }
0x1ca0   :  { %8684 = vsyncpa [#allocation3 + $0x1], 1 }

</bundles_post_ra>
